<compile_context>
chip_gen: v7x
topology: tpu7x:2x2x1
jax: 0.10.0
libtpu: 0.0.40
codegen_flags: <defaults>
</compile_context>

<pallas_src>
import functools

import jax
import jax.numpy as jnp
from jax import lax
from jax.experimental import pallas as pl
from jax.experimental.pallas import tpu as pltpu

KSIZE = 7  # kernel_size of the PyTorch module in the test below


def _spatial_attention_kernel(w_ref, x_ref, o_ref, pad_ref, *, W, K, CT):
    """One grid step processes Bt batch elements.

    w_ref   : SMEM (2*K*K,)        flattened conv weight (out=1, in=2, K, K)
    x_ref   : VMEM (Bt, C, HW)     lane-dense input block
    o_ref   : VMEM (Bt, C, HW)     output block
    pad_ref : VMEM (2, HW + 2*PW)  flat zero-padded [avg, max] maps
    """
    Bt, C, HW = x_ref.shape
    PAD = K // 2
    PW = PAD * (W + 1)            # flat halo width on each side
    f32 = jnp.float32

    # Column-validity masks (kill the row wrap-around of the flat layout).
    # Loop invariants: computed once per kernel invocation and reused.
    col = lax.broadcasted_iota(jnp.int32, (1, HW), 1) % W
    col_ok = [
        (col + (dx - PAD) >= 0) & (col + (dx - PAD) < W)
        for dx in range(K)
    ]

    # Re-zero only the tiny halo regions; the interior is fully overwritten
    # for every batch element below.
    pad_ref[pl.ds(0, 2), pl.ds(0, PW)] = jnp.zeros((2, PW), f32)
    pad_ref[pl.ds(0, 2), pl.ds(PW + HW, PW)] = jnp.zeros((2, PW), f32)

    for b in range(Bt):
        # ---- channel statistics (mean / max over C), chunked over C ----
        s = jnp.zeros((1, HW), f32)
        m = jnp.full((1, HW), -jnp.inf, f32)
        for c0 in range(0, C, CT):
            cs = min(CT, C - c0)
            chunk = x_ref[b, pl.ds(c0, cs), :].astype(f32)        # (cs, HW)
            s = s + jnp.sum(chunk, axis=0, keepdims=True)
            m = jnp.maximum(m, jnp.max(chunk, axis=0, keepdims=True))
        avg = s * (1.0 / C)

        pad_ref[pl.ds(0, 1), pl.ds(PW, HW)] = avg
        pad_ref[pl.ds(1, 1), pl.ds(PW, HW)] = m

        # ---- 7x7 conv, 2 -> 1 channels, no bias -------------------------
        # Flat shift-and-accumulate: tap offset (dy-PAD)*W + (dx-PAD) into the
        # zero-padded flat map; the flat halo handles out-of-range rows and
        # the column mask handles out-of-range columns.
        acc = [jnp.zeros((1, HW), f32) for _ in range(4)]
        for dy in range(K):
            for dx in range(K):
                off = PW + (dy - PAD) * W + (dx - PAD)
                tap_avg = pad_ref[pl.ds(0, 1), pl.ds(off, HW)]    # (1, HW)
                tap_max = pad_ref[pl.ds(1, 1), pl.ds(off, HW)]    # (1, HW)
                w_avg = w_ref[dy * K + dx]
                w_max = w_ref[K * K + dy * K + dx]
                term = w_avg * tap_avg + w_max * tap_max
                if dx != PAD:
                    term = jnp.where(col_ok[dx], term, 0.0)
                j = (dy * K + dx) & 3
                acc[j] = acc[j] + term
        att = jax.nn.sigmoid((acc[0] + acc[1]) + (acc[2] + acc[3]))  # (1, HW)

        # ---- apply attention, chunked over C ----------------------------
        for c0 in range(0, C, CT):
            cs = min(CT, C - c0)
            xa = x_ref[b, pl.ds(c0, cs), :].astype(f32)
            o_ref[b, pl.ds(c0, cs), :] = (xa * att).astype(o_ref.dtype)


def spatial_attention(x, weight):
    """x: (B, C, H, W) NCHW.  weight: (1, 2, K, K) conv weight (bias=False)."""
    B, C, H, W = x.shape
    K = weight.shape[-1]
    PAD = K // 2
    HW = H * W
    PW = PAD * (W + 1)

    x_flat = x.reshape(B, C, HW)                       # lane-dense view
    w_flat = weight.reshape(-1).astype(jnp.float32)    # (2*K*K,) into SMEM

    # C-chunk size: keep each (CT, HW) f32 chunk at <= ~8 vregs.
    CT = max(1, min(C, 8192 // max(1, HW)))

    # Batch elements per grid step: amortize per-step overhead, but keep
    # 2 x (in + out) double-buffered blocks well under the default scoped
    # VMEM limit (32 MiB on v6e/v7x, 16 MiB on v5e).
    bytes_per_b = C * HW * x.dtype.itemsize
    Bt = max(1, min(B, 8, (2 * 1024 * 1024) // max(1, bytes_per_b)))
    while Bt > 1 and 4 * Bt * bytes_per_b > 12 * 1024 * 1024:
        Bt -= 1
    while B % Bt != 0:
        Bt -= 1
    grid = (B // Bt,)
    # TODO(synk): for very large C*H*W (> ~3 MiB per batch element) on v7x,
    # the C axis should additionally be tiled with the reduction restructured
    # across an 'arbitrary' grid axis; not needed at these block sizes.

    kernel = functools.partial(_spatial_attention_kernel, W=W, K=K, CT=CT)

    cost = pl.CostEstimate(
        flops=int(B * HW * (3 * C + 4 * K * K)),
        transcendentals=int(B * HW),
        bytes_accessed=int(2 * B * C * HW * x.dtype.itemsize + w_flat.size * 4),
    )

    out_flat = pl.pallas_call(
        kernel,
        out_shape=jax.ShapeDtypeStruct((B, C, HW), x.dtype),
        grid_spec=pltpu.PrefetchScalarGridSpec(
            num_scalar_prefetch=0,
            grid=grid,
            in_specs=[
                pl.BlockSpec(memory_space=pltpu.MemorySpace.SMEM),   # weights
                pl.BlockSpec((Bt, C, HW), lambda i: (i, 0, 0)),      # x
            ],
            out_specs=pl.BlockSpec((Bt, C, HW), lambda i: (i, 0, 0)),
            scratch_shapes=[
                pltpu.VMEM((2, HW + 2 * PW), jnp.float32),
            ],
        ),
        compiler_params=pltpu.CompilerParams(
            dimension_semantics=("parallel",)),
        cost_estimate=cost,
    )(w_flat, x_flat)

    return out_flat.reshape(B, C, H, W)


def spatial_attention_ref(x, weight):
    """Pure-JAX reference mirroring the PyTorch forward."""
    pad = weight.shape[-1] // 2
    avg = jnp.mean(x, axis=1, keepdims=True)
    mx = jnp.max(x, axis=1, keepdims=True)
    xc = jnp.concatenate([avg, mx], axis=1)
    att = lax.conv_general_dilated(
        xc, weight, window_strides=(1, 1),
        padding=((pad, pad), (pad, pad)),
        dimension_numbers=("NCHW", "OIHW", "NCHW"))
    return x * jax.nn.sigmoid(att)


if __name__ == "__main__":
    key = jax.random.PRNGKey(0)
    kx, kw = jax.random.split(key)

    B, C, H, W = 2, 4, 16, 16
    x = jax.random.normal(kx, (B, C, H, W), dtype=jnp.float32)
    # Conv weight: shape (out=1, in=2, 7, 7), no bias (matches the module).
    weight = 0.1 * jax.random.normal(kw, (1, 2, KSIZE, KSIZE), dtype=jnp.float32)

    out = spatial_attention(x, weight)
    out = jax.block_until_ready(out)

    ref = spatial_attention_ref(x, weight)
    assert out.shape == (B, C, H, W)
    assert jnp.allclose(out, ref, atol=1e-5, rtol=1e-5), "mismatch vs reference"

    print("KERNEL_OK")
</pallas_src>

<mosaic_0001>
module attributes {stable_mosaic.version = 11 : i64} {
  func.func @_spatial_attention_kernel(%arg0: i32, %arg1: memref<98xf32, #tpu.memory_space<smem>>, %arg2: memref<2x4x256xf32, #tpu.memory_space<vmem>>, %arg3: memref<2x4x256xf32, #tpu.memory_space<vmem>>, %arg4: memref<2x358xf32, #tpu.memory_space<vmem>>) attributes {dimension_semantics = [#tpu.dimension_semantics<parallel>], iteration_bounds = array<i64: 1>, scalar_prefetch = 0 : i64, scratch_operands = 1 : i64, tpu.core_type = #tpu.core_type<tc>, window_params = [{transform_indices = @transform_0, window_bounds = array<i64: 98>}, {transform_indices = @transform_1, window_bounds = array<i64: 2, 4, 256>}, {transform_indices = @transform_2, window_bounds = array<i64: 2, 4, 256>}]} {
    %0 = tpu.iota {dimensions = array<i32: 1>} : vector<1x256xi32>
    %c16_i32 = arith.constant 16 : i32
    %c0_i32 = arith.constant 0 : i32
    %1 = arith.cmpi eq, %c16_i32, %c0_i32 : i32
    %c1_i32 = arith.constant 1 : i32
    %2 = arith.select %1, %c1_i32, %c16_i32 : i32
    %3 = vector.broadcast %2 : i32 to vector<1x256xi32>
    %4 = arith.remsi %0, %3 : vector<1x256xi32>
    %c0_i32_0 = arith.constant 0 : i32
    %5 = vector.broadcast %c0_i32_0 : i32 to vector<1x256xi32>
    %6 = arith.cmpi ne, %4, %5 : vector<1x256xi32>
    %c0_i32_1 = arith.constant 0 : i32
    %7 = vector.broadcast %c0_i32_1 : i32 to vector<1x256xi32>
    %8 = arith.cmpi slt, %4, %7 : vector<1x256xi32>
    %c0_i32_2 = arith.constant 0 : i32
    %9 = arith.cmpi slt, %2, %c0_i32_2 : i32
    %10 = vector.broadcast %9 : i1 to vector<1x256xi1>
    %11 = vector.broadcast %10 : vector<1x256xi1> to vector<1x256xi1>
    %12 = arith.xori %8, %11 : vector<1x256xi1>
    %13 = arith.andi %12, %6 : vector<1x256xi1>
    %14 = vector.broadcast %2 : i32 to vector<1x256xi32>
    %15 = arith.addi %4, %14 : vector<1x256xi32>
    %16 = arith.select %13, %15, %4 : vector<1x256xi1>, vector<1x256xi32>
    %c-3_i32 = arith.constant -3 : i32
    %17 = vector.broadcast %c-3_i32 : i32 to vector<1x256xi32>
    %18 = arith.addi %16, %17 : vector<1x256xi32>
    %c0_i32_3 = arith.constant 0 : i32
    %19 = vector.broadcast %c0_i32_3 : i32 to vector<1x256xi32>
    %20 = arith.cmpi sge, %18, %19 : vector<1x256xi32>
    %c-3_i32_4 = arith.constant -3 : i32
    %21 = vector.broadcast %c-3_i32_4 : i32 to vector<1x256xi32>
    %22 = arith.addi %16, %21 : vector<1x256xi32>
    %c16_i32_5 = arith.constant 16 : i32
    %23 = vector.broadcast %c16_i32_5 : i32 to vector<1x256xi32>
    %24 = arith.cmpi slt, %22, %23 : vector<1x256xi32>
    %25 = arith.andi %20, %24 : vector<1x256xi1>
    %c-2_i32 = arith.constant -2 : i32
    %26 = vector.broadcast %c-2_i32 : i32 to vector<1x256xi32>
    %27 = arith.addi %16, %26 : vector<1x256xi32>
    %c0_i32_6 = arith.constant 0 : i32
    %28 = vector.broadcast %c0_i32_6 : i32 to vector<1x256xi32>
    %29 = arith.cmpi sge, %27, %28 : vector<1x256xi32>
    %c-2_i32_7 = arith.constant -2 : i32
    %30 = vector.broadcast %c-2_i32_7 : i32 to vector<1x256xi32>
    %31 = arith.addi %16, %30 : vector<1x256xi32>
    %c16_i32_8 = arith.constant 16 : i32
    %32 = vector.broadcast %c16_i32_8 : i32 to vector<1x256xi32>
    %33 = arith.cmpi slt, %31, %32 : vector<1x256xi32>
    %34 = arith.andi %29, %33 : vector<1x256xi1>
    %c-1_i32 = arith.constant -1 : i32
    %35 = vector.broadcast %c-1_i32 : i32 to vector<1x256xi32>
    %36 = arith.addi %16, %35 : vector<1x256xi32>
    %c0_i32_9 = arith.constant 0 : i32
    %37 = vector.broadcast %c0_i32_9 : i32 to vector<1x256xi32>
    %38 = arith.cmpi sge, %36, %37 : vector<1x256xi32>
    %c-1_i32_10 = arith.constant -1 : i32
    %39 = vector.broadcast %c-1_i32_10 : i32 to vector<1x256xi32>
    %40 = arith.addi %16, %39 : vector<1x256xi32>
    %c16_i32_11 = arith.constant 16 : i32
    %41 = vector.broadcast %c16_i32_11 : i32 to vector<1x256xi32>
    %42 = arith.cmpi slt, %40, %41 : vector<1x256xi32>
    %43 = arith.andi %38, %42 : vector<1x256xi1>
    %c1_i32_12 = arith.constant 1 : i32
    %44 = vector.broadcast %c1_i32_12 : i32 to vector<1x256xi32>
    %45 = arith.addi %16, %44 : vector<1x256xi32>
    %c0_i32_13 = arith.constant 0 : i32
    %46 = vector.broadcast %c0_i32_13 : i32 to vector<1x256xi32>
    %47 = arith.cmpi sge, %45, %46 : vector<1x256xi32>
    %c1_i32_14 = arith.constant 1 : i32
    %48 = vector.broadcast %c1_i32_14 : i32 to vector<1x256xi32>
    %49 = arith.addi %16, %48 : vector<1x256xi32>
    %c16_i32_15 = arith.constant 16 : i32
    %50 = vector.broadcast %c16_i32_15 : i32 to vector<1x256xi32>
    %51 = arith.cmpi slt, %49, %50 : vector<1x256xi32>
    %52 = arith.andi %47, %51 : vector<1x256xi1>
    %c2_i32 = arith.constant 2 : i32
    %53 = vector.broadcast %c2_i32 : i32 to vector<1x256xi32>
    %54 = arith.addi %16, %53 : vector<1x256xi32>
    %c0_i32_16 = arith.constant 0 : i32
    %55 = vector.broadcast %c0_i32_16 : i32 to vector<1x256xi32>
    %56 = arith.cmpi sge, %54, %55 : vector<1x256xi32>
    %c2_i32_17 = arith.constant 2 : i32
    %57 = vector.broadcast %c2_i32_17 : i32 to vector<1x256xi32>
    %58 = arith.addi %16, %57 : vector<1x256xi32>
    %c16_i32_18 = arith.constant 16 : i32
    %59 = vector.broadcast %c16_i32_18 : i32 to vector<1x256xi32>
    %60 = arith.cmpi slt, %58, %59 : vector<1x256xi32>
    %61 = arith.andi %56, %60 : vector<1x256xi1>
    %c3_i32 = arith.constant 3 : i32
    %62 = vector.broadcast %c3_i32 : i32 to vector<1x256xi32>
    %63 = arith.addi %16, %62 : vector<1x256xi32>
    %c0_i32_19 = arith.constant 0 : i32
    %64 = vector.broadcast %c0_i32_19 : i32 to vector<1x256xi32>
    %65 = arith.cmpi sge, %63, %64 : vector<1x256xi32>
    %c3_i32_20 = arith.constant 3 : i32
    %66 = vector.broadcast %c3_i32_20 : i32 to vector<1x256xi32>
    %67 = arith.addi %16, %66 : vector<1x256xi32>
    %c16_i32_21 = arith.constant 16 : i32
    %68 = vector.broadcast %c16_i32_21 : i32 to vector<1x256xi32>
    %69 = arith.cmpi slt, %67, %68 : vector<1x256xi32>
    %70 = arith.andi %65, %69 : vector<1x256xi1>
    %cst = arith.constant 0.000000e+00 : f32
    %71 = vector.broadcast %cst : f32 to vector<2x51xf32>
    %c0 = arith.constant 0 : index
    %c0_22 = arith.constant 0 : index
    %72 = vector.load %arg4[%c0, %c0_22] : memref<2x358xf32, #tpu.memory_space<vmem>>, vector<2x51xf32>
    tpu.vector_store %arg4[%c0, %c0_22], %71 {strides = array<i32>} : memref<2x358xf32, #tpu.memory_space<vmem>>, vector<2x51xf32>,
    %cst_23 = arith.constant 0.000000e+00 : f32
    %73 = vector.broadcast %cst_23 : f32 to vector<2x51xf32>
    %c0_24 = arith.constant 0 : index
    %c307 = arith.constant 307 : index
    %74 = vector.load %arg4[%c0_24, %c307] : memref<2x358xf32, #tpu.memory_space<vmem>>, vector<2x51xf32>
    tpu.vector_store %arg4[%c0_24, %c307], %73 {strides = array<i32>} : memref<2x358xf32, #tpu.memory_space<vmem>>, vector<2x51xf32>,
    %cst_25 = arith.constant 0.000000e+00 : f32
    %75 = vector.broadcast %cst_25 : f32 to vector<1x256xf32>
    %cst_26 = arith.constant 0xFF800000 : f32
    %76 = vector.broadcast %cst_26 : f32 to vector<1x256xf32>
    %c0_27 = arith.constant 0 : index
    %c0_28 = arith.constant 0 : index
    %c0_29 = arith.constant 0 : index
    %77 = vector.load %arg2[%c0_27, %c0_28, %c0_29] : memref<2x4x256xf32, #tpu.memory_space<vmem>>, vector<1x4x256xf32>
    %78 = vector.shape_cast %77 : vector<1x4x256xf32> to vector<4x256xf32>
    %cst_30 = arith.constant dense<0.000000e+00> : vector<256xf32>
    %79 = vector.multi_reduction <add>, %78, %cst_30 [0] : vector<4x256xf32> to vector<256xf32>
    %80 = vector.shape_cast %79 : vector<256xf32> to vector<1x256xf32>
    %81 = arith.addf %75, %80 : vector<1x256xf32>
    %cst_31 = arith.constant dense<0xFF800000> : vector<256xf32>
    %82 = vector.multi_reduction <maximumf>, %78, %cst_31 [0] : vector<4x256xf32> to vector<256xf32>
    %83 = vector.shape_cast %82 : vector<256xf32> to vector<1x256xf32>
    %84 = arith.maximumf %76, %83 : vector<1x256xf32>
    %cst_32 = arith.constant 2.500000e-01 : f32
    %85 = vector.broadcast %cst_32 : f32 to vector<1x256xf32>
    %86 = arith.mulf %81, %85 : vector<1x256xf32>
    %c0_33 = arith.constant 0 : index
    %c51 = arith.constant 51 : index
    %87 = vector.load %arg4[%c0_33, %c51] : memref<2x358xf32, #tpu.memory_space<vmem>>, vector<1x256xf32>
    tpu.vector_store %arg4[%c0_33, %c51], %86 {strides = array<i32>} : memref<2x358xf32, #tpu.memory_space<vmem>>, vector<1x256xf32>,
    %c1 = arith.constant 1 : index
    %c51_34 = arith.constant 51 : index
    %88 = vector.load %arg4[%c1, %c51_34] : memref<2x358xf32, #tpu.memory_space<vmem>>, vector<1x256xf32>
    tpu.vector_store %arg4[%c1, %c51_34], %84 {strides = array<i32>} : memref<2x358xf32, #tpu.memory_space<vmem>>, vector<1x256xf32>,
    %cst_35 = arith.constant 0.000000e+00 : f32
    %89 = vector.broadcast %cst_35 : f32 to vector<1x256xf32>
    %cst_36 = arith.constant 0.000000e+00 : f32
    %90 = vector.broadcast %cst_36 : f32 to vector<1x256xf32>
    %cst_37 = arith.constant 0.000000e+00 : f32
    %91 = vector.broadcast %cst_37 : f32 to vector<1x256xf32>
    %cst_38 = arith.constant 0.000000e+00 : f32
    %92 = vector.broadcast %cst_38 : f32 to vector<1x256xf32>
    %c0_39 = arith.constant 0 : index
    %c0_40 = arith.constant 0 : index
    %93 = vector.load %arg4[%c0_39, %c0_40] : memref<2x358xf32, #tpu.memory_space<vmem>>, vector<1x256xf32>
    %c1_41 = arith.constant 1 : index
    %c0_42 = arith.constant 0 : index
    %94 = vector.load %arg4[%c1_41, %c0_42] : memref<2x358xf32, #tpu.memory_space<vmem>>, vector<1x256xf32>
    %c0_43 = arith.constant 0 : index
    %95 = memref.load %arg1[%c0_43] : memref<98xf32, #tpu.memory_space<smem>>
    %c49 = arith.constant 49 : index
    %96 = memref.load %arg1[%c49] : memref<98xf32, #tpu.memory_space<smem>>
    %97 = vector.broadcast %95 : f32 to vector<1x256xf32>
    %98 = arith.mulf %97, %93 : vector<1x256xf32>
    %99 = vector.broadcast %96 : f32 to vector<1x256xf32>
    %100 = arith.mulf %99, %94 : vector<1x256xf32>
    %101 = arith.addf %98, %100 : vector<1x256xf32>
    %cst_44 = arith.constant 0.000000e+00 : f32
    %102 = vector.broadcast %cst_44 : f32 to vector<1x256xf32>
    %103 = arith.select %25, %101, %102 : vector<1x256xi1>, vector<1x256xf32>
    %104 = arith.addf %89, %103 : vector<1x256xf32>
    %c0_45 = arith.constant 0 : index
    %c1_46 = arith.constant 1 : index
    %105 = vector.load %arg4[%c0_45, %c1_46] : memref<2x358xf32, #tpu.memory_space<vmem>>, vector<1x256xf32>
    %c1_47 = arith.constant 1 : index
    %c1_48 = arith.constant 1 : index
    %106 = vector.load %arg4[%c1_47, %c1_48] : memref<2x358xf32, #tpu.memory_space<vmem>>, vector<1x256xf32>
    %c1_49 = arith.constant 1 : index
    %107 = memref.load %arg1[%c1_49] : memref<98xf32, #tpu.memory_space<smem>>
    %c50 = arith.constant 50 : index
    %108 = memref.load %arg1[%c50] : memref<98xf32, #tpu.memory_space<smem>>
    %109 = vector.broadcast %107 : f32 to vector<1x256xf32>
    %110 = arith.mulf %109, %105 : vector<1x256xf32>
    %111 = vector.broadcast %108 : f32 to vector<1x256xf32>
    %112 = arith.mulf %111, %106 : vector<1x256xf32>
    %113 = arith.addf %110, %112 : vector<1x256xf32>
    %cst_50 = arith.constant 0.000000e+00 : f32
    %114 = vector.broadcast %cst_50 : f32 to vector<1x256xf32>
    %115 = arith.select %34, %113, %114 : vector<1x256xi1>, vector<1x256xf32>
    %116 = arith.addf %90, %115 : vector<1x256xf32>
    %c0_51 = arith.constant 0 : index
    %c2 = arith.constant 2 : index
    %117 = vector.load %arg4[%c0_51, %c2] : memref<2x358xf32, #tpu.memory_space<vmem>>, vector<1x256xf32>
    %c1_52 = arith.constant 1 : index
    %c2_53 = arith.constant 2 : index
    %118 = vector.load %arg4[%c1_52, %c2_53] : memref<2x358xf32, #tpu.memory_space<vmem>>, vector<1x256xf32>
    %c2_54 = arith.constant 2 : index
    %119 = memref.load %arg1[%c2_54] : memref<98xf32, #tpu.memory_space<smem>>
    %c51_55 = arith.constant 51 : index
    %120 = memref.load %arg1[%c51_55] : memref<98xf32, #tpu.memory_space<smem>>
    %121 = vector.broadcast %119 : f32 to vector<1x256xf32>
    %122 = arith.mulf %121, %117 : vector<1x256xf32>
    %123 = vector.broadcast %120 : f32 to vector<1x256xf32>
    %124 = arith.mulf %123, %118 : vector<1x256xf32>
    %125 = arith.addf %122, %124 : vector<1x256xf32>
    %cst_56 = arith.constant 0.000000e+00 : f32
    %126 = vector.broadcast %cst_56 : f32 to vector<1x256xf32>
    %127 = arith.select %43, %125, %126 : vector<1x256xi1>, vector<1x256xf32>
    %128 = arith.addf %91, %127 : vector<1x256xf32>
    %c0_57 = arith.constant 0 : index
    %c3 = arith.constant 3 : index
    %129 = vector.load %arg4[%c0_57, %c3] : memref<2x358xf32, #tpu.memory_space<vmem>>, vector<1x256xf32>
    %c1_58 = arith.constant 1 : index
    %c3_59 = arith.constant 3 : index
    %130 = vector.load %arg4[%c1_58, %c3_59] : memref<2x358xf32, #tpu.memory_space<vmem>>, vector<1x256xf32>
    %c3_60 = arith.constant 3 : index
    %131 = memref.load %arg1[%c3_60] : memref<98xf32, #tpu.memory_space<smem>>
    %c52 = arith.constant 52 : index
    %132 = memref.load %arg1[%c52] : memref<98xf32, #tpu.memory_space<smem>>
    %133 = vector.broadcast %131 : f32 to vector<1x256xf32>
    %134 = arith.mulf %133, %129 : vector<1x256xf32>
    %135 = vector.broadcast %132 : f32 to vector<1x256xf32>
    %136 = arith.mulf %135, %130 : vector<1x256xf32>
    %137 = arith.addf %134, %136 : vector<1x256xf32>
    %138 = arith.addf %92, %137 : vector<1x256xf32>
    %c0_61 = arith.constant 0 : index
    %c4 = arith.constant 4 : index
    %139 = vector.load %arg4[%c0_61, %c4] : memref<2x358xf32, #tpu.memory_space<vmem>>, vector<1x256xf32>
    %c1_62 = arith.constant 1 : index
    %c4_63 = arith.constant 4 : index
    %140 = vector.load %arg4[%c1_62, %c4_63] : memref<2x358xf32, #tpu.memory_space<vmem>>, vector<1x256xf32>
    %c4_64 = arith.constant 4 : index
    %141 = memref.load %arg1[%c4_64] : memref<98xf32, #tpu.memory_space<smem>>
    %c53 = arith.constant 53 : index
    %142 = memref.load %arg1[%c53] : memref<98xf32, #tpu.memory_space<smem>>
    %143 = vector.broadcast %141 : f32 to vector<1x256xf32>
    %144 = arith.mulf %143, %139 : vector<1x256xf32>
    %145 = vector.broadcast %142 : f32 to vector<1x256xf32>
    %146 = arith.mulf %145, %140 : vector<1x256xf32>
    %147 = arith.addf %144, %146 : vector<1x256xf32>
    %cst_65 = arith.constant 0.000000e+00 : f32
    %148 = vector.broadcast %cst_65 : f32 to vector<1x256xf32>
    %149 = arith.select %52, %147, %148 : vector<1x256xi1>, vector<1x256xf32>
    %150 = arith.addf %104, %149 : vector<1x256xf32>
    %c0_66 = arith.constant 0 : index
    %c5 = arith.constant 5 : index
    %151 = vector.load %arg4[%c0_66, %c5] : memref<2x358xf32, #tpu.memory_space<vmem>>, vector<1x256xf32>
    %c1_67 = arith.constant 1 : index
    %c5_68 = arith.constant 5 : index
    %152 = vector.load %arg4[%c1_67, %c5_68] : memref<2x358xf32, #tpu.memory_space<vmem>>, vector<1x256xf32>
    %c5_69 = arith.constant 5 : index
    %153 = memref.load %arg1[%c5_69] : memref<98xf32, #tpu.memory_space<smem>>
    %c54 = arith.constant 54 : index
    %154 = memref.load %arg1[%c54] : memref<98xf32, #tpu.memory_space<smem>>
    %155 = vector.broadcast %153 : f32 to vector<1x256xf32>
    %156 = arith.mulf %155, %151 : vector<1x256xf32>
    %157 = vector.broadcast %154 : f32 to vector<1x256xf32>
    %158 = arith.mulf %157, %152 : vector<1x256xf32>
    %159 = arith.addf %156, %158 : vector<1x256xf32>
    %cst_70 = arith.constant 0.000000e+00 : f32
    %160 = vector.broadcast %cst_70 : f32 to vector<1x256xf32>
    %161 = arith.select %61, %159, %160 : vector<1x256xi1>, vector<1x256xf32>
    %162 = arith.addf %116, %161 : vector<1x256xf32>
    %c0_71 = arith.constant 0 : index
    %c6 = arith.constant 6 : index
    %163 = vector.load %arg4[%c0_71, %c6] : memref<2x358xf32, #tpu.memory_space<vmem>>, vector<1x256xf32>
    %c1_72 = arith.constant 1 : index
    %c6_73 = arith.constant 6 : index
    %164 = vector.load %arg4[%c1_72, %c6_73] : memref<2x358xf32, #tpu.memory_space<vmem>>, vector<1x256xf32>
    %c6_74 = arith.constant 6 : index
    %165 = memref.load %arg1[%c6_74] : memref<98xf32, #tpu.memory_space<smem>>
    %c55 = arith.constant 55 : index
    %166 = memref.load %arg1[%c55] : memref<98xf32, #tpu.memory_space<smem>>
    %167 = vector.broadcast %165 : f32 to vector<1x256xf32>
    %168 = arith.mulf %167, %163 : vector<1x256xf32>
    %169 = vector.broadcast %166 : f32 to vector<1x256xf32>
    %170 = arith.mulf %169, %164 : vector<1x256xf32>
    %171 = arith.addf %168, %170 : vector<1x256xf32>
    %cst_75 = arith.constant 0.000000e+00 : f32
    %172 = vector.broadcast %cst_75 : f32 to vector<1x256xf32>
    %173 = arith.select %70, %171, %172 : vector<1x256xi1>, vector<1x256xf32>
    %174 = arith.addf %128, %173 : vector<1x256xf32>
    %c0_76 = arith.constant 0 : index
    %c16 = arith.constant 16 : index
    %175 = vector.load %arg4[%c0_76, %c16] : memref<2x358xf32, #tpu.memory_space<vmem>>, vector<1x256xf32>
    %c1_77 = arith.constant 1 : index
    %c16_78 = arith.constant 16 : index
    %176 = vector.load %arg4[%c1_77, %c16_78] : memref<2x358xf32, #tpu.memory_space<vmem>>, vector<1x256xf32>
    %c7 = arith.constant 7 : index
    %177 = memref.load %arg1[%c7] : memref<98xf32, #tpu.memory_space<smem>>
    %c56 = arith.constant 56 : index
    %178 = memref.load %arg1[%c56] : memref<98xf32, #tpu.memory_space<smem>>
    %179 = vector.broadcast %177 : f32 to vector<1x256xf32>
    %180 = arith.mulf %179, %175 : vector<1x256xf32>
    %181 = vector.broadcast %178 : f32 to vector<1x256xf32>
    %182 = arith.mulf %181, %176 : vector<1x256xf32>
    %183 = arith.addf %180, %182 : vector<1x256xf32>
    %cst_79 = arith.constant 0.000000e+00 : f32
    %184 = vector.broadcast %cst_79 : f32 to vector<1x256xf32>
    %185 = arith.select %25, %183, %184 : vector<1x256xi1>, vector<1x256xf32>
    %186 = arith.addf %138, %185 : vector<1x256xf32>
    %c0_80 = arith.constant 0 : index
    %c17 = arith.constant 17 : index
    %187 = vector.load %arg4[%c0_80, %c17] : memref<2x358xf32, #tpu.memory_space<vmem>>, vector<1x256xf32>
    %c1_81 = arith.constant 1 : index
    %c17_82 = arith.constant 17 : index
    %188 = vector.load %arg4[%c1_81, %c17_82] : memref<2x358xf32, #tpu.memory_space<vmem>>, vector<1x256xf32>
    %c8 = arith.constant 8 : index
    %189 = memref.load %arg1[%c8] : memref<98xf32, #tpu.memory_space<smem>>
    %c57 = arith.constant 57 : index
    %190 = memref.load %arg1[%c57] : memref<98xf32, #tpu.memory_space<smem>>
    %191 = vector.broadcast %189 : f32 to vector<1x256xf32>
    %192 = arith.mulf %191, %187 : vector<1x256xf32>
    %193 = vector.broadcast %190 : f32 to vector<1x256xf32>
    %194 = arith.mulf %193, %188 : vector<1x256xf32>
    %195 = arith.addf %192, %194 : vector<1x256xf32>
    %cst_83 = arith.constant 0.000000e+00 : f32
    %196 = vector.broadcast %cst_83 : f32 to vector<1x256xf32>
    %197 = arith.select %34, %195, %196 : vector<1x256xi1>, vector<1x256xf32>
    %198 = arith.addf %150, %197 : vector<1x256xf32>
    %c0_84 = arith.constant 0 : index
    %c18 = arith.constant 18 : index
    %199 = vector.load %arg4[%c0_84, %c18] : memref<2x358xf32, #tpu.memory_space<vmem>>, vector<1x256xf32>
    %c1_85 = arith.constant 1 : index
    %c18_86 = arith.constant 18 : index
    %200 = vector.load %arg4[%c1_85, %c18_86] : memref<2x358xf32, #tpu.memory_space<vmem>>, vector<1x256xf32>
    %c9 = arith.constant 9 : index
    %201 = memref.load %arg1[%c9] : memref<98xf32, #tpu.memory_space<smem>>
    %c58 = arith.constant 58 : index
    %202 = memref.load %arg1[%c58] : memref<98xf32, #tpu.memory_space<smem>>
    %203 = vector.broadcast %201 : f32 to vector<1x256xf32>
    %204 = arith.mulf %203, %199 : vector<1x256xf32>
    %205 = vector.broadcast %202 : f32 to vector<1x256xf32>
    %206 = arith.mulf %205, %200 : vector<1x256xf32>
    %207 = arith.addf %204, %206 : vector<1x256xf32>
    %cst_87 = arith.constant 0.000000e+00 : f32
    %208 = vector.broadcast %cst_87 : f32 to vector<1x256xf32>
    %209 = arith.select %43, %207, %208 : vector<1x256xi1>, vector<1x256xf32>
    %210 = arith.addf %162, %209 : vector<1x256xf32>
    %c0_88 = arith.constant 0 : index
    %c19 = arith.constant 19 : index
    %211 = vector.load %arg4[%c0_88, %c19] : memref<2x358xf32, #tpu.memory_space<vmem>>, vector<1x256xf32>
    %c1_89 = arith.constant 1 : index
    %c19_90 = arith.constant 19 : index
    %212 = vector.load %arg4[%c1_89, %c19_90] : memref<2x358xf32, #tpu.memory_space<vmem>>, vector<1x256xf32>
    %c10 = arith.constant 10 : index
    %213 = memref.load %arg1[%c10] : memref<98xf32, #tpu.memory_space<smem>>
    %c59 = arith.constant 59 : index
    %214 = memref.load %arg1[%c59] : memref<98xf32, #tpu.memory_space<smem>>
    %215 = vector.broadcast %213 : f32 to vector<1x256xf32>
    %216 = arith.mulf %215, %211 : vector<1x256xf32>
    %217 = vector.broadcast %214 : f32 to vector<1x256xf32>
    %218 = arith.mulf %217, %212 : vector<1x256xf32>
    %219 = arith.addf %216, %218 : vector<1x256xf32>
    %220 = arith.addf %174, %219 : vector<1x256xf32>
    %c0_91 = arith.constant 0 : index
    %c20 = arith.constant 20 : index
    %221 = vector.load %arg4[%c0_91, %c20] : memref<2x358xf32, #tpu.memory_space<vmem>>, vector<1x256xf32>
    %c1_92 = arith.constant 1 : index
    %c20_93 = arith.constant 20 : index
    %222 = vector.load %arg4[%c1_92, %c20_93] : memref<2x358xf32, #tpu.memory_space<vmem>>, vector<1x256xf32>
    %c11 = arith.constant 11 : index
    %223 = memref.load %arg1[%c11] : memref<98xf32, #tpu.memory_space<smem>>
    %c60 = arith.constant 60 : index
    %224 = memref.load %arg1[%c60] : memref<98xf32, #tpu.memory_space<smem>>
    %225 = vector.broadcast %223 : f32 to vector<1x256xf32>
    %226 = arith.mulf %225, %221 : vector<1x256xf32>
    %227 = vector.broadcast %224 : f32 to vector<1x256xf32>
    %228 = arith.mulf %227, %222 : vector<1x256xf32>
    %229 = arith.addf %226, %228 : vector<1x256xf32>
    %cst_94 = arith.constant 0.000000e+00 : f32
    %230 = vector.broadcast %cst_94 : f32 to vector<1x256xf32>
    %231 = arith.select %52, %229, %230 : vector<1x256xi1>, vector<1x256xf32>
    %232 = arith.addf %186, %231 : vector<1x256xf32>
    %c0_95 = arith.constant 0 : index
    %c21 = arith.constant 21 : index
    %233 = vector.load %arg4[%c0_95, %c21] : memref<2x358xf32, #tpu.memory_space<vmem>>, vector<1x256xf32>
    %c1_96 = arith.constant 1 : index
    %c21_97 = arith.constant 21 : index
    %234 = vector.load %arg4[%c1_96, %c21_97] : memref<2x358xf32, #tpu.memory_space<vmem>>, vector<1x256xf32>
    %c12 = arith.constant 12 : index
    %235 = memref.load %arg1[%c12] : memref<98xf32, #tpu.memory_space<smem>>
    %c61 = arith.constant 61 : index
    %236 = memref.load %arg1[%c61] : memref<98xf32, #tpu.memory_space<smem>>
    %237 = vector.broadcast %235 : f32 to vector<1x256xf32>
    %238 = arith.mulf %237, %233 : vector<1x256xf32>
    %239 = vector.broadcast %236 : f32 to vector<1x256xf32>
    %240 = arith.mulf %239, %234 : vector<1x256xf32>
    %241 = arith.addf %238, %240 : vector<1x256xf32>
    %cst_98 = arith.constant 0.000000e+00 : f32
    %242 = vector.broadcast %cst_98 : f32 to vector<1x256xf32>
    %243 = arith.select %61, %241, %242 : vector<1x256xi1>, vector<1x256xf32>
    %244 = arith.addf %198, %243 : vector<1x256xf32>
    %c0_99 = arith.constant 0 : index
    %c22 = arith.constant 22 : index
    %245 = vector.load %arg4[%c0_99, %c22] : memref<2x358xf32, #tpu.memory_space<vmem>>, vector<1x256xf32>
    %c1_100 = arith.constant 1 : index
    %c22_101 = arith.constant 22 : index
    %246 = vector.load %arg4[%c1_100, %c22_101] : memref<2x358xf32, #tpu.memory_space<vmem>>, vector<1x256xf32>
    %c13 = arith.constant 13 : index
    %247 = memref.load %arg1[%c13] : memref<98xf32, #tpu.memory_space<smem>>
    %c62 = arith.constant 62 : index
    %248 = memref.load %arg1[%c62] : memref<98xf32, #tpu.memory_space<smem>>
    %249 = vector.broadcast %247 : f32 to vector<1x256xf32>
    %250 = arith.mulf %249, %245 : vector<1x256xf32>
    %251 = vector.broadcast %248 : f32 to vector<1x256xf32>
    %252 = arith.mulf %251, %246 : vector<1x256xf32>
    %253 = arith.addf %250, %252 : vector<1x256xf32>
    %cst_102 = arith.constant 0.000000e+00 : f32
    %254 = vector.broadcast %cst_102 : f32 to vector<1x256xf32>
    %255 = arith.select %70, %253, %254 : vector<1x256xi1>, vector<1x256xf32>
    %256 = arith.addf %210, %255 : vector<1x256xf32>
    %c0_103 = arith.constant 0 : index
    %c32 = arith.constant 32 : index
    %257 = vector.load %arg4[%c0_103, %c32] : memref<2x358xf32, #tpu.memory_space<vmem>>, vector<1x256xf32>
    %c1_104 = arith.constant 1 : index
    %c32_105 = arith.constant 32 : index
    %258 = vector.load %arg4[%c1_104, %c32_105] : memref<2x358xf32, #tpu.memory_space<vmem>>, vector<1x256xf32>
    %c14 = arith.constant 14 : index
    %259 = memref.load %arg1[%c14] : memref<98xf32, #tpu.memory_space<smem>>
    %c63 = arith.constant 63 : index
    %260 = memref.load %arg1[%c63] : memref<98xf32, #tpu.memory_space<smem>>
    %261 = vector.broadcast %259 : f32 to vector<1x256xf32>
    %262 = arith.mulf %261, %257 : vector<1x256xf32>
    %263 = vector.broadcast %260 : f32 to vector<1x256xf32>
    %264 = arith.mulf %263, %258 : vector<1x256xf32>
    %265 = arith.addf %262, %264 : vector<1x256xf32>
    %cst_106 = arith.constant 0.000000e+00 : f32
    %266 = vector.broadcast %cst_106 : f32 to vector<1x256xf32>
    %267 = arith.select %25, %265, %266 : vector<1x256xi1>, vector<1x256xf32>
    %268 = arith.addf %220, %267 : vector<1x256xf32>
    %c0_107 = arith.constant 0 : index
    %c33 = arith.constant 33 : index
    %269 = vector.load %arg4[%c0_107, %c33] : memref<2x358xf32, #tpu.memory_space<vmem>>, vector<1x256xf32>
    %c1_108 = arith.constant 1 : index
    %c33_109 = arith.constant 33 : index
    %270 = vector.load %arg4[%c1_108, %c33_109] : memref<2x358xf32, #tpu.memory_space<vmem>>, vector<1x256xf32>
    %c15 = arith.constant 15 : index
    %271 = memref.load %arg1[%c15] : memref<98xf32, #tpu.memory_space<smem>>
    %c64 = arith.constant 64 : index
    %272 = memref.load %arg1[%c64] : memref<98xf32, #tpu.memory_space<smem>>
    %273 = vector.broadcast %271 : f32 to vector<1x256xf32>
    %274 = arith.mulf %273, %269 : vector<1x256xf32>
    %275 = vector.broadcast %272 : f32 to vector<1x256xf32>
    %276 = arith.mulf %275, %270 : vector<1x256xf32>
    %277 = arith.addf %274, %276 : vector<1x256xf32>
    %cst_110 = arith.constant 0.000000e+00 : f32
    %278 = vector.broadcast %cst_110 : f32 to vector<1x256xf32>
    %279 = arith.select %34, %277, %278 : vector<1x256xi1>, vector<1x256xf32>
    %280 = arith.addf %232, %279 : vector<1x256xf32>
    %c0_111 = arith.constant 0 : index
    %c34 = arith.constant 34 : index
    %281 = vector.load %arg4[%c0_111, %c34] : memref<2x358xf32, #tpu.memory_space<vmem>>, vector<1x256xf32>
    %c1_112 = arith.constant 1 : index
    %c34_113 = arith.constant 34 : index
    %282 = vector.load %arg4[%c1_112, %c34_113] : memref<2x358xf32, #tpu.memory_space<vmem>>, vector<1x256xf32>
    %c16_114 = arith.constant 16 : index
    %283 = memref.load %arg1[%c16_114] : memref<98xf32, #tpu.memory_space<smem>>
    %c65 = arith.constant 65 : index
    %284 = memref.load %arg1[%c65] : memref<98xf32, #tpu.memory_space<smem>>
    %285 = vector.broadcast %283 : f32 to vector<1x256xf32>
    %286 = arith.mulf %285, %281 : vector<1x256xf32>
    %287 = vector.broadcast %284 : f32 to vector<1x256xf32>
    %288 = arith.mulf %287, %282 : vector<1x256xf32>
    %289 = arith.addf %286, %288 : vector<1x256xf32>
    %cst_115 = arith.constant 0.000000e+00 : f32
    %290 = vector.broadcast %cst_115 : f32 to vector<1x256xf32>
    %291 = arith.select %43, %289, %290 : vector<1x256xi1>, vector<1x256xf32>
    %292 = arith.addf %244, %291 : vector<1x256xf32>
    %c0_116 = arith.constant 0 : index
    %c35 = arith.constant 35 : index
    %293 = vector.load %arg4[%c0_116, %c35] : memref<2x358xf32, #tpu.memory_space<vmem>>, vector<1x256xf32>
    %c1_117 = arith.constant 1 : index
    %c35_118 = arith.constant 35 : index
    %294 = vector.load %arg4[%c1_117, %c35_118] : memref<2x358xf32, #tpu.memory_space<vmem>>, vector<1x256xf32>
    %c17_119 = arith.constant 17 : index
    %295 = memref.load %arg1[%c17_119] : memref<98xf32, #tpu.memory_space<smem>>
    %c66 = arith.constant 66 : index
    %296 = memref.load %arg1[%c66] : memref<98xf32, #tpu.memory_space<smem>>
    %297 = vector.broadcast %295 : f32 to vector<1x256xf32>
    %298 = arith.mulf %297, %293 : vector<1x256xf32>
    %299 = vector.broadcast %296 : f32 to vector<1x256xf32>
    %300 = arith.mulf %299, %294 : vector<1x256xf32>
    %301 = arith.addf %298, %300 : vector<1x256xf32>
    %302 = arith.addf %256, %301 : vector<1x256xf32>
    %c0_120 = arith.constant 0 : index
    %c36 = arith.constant 36 : index
    %303 = vector.load %arg4[%c0_120, %c36] : memref<2x358xf32, #tpu.memory_space<vmem>>, vector<1x256xf32>
    %c1_121 = arith.constant 1 : index
    %c36_122 = arith.constant 36 : index
    %304 = vector.load %arg4[%c1_121, %c36_122] : memref<2x358xf32, #tpu.memory_space<vmem>>, vector<1x256xf32>
    %c18_123 = arith.constant 18 : index
    %305 = memref.load %arg1[%c18_123] : memref<98xf32, #tpu.memory_space<smem>>
    %c67 = arith.constant 67 : index
    %306 = memref.load %arg1[%c67] : memref<98xf32, #tpu.memory_space<smem>>
    %307 = vector.broadcast %305 : f32 to vector<1x256xf32>
    %308 = arith.mulf %307, %303 : vector<1x256xf32>
    %309 = vector.broadcast %306 : f32 to vector<1x256xf32>
    %310 = arith.mulf %309, %304 : vector<1x256xf32>
    %311 = arith.addf %308, %310 : vector<1x256xf32>
    %cst_124 = arith.constant 0.000000e+00 : f32
    %312 = vector.broadcast %cst_124 : f32 to vector<1x256xf32>
    %313 = arith.select %52, %311, %312 : vector<1x256xi1>, vector<1x256xf32>
    %314 = arith.addf %268, %313 : vector<1x256xf32>
    %c0_125 = arith.constant 0 : index
    %c37 = arith.constant 37 : index
    %315 = vector.load %arg4[%c0_125, %c37] : memref<2x358xf32, #tpu.memory_space<vmem>>, vector<1x256xf32>
    %c1_126 = arith.constant 1 : index
    %c37_127 = arith.constant 37 : index
    %316 = vector.load %arg4[%c1_126, %c37_127] : memref<2x358xf32, #tpu.memory_space<vmem>>, vector<1x256xf32>
    %c19_128 = arith.constant 19 : index
    %317 = memref.load %arg1[%c19_128] : memref<98xf32, #tpu.memory_space<smem>>
    %c68 = arith.constant 68 : index
    %318 = memref.load %arg1[%c68] : memref<98xf32, #tpu.memory_space<smem>>
    %319 = vector.broadcast %317 : f32 to vector<1x256xf32>
    %320 = arith.mulf %319, %315 : vector<1x256xf32>
    %321 = vector.broadcast %318 : f32 to vector<1x256xf32>
    %322 = arith.mulf %321, %316 : vector<1x256xf32>
    %323 = arith.addf %320, %322 : vector<1x256xf32>
    %cst_129 = arith.constant 0.000000e+00 : f32
    %324 = vector.broadcast %cst_129 : f32 to vector<1x256xf32>
    %325 = arith.select %61, %323, %324 : vector<1x256xi1>, vector<1x256xf32>
    %326 = arith.addf %280, %325 : vector<1x256xf32>
    %c0_130 = arith.constant 0 : index
    %c38 = arith.constant 38 : index
    %327 = vector.load %arg4[%c0_130, %c38] : memref<2x358xf32, #tpu.memory_space<vmem>>, vector<1x256xf32>
    %c1_131 = arith.constant 1 : index
    %c38_132 = arith.constant 38 : index
    %328 = vector.load %arg4[%c1_131, %c38_132] : memref<2x358xf32, #tpu.memory_space<vmem>>, vector<1x256xf32>
    %c20_133 = arith.constant 20 : index
    %329 = memref.load %arg1[%c20_133] : memref<98xf32, #tpu.memory_space<smem>>
    %c69 = arith.constant 69 : index
    %330 = memref.load %arg1[%c69] : memref<98xf32, #tpu.memory_space<smem>>
    %331 = vector.broadcast %329 : f32 to vector<1x256xf32>
    %332 = arith.mulf %331, %327 : vector<1x256xf32>
    %333 = vector.broadcast %330 : f32 to vector<1x256xf32>
    %334 = arith.mulf %333, %328 : vector<1x256xf32>
    %335 = arith.addf %332, %334 : vector<1x256xf32>
    %cst_134 = arith.constant 0.000000e+00 : f32
    %336 = vector.broadcast %cst_134 : f32 to vector<1x256xf32>
    %337 = arith.select %70, %335, %336 : vector<1x256xi1>, vector<1x256xf32>
    %338 = arith.addf %292, %337 : vector<1x256xf32>
    %c0_135 = arith.constant 0 : index
    %c48 = arith.constant 48 : index
    %339 = vector.load %arg4[%c0_135, %c48] : memref<2x358xf32, #tpu.memory_space<vmem>>, vector<1x256xf32>
    %c1_136 = arith.constant 1 : index
    %c48_137 = arith.constant 48 : index
    %340 = vector.load %arg4[%c1_136, %c48_137] : memref<2x358xf32, #tpu.memory_space<vmem>>, vector<1x256xf32>
    %c21_138 = arith.constant 21 : index
    %341 = memref.load %arg1[%c21_138] : memref<98xf32, #tpu.memory_space<smem>>
    %c70 = arith.constant 70 : index
    %342 = memref.load %arg1[%c70] : memref<98xf32, #tpu.memory_space<smem>>
    %343 = vector.broadcast %341 : f32 to vector<1x256xf32>
    %344 = arith.mulf %343, %339 : vector<1x256xf32>
    %345 = vector.broadcast %342 : f32 to vector<1x256xf32>
    %346 = arith.mulf %345, %340 : vector<1x256xf32>
    %347 = arith.addf %344, %346 : vector<1x256xf32>
    %cst_139 = arith.constant 0.000000e+00 : f32
    %348 = vector.broadcast %cst_139 : f32 to vector<1x256xf32>
    %349 = arith.select %25, %347, %348 : vector<1x256xi1>, vector<1x256xf32>
    %350 = arith.addf %302, %349 : vector<1x256xf32>
    %c0_140 = arith.constant 0 : index
    %c49_141 = arith.constant 49 : index
    %351 = vector.load %arg4[%c0_140, %c49_141] : memref<2x358xf32, #tpu.memory_space<vmem>>, vector<1x256xf32>
    %c1_142 = arith.constant 1 : index
    %c49_143 = arith.constant 49 : index
    %352 = vector.load %arg4[%c1_142, %c49_143] : memref<2x358xf32, #tpu.memory_space<vmem>>, vector<1x256xf32>
    %c22_144 = arith.constant 22 : index
    %353 = memref.load %arg1[%c22_144] : memref<98xf32, #tpu.memory_space<smem>>
    %c71 = arith.constant 71 : index
    %354 = memref.load %arg1[%c71] : memref<98xf32, #tpu.memory_space<smem>>
    %355 = vector.broadcast %353 : f32 to vector<1x256xf32>
    %356 = arith.mulf %355, %351 : vector<1x256xf32>
    %357 = vector.broadcast %354 : f32 to vector<1x256xf32>
    %358 = arith.mulf %357, %352 : vector<1x256xf32>
    %359 = arith.addf %356, %358 : vector<1x256xf32>
    %cst_145 = arith.constant 0.000000e+00 : f32
    %360 = vector.broadcast %cst_145 : f32 to vector<1x256xf32>
    %361 = arith.select %34, %359, %360 : vector<1x256xi1>, vector<1x256xf32>
    %362 = arith.addf %314, %361 : vector<1x256xf32>
    %c0_146 = arith.constant 0 : index
    %c50_147 = arith.constant 50 : index
    %363 = vector.load %arg4[%c0_146, %c50_147] : memref<2x358xf32, #tpu.memory_space<vmem>>, vector<1x256xf32>
    %c1_148 = arith.constant 1 : index
    %c50_149 = arith.constant 50 : index
    %364 = vector.load %arg4[%c1_148, %c50_149] : memref<2x358xf32, #tpu.memory_space<vmem>>, vector<1x256xf32>
    %c23 = arith.constant 23 : index
    %365 = memref.load %arg1[%c23] : memref<98xf32, #tpu.memory_space<smem>>
    %c72 = arith.constant 72 : index
    %366 = memref.load %arg1[%c72] : memref<98xf32, #tpu.memory_space<smem>>
    %367 = vector.broadcast %365 : f32 to vector<1x256xf32>
    %368 = arith.mulf %367, %363 : vector<1x256xf32>
    %369 = vector.broadcast %366 : f32 to vector<1x256xf32>
    %370 = arith.mulf %369, %364 : vector<1x256xf32>
    %371 = arith.addf %368, %370 : vector<1x256xf32>
    %cst_150 = arith.constant 0.000000e+00 : f32
    %372 = vector.broadcast %cst_150 : f32 to vector<1x256xf32>
    %373 = arith.select %43, %371, %372 : vector<1x256xi1>, vector<1x256xf32>
    %374 = arith.addf %326, %373 : vector<1x256xf32>
    %c0_151 = arith.constant 0 : index
    %c51_152 = arith.constant 51 : index
    %375 = vector.load %arg4[%c0_151, %c51_152] : memref<2x358xf32, #tpu.memory_space<vmem>>, vector<1x256xf32>
    %c1_153 = arith.constant 1 : index
    %c51_154 = arith.constant 51 : index
    %376 = vector.load %arg4[%c1_153, %c51_154] : memref<2x358xf32, #tpu.memory_space<vmem>>, vector<1x256xf32>
    %c24 = arith.constant 24 : index
    %377 = memref.load %arg1[%c24] : memref<98xf32, #tpu.memory_space<smem>>
    %c73 = arith.constant 73 : index
    %378 = memref.load %arg1[%c73] : memref<98xf32, #tpu.memory_space<smem>>
    %379 = vector.broadcast %377 : f32 to vector<1x256xf32>
    %380 = arith.mulf %379, %375 : vector<1x256xf32>
    %381 = vector.broadcast %378 : f32 to vector<1x256xf32>
    %382 = arith.mulf %381, %376 : vector<1x256xf32>
    %383 = arith.addf %380, %382 : vector<1x256xf32>
    %384 = arith.addf %338, %383 : vector<1x256xf32>
    %c0_155 = arith.constant 0 : index
    %c52_156 = arith.constant 52 : index
    %385 = vector.load %arg4[%c0_155, %c52_156] : memref<2x358xf32, #tpu.memory_space<vmem>>, vector<1x256xf32>
    %c1_157 = arith.constant 1 : index
    %c52_158 = arith.constant 52 : index
    %386 = vector.load %arg4[%c1_157, %c52_158] : memref<2x358xf32, #tpu.memory_space<vmem>>, vector<1x256xf32>
    %c25 = arith.constant 25 : index
    %387 = memref.load %arg1[%c25] : memref<98xf32, #tpu.memory_space<smem>>
    %c74 = arith.constant 74 : index
    %388 = memref.load %arg1[%c74] : memref<98xf32, #tpu.memory_space<smem>>
    %389 = vector.broadcast %387 : f32 to vector<1x256xf32>
    %390 = arith.mulf %389, %385 : vector<1x256xf32>
    %391 = vector.broadcast %388 : f32 to vector<1x256xf32>
    %392 = arith.mulf %391, %386 : vector<1x256xf32>
    %393 = arith.addf %390, %392 : vector<1x256xf32>
    %cst_159 = arith.constant 0.000000e+00 : f32
    %394 = vector.broadcast %cst_159 : f32 to vector<1x256xf32>
    %395 = arith.select %52, %393, %394 : vector<1x256xi1>, vector<1x256xf32>
    %396 = arith.addf %350, %395 : vector<1x256xf32>
    %c0_160 = arith.constant 0 : index
    %c53_161 = arith.constant 53 : index
    %397 = vector.load %arg4[%c0_160, %c53_161] : memref<2x358xf32, #tpu.memory_space<vmem>>, vector<1x256xf32>
    %c1_162 = arith.constant 1 : index
    %c53_163 = arith.constant 53 : index
    %398 = vector.load %arg4[%c1_162, %c53_163] : memref<2x358xf32, #tpu.memory_space<vmem>>, vector<1x256xf32>
    %c26 = arith.constant 26 : index
    %399 = memref.load %arg1[%c26] : memref<98xf32, #tpu.memory_space<smem>>
    %c75 = arith.constant 75 : index
    %400 = memref.load %arg1[%c75] : memref<98xf32, #tpu.memory_space<smem>>
    %401 = vector.broadcast %399 : f32 to vector<1x256xf32>
    %402 = arith.mulf %401, %397 : vector<1x256xf32>
    %403 = vector.broadcast %400 : f32 to vector<1x256xf32>
    %404 = arith.mulf %403, %398 : vector<1x256xf32>
    %405 = arith.addf %402, %404 : vector<1x256xf32>
    %cst_164 = arith.constant 0.000000e+00 : f32
    %406 = vector.broadcast %cst_164 : f32 to vector<1x256xf32>
    %407 = arith.select %61, %405, %406 : vector<1x256xi1>, vector<1x256xf32>
    %408 = arith.addf %362, %407 : vector<1x256xf32>
    %c0_165 = arith.constant 0 : index
    %c54_166 = arith.constant 54 : index
    %409 = vector.load %arg4[%c0_165, %c54_166] : memref<2x358xf32, #tpu.memory_space<vmem>>, vector<1x256xf32>
    %c1_167 = arith.constant 1 : index
    %c54_168 = arith.constant 54 : index
    %410 = vector.load %arg4[%c1_167, %c54_168] : memref<2x358xf32, #tpu.memory_space<vmem>>, vector<1x256xf32>
    %c27 = arith.constant 27 : index
    %411 = memref.load %arg1[%c27] : memref<98xf32, #tpu.memory_space<smem>>
    %c76 = arith.constant 76 : index
    %412 = memref.load %arg1[%c76] : memref<98xf32, #tpu.memory_space<smem>>
    %413 = vector.broadcast %411 : f32 to vector<1x256xf32>
    %414 = arith.mulf %413, %409 : vector<1x256xf32>
    %415 = vector.broadcast %412 : f32 to vector<1x256xf32>
    %416 = arith.mulf %415, %410 : vector<1x256xf32>
    %417 = arith.addf %414, %416 : vector<1x256xf32>
    %cst_169 = arith.constant 0.000000e+00 : f32
    %418 = vector.broadcast %cst_169 : f32 to vector<1x256xf32>
    %419 = arith.select %70, %417, %418 : vector<1x256xi1>, vector<1x256xf32>
    %420 = arith.addf %374, %419 : vector<1x256xf32>
    %c0_170 = arith.constant 0 : index
    %c64_171 = arith.constant 64 : index
    %421 = vector.load %arg4[%c0_170, %c64_171] : memref<2x358xf32, #tpu.memory_space<vmem>>, vector<1x256xf32>
    %c1_172 = arith.constant 1 : index
    %c64_173 = arith.constant 64 : index
    %422 = vector.load %arg4[%c1_172, %c64_173] : memref<2x358xf32, #tpu.memory_space<vmem>>, vector<1x256xf32>
    %c28 = arith.constant 28 : index
    %423 = memref.load %arg1[%c28] : memref<98xf32, #tpu.memory_space<smem>>
    %c77 = arith.constant 77 : index
    %424 = memref.load %arg1[%c77] : memref<98xf32, #tpu.memory_space<smem>>
    %425 = vector.broadcast %423 : f32 to vector<1x256xf32>
    %426 = arith.mulf %425, %421 : vector<1x256xf32>
    %427 = vector.broadcast %424 : f32 to vector<1x256xf32>
    %428 = arith.mulf %427, %422 : vector<1x256xf32>
    %429 = arith.addf %426, %428 : vector<1x256xf32>
    %cst_174 = arith.constant 0.000000e+00 : f32
    %430 = vector.broadcast %cst_174 : f32 to vector<1x256xf32>
    %431 = arith.select %25, %429, %430 : vector<1x256xi1>, vector<1x256xf32>
    %432 = arith.addf %384, %431 : vector<1x256xf32>
    %c0_175 = arith.constant 0 : index
    %c65_176 = arith.constant 65 : index
    %433 = vector.load %arg4[%c0_175, %c65_176] : memref<2x358xf32, #tpu.memory_space<vmem>>, vector<1x256xf32>
    %c1_177 = arith.constant 1 : index
    %c65_178 = arith.constant 65 : index
    %434 = vector.load %arg4[%c1_177, %c65_178] : memref<2x358xf32, #tpu.memory_space<vmem>>, vector<1x256xf32>
    %c29 = arith.constant 29 : index
    %435 = memref.load %arg1[%c29] : memref<98xf32, #tpu.memory_space<smem>>
    %c78 = arith.constant 78 : index
    %436 = memref.load %arg1[%c78] : memref<98xf32, #tpu.memory_space<smem>>
    %437 = vector.broadcast %435 : f32 to vector<1x256xf32>
    %438 = arith.mulf %437, %433 : vector<1x256xf32>
    %439 = vector.broadcast %436 : f32 to vector<1x256xf32>
    %440 = arith.mulf %439, %434 : vector<1x256xf32>
    %441 = arith.addf %438, %440 : vector<1x256xf32>
    %cst_179 = arith.constant 0.000000e+00 : f32
    %442 = vector.broadcast %cst_179 : f32 to vector<1x256xf32>
    %443 = arith.select %34, %441, %442 : vector<1x256xi1>, vector<1x256xf32>
    %444 = arith.addf %396, %443 : vector<1x256xf32>
    %c0_180 = arith.constant 0 : index
    %c66_181 = arith.constant 66 : index
    %445 = vector.load %arg4[%c0_180, %c66_181] : memref<2x358xf32, #tpu.memory_space<vmem>>, vector<1x256xf32>
    %c1_182 = arith.constant 1 : index
    %c66_183 = arith.constant 66 : index
    %446 = vector.load %arg4[%c1_182, %c66_183] : memref<2x358xf32, #tpu.memory_space<vmem>>, vector<1x256xf32>
    %c30 = arith.constant 30 : index
    %447 = memref.load %arg1[%c30] : memref<98xf32, #tpu.memory_space<smem>>
    %c79 = arith.constant 79 : index
    %448 = memref.load %arg1[%c79] : memref<98xf32, #tpu.memory_space<smem>>
    %449 = vector.broadcast %447 : f32 to vector<1x256xf32>
    %450 = arith.mulf %449, %445 : vector<1x256xf32>
    %451 = vector.broadcast %448 : f32 to vector<1x256xf32>
    %452 = arith.mulf %451, %446 : vector<1x256xf32>
    %453 = arith.addf %450, %452 : vector<1x256xf32>
    %cst_184 = arith.constant 0.000000e+00 : f32
    %454 = vector.broadcast %cst_184 : f32 to vector<1x256xf32>
    %455 = arith.select %43, %453, %454 : vector<1x256xi1>, vector<1x256xf32>
    %456 = arith.addf %408, %455 : vector<1x256xf32>
    %c0_185 = arith.constant 0 : index
    %c67_186 = arith.constant 67 : index
    %457 = vector.load %arg4[%c0_185, %c67_186] : memref<2x358xf32, #tpu.memory_space<vmem>>, vector<1x256xf32>
    %c1_187 = arith.constant 1 : index
    %c67_188 = arith.constant 67 : index
    %458 = vector.load %arg4[%c1_187, %c67_188] : memref<2x358xf32, #tpu.memory_space<vmem>>, vector<1x256xf32>
    %c31 = arith.constant 31 : index
    %459 = memref.load %arg1[%c31] : memref<98xf32, #tpu.memory_space<smem>>
    %c80 = arith.constant 80 : index
    %460 = memref.load %arg1[%c80] : memref<98xf32, #tpu.memory_space<smem>>
    %461 = vector.broadcast %459 : f32 to vector<1x256xf32>
    %462 = arith.mulf %461, %457 : vector<1x256xf32>
    %463 = vector.broadcast %460 : f32 to vector<1x256xf32>
    %464 = arith.mulf %463, %458 : vector<1x256xf32>
    %465 = arith.addf %462, %464 : vector<1x256xf32>
    %466 = arith.addf %420, %465 : vector<1x256xf32>
    %c0_189 = arith.constant 0 : index
    %c68_190 = arith.constant 68 : index
    %467 = vector.load %arg4[%c0_189, %c68_190] : memref<2x358xf32, #tpu.memory_space<vmem>>, vector<1x256xf32>
    %c1_191 = arith.constant 1 : index
    %c68_192 = arith.constant 68 : index
    %468 = vector.load %arg4[%c1_191, %c68_192] : memref<2x358xf32, #tpu.memory_space<vmem>>, vector<1x256xf32>
    %c32_193 = arith.constant 32 : index
    %469 = memref.load %arg1[%c32_193] : memref<98xf32, #tpu.memory_space<smem>>
    %c81 = arith.constant 81 : index
    %470 = memref.load %arg1[%c81] : memref<98xf32, #tpu.memory_space<smem>>
    %471 = vector.broadcast %469 : f32 to vector<1x256xf32>
    %472 = arith.mulf %471, %467 : vector<1x256xf32>
    %473 = vector.broadcast %470 : f32 to vector<1x256xf32>
    %474 = arith.mulf %473, %468 : vector<1x256xf32>
    %475 = arith.addf %472, %474 : vector<1x256xf32>
    %cst_194 = arith.constant 0.000000e+00 : f32
    %476 = vector.broadcast %cst_194 : f32 to vector<1x256xf32>
    %477 = arith.select %52, %475, %476 : vector<1x256xi1>, vector<1x256xf32>
    %478 = arith.addf %432, %477 : vector<1x256xf32>
    %c0_195 = arith.constant 0 : index
    %c69_196 = arith.constant 69 : index
    %479 = vector.load %arg4[%c0_195, %c69_196] : memref<2x358xf32, #tpu.memory_space<vmem>>, vector<1x256xf32>
    %c1_197 = arith.constant 1 : index
    %c69_198 = arith.constant 69 : index
    %480 = vector.load %arg4[%c1_197, %c69_198] : memref<2x358xf32, #tpu.memory_space<vmem>>, vector<1x256xf32>
    %c33_199 = arith.constant 33 : index
    %481 = memref.load %arg1[%c33_199] : memref<98xf32, #tpu.memory_space<smem>>
    %c82 = arith.constant 82 : index
    %482 = memref.load %arg1[%c82] : memref<98xf32, #tpu.memory_space<smem>>
    %483 = vector.broadcast %481 : f32 to vector<1x256xf32>
    %484 = arith.mulf %483, %479 : vector<1x256xf32>
    %485 = vector.broadcast %482 : f32 to vector<1x256xf32>
    %486 = arith.mulf %485, %480 : vector<1x256xf32>
    %487 = arith.addf %484, %486 : vector<1x256xf32>
    %cst_200 = arith.constant 0.000000e+00 : f32
    %488 = vector.broadcast %cst_200 : f32 to vector<1x256xf32>
    %489 = arith.select %61, %487, %488 : vector<1x256xi1>, vector<1x256xf32>
    %490 = arith.addf %444, %489 : vector<1x256xf32>
    %c0_201 = arith.constant 0 : index
    %c70_202 = arith.constant 70 : index
    %491 = vector.load %arg4[%c0_201, %c70_202] : memref<2x358xf32, #tpu.memory_space<vmem>>, vector<1x256xf32>
    %c1_203 = arith.constant 1 : index
    %c70_204 = arith.constant 70 : index
    %492 = vector.load %arg4[%c1_203, %c70_204] : memref<2x358xf32, #tpu.memory_space<vmem>>, vector<1x256xf32>
    %c34_205 = arith.constant 34 : index
    %493 = memref.load %arg1[%c34_205] : memref<98xf32, #tpu.memory_space<smem>>
    %c83 = arith.constant 83 : index
    %494 = memref.load %arg1[%c83] : memref<98xf32, #tpu.memory_space<smem>>
    %495 = vector.broadcast %493 : f32 to vector<1x256xf32>
    %496 = arith.mulf %495, %491 : vector<1x256xf32>
    %497 = vector.broadcast %494 : f32 to vector<1x256xf32>
    %498 = arith.mulf %497, %492 : vector<1x256xf32>
    %499 = arith.addf %496, %498 : vector<1x256xf32>
    %cst_206 = arith.constant 0.000000e+00 : f32
    %500 = vector.broadcast %cst_206 : f32 to vector<1x256xf32>
    %501 = arith.select %70, %499, %500 : vector<1x256xi1>, vector<1x256xf32>
    %502 = arith.addf %456, %501 : vector<1x256xf32>
    %c0_207 = arith.constant 0 : index
    %c80_208 = arith.constant 80 : index
    %503 = vector.load %arg4[%c0_207, %c80_208] : memref<2x358xf32, #tpu.memory_space<vmem>>, vector<1x256xf32>
    %c1_209 = arith.constant 1 : index
    %c80_210 = arith.constant 80 : index
    %504 = vector.load %arg4[%c1_209, %c80_210] : memref<2x358xf32, #tpu.memory_space<vmem>>, vector<1x256xf32>
    %c35_211 = arith.constant 35 : index
    %505 = memref.load %arg1[%c35_211] : memref<98xf32, #tpu.memory_space<smem>>
    %c84 = arith.constant 84 : index
    %506 = memref.load %arg1[%c84] : memref<98xf32, #tpu.memory_space<smem>>
    %507 = vector.broadcast %505 : f32 to vector<1x256xf32>
    %508 = arith.mulf %507, %503 : vector<1x256xf32>
    %509 = vector.broadcast %506 : f32 to vector<1x256xf32>
    %510 = arith.mulf %509, %504 : vector<1x256xf32>
    %511 = arith.addf %508, %510 : vector<1x256xf32>
    %cst_212 = arith.constant 0.000000e+00 : f32
    %512 = vector.broadcast %cst_212 : f32 to vector<1x256xf32>
    %513 = arith.select %25, %511, %512 : vector<1x256xi1>, vector<1x256xf32>
    %514 = arith.addf %466, %513 : vector<1x256xf32>
    %c0_213 = arith.constant 0 : index
    %c81_214 = arith.constant 81 : index
    %515 = vector.load %arg4[%c0_213, %c81_214] : memref<2x358xf32, #tpu.memory_space<vmem>>, vector<1x256xf32>
    %c1_215 = arith.constant 1 : index
    %c81_216 = arith.constant 81 : index
    %516 = vector.load %arg4[%c1_215, %c81_216] : memref<2x358xf32, #tpu.memory_space<vmem>>, vector<1x256xf32>
    %c36_217 = arith.constant 36 : index
    %517 = memref.load %arg1[%c36_217] : memref<98xf32, #tpu.memory_space<smem>>
    %c85 = arith.constant 85 : index
    %518 = memref.load %arg1[%c85] : memref<98xf32, #tpu.memory_space<smem>>
    %519 = vector.broadcast %517 : f32 to vector<1x256xf32>
    %520 = arith.mulf %519, %515 : vector<1x256xf32>
    %521 = vector.broadcast %518 : f32 to vector<1x256xf32>
    %522 = arith.mulf %521, %516 : vector<1x256xf32>
    %523 = arith.addf %520, %522 : vector<1x256xf32>
    %cst_218 = arith.constant 0.000000e+00 : f32
    %524 = vector.broadcast %cst_218 : f32 to vector<1x256xf32>
    %525 = arith.select %34, %523, %524 : vector<1x256xi1>, vector<1x256xf32>
    %526 = arith.addf %478, %525 : vector<1x256xf32>
    %c0_219 = arith.constant 0 : index
    %c82_220 = arith.constant 82 : index
    %527 = vector.load %arg4[%c0_219, %c82_220] : memref<2x358xf32, #tpu.memory_space<vmem>>, vector<1x256xf32>
    %c1_221 = arith.constant 1 : index
    %c82_222 = arith.constant 82 : index
    %528 = vector.load %arg4[%c1_221, %c82_222] : memref<2x358xf32, #tpu.memory_space<vmem>>, vector<1x256xf32>
    %c37_223 = arith.constant 37 : index
    %529 = memref.load %arg1[%c37_223] : memref<98xf32, #tpu.memory_space<smem>>
    %c86 = arith.constant 86 : index
    %530 = memref.load %arg1[%c86] : memref<98xf32, #tpu.memory_space<smem>>
    %531 = vector.broadcast %529 : f32 to vector<1x256xf32>
    %532 = arith.mulf %531, %527 : vector<1x256xf32>
    %533 = vector.broadcast %530 : f32 to vector<1x256xf32>
    %534 = arith.mulf %533, %528 : vector<1x256xf32>
    %535 = arith.addf %532, %534 : vector<1x256xf32>
    %cst_224 = arith.constant 0.000000e+00 : f32
    %536 = vector.broadcast %cst_224 : f32 to vector<1x256xf32>
    %537 = arith.select %43, %535, %536 : vector<1x256xi1>, vector<1x256xf32>
    %538 = arith.addf %490, %537 : vector<1x256xf32>
    %c0_225 = arith.constant 0 : index
    %c83_226 = arith.constant 83 : index
    %539 = vector.load %arg4[%c0_225, %c83_226] : memref<2x358xf32, #tpu.memory_space<vmem>>, vector<1x256xf32>
    %c1_227 = arith.constant 1 : index
    %c83_228 = arith.constant 83 : index
    %540 = vector.load %arg4[%c1_227, %c83_228] : memref<2x358xf32, #tpu.memory_space<vmem>>, vector<1x256xf32>
    %c38_229 = arith.constant 38 : index
    %541 = memref.load %arg1[%c38_229] : memref<98xf32, #tpu.memory_space<smem>>
    %c87 = arith.constant 87 : index
    %542 = memref.load %arg1[%c87] : memref<98xf32, #tpu.memory_space<smem>>
    %543 = vector.broadcast %541 : f32 to vector<1x256xf32>
    %544 = arith.mulf %543, %539 : vector<1x256xf32>
    %545 = vector.broadcast %542 : f32 to vector<1x256xf32>
    %546 = arith.mulf %545, %540 : vector<1x256xf32>
    %547 = arith.addf %544, %546 : vector<1x256xf32>
    %548 = arith.addf %502, %547 : vector<1x256xf32>
    %c0_230 = arith.constant 0 : index
    %c84_231 = arith.constant 84 : index
    %549 = vector.load %arg4[%c0_230, %c84_231] : memref<2x358xf32, #tpu.memory_space<vmem>>, vector<1x256xf32>
    %c1_232 = arith.constant 1 : index
    %c84_233 = arith.constant 84 : index
    %550 = vector.load %arg4[%c1_232, %c84_233] : memref<2x358xf32, #tpu.memory_space<vmem>>, vector<1x256xf32>
    %c39 = arith.constant 39 : index
    %551 = memref.load %arg1[%c39] : memref<98xf32, #tpu.memory_space<smem>>
    %c88 = arith.constant 88 : index
    %552 = memref.load %arg1[%c88] : memref<98xf32, #tpu.memory_space<smem>>
    %553 = vector.broadcast %551 : f32 to vector<1x256xf32>
    %554 = arith.mulf %553, %549 : vector<1x256xf32>
    %555 = vector.broadcast %552 : f32 to vector<1x256xf32>
    %556 = arith.mulf %555, %550 : vector<1x256xf32>
    %557 = arith.addf %554, %556 : vector<1x256xf32>
    %cst_234 = arith.constant 0.000000e+00 : f32
    %558 = vector.broadcast %cst_234 : f32 to vector<1x256xf32>
    %559 = arith.select %52, %557, %558 : vector<1x256xi1>, vector<1x256xf32>
    %560 = arith.addf %514, %559 : vector<1x256xf32>
    %c0_235 = arith.constant 0 : index
    %c85_236 = arith.constant 85 : index
    %561 = vector.load %arg4[%c0_235, %c85_236] : memref<2x358xf32, #tpu.memory_space<vmem>>, vector<1x256xf32>
    %c1_237 = arith.constant 1 : index
    %c85_238 = arith.constant 85 : index
    %562 = vector.load %arg4[%c1_237, %c85_238] : memref<2x358xf32, #tpu.memory_space<vmem>>, vector<1x256xf32>
    %c40 = arith.constant 40 : index
    %563 = memref.load %arg1[%c40] : memref<98xf32, #tpu.memory_space<smem>>
    %c89 = arith.constant 89 : index
    %564 = memref.load %arg1[%c89] : memref<98xf32, #tpu.memory_space<smem>>
    %565 = vector.broadcast %563 : f32 to vector<1x256xf32>
    %566 = arith.mulf %565, %561 : vector<1x256xf32>
    %567 = vector.broadcast %564 : f32 to vector<1x256xf32>
    %568 = arith.mulf %567, %562 : vector<1x256xf32>
    %569 = arith.addf %566, %568 : vector<1x256xf32>
    %cst_239 = arith.constant 0.000000e+00 : f32
    %570 = vector.broadcast %cst_239 : f32 to vector<1x256xf32>
    %571 = arith.select %61, %569, %570 : vector<1x256xi1>, vector<1x256xf32>
    %572 = arith.addf %526, %571 : vector<1x256xf32>
    %c0_240 = arith.constant 0 : index
    %c86_241 = arith.constant 86 : index
    %573 = vector.load %arg4[%c0_240, %c86_241] : memref<2x358xf32, #tpu.memory_space<vmem>>, vector<1x256xf32>
    %c1_242 = arith.constant 1 : index
    %c86_243 = arith.constant 86 : index
    %574 = vector.load %arg4[%c1_242, %c86_243] : memref<2x358xf32, #tpu.memory_space<vmem>>, vector<1x256xf32>
    %c41 = arith.constant 41 : index
    %575 = memref.load %arg1[%c41] : memref<98xf32, #tpu.memory_space<smem>>
    %c90 = arith.constant 90 : index
    %576 = memref.load %arg1[%c90] : memref<98xf32, #tpu.memory_space<smem>>
    %577 = vector.broadcast %575 : f32 to vector<1x256xf32>
    %578 = arith.mulf %577, %573 : vector<1x256xf32>
    %579 = vector.broadcast %576 : f32 to vector<1x256xf32>
    %580 = arith.mulf %579, %574 : vector<1x256xf32>
    %581 = arith.addf %578, %580 : vector<1x256xf32>
    %cst_244 = arith.constant 0.000000e+00 : f32
    %582 = vector.broadcast %cst_244 : f32 to vector<1x256xf32>
    %583 = arith.select %70, %581, %582 : vector<1x256xi1>, vector<1x256xf32>
    %584 = arith.addf %538, %583 : vector<1x256xf32>
    %c0_245 = arith.constant 0 : index
    %c96 = arith.constant 96 : index
    %585 = vector.load %arg4[%c0_245, %c96] : memref<2x358xf32, #tpu.memory_space<vmem>>, vector<1x256xf32>
    %c1_246 = arith.constant 1 : index
    %c96_247 = arith.constant 96 : index
    %586 = vector.load %arg4[%c1_246, %c96_247] : memref<2x358xf32, #tpu.memory_space<vmem>>, vector<1x256xf32>
    %c42 = arith.constant 42 : index
    %587 = memref.load %arg1[%c42] : memref<98xf32, #tpu.memory_space<smem>>
    %c91 = arith.constant 91 : index
    %588 = memref.load %arg1[%c91] : memref<98xf32, #tpu.memory_space<smem>>
    %589 = vector.broadcast %587 : f32 to vector<1x256xf32>
    %590 = arith.mulf %589, %585 : vector<1x256xf32>
    %591 = vector.broadcast %588 : f32 to vector<1x256xf32>
    %592 = arith.mulf %591, %586 : vector<1x256xf32>
    %593 = arith.addf %590, %592 : vector<1x256xf32>
    %cst_248 = arith.constant 0.000000e+00 : f32
    %594 = vector.broadcast %cst_248 : f32 to vector<1x256xf32>
    %595 = arith.select %25, %593, %594 : vector<1x256xi1>, vector<1x256xf32>
    %596 = arith.addf %548, %595 : vector<1x256xf32>
    %c0_249 = arith.constant 0 : index
    %c97 = arith.constant 97 : index
    %597 = vector.load %arg4[%c0_249, %c97] : memref<2x358xf32, #tpu.memory_space<vmem>>, vector<1x256xf32>
    %c1_250 = arith.constant 1 : index
    %c97_251 = arith.constant 97 : index
    %598 = vector.load %arg4[%c1_250, %c97_251] : memref<2x358xf32, #tpu.memory_space<vmem>>, vector<1x256xf32>
    %c43 = arith.constant 43 : index
    %599 = memref.load %arg1[%c43] : memref<98xf32, #tpu.memory_space<smem>>
    %c92 = arith.constant 92 : index
    %600 = memref.load %arg1[%c92] : memref<98xf32, #tpu.memory_space<smem>>
    %601 = vector.broadcast %599 : f32 to vector<1x256xf32>
    %602 = arith.mulf %601, %597 : vector<1x256xf32>
    %603 = vector.broadcast %600 : f32 to vector<1x256xf32>
    %604 = arith.mulf %603, %598 : vector<1x256xf32>
    %605 = arith.addf %602, %604 : vector<1x256xf32>
    %cst_252 = arith.constant 0.000000e+00 : f32
    %606 = vector.broadcast %cst_252 : f32 to vector<1x256xf32>
    %607 = arith.select %34, %605, %606 : vector<1x256xi1>, vector<1x256xf32>
    %608 = arith.addf %560, %607 : vector<1x256xf32>
    %c0_253 = arith.constant 0 : index
    %c98 = arith.constant 98 : index
    %609 = vector.load %arg4[%c0_253, %c98] : memref<2x358xf32, #tpu.memory_space<vmem>>, vector<1x256xf32>
    %c1_254 = arith.constant 1 : index
    %c98_255 = arith.constant 98 : index
    %610 = vector.load %arg4[%c1_254, %c98_255] : memref<2x358xf32, #tpu.memory_space<vmem>>, vector<1x256xf32>
    %c44 = arith.constant 44 : index
    %611 = memref.load %arg1[%c44] : memref<98xf32, #tpu.memory_space<smem>>
    %c93 = arith.constant 93 : index
    %612 = memref.load %arg1[%c93] : memref<98xf32, #tpu.memory_space<smem>>
    %613 = vector.broadcast %611 : f32 to vector<1x256xf32>
    %614 = arith.mulf %613, %609 : vector<1x256xf32>
    %615 = vector.broadcast %612 : f32 to vector<1x256xf32>
    %616 = arith.mulf %615, %610 : vector<1x256xf32>
    %617 = arith.addf %614, %616 : vector<1x256xf32>
    %cst_256 = arith.constant 0.000000e+00 : f32
    %618 = vector.broadcast %cst_256 : f32 to vector<1x256xf32>
    %619 = arith.select %43, %617, %618 : vector<1x256xi1>, vector<1x256xf32>
    %620 = arith.addf %572, %619 : vector<1x256xf32>
    %c0_257 = arith.constant 0 : index
    %c99 = arith.constant 99 : index
    %621 = vector.load %arg4[%c0_257, %c99] : memref<2x358xf32, #tpu.memory_space<vmem>>, vector<1x256xf32>
    %c1_258 = arith.constant 1 : index
    %c99_259 = arith.constant 99 : index
    %622 = vector.load %arg4[%c1_258, %c99_259] : memref<2x358xf32, #tpu.memory_space<vmem>>, vector<1x256xf32>
    %c45 = arith.constant 45 : index
    %623 = memref.load %arg1[%c45] : memref<98xf32, #tpu.memory_space<smem>>
    %c94 = arith.constant 94 : index
    %624 = memref.load %arg1[%c94] : memref<98xf32, #tpu.memory_space<smem>>
    %625 = vector.broadcast %623 : f32 to vector<1x256xf32>
    %626 = arith.mulf %625, %621 : vector<1x256xf32>
    %627 = vector.broadcast %624 : f32 to vector<1x256xf32>
    %628 = arith.mulf %627, %622 : vector<1x256xf32>
    %629 = arith.addf %626, %628 : vector<1x256xf32>
    %630 = arith.addf %584, %629 : vector<1x256xf32>
    %c0_260 = arith.constant 0 : index
    %c100 = arith.constant 100 : index
    %631 = vector.load %arg4[%c0_260, %c100] : memref<2x358xf32, #tpu.memory_space<vmem>>, vector<1x256xf32>
    %c1_261 = arith.constant 1 : index
    %c100_262 = arith.constant 100 : index
    %632 = vector.load %arg4[%c1_261, %c100_262] : memref<2x358xf32, #tpu.memory_space<vmem>>, vector<1x256xf32>
    %c46 = arith.constant 46 : index
    %633 = memref.load %arg1[%c46] : memref<98xf32, #tpu.memory_space<smem>>
    %c95 = arith.constant 95 : index
    %634 = memref.load %arg1[%c95] : memref<98xf32, #tpu.memory_space<smem>>
    %635 = vector.broadcast %633 : f32 to vector<1x256xf32>
    %636 = arith.mulf %635, %631 : vector<1x256xf32>
    %637 = vector.broadcast %634 : f32 to vector<1x256xf32>
    %638 = arith.mulf %637, %632 : vector<1x256xf32>
    %639 = arith.addf %636, %638 : vector<1x256xf32>
    %cst_263 = arith.constant 0.000000e+00 : f32
    %640 = vector.broadcast %cst_263 : f32 to vector<1x256xf32>
    %641 = arith.select %52, %639, %640 : vector<1x256xi1>, vector<1x256xf32>
    %642 = arith.addf %596, %641 : vector<1x256xf32>
    %c0_264 = arith.constant 0 : index
    %c101 = arith.constant 101 : index
    %643 = vector.load %arg4[%c0_264, %c101] : memref<2x358xf32, #tpu.memory_space<vmem>>, vector<1x256xf32>
    %c1_265 = arith.constant 1 : index
    %c101_266 = arith.constant 101 : index
    %644 = vector.load %arg4[%c1_265, %c101_266] : memref<2x358xf32, #tpu.memory_space<vmem>>, vector<1x256xf32>
    %c47 = arith.constant 47 : index
    %645 = memref.load %arg1[%c47] : memref<98xf32, #tpu.memory_space<smem>>
    %c96_267 = arith.constant 96 : index
    %646 = memref.load %arg1[%c96_267] : memref<98xf32, #tpu.memory_space<smem>>
    %647 = vector.broadcast %645 : f32 to vector<1x256xf32>
    %648 = arith.mulf %647, %643 : vector<1x256xf32>
    %649 = vector.broadcast %646 : f32 to vector<1x256xf32>
    %650 = arith.mulf %649, %644 : vector<1x256xf32>
    %651 = arith.addf %648, %650 : vector<1x256xf32>
    %cst_268 = arith.constant 0.000000e+00 : f32
    %652 = vector.broadcast %cst_268 : f32 to vector<1x256xf32>
    %653 = arith.select %61, %651, %652 : vector<1x256xi1>, vector<1x256xf32>
    %654 = arith.addf %608, %653 : vector<1x256xf32>
    %c0_269 = arith.constant 0 : index
    %c102 = arith.constant 102 : index
    %655 = vector.load %arg4[%c0_269, %c102] : memref<2x358xf32, #tpu.memory_space<vmem>>, vector<1x256xf32>
    %c1_270 = arith.constant 1 : index
    %c102_271 = arith.constant 102 : index
    %656 = vector.load %arg4[%c1_270, %c102_271] : memref<2x358xf32, #tpu.memory_space<vmem>>, vector<1x256xf32>
    %c48_272 = arith.constant 48 : index
    %657 = memref.load %arg1[%c48_272] : memref<98xf32, #tpu.memory_space<smem>>
    %c97_273 = arith.constant 97 : index
    %658 = memref.load %arg1[%c97_273] : memref<98xf32, #tpu.memory_space<smem>>
    %659 = vector.broadcast %657 : f32 to vector<1x256xf32>
    %660 = arith.mulf %659, %655 : vector<1x256xf32>
    %661 = vector.broadcast %658 : f32 to vector<1x256xf32>
    %662 = arith.mulf %661, %656 : vector<1x256xf32>
    %663 = arith.addf %660, %662 : vector<1x256xf32>
    %cst_274 = arith.constant 0.000000e+00 : f32
    %664 = vector.broadcast %cst_274 : f32 to vector<1x256xf32>
    %665 = arith.select %70, %663, %664 : vector<1x256xi1>, vector<1x256xf32>
    %666 = arith.addf %620, %665 : vector<1x256xf32>
    %667 = arith.addf %666, %630 : vector<1x256xf32>
    %668 = arith.addf %642, %654 : vector<1x256xf32>
    %669 = arith.addf %667, %668 : vector<1x256xf32>
    %670 = arith.negf %669 : vector<1x256xf32>
    %671 = math.exp %670 : vector<1x256xf32>
    %cst_275 = arith.constant 1.000000e+00 : f32
    %672 = vector.broadcast %cst_275 : f32 to vector<1x256xf32>
    %673 = arith.addf %672, %671 : vector<1x256xf32>
    %674 = arith.divf %672, %673 : vector<1x256xf32>
    %c0_276 = arith.constant 0 : index
    %c0_277 = arith.constant 0 : index
    %c0_278 = arith.constant 0 : index
    %675 = vector.load %arg2[%c0_276, %c0_277, %c0_278] : memref<2x4x256xf32, #tpu.memory_space<vmem>>, vector<1x4x256xf32>
    %676 = vector.shape_cast %675 : vector<1x4x256xf32> to vector<4x256xf32>
    %677 = vector.broadcast %674 : vector<1x256xf32> to vector<4x256xf32>
    %678 = arith.mulf %676, %677 : vector<4x256xf32>
    %c0_279 = arith.constant 0 : index
    %c0_280 = arith.constant 0 : index
    %c0_281 = arith.constant 0 : index
    %679 = vector.load %arg3[%c0_279, %c0_280, %c0_281] : memref<2x4x256xf32, #tpu.memory_space<vmem>>, vector<1x4x256xf32>
    %680 = vector.shape_cast %679 : vector<1x4x256xf32> to vector<4x256xf32>
    %681 = vector.shape_cast %678 : vector<4x256xf32> to vector<1x4x256xf32>
    tpu.vector_store %arg3[%c0_279, %c0_280, %c0_281], %681 {strides = array<i32>} : memref<2x4x256xf32, #tpu.memory_space<vmem>>, vector<1x4x256xf32>,
    %cst_282 = arith.constant 0.000000e+00 : f32
    %682 = vector.broadcast %cst_282 : f32 to vector<1x256xf32>
    %cst_283 = arith.constant 0xFF800000 : f32
    %683 = vector.broadcast %cst_283 : f32 to vector<1x256xf32>
    %c1_284 = arith.constant 1 : index
    %c0_285 = arith.constant 0 : index
    %c0_286 = arith.constant 0 : index
    %684 = vector.load %arg2[%c1_284, %c0_285, %c0_286] : memref<2x4x256xf32, #tpu.memory_space<vmem>>, vector<1x4x256xf32>
    %685 = vector.shape_cast %684 : vector<1x4x256xf32> to vector<4x256xf32>
    %cst_287 = arith.constant dense<0.000000e+00> : vector<256xf32>
    %686 = vector.multi_reduction <add>, %685, %cst_287 [0] : vector<4x256xf32> to vector<256xf32>
    %687 = vector.shape_cast %686 : vector<256xf32> to vector<1x256xf32>
    %688 = arith.addf %682, %687 : vector<1x256xf32>
    %cst_288 = arith.constant dense<0xFF800000> : vector<256xf32>
    %689 = vector.multi_reduction <maximumf>, %685, %cst_288 [0] : vector<4x256xf32> to vector<256xf32>
    %690 = vector.shape_cast %689 : vector<256xf32> to vector<1x256xf32>
    %691 = arith.maximumf %683, %690 : vector<1x256xf32>
    %cst_289 = arith.constant 2.500000e-01 : f32
    %692 = vector.broadcast %cst_289 : f32 to vector<1x256xf32>
    %693 = arith.mulf %688, %692 : vector<1x256xf32>
    %c0_290 = arith.constant 0 : index
    %c51_291 = arith.constant 51 : index
    %694 = vector.load %arg4[%c0_290, %c51_291] : memref<2x358xf32, #tpu.memory_space<vmem>>, vector<1x256xf32>
    tpu.vector_store %arg4[%c0_290, %c51_291], %693 {strides = array<i32>} : memref<2x358xf32, #tpu.memory_space<vmem>>, vector<1x256xf32>,
    %c1_292 = arith.constant 1 : index
    %c51_293 = arith.constant 51 : index
    %695 = vector.load %arg4[%c1_292, %c51_293] : memref<2x358xf32, #tpu.memory_space<vmem>>, vector<1x256xf32>
    tpu.vector_store %arg4[%c1_292, %c51_293], %691 {strides = array<i32>} : memref<2x358xf32, #tpu.memory_space<vmem>>, vector<1x256xf32>,
    %cst_294 = arith.constant 0.000000e+00 : f32
    %696 = vector.broadcast %cst_294 : f32 to vector<1x256xf32>
    %cst_295 = arith.constant 0.000000e+00 : f32
    %697 = vector.broadcast %cst_295 : f32 to vector<1x256xf32>
    %cst_296 = arith.constant 0.000000e+00 : f32
    %698 = vector.broadcast %cst_296 : f32 to vector<1x256xf32>
    %cst_297 = arith.constant 0.000000e+00 : f32
    %699 = vector.broadcast %cst_297 : f32 to vector<1x256xf32>
    %c0_298 = arith.constant 0 : index
    %c0_299 = arith.constant 0 : index
    %700 = vector.load %arg4[%c0_298, %c0_299] : memref<2x358xf32, #tpu.memory_space<vmem>>, vector<1x256xf32>
    %c1_300 = arith.constant 1 : index
    %c0_301 = arith.constant 0 : index
    %701 = vector.load %arg4[%c1_300, %c0_301] : memref<2x358xf32, #tpu.memory_space<vmem>>, vector<1x256xf32>
    %c0_302 = arith.constant 0 : index
    %702 = memref.load %arg1[%c0_302] : memref<98xf32, #tpu.memory_space<smem>>
    %c49_303 = arith.constant 49 : index
    %703 = memref.load %arg1[%c49_303] : memref<98xf32, #tpu.memory_space<smem>>
    %704 = vector.broadcast %702 : f32 to vector<1x256xf32>
    %705 = arith.mulf %704, %700 : vector<1x256xf32>
    %706 = vector.broadcast %703 : f32 to vector<1x256xf32>
    %707 = arith.mulf %706, %701 : vector<1x256xf32>
    %708 = arith.addf %705, %707 : vector<1x256xf32>
    %cst_304 = arith.constant 0.000000e+00 : f32
    %709 = vector.broadcast %cst_304 : f32 to vector<1x256xf32>
    %710 = arith.select %25, %708, %709 : vector<1x256xi1>, vector<1x256xf32>
    %711 = arith.addf %696, %710 : vector<1x256xf32>
    %c0_305 = arith.constant 0 : index
    %c1_306 = arith.constant 1 : index
    %712 = vector.load %arg4[%c0_305, %c1_306] : memref<2x358xf32, #tpu.memory_space<vmem>>, vector<1x256xf32>
    %c1_307 = arith.constant 1 : index
    %c1_308 = arith.constant 1 : index
    %713 = vector.load %arg4[%c1_307, %c1_308] : memref<2x358xf32, #tpu.memory_space<vmem>>, vector<1x256xf32>
    %c1_309 = arith.constant 1 : index
    %714 = memref.load %arg1[%c1_309] : memref<98xf32, #tpu.memory_space<smem>>
    %c50_310 = arith.constant 50 : index
    %715 = memref.load %arg1[%c50_310] : memref<98xf32, #tpu.memory_space<smem>>
    %716 = vector.broadcast %714 : f32 to vector<1x256xf32>
    %717 = arith.mulf %716, %712 : vector<1x256xf32>
    %718 = vector.broadcast %715 : f32 to vector<1x256xf32>
    %719 = arith.mulf %718, %713 : vector<1x256xf32>
    %720 = arith.addf %717, %719 : vector<1x256xf32>
    %cst_311 = arith.constant 0.000000e+00 : f32
    %721 = vector.broadcast %cst_311 : f32 to vector<1x256xf32>
    %722 = arith.select %34, %720, %721 : vector<1x256xi1>, vector<1x256xf32>
    %723 = arith.addf %697, %722 : vector<1x256xf32>
    %c0_312 = arith.constant 0 : index
    %c2_313 = arith.constant 2 : index
    %724 = vector.load %arg4[%c0_312, %c2_313] : memref<2x358xf32, #tpu.memory_space<vmem>>, vector<1x256xf32>
    %c1_314 = arith.constant 1 : index
    %c2_315 = arith.constant 2 : index
    %725 = vector.load %arg4[%c1_314, %c2_315] : memref<2x358xf32, #tpu.memory_space<vmem>>, vector<1x256xf32>
    %c2_316 = arith.constant 2 : index
    %726 = memref.load %arg1[%c2_316] : memref<98xf32, #tpu.memory_space<smem>>
    %c51_317 = arith.constant 51 : index
    %727 = memref.load %arg1[%c51_317] : memref<98xf32, #tpu.memory_space<smem>>
    %728 = vector.broadcast %726 : f32 to vector<1x256xf32>
    %729 = arith.mulf %728, %724 : vector<1x256xf32>
    %730 = vector.broadcast %727 : f32 to vector<1x256xf32>
    %731 = arith.mulf %730, %725 : vector<1x256xf32>
    %732 = arith.addf %729, %731 : vector<1x256xf32>
    %cst_318 = arith.constant 0.000000e+00 : f32
    %733 = vector.broadcast %cst_318 : f32 to vector<1x256xf32>
    %734 = arith.select %43, %732, %733 : vector<1x256xi1>, vector<1x256xf32>
    %735 = arith.addf %698, %734 : vector<1x256xf32>
    %c0_319 = arith.constant 0 : index
    %c3_320 = arith.constant 3 : index
    %736 = vector.load %arg4[%c0_319, %c3_320] : memref<2x358xf32, #tpu.memory_space<vmem>>, vector<1x256xf32>
    %c1_321 = arith.constant 1 : index
    %c3_322 = arith.constant 3 : index
    %737 = vector.load %arg4[%c1_321, %c3_322] : memref<2x358xf32, #tpu.memory_space<vmem>>, vector<1x256xf32>
    %c3_323 = arith.constant 3 : index
    %738 = memref.load %arg1[%c3_323] : memref<98xf32, #tpu.memory_space<smem>>
    %c52_324 = arith.constant 52 : index
    %739 = memref.load %arg1[%c52_324] : memref<98xf32, #tpu.memory_space<smem>>
    %740 = vector.broadcast %738 : f32 to vector<1x256xf32>
    %741 = arith.mulf %740, %736 : vector<1x256xf32>
    %742 = vector.broadcast %739 : f32 to vector<1x256xf32>
    %743 = arith.mulf %742, %737 : vector<1x256xf32>
    %744 = arith.addf %741, %743 : vector<1x256xf32>
    %745 = arith.addf %699, %744 : vector<1x256xf32>
    %c0_325 = arith.constant 0 : index
    %c4_326 = arith.constant 4 : index
    %746 = vector.load %arg4[%c0_325, %c4_326] : memref<2x358xf32, #tpu.memory_space<vmem>>, vector<1x256xf32>
    %c1_327 = arith.constant 1 : index
    %c4_328 = arith.constant 4 : index
    %747 = vector.load %arg4[%c1_327, %c4_328] : memref<2x358xf32, #tpu.memory_space<vmem>>, vector<1x256xf32>
    %c4_329 = arith.constant 4 : index
    %748 = memref.load %arg1[%c4_329] : memref<98xf32, #tpu.memory_space<smem>>
    %c53_330 = arith.constant 53 : index
    %749 = memref.load %arg1[%c53_330] : memref<98xf32, #tpu.memory_space<smem>>
    %750 = vector.broadcast %748 : f32 to vector<1x256xf32>
    %751 = arith.mulf %750, %746 : vector<1x256xf32>
    %752 = vector.broadcast %749 : f32 to vector<1x256xf32>
    %753 = arith.mulf %752, %747 : vector<1x256xf32>
    %754 = arith.addf %751, %753 : vector<1x256xf32>
    %cst_331 = arith.constant 0.000000e+00 : f32
    %755 = vector.broadcast %cst_331 : f32 to vector<1x256xf32>
    %756 = arith.select %52, %754, %755 : vector<1x256xi1>, vector<1x256xf32>
    %757 = arith.addf %711, %756 : vector<1x256xf32>
    %c0_332 = arith.constant 0 : index
    %c5_333 = arith.constant 5 : index
    %758 = vector.load %arg4[%c0_332, %c5_333] : memref<2x358xf32, #tpu.memory_space<vmem>>, vector<1x256xf32>
    %c1_334 = arith.constant 1 : index
    %c5_335 = arith.constant 5 : index
    %759 = vector.load %arg4[%c1_334, %c5_335] : memref<2x358xf32, #tpu.memory_space<vmem>>, vector<1x256xf32>
    %c5_336 = arith.constant 5 : index
    %760 = memref.load %arg1[%c5_336] : memref<98xf32, #tpu.memory_space<smem>>
    %c54_337 = arith.constant 54 : index
    %761 = memref.load %arg1[%c54_337] : memref<98xf32, #tpu.memory_space<smem>>
    %762 = vector.broadcast %760 : f32 to vector<1x256xf32>
    %763 = arith.mulf %762, %758 : vector<1x256xf32>
    %764 = vector.broadcast %761 : f32 to vector<1x256xf32>
    %765 = arith.mulf %764, %759 : vector<1x256xf32>
    %766 = arith.addf %763, %765 : vector<1x256xf32>
    %cst_338 = arith.constant 0.000000e+00 : f32
    %767 = vector.broadcast %cst_338 : f32 to vector<1x256xf32>
    %768 = arith.select %61, %766, %767 : vector<1x256xi1>, vector<1x256xf32>
    %769 = arith.addf %723, %768 : vector<1x256xf32>
    %c0_339 = arith.constant 0 : index
    %c6_340 = arith.constant 6 : index
    %770 = vector.load %arg4[%c0_339, %c6_340] : memref<2x358xf32, #tpu.memory_space<vmem>>, vector<1x256xf32>
    %c1_341 = arith.constant 1 : index
    %c6_342 = arith.constant 6 : index
    %771 = vector.load %arg4[%c1_341, %c6_342] : memref<2x358xf32, #tpu.memory_space<vmem>>, vector<1x256xf32>
    %c6_343 = arith.constant 6 : index
    %772 = memref.load %arg1[%c6_343] : memref<98xf32, #tpu.memory_space<smem>>
    %c55_344 = arith.constant 55 : index
    %773 = memref.load %arg1[%c55_344] : memref<98xf32, #tpu.memory_space<smem>>
    %774 = vector.broadcast %772 : f32 to vector<1x256xf32>
    %775 = arith.mulf %774, %770 : vector<1x256xf32>
    %776 = vector.broadcast %773 : f32 to vector<1x256xf32>
    %777 = arith.mulf %776, %771 : vector<1x256xf32>
    %778 = arith.addf %775, %777 : vector<1x256xf32>
    %cst_345 = arith.constant 0.000000e+00 : f32
    %779 = vector.broadcast %cst_345 : f32 to vector<1x256xf32>
    %780 = arith.select %70, %778, %779 : vector<1x256xi1>, vector<1x256xf32>
    %781 = arith.addf %735, %780 : vector<1x256xf32>
    %c0_346 = arith.constant 0 : index
    %c16_347 = arith.constant 16 : index
    %782 = vector.load %arg4[%c0_346, %c16_347] : memref<2x358xf32, #tpu.memory_space<vmem>>, vector<1x256xf32>
    %c1_348 = arith.constant 1 : index
    %c16_349 = arith.constant 16 : index
    %783 = vector.load %arg4[%c1_348, %c16_349] : memref<2x358xf32, #tpu.memory_space<vmem>>, vector<1x256xf32>
    %c7_350 = arith.constant 7 : index
    %784 = memref.load %arg1[%c7_350] : memref<98xf32, #tpu.memory_space<smem>>
    %c56_351 = arith.constant 56 : index
    %785 = memref.load %arg1[%c56_351] : memref<98xf32, #tpu.memory_space<smem>>
    %786 = vector.broadcast %784 : f32 to vector<1x256xf32>
    %787 = arith.mulf %786, %782 : vector<1x256xf32>
    %788 = vector.broadcast %785 : f32 to vector<1x256xf32>
    %789 = arith.mulf %788, %783 : vector<1x256xf32>
    %790 = arith.addf %787, %789 : vector<1x256xf32>
    %cst_352 = arith.constant 0.000000e+00 : f32
    %791 = vector.broadcast %cst_352 : f32 to vector<1x256xf32>
    %792 = arith.select %25, %790, %791 : vector<1x256xi1>, vector<1x256xf32>
    %793 = arith.addf %745, %792 : vector<1x256xf32>
    %c0_353 = arith.constant 0 : index
    %c17_354 = arith.constant 17 : index
    %794 = vector.load %arg4[%c0_353, %c17_354] : memref<2x358xf32, #tpu.memory_space<vmem>>, vector<1x256xf32>
    %c1_355 = arith.constant 1 : index
    %c17_356 = arith.constant 17 : index
    %795 = vector.load %arg4[%c1_355, %c17_356] : memref<2x358xf32, #tpu.memory_space<vmem>>, vector<1x256xf32>
    %c8_357 = arith.constant 8 : index
    %796 = memref.load %arg1[%c8_357] : memref<98xf32, #tpu.memory_space<smem>>
    %c57_358 = arith.constant 57 : index
    %797 = memref.load %arg1[%c57_358] : memref<98xf32, #tpu.memory_space<smem>>
    %798 = vector.broadcast %796 : f32 to vector<1x256xf32>
    %799 = arith.mulf %798, %794 : vector<1x256xf32>
    %800 = vector.broadcast %797 : f32 to vector<1x256xf32>
    %801 = arith.mulf %800, %795 : vector<1x256xf32>
    %802 = arith.addf %799, %801 : vector<1x256xf32>
    %cst_359 = arith.constant 0.000000e+00 : f32
    %803 = vector.broadcast %cst_359 : f32 to vector<1x256xf32>
    %804 = arith.select %34, %802, %803 : vector<1x256xi1>, vector<1x256xf32>
    %805 = arith.addf %757, %804 : vector<1x256xf32>
    %c0_360 = arith.constant 0 : index
    %c18_361 = arith.constant 18 : index
    %806 = vector.load %arg4[%c0_360, %c18_361] : memref<2x358xf32, #tpu.memory_space<vmem>>, vector<1x256xf32>
    %c1_362 = arith.constant 1 : index
    %c18_363 = arith.constant 18 : index
    %807 = vector.load %arg4[%c1_362, %c18_363] : memref<2x358xf32, #tpu.memory_space<vmem>>, vector<1x256xf32>
    %c9_364 = arith.constant 9 : index
    %808 = memref.load %arg1[%c9_364] : memref<98xf32, #tpu.memory_space<smem>>
    %c58_365 = arith.constant 58 : index
    %809 = memref.load %arg1[%c58_365] : memref<98xf32, #tpu.memory_space<smem>>
    %810 = vector.broadcast %808 : f32 to vector<1x256xf32>
    %811 = arith.mulf %810, %806 : vector<1x256xf32>
    %812 = vector.broadcast %809 : f32 to vector<1x256xf32>
    %813 = arith.mulf %812, %807 : vector<1x256xf32>
    %814 = arith.addf %811, %813 : vector<1x256xf32>
    %cst_366 = arith.constant 0.000000e+00 : f32
    %815 = vector.broadcast %cst_366 : f32 to vector<1x256xf32>
    %816 = arith.select %43, %814, %815 : vector<1x256xi1>, vector<1x256xf32>
    %817 = arith.addf %769, %816 : vector<1x256xf32>
    %c0_367 = arith.constant 0 : index
    %c19_368 = arith.constant 19 : index
    %818 = vector.load %arg4[%c0_367, %c19_368] : memref<2x358xf32, #tpu.memory_space<vmem>>, vector<1x256xf32>
    %c1_369 = arith.constant 1 : index
    %c19_370 = arith.constant 19 : index
    %819 = vector.load %arg4[%c1_369, %c19_370] : memref<2x358xf32, #tpu.memory_space<vmem>>, vector<1x256xf32>
    %c10_371 = arith.constant 10 : index
    %820 = memref.load %arg1[%c10_371] : memref<98xf32, #tpu.memory_space<smem>>
    %c59_372 = arith.constant 59 : index
    %821 = memref.load %arg1[%c59_372] : memref<98xf32, #tpu.memory_space<smem>>
    %822 = vector.broadcast %820 : f32 to vector<1x256xf32>
    %823 = arith.mulf %822, %818 : vector<1x256xf32>
    %824 = vector.broadcast %821 : f32 to vector<1x256xf32>
    %825 = arith.mulf %824, %819 : vector<1x256xf32>
    %826 = arith.addf %823, %825 : vector<1x256xf32>
    %827 = arith.addf %781, %826 : vector<1x256xf32>
    %c0_373 = arith.constant 0 : index
    %c20_374 = arith.constant 20 : index
    %828 = vector.load %arg4[%c0_373, %c20_374] : memref<2x358xf32, #tpu.memory_space<vmem>>, vector<1x256xf32>
    %c1_375 = arith.constant 1 : index
    %c20_376 = arith.constant 20 : index
    %829 = vector.load %arg4[%c1_375, %c20_376] : memref<2x358xf32, #tpu.memory_space<vmem>>, vector<1x256xf32>
    %c11_377 = arith.constant 11 : index
    %830 = memref.load %arg1[%c11_377] : memref<98xf32, #tpu.memory_space<smem>>
    %c60_378 = arith.constant 60 : index
    %831 = memref.load %arg1[%c60_378] : memref<98xf32, #tpu.memory_space<smem>>
    %832 = vector.broadcast %830 : f32 to vector<1x256xf32>
    %833 = arith.mulf %832, %828 : vector<1x256xf32>
    %834 = vector.broadcast %831 : f32 to vector<1x256xf32>
    %835 = arith.mulf %834, %829 : vector<1x256xf32>
    %836 = arith.addf %833, %835 : vector<1x256xf32>
    %cst_379 = arith.constant 0.000000e+00 : f32
    %837 = vector.broadcast %cst_379 : f32 to vector<1x256xf32>
    %838 = arith.select %52, %836, %837 : vector<1x256xi1>, vector<1x256xf32>
    %839 = arith.addf %793, %838 : vector<1x256xf32>
    %c0_380 = arith.constant 0 : index
    %c21_381 = arith.constant 21 : index
    %840 = vector.load %arg4[%c0_380, %c21_381] : memref<2x358xf32, #tpu.memory_space<vmem>>, vector<1x256xf32>
    %c1_382 = arith.constant 1 : index
    %c21_383 = arith.constant 21 : index
    %841 = vector.load %arg4[%c1_382, %c21_383] : memref<2x358xf32, #tpu.memory_space<vmem>>, vector<1x256xf32>
    %c12_384 = arith.constant 12 : index
    %842 = memref.load %arg1[%c12_384] : memref<98xf32, #tpu.memory_space<smem>>
    %c61_385 = arith.constant 61 : index
    %843 = memref.load %arg1[%c61_385] : memref<98xf32, #tpu.memory_space<smem>>
    %844 = vector.broadcast %842 : f32 to vector<1x256xf32>
    %845 = arith.mulf %844, %840 : vector<1x256xf32>
    %846 = vector.broadcast %843 : f32 to vector<1x256xf32>
    %847 = arith.mulf %846, %841 : vector<1x256xf32>
    %848 = arith.addf %845, %847 : vector<1x256xf32>
    %cst_386 = arith.constant 0.000000e+00 : f32
    %849 = vector.broadcast %cst_386 : f32 to vector<1x256xf32>
    %850 = arith.select %61, %848, %849 : vector<1x256xi1>, vector<1x256xf32>
    %851 = arith.addf %805, %850 : vector<1x256xf32>
    %c0_387 = arith.constant 0 : index
    %c22_388 = arith.constant 22 : index
    %852 = vector.load %arg4[%c0_387, %c22_388] : memref<2x358xf32, #tpu.memory_space<vmem>>, vector<1x256xf32>
    %c1_389 = arith.constant 1 : index
    %c22_390 = arith.constant 22 : index
    %853 = vector.load %arg4[%c1_389, %c22_390] : memref<2x358xf32, #tpu.memory_space<vmem>>, vector<1x256xf32>
    %c13_391 = arith.constant 13 : index
    %854 = memref.load %arg1[%c13_391] : memref<98xf32, #tpu.memory_space<smem>>
    %c62_392 = arith.constant 62 : index
    %855 = memref.load %arg1[%c62_392] : memref<98xf32, #tpu.memory_space<smem>>
    %856 = vector.broadcast %854 : f32 to vector<1x256xf32>
    %857 = arith.mulf %856, %852 : vector<1x256xf32>
    %858 = vector.broadcast %855 : f32 to vector<1x256xf32>
    %859 = arith.mulf %858, %853 : vector<1x256xf32>
    %860 = arith.addf %857, %859 : vector<1x256xf32>
    %cst_393 = arith.constant 0.000000e+00 : f32
    %861 = vector.broadcast %cst_393 : f32 to vector<1x256xf32>
    %862 = arith.select %70, %860, %861 : vector<1x256xi1>, vector<1x256xf32>
    %863 = arith.addf %817, %862 : vector<1x256xf32>
    %c0_394 = arith.constant 0 : index
    %c32_395 = arith.constant 32 : index
    %864 = vector.load %arg4[%c0_394, %c32_395] : memref<2x358xf32, #tpu.memory_space<vmem>>, vector<1x256xf32>
    %c1_396 = arith.constant 1 : index
    %c32_397 = arith.constant 32 : index
    %865 = vector.load %arg4[%c1_396, %c32_397] : memref<2x358xf32, #tpu.memory_space<vmem>>, vector<1x256xf32>
    %c14_398 = arith.constant 14 : index
    %866 = memref.load %arg1[%c14_398] : memref<98xf32, #tpu.memory_space<smem>>
    %c63_399 = arith.constant 63 : index
    %867 = memref.load %arg1[%c63_399] : memref<98xf32, #tpu.memory_space<smem>>
    %868 = vector.broadcast %866 : f32 to vector<1x256xf32>
    %869 = arith.mulf %868, %864 : vector<1x256xf32>
    %870 = vector.broadcast %867 : f32 to vector<1x256xf32>
    %871 = arith.mulf %870, %865 : vector<1x256xf32>
    %872 = arith.addf %869, %871 : vector<1x256xf32>
    %cst_400 = arith.constant 0.000000e+00 : f32
    %873 = vector.broadcast %cst_400 : f32 to vector<1x256xf32>
    %874 = arith.select %25, %872, %873 : vector<1x256xi1>, vector<1x256xf32>
    %875 = arith.addf %827, %874 : vector<1x256xf32>
    %c0_401 = arith.constant 0 : index
    %c33_402 = arith.constant 33 : index
    %876 = vector.load %arg4[%c0_401, %c33_402] : memref<2x358xf32, #tpu.memory_space<vmem>>, vector<1x256xf32>
    %c1_403 = arith.constant 1 : index
    %c33_404 = arith.constant 33 : index
    %877 = vector.load %arg4[%c1_403, %c33_404] : memref<2x358xf32, #tpu.memory_space<vmem>>, vector<1x256xf32>
    %c15_405 = arith.constant 15 : index
    %878 = memref.load %arg1[%c15_405] : memref<98xf32, #tpu.memory_space<smem>>
    %c64_406 = arith.constant 64 : index
    %879 = memref.load %arg1[%c64_406] : memref<98xf32, #tpu.memory_space<smem>>
    %880 = vector.broadcast %878 : f32 to vector<1x256xf32>
    %881 = arith.mulf %880, %876 : vector<1x256xf32>
    %882 = vector.broadcast %879 : f32 to vector<1x256xf32>
    %883 = arith.mulf %882, %877 : vector<1x256xf32>
    %884 = arith.addf %881, %883 : vector<1x256xf32>
    %cst_407 = arith.constant 0.000000e+00 : f32
    %885 = vector.broadcast %cst_407 : f32 to vector<1x256xf32>
    %886 = arith.select %34, %884, %885 : vector<1x256xi1>, vector<1x256xf32>
    %887 = arith.addf %839, %886 : vector<1x256xf32>
    %c0_408 = arith.constant 0 : index
    %c34_409 = arith.constant 34 : index
    %888 = vector.load %arg4[%c0_408, %c34_409] : memref<2x358xf32, #tpu.memory_space<vmem>>, vector<1x256xf32>
    %c1_410 = arith.constant 1 : index
    %c34_411 = arith.constant 34 : index
    %889 = vector.load %arg4[%c1_410, %c34_411] : memref<2x358xf32, #tpu.memory_space<vmem>>, vector<1x256xf32>
    %c16_412 = arith.constant 16 : index
    %890 = memref.load %arg1[%c16_412] : memref<98xf32, #tpu.memory_space<smem>>
    %c65_413 = arith.constant 65 : index
    %891 = memref.load %arg1[%c65_413] : memref<98xf32, #tpu.memory_space<smem>>
    %892 = vector.broadcast %890 : f32 to vector<1x256xf32>
    %893 = arith.mulf %892, %888 : vector<1x256xf32>
    %894 = vector.broadcast %891 : f32 to vector<1x256xf32>
    %895 = arith.mulf %894, %889 : vector<1x256xf32>
    %896 = arith.addf %893, %895 : vector<1x256xf32>
    %cst_414 = arith.constant 0.000000e+00 : f32
    %897 = vector.broadcast %cst_414 : f32 to vector<1x256xf32>
    %898 = arith.select %43, %896, %897 : vector<1x256xi1>, vector<1x256xf32>
    %899 = arith.addf %851, %898 : vector<1x256xf32>
    %c0_415 = arith.constant 0 : index
    %c35_416 = arith.constant 35 : index
    %900 = vector.load %arg4[%c0_415, %c35_416] : memref<2x358xf32, #tpu.memory_space<vmem>>, vector<1x256xf32>
    %c1_417 = arith.constant 1 : index
    %c35_418 = arith.constant 35 : index
    %901 = vector.load %arg4[%c1_417, %c35_418] : memref<2x358xf32, #tpu.memory_space<vmem>>, vector<1x256xf32>
    %c17_419 = arith.constant 17 : index
    %902 = memref.load %arg1[%c17_419] : memref<98xf32, #tpu.memory_space<smem>>
    %c66_420 = arith.constant 66 : index
    %903 = memref.load %arg1[%c66_420] : memref<98xf32, #tpu.memory_space<smem>>
    %904 = vector.broadcast %902 : f32 to vector<1x256xf32>
    %905 = arith.mulf %904, %900 : vector<1x256xf32>
    %906 = vector.broadcast %903 : f32 to vector<1x256xf32>
    %907 = arith.mulf %906, %901 : vector<1x256xf32>
    %908 = arith.addf %905, %907 : vector<1x256xf32>
    %909 = arith.addf %863, %908 : vector<1x256xf32>
    %c0_421 = arith.constant 0 : index
    %c36_422 = arith.constant 36 : index
    %910 = vector.load %arg4[%c0_421, %c36_422] : memref<2x358xf32, #tpu.memory_space<vmem>>, vector<1x256xf32>
    %c1_423 = arith.constant 1 : index
    %c36_424 = arith.constant 36 : index
    %911 = vector.load %arg4[%c1_423, %c36_424] : memref<2x358xf32, #tpu.memory_space<vmem>>, vector<1x256xf32>
    %c18_425 = arith.constant 18 : index
    %912 = memref.load %arg1[%c18_425] : memref<98xf32, #tpu.memory_space<smem>>
    %c67_426 = arith.constant 67 : index
    %913 = memref.load %arg1[%c67_426] : memref<98xf32, #tpu.memory_space<smem>>
    %914 = vector.broadcast %912 : f32 to vector<1x256xf32>
    %915 = arith.mulf %914, %910 : vector<1x256xf32>
    %916 = vector.broadcast %913 : f32 to vector<1x256xf32>
    %917 = arith.mulf %916, %911 : vector<1x256xf32>
    %918 = arith.addf %915, %917 : vector<1x256xf32>
    %cst_427 = arith.constant 0.000000e+00 : f32
    %919 = vector.broadcast %cst_427 : f32 to vector<1x256xf32>
    %920 = arith.select %52, %918, %919 : vector<1x256xi1>, vector<1x256xf32>
    %921 = arith.addf %875, %920 : vector<1x256xf32>
    %c0_428 = arith.constant 0 : index
    %c37_429 = arith.constant 37 : index
    %922 = vector.load %arg4[%c0_428, %c37_429] : memref<2x358xf32, #tpu.memory_space<vmem>>, vector<1x256xf32>
    %c1_430 = arith.constant 1 : index
    %c37_431 = arith.constant 37 : index
    %923 = vector.load %arg4[%c1_430, %c37_431] : memref<2x358xf32, #tpu.memory_space<vmem>>, vector<1x256xf32>
    %c19_432 = arith.constant 19 : index
    %924 = memref.load %arg1[%c19_432] : memref<98xf32, #tpu.memory_space<smem>>
    %c68_433 = arith.constant 68 : index
    %925 = memref.load %arg1[%c68_433] : memref<98xf32, #tpu.memory_space<smem>>
    %926 = vector.broadcast %924 : f32 to vector<1x256xf32>
    %927 = arith.mulf %926, %922 : vector<1x256xf32>
    %928 = vector.broadcast %925 : f32 to vector<1x256xf32>
    %929 = arith.mulf %928, %923 : vector<1x256xf32>
    %930 = arith.addf %927, %929 : vector<1x256xf32>
    %cst_434 = arith.constant 0.000000e+00 : f32
    %931 = vector.broadcast %cst_434 : f32 to vector<1x256xf32>
    %932 = arith.select %61, %930, %931 : vector<1x256xi1>, vector<1x256xf32>
    %933 = arith.addf %887, %932 : vector<1x256xf32>
    %c0_435 = arith.constant 0 : index
    %c38_436 = arith.constant 38 : index
    %934 = vector.load %arg4[%c0_435, %c38_436] : memref<2x358xf32, #tpu.memory_space<vmem>>, vector<1x256xf32>
    %c1_437 = arith.constant 1 : index
    %c38_438 = arith.constant 38 : index
    %935 = vector.load %arg4[%c1_437, %c38_438] : memref<2x358xf32, #tpu.memory_space<vmem>>, vector<1x256xf32>
    %c20_439 = arith.constant 20 : index
    %936 = memref.load %arg1[%c20_439] : memref<98xf32, #tpu.memory_space<smem>>
    %c69_440 = arith.constant 69 : index
    %937 = memref.load %arg1[%c69_440] : memref<98xf32, #tpu.memory_space<smem>>
    %938 = vector.broadcast %936 : f32 to vector<1x256xf32>
    %939 = arith.mulf %938, %934 : vector<1x256xf32>
    %940 = vector.broadcast %937 : f32 to vector<1x256xf32>
    %941 = arith.mulf %940, %935 : vector<1x256xf32>
    %942 = arith.addf %939, %941 : vector<1x256xf32>
    %cst_441 = arith.constant 0.000000e+00 : f32
    %943 = vector.broadcast %cst_441 : f32 to vector<1x256xf32>
    %944 = arith.select %70, %942, %943 : vector<1x256xi1>, vector<1x256xf32>
    %945 = arith.addf %899, %944 : vector<1x256xf32>
    %c0_442 = arith.constant 0 : index
    %c48_443 = arith.constant 48 : index
    %946 = vector.load %arg4[%c0_442, %c48_443] : memref<2x358xf32, #tpu.memory_space<vmem>>, vector<1x256xf32>
    %c1_444 = arith.constant 1 : index
    %c48_445 = arith.constant 48 : index
    %947 = vector.load %arg4[%c1_444, %c48_445] : memref<2x358xf32, #tpu.memory_space<vmem>>, vector<1x256xf32>
    %c21_446 = arith.constant 21 : index
    %948 = memref.load %arg1[%c21_446] : memref<98xf32, #tpu.memory_space<smem>>
    %c70_447 = arith.constant 70 : index
    %949 = memref.load %arg1[%c70_447] : memref<98xf32, #tpu.memory_space<smem>>
    %950 = vector.broadcast %948 : f32 to vector<1x256xf32>
    %951 = arith.mulf %950, %946 : vector<1x256xf32>
    %952 = vector.broadcast %949 : f32 to vector<1x256xf32>
    %953 = arith.mulf %952, %947 : vector<1x256xf32>
    %954 = arith.addf %951, %953 : vector<1x256xf32>
    %cst_448 = arith.constant 0.000000e+00 : f32
    %955 = vector.broadcast %cst_448 : f32 to vector<1x256xf32>
    %956 = arith.select %25, %954, %955 : vector<1x256xi1>, vector<1x256xf32>
    %957 = arith.addf %909, %956 : vector<1x256xf32>
    %c0_449 = arith.constant 0 : index
    %c49_450 = arith.constant 49 : index
    %958 = vector.load %arg4[%c0_449, %c49_450] : memref<2x358xf32, #tpu.memory_space<vmem>>, vector<1x256xf32>
    %c1_451 = arith.constant 1 : index
    %c49_452 = arith.constant 49 : index
    %959 = vector.load %arg4[%c1_451, %c49_452] : memref<2x358xf32, #tpu.memory_space<vmem>>, vector<1x256xf32>
    %c22_453 = arith.constant 22 : index
    %960 = memref.load %arg1[%c22_453] : memref<98xf32, #tpu.memory_space<smem>>
    %c71_454 = arith.constant 71 : index
    %961 = memref.load %arg1[%c71_454] : memref<98xf32, #tpu.memory_space<smem>>
    %962 = vector.broadcast %960 : f32 to vector<1x256xf32>
    %963 = arith.mulf %962, %958 : vector<1x256xf32>
    %964 = vector.broadcast %961 : f32 to vector<1x256xf32>
    %965 = arith.mulf %964, %959 : vector<1x256xf32>
    %966 = arith.addf %963, %965 : vector<1x256xf32>
    %cst_455 = arith.constant 0.000000e+00 : f32
    %967 = vector.broadcast %cst_455 : f32 to vector<1x256xf32>
    %968 = arith.select %34, %966, %967 : vector<1x256xi1>, vector<1x256xf32>
    %969 = arith.addf %921, %968 : vector<1x256xf32>
    %c0_456 = arith.constant 0 : index
    %c50_457 = arith.constant 50 : index
    %970 = vector.load %arg4[%c0_456, %c50_457] : memref<2x358xf32, #tpu.memory_space<vmem>>, vector<1x256xf32>
    %c1_458 = arith.constant 1 : index
    %c50_459 = arith.constant 50 : index
    %971 = vector.load %arg4[%c1_458, %c50_459] : memref<2x358xf32, #tpu.memory_space<vmem>>, vector<1x256xf32>
    %c23_460 = arith.constant 23 : index
    %972 = memref.load %arg1[%c23_460] : memref<98xf32, #tpu.memory_space<smem>>
    %c72_461 = arith.constant 72 : index
    %973 = memref.load %arg1[%c72_461] : memref<98xf32, #tpu.memory_space<smem>>
    %974 = vector.broadcast %972 : f32 to vector<1x256xf32>
    %975 = arith.mulf %974, %970 : vector<1x256xf32>
    %976 = vector.broadcast %973 : f32 to vector<1x256xf32>
    %977 = arith.mulf %976, %971 : vector<1x256xf32>
    %978 = arith.addf %975, %977 : vector<1x256xf32>
    %cst_462 = arith.constant 0.000000e+00 : f32
    %979 = vector.broadcast %cst_462 : f32 to vector<1x256xf32>
    %980 = arith.select %43, %978, %979 : vector<1x256xi1>, vector<1x256xf32>
    %981 = arith.addf %933, %980 : vector<1x256xf32>
    %c0_463 = arith.constant 0 : index
    %c51_464 = arith.constant 51 : index
    %982 = vector.load %arg4[%c0_463, %c51_464] : memref<2x358xf32, #tpu.memory_space<vmem>>, vector<1x256xf32>
    %c1_465 = arith.constant 1 : index
    %c51_466 = arith.constant 51 : index
    %983 = vector.load %arg4[%c1_465, %c51_466] : memref<2x358xf32, #tpu.memory_space<vmem>>, vector<1x256xf32>
    %c24_467 = arith.constant 24 : index
    %984 = memref.load %arg1[%c24_467] : memref<98xf32, #tpu.memory_space<smem>>
    %c73_468 = arith.constant 73 : index
    %985 = memref.load %arg1[%c73_468] : memref<98xf32, #tpu.memory_space<smem>>
    %986 = vector.broadcast %984 : f32 to vector<1x256xf32>
    %987 = arith.mulf %986, %982 : vector<1x256xf32>
    %988 = vector.broadcast %985 : f32 to vector<1x256xf32>
    %989 = arith.mulf %988, %983 : vector<1x256xf32>
    %990 = arith.addf %987, %989 : vector<1x256xf32>
    %991 = arith.addf %945, %990 : vector<1x256xf32>
    %c0_469 = arith.constant 0 : index
    %c52_470 = arith.constant 52 : index
    %992 = vector.load %arg4[%c0_469, %c52_470] : memref<2x358xf32, #tpu.memory_space<vmem>>, vector<1x256xf32>
    %c1_471 = arith.constant 1 : index
    %c52_472 = arith.constant 52 : index
    %993 = vector.load %arg4[%c1_471, %c52_472] : memref<2x358xf32, #tpu.memory_space<vmem>>, vector<1x256xf32>
    %c25_473 = arith.constant 25 : index
    %994 = memref.load %arg1[%c25_473] : memref<98xf32, #tpu.memory_space<smem>>
    %c74_474 = arith.constant 74 : index
    %995 = memref.load %arg1[%c74_474] : memref<98xf32, #tpu.memory_space<smem>>
    %996 = vector.broadcast %994 : f32 to vector<1x256xf32>
    %997 = arith.mulf %996, %992 : vector<1x256xf32>
    %998 = vector.broadcast %995 : f32 to vector<1x256xf32>
    %999 = arith.mulf %998, %993 : vector<1x256xf32>
    %1000 = arith.addf %997, %999 : vector<1x256xf32>
    %cst_475 = arith.constant 0.000000e+00 : f32
    %1001 = vector.broadcast %cst_475 : f32 to vector<1x256xf32>
    %1002 = arith.select %52, %1000, %1001 : vector<1x256xi1>, vector<1x256xf32>
    %1003 = arith.addf %957, %1002 : vector<1x256xf32>
    %c0_476 = arith.constant 0 : index
    %c53_477 = arith.constant 53 : index
    %1004 = vector.load %arg4[%c0_476, %c53_477] : memref<2x358xf32, #tpu.memory_space<vmem>>, vector<1x256xf32>
    %c1_478 = arith.constant 1 : index
    %c53_479 = arith.constant 53 : index
    %1005 = vector.load %arg4[%c1_478, %c53_479] : memref<2x358xf32, #tpu.memory_space<vmem>>, vector<1x256xf32>
    %c26_480 = arith.constant 26 : index
    %1006 = memref.load %arg1[%c26_480] : memref<98xf32, #tpu.memory_space<smem>>
    %c75_481 = arith.constant 75 : index
    %1007 = memref.load %arg1[%c75_481] : memref<98xf32, #tpu.memory_space<smem>>
    %1008 = vector.broadcast %1006 : f32 to vector<1x256xf32>
    %1009 = arith.mulf %1008, %1004 : vector<1x256xf32>
    %1010 = vector.broadcast %1007 : f32 to vector<1x256xf32>
    %1011 = arith.mulf %1010, %1005 : vector<1x256xf32>
    %1012 = arith.addf %1009, %1011 : vector<1x256xf32>
    %cst_482 = arith.constant 0.000000e+00 : f32
    %1013 = vector.broadcast %cst_482 : f32 to vector<1x256xf32>
    %1014 = arith.select %61, %1012, %1013 : vector<1x256xi1>, vector<1x256xf32>
    %1015 = arith.addf %969, %1014 : vector<1x256xf32>
    %c0_483 = arith.constant 0 : index
    %c54_484 = arith.constant 54 : index
    %1016 = vector.load %arg4[%c0_483, %c54_484] : memref<2x358xf32, #tpu.memory_space<vmem>>, vector<1x256xf32>
    %c1_485 = arith.constant 1 : index
    %c54_486 = arith.constant 54 : index
    %1017 = vector.load %arg4[%c1_485, %c54_486] : memref<2x358xf32, #tpu.memory_space<vmem>>, vector<1x256xf32>
    %c27_487 = arith.constant 27 : index
    %1018 = memref.load %arg1[%c27_487] : memref<98xf32, #tpu.memory_space<smem>>
    %c76_488 = arith.constant 76 : index
    %1019 = memref.load %arg1[%c76_488] : memref<98xf32, #tpu.memory_space<smem>>
    %1020 = vector.broadcast %1018 : f32 to vector<1x256xf32>
    %1021 = arith.mulf %1020, %1016 : vector<1x256xf32>
    %1022 = vector.broadcast %1019 : f32 to vector<1x256xf32>
    %1023 = arith.mulf %1022, %1017 : vector<1x256xf32>
    %1024 = arith.addf %1021, %1023 : vector<1x256xf32>
    %cst_489 = arith.constant 0.000000e+00 : f32
    %1025 = vector.broadcast %cst_489 : f32 to vector<1x256xf32>
    %1026 = arith.select %70, %1024, %1025 : vector<1x256xi1>, vector<1x256xf32>
    %1027 = arith.addf %981, %1026 : vector<1x256xf32>
    %c0_490 = arith.constant 0 : index
    %c64_491 = arith.constant 64 : index
    %1028 = vector.load %arg4[%c0_490, %c64_491] : memref<2x358xf32, #tpu.memory_space<vmem>>, vector<1x256xf32>
    %c1_492 = arith.constant 1 : index
    %c64_493 = arith.constant 64 : index
    %1029 = vector.load %arg4[%c1_492, %c64_493] : memref<2x358xf32, #tpu.memory_space<vmem>>, vector<1x256xf32>
    %c28_494 = arith.constant 28 : index
    %1030 = memref.load %arg1[%c28_494] : memref<98xf32, #tpu.memory_space<smem>>
    %c77_495 = arith.constant 77 : index
    %1031 = memref.load %arg1[%c77_495] : memref<98xf32, #tpu.memory_space<smem>>
    %1032 = vector.broadcast %1030 : f32 to vector<1x256xf32>
    %1033 = arith.mulf %1032, %1028 : vector<1x256xf32>
    %1034 = vector.broadcast %1031 : f32 to vector<1x256xf32>
    %1035 = arith.mulf %1034, %1029 : vector<1x256xf32>
    %1036 = arith.addf %1033, %1035 : vector<1x256xf32>
    %cst_496 = arith.constant 0.000000e+00 : f32
    %1037 = vector.broadcast %cst_496 : f32 to vector<1x256xf32>
    %1038 = arith.select %25, %1036, %1037 : vector<1x256xi1>, vector<1x256xf32>
    %1039 = arith.addf %991, %1038 : vector<1x256xf32>
    %c0_497 = arith.constant 0 : index
    %c65_498 = arith.constant 65 : index
    %1040 = vector.load %arg4[%c0_497, %c65_498] : memref<2x358xf32, #tpu.memory_space<vmem>>, vector<1x256xf32>
    %c1_499 = arith.constant 1 : index
    %c65_500 = arith.constant 65 : index
    %1041 = vector.load %arg4[%c1_499, %c65_500] : memref<2x358xf32, #tpu.memory_space<vmem>>, vector<1x256xf32>
    %c29_501 = arith.constant 29 : index
    %1042 = memref.load %arg1[%c29_501] : memref<98xf32, #tpu.memory_space<smem>>
    %c78_502 = arith.constant 78 : index
    %1043 = memref.load %arg1[%c78_502] : memref<98xf32, #tpu.memory_space<smem>>
    %1044 = vector.broadcast %1042 : f32 to vector<1x256xf32>
    %1045 = arith.mulf %1044, %1040 : vector<1x256xf32>
    %1046 = vector.broadcast %1043 : f32 to vector<1x256xf32>
    %1047 = arith.mulf %1046, %1041 : vector<1x256xf32>
    %1048 = arith.addf %1045, %1047 : vector<1x256xf32>
    %cst_503 = arith.constant 0.000000e+00 : f32
    %1049 = vector.broadcast %cst_503 : f32 to vector<1x256xf32>
    %1050 = arith.select %34, %1048, %1049 : vector<1x256xi1>, vector<1x256xf32>
    %1051 = arith.addf %1003, %1050 : vector<1x256xf32>
    %c0_504 = arith.constant 0 : index
    %c66_505 = arith.constant 66 : index
    %1052 = vector.load %arg4[%c0_504, %c66_505] : memref<2x358xf32, #tpu.memory_space<vmem>>, vector<1x256xf32>
    %c1_506 = arith.constant 1 : index
    %c66_507 = arith.constant 66 : index
    %1053 = vector.load %arg4[%c1_506, %c66_507] : memref<2x358xf32, #tpu.memory_space<vmem>>, vector<1x256xf32>
    %c30_508 = arith.constant 30 : index
    %1054 = memref.load %arg1[%c30_508] : memref<98xf32, #tpu.memory_space<smem>>
    %c79_509 = arith.constant 79 : index
    %1055 = memref.load %arg1[%c79_509] : memref<98xf32, #tpu.memory_space<smem>>
    %1056 = vector.broadcast %1054 : f32 to vector<1x256xf32>
    %1057 = arith.mulf %1056, %1052 : vector<1x256xf32>
    %1058 = vector.broadcast %1055 : f32 to vector<1x256xf32>
    %1059 = arith.mulf %1058, %1053 : vector<1x256xf32>
    %1060 = arith.addf %1057, %1059 : vector<1x256xf32>
    %cst_510 = arith.constant 0.000000e+00 : f32
    %1061 = vector.broadcast %cst_510 : f32 to vector<1x256xf32>
    %1062 = arith.select %43, %1060, %1061 : vector<1x256xi1>, vector<1x256xf32>
    %1063 = arith.addf %1015, %1062 : vector<1x256xf32>
    %c0_511 = arith.constant 0 : index
    %c67_512 = arith.constant 67 : index
    %1064 = vector.load %arg4[%c0_511, %c67_512] : memref<2x358xf32, #tpu.memory_space<vmem>>, vector<1x256xf32>
    %c1_513 = arith.constant 1 : index
    %c67_514 = arith.constant 67 : index
    %1065 = vector.load %arg4[%c1_513, %c67_514] : memref<2x358xf32, #tpu.memory_space<vmem>>, vector<1x256xf32>
    %c31_515 = arith.constant 31 : index
    %1066 = memref.load %arg1[%c31_515] : memref<98xf32, #tpu.memory_space<smem>>
    %c80_516 = arith.constant 80 : index
    %1067 = memref.load %arg1[%c80_516] : memref<98xf32, #tpu.memory_space<smem>>
    %1068 = vector.broadcast %1066 : f32 to vector<1x256xf32>
    %1069 = arith.mulf %1068, %1064 : vector<1x256xf32>
    %1070 = vector.broadcast %1067 : f32 to vector<1x256xf32>
    %1071 = arith.mulf %1070, %1065 : vector<1x256xf32>
    %1072 = arith.addf %1069, %1071 : vector<1x256xf32>
    %1073 = arith.addf %1027, %1072 : vector<1x256xf32>
    %c0_517 = arith.constant 0 : index
    %c68_518 = arith.constant 68 : index
    %1074 = vector.load %arg4[%c0_517, %c68_518] : memref<2x358xf32, #tpu.memory_space<vmem>>, vector<1x256xf32>
    %c1_519 = arith.constant 1 : index
    %c68_520 = arith.constant 68 : index
    %1075 = vector.load %arg4[%c1_519, %c68_520] : memref<2x358xf32, #tpu.memory_space<vmem>>, vector<1x256xf32>
    %c32_521 = arith.constant 32 : index
    %1076 = memref.load %arg1[%c32_521] : memref<98xf32, #tpu.memory_space<smem>>
    %c81_522 = arith.constant 81 : index
    %1077 = memref.load %arg1[%c81_522] : memref<98xf32, #tpu.memory_space<smem>>
    %1078 = vector.broadcast %1076 : f32 to vector<1x256xf32>
    %1079 = arith.mulf %1078, %1074 : vector<1x256xf32>
    %1080 = vector.broadcast %1077 : f32 to vector<1x256xf32>
    %1081 = arith.mulf %1080, %1075 : vector<1x256xf32>
    %1082 = arith.addf %1079, %1081 : vector<1x256xf32>
    %cst_523 = arith.constant 0.000000e+00 : f32
    %1083 = vector.broadcast %cst_523 : f32 to vector<1x256xf32>
    %1084 = arith.select %52, %1082, %1083 : vector<1x256xi1>, vector<1x256xf32>
    %1085 = arith.addf %1039, %1084 : vector<1x256xf32>
    %c0_524 = arith.constant 0 : index
    %c69_525 = arith.constant 69 : index
    %1086 = vector.load %arg4[%c0_524, %c69_525] : memref<2x358xf32, #tpu.memory_space<vmem>>, vector<1x256xf32>
    %c1_526 = arith.constant 1 : index
    %c69_527 = arith.constant 69 : index
    %1087 = vector.load %arg4[%c1_526, %c69_527] : memref<2x358xf32, #tpu.memory_space<vmem>>, vector<1x256xf32>
    %c33_528 = arith.constant 33 : index
    %1088 = memref.load %arg1[%c33_528] : memref<98xf32, #tpu.memory_space<smem>>
    %c82_529 = arith.constant 82 : index
    %1089 = memref.load %arg1[%c82_529] : memref<98xf32, #tpu.memory_space<smem>>
    %1090 = vector.broadcast %1088 : f32 to vector<1x256xf32>
    %1091 = arith.mulf %1090, %1086 : vector<1x256xf32>
    %1092 = vector.broadcast %1089 : f32 to vector<1x256xf32>
    %1093 = arith.mulf %1092, %1087 : vector<1x256xf32>
    %1094 = arith.addf %1091, %1093 : vector<1x256xf32>
    %cst_530 = arith.constant 0.000000e+00 : f32
    %1095 = vector.broadcast %cst_530 : f32 to vector<1x256xf32>
    %1096 = arith.select %61, %1094, %1095 : vector<1x256xi1>, vector<1x256xf32>
    %1097 = arith.addf %1051, %1096 : vector<1x256xf32>
    %c0_531 = arith.constant 0 : index
    %c70_532 = arith.constant 70 : index
    %1098 = vector.load %arg4[%c0_531, %c70_532] : memref<2x358xf32, #tpu.memory_space<vmem>>, vector<1x256xf32>
    %c1_533 = arith.constant 1 : index
    %c70_534 = arith.constant 70 : index
    %1099 = vector.load %arg4[%c1_533, %c70_534] : memref<2x358xf32, #tpu.memory_space<vmem>>, vector<1x256xf32>
    %c34_535 = arith.constant 34 : index
    %1100 = memref.load %arg1[%c34_535] : memref<98xf32, #tpu.memory_space<smem>>
    %c83_536 = arith.constant 83 : index
    %1101 = memref.load %arg1[%c83_536] : memref<98xf32, #tpu.memory_space<smem>>
    %1102 = vector.broadcast %1100 : f32 to vector<1x256xf32>
    %1103 = arith.mulf %1102, %1098 : vector<1x256xf32>
    %1104 = vector.broadcast %1101 : f32 to vector<1x256xf32>
    %1105 = arith.mulf %1104, %1099 : vector<1x256xf32>
    %1106 = arith.addf %1103, %1105 : vector<1x256xf32>
    %cst_537 = arith.constant 0.000000e+00 : f32
    %1107 = vector.broadcast %cst_537 : f32 to vector<1x256xf32>
    %1108 = arith.select %70, %1106, %1107 : vector<1x256xi1>, vector<1x256xf32>
    %1109 = arith.addf %1063, %1108 : vector<1x256xf32>
    %c0_538 = arith.constant 0 : index
    %c80_539 = arith.constant 80 : index
    %1110 = vector.load %arg4[%c0_538, %c80_539] : memref<2x358xf32, #tpu.memory_space<vmem>>, vector<1x256xf32>
    %c1_540 = arith.constant 1 : index
    %c80_541 = arith.constant 80 : index
    %1111 = vector.load %arg4[%c1_540, %c80_541] : memref<2x358xf32, #tpu.memory_space<vmem>>, vector<1x256xf32>
    %c35_542 = arith.constant 35 : index
    %1112 = memref.load %arg1[%c35_542] : memref<98xf32, #tpu.memory_space<smem>>
    %c84_543 = arith.constant 84 : index
    %1113 = memref.load %arg1[%c84_543] : memref<98xf32, #tpu.memory_space<smem>>
    %1114 = vector.broadcast %1112 : f32 to vector<1x256xf32>
    %1115 = arith.mulf %1114, %1110 : vector<1x256xf32>
    %1116 = vector.broadcast %1113 : f32 to vector<1x256xf32>
    %1117 = arith.mulf %1116, %1111 : vector<1x256xf32>
    %1118 = arith.addf %1115, %1117 : vector<1x256xf32>
    %cst_544 = arith.constant 0.000000e+00 : f32
    %1119 = vector.broadcast %cst_544 : f32 to vector<1x256xf32>
    %1120 = arith.select %25, %1118, %1119 : vector<1x256xi1>, vector<1x256xf32>
    %1121 = arith.addf %1073, %1120 : vector<1x256xf32>
    %c0_545 = arith.constant 0 : index
    %c81_546 = arith.constant 81 : index
    %1122 = vector.load %arg4[%c0_545, %c81_546] : memref<2x358xf32, #tpu.memory_space<vmem>>, vector<1x256xf32>
    %c1_547 = arith.constant 1 : index
    %c81_548 = arith.constant 81 : index
    %1123 = vector.load %arg4[%c1_547, %c81_548] : memref<2x358xf32, #tpu.memory_space<vmem>>, vector<1x256xf32>
    %c36_549 = arith.constant 36 : index
    %1124 = memref.load %arg1[%c36_549] : memref<98xf32, #tpu.memory_space<smem>>
    %c85_550 = arith.constant 85 : index
    %1125 = memref.load %arg1[%c85_550] : memref<98xf32, #tpu.memory_space<smem>>
    %1126 = vector.broadcast %1124 : f32 to vector<1x256xf32>
    %1127 = arith.mulf %1126, %1122 : vector<1x256xf32>
    %1128 = vector.broadcast %1125 : f32 to vector<1x256xf32>
    %1129 = arith.mulf %1128, %1123 : vector<1x256xf32>
    %1130 = arith.addf %1127, %1129 : vector<1x256xf32>
    %cst_551 = arith.constant 0.000000e+00 : f32
    %1131 = vector.broadcast %cst_551 : f32 to vector<1x256xf32>
    %1132 = arith.select %34, %1130, %1131 : vector<1x256xi1>, vector<1x256xf32>
    %1133 = arith.addf %1085, %1132 : vector<1x256xf32>
    %c0_552 = arith.constant 0 : index
    %c82_553 = arith.constant 82 : index
    %1134 = vector.load %arg4[%c0_552, %c82_553] : memref<2x358xf32, #tpu.memory_space<vmem>>, vector<1x256xf32>
    %c1_554 = arith.constant 1 : index
    %c82_555 = arith.constant 82 : index
    %1135 = vector.load %arg4[%c1_554, %c82_555] : memref<2x358xf32, #tpu.memory_space<vmem>>, vector<1x256xf32>
    %c37_556 = arith.constant 37 : index
    %1136 = memref.load %arg1[%c37_556] : memref<98xf32, #tpu.memory_space<smem>>
    %c86_557 = arith.constant 86 : index
    %1137 = memref.load %arg1[%c86_557] : memref<98xf32, #tpu.memory_space<smem>>
    %1138 = vector.broadcast %1136 : f32 to vector<1x256xf32>
    %1139 = arith.mulf %1138, %1134 : vector<1x256xf32>
    %1140 = vector.broadcast %1137 : f32 to vector<1x256xf32>
    %1141 = arith.mulf %1140, %1135 : vector<1x256xf32>
    %1142 = arith.addf %1139, %1141 : vector<1x256xf32>
    %cst_558 = arith.constant 0.000000e+00 : f32
    %1143 = vector.broadcast %cst_558 : f32 to vector<1x256xf32>
    %1144 = arith.select %43, %1142, %1143 : vector<1x256xi1>, vector<1x256xf32>
    %1145 = arith.addf %1097, %1144 : vector<1x256xf32>
    %c0_559 = arith.constant 0 : index
    %c83_560 = arith.constant 83 : index
    %1146 = vector.load %arg4[%c0_559, %c83_560] : memref<2x358xf32, #tpu.memory_space<vmem>>, vector<1x256xf32>
    %c1_561 = arith.constant 1 : index
    %c83_562 = arith.constant 83 : index
    %1147 = vector.load %arg4[%c1_561, %c83_562] : memref<2x358xf32, #tpu.memory_space<vmem>>, vector<1x256xf32>
    %c38_563 = arith.constant 38 : index
    %1148 = memref.load %arg1[%c38_563] : memref<98xf32, #tpu.memory_space<smem>>
    %c87_564 = arith.constant 87 : index
    %1149 = memref.load %arg1[%c87_564] : memref<98xf32, #tpu.memory_space<smem>>
    %1150 = vector.broadcast %1148 : f32 to vector<1x256xf32>
    %1151 = arith.mulf %1150, %1146 : vector<1x256xf32>
    %1152 = vector.broadcast %1149 : f32 to vector<1x256xf32>
    %1153 = arith.mulf %1152, %1147 : vector<1x256xf32>
    %1154 = arith.addf %1151, %1153 : vector<1x256xf32>
    %1155 = arith.addf %1109, %1154 : vector<1x256xf32>
    %c0_565 = arith.constant 0 : index
    %c84_566 = arith.constant 84 : index
    %1156 = vector.load %arg4[%c0_565, %c84_566] : memref<2x358xf32, #tpu.memory_space<vmem>>, vector<1x256xf32>
    %c1_567 = arith.constant 1 : index
    %c84_568 = arith.constant 84 : index
    %1157 = vector.load %arg4[%c1_567, %c84_568] : memref<2x358xf32, #tpu.memory_space<vmem>>, vector<1x256xf32>
    %c39_569 = arith.constant 39 : index
    %1158 = memref.load %arg1[%c39_569] : memref<98xf32, #tpu.memory_space<smem>>
    %c88_570 = arith.constant 88 : index
    %1159 = memref.load %arg1[%c88_570] : memref<98xf32, #tpu.memory_space<smem>>
    %1160 = vector.broadcast %1158 : f32 to vector<1x256xf32>
    %1161 = arith.mulf %1160, %1156 : vector<1x256xf32>
    %1162 = vector.broadcast %1159 : f32 to vector<1x256xf32>
    %1163 = arith.mulf %1162, %1157 : vector<1x256xf32>
    %1164 = arith.addf %1161, %1163 : vector<1x256xf32>
    %cst_571 = arith.constant 0.000000e+00 : f32
    %1165 = vector.broadcast %cst_571 : f32 to vector<1x256xf32>
    %1166 = arith.select %52, %1164, %1165 : vector<1x256xi1>, vector<1x256xf32>
    %1167 = arith.addf %1121, %1166 : vector<1x256xf32>
    %c0_572 = arith.constant 0 : index
    %c85_573 = arith.constant 85 : index
    %1168 = vector.load %arg4[%c0_572, %c85_573] : memref<2x358xf32, #tpu.memory_space<vmem>>, vector<1x256xf32>
    %c1_574 = arith.constant 1 : index
    %c85_575 = arith.constant 85 : index
    %1169 = vector.load %arg4[%c1_574, %c85_575] : memref<2x358xf32, #tpu.memory_space<vmem>>, vector<1x256xf32>
    %c40_576 = arith.constant 40 : index
    %1170 = memref.load %arg1[%c40_576] : memref<98xf32, #tpu.memory_space<smem>>
    %c89_577 = arith.constant 89 : index
    %1171 = memref.load %arg1[%c89_577] : memref<98xf32, #tpu.memory_space<smem>>
    %1172 = vector.broadcast %1170 : f32 to vector<1x256xf32>
    %1173 = arith.mulf %1172, %1168 : vector<1x256xf32>
    %1174 = vector.broadcast %1171 : f32 to vector<1x256xf32>
    %1175 = arith.mulf %1174, %1169 : vector<1x256xf32>
    %1176 = arith.addf %1173, %1175 : vector<1x256xf32>
    %cst_578 = arith.constant 0.000000e+00 : f32
    %1177 = vector.broadcast %cst_578 : f32 to vector<1x256xf32>
    %1178 = arith.select %61, %1176, %1177 : vector<1x256xi1>, vector<1x256xf32>
    %1179 = arith.addf %1133, %1178 : vector<1x256xf32>
    %c0_579 = arith.constant 0 : index
    %c86_580 = arith.constant 86 : index
    %1180 = vector.load %arg4[%c0_579, %c86_580] : memref<2x358xf32, #tpu.memory_space<vmem>>, vector<1x256xf32>
    %c1_581 = arith.constant 1 : index
    %c86_582 = arith.constant 86 : index
    %1181 = vector.load %arg4[%c1_581, %c86_582] : memref<2x358xf32, #tpu.memory_space<vmem>>, vector<1x256xf32>
    %c41_583 = arith.constant 41 : index
    %1182 = memref.load %arg1[%c41_583] : memref<98xf32, #tpu.memory_space<smem>>
    %c90_584 = arith.constant 90 : index
    %1183 = memref.load %arg1[%c90_584] : memref<98xf32, #tpu.memory_space<smem>>
    %1184 = vector.broadcast %1182 : f32 to vector<1x256xf32>
    %1185 = arith.mulf %1184, %1180 : vector<1x256xf32>
    %1186 = vector.broadcast %1183 : f32 to vector<1x256xf32>
    %1187 = arith.mulf %1186, %1181 : vector<1x256xf32>
    %1188 = arith.addf %1185, %1187 : vector<1x256xf32>
    %cst_585 = arith.constant 0.000000e+00 : f32
    %1189 = vector.broadcast %cst_585 : f32 to vector<1x256xf32>
    %1190 = arith.select %70, %1188, %1189 : vector<1x256xi1>, vector<1x256xf32>
    %1191 = arith.addf %1145, %1190 : vector<1x256xf32>
    %c0_586 = arith.constant 0 : index
    %c96_587 = arith.constant 96 : index
    %1192 = vector.load %arg4[%c0_586, %c96_587] : memref<2x358xf32, #tpu.memory_space<vmem>>, vector<1x256xf32>
    %c1_588 = arith.constant 1 : index
    %c96_589 = arith.constant 96 : index
    %1193 = vector.load %arg4[%c1_588, %c96_589] : memref<2x358xf32, #tpu.memory_space<vmem>>, vector<1x256xf32>
    %c42_590 = arith.constant 42 : index
    %1194 = memref.load %arg1[%c42_590] : memref<98xf32, #tpu.memory_space<smem>>
    %c91_591 = arith.constant 91 : index
    %1195 = memref.load %arg1[%c91_591] : memref<98xf32, #tpu.memory_space<smem>>
    %1196 = vector.broadcast %1194 : f32 to vector<1x256xf32>
    %1197 = arith.mulf %1196, %1192 : vector<1x256xf32>
    %1198 = vector.broadcast %1195 : f32 to vector<1x256xf32>
    %1199 = arith.mulf %1198, %1193 : vector<1x256xf32>
    %1200 = arith.addf %1197, %1199 : vector<1x256xf32>
    %cst_592 = arith.constant 0.000000e+00 : f32
    %1201 = vector.broadcast %cst_592 : f32 to vector<1x256xf32>
    %1202 = arith.select %25, %1200, %1201 : vector<1x256xi1>, vector<1x256xf32>
    %1203 = arith.addf %1155, %1202 : vector<1x256xf32>
    %c0_593 = arith.constant 0 : index
    %c97_594 = arith.constant 97 : index
    %1204 = vector.load %arg4[%c0_593, %c97_594] : memref<2x358xf32, #tpu.memory_space<vmem>>, vector<1x256xf32>
    %c1_595 = arith.constant 1 : index
    %c97_596 = arith.constant 97 : index
    %1205 = vector.load %arg4[%c1_595, %c97_596] : memref<2x358xf32, #tpu.memory_space<vmem>>, vector<1x256xf32>
    %c43_597 = arith.constant 43 : index
    %1206 = memref.load %arg1[%c43_597] : memref<98xf32, #tpu.memory_space<smem>>
    %c92_598 = arith.constant 92 : index
    %1207 = memref.load %arg1[%c92_598] : memref<98xf32, #tpu.memory_space<smem>>
    %1208 = vector.broadcast %1206 : f32 to vector<1x256xf32>
    %1209 = arith.mulf %1208, %1204 : vector<1x256xf32>
    %1210 = vector.broadcast %1207 : f32 to vector<1x256xf32>
    %1211 = arith.mulf %1210, %1205 : vector<1x256xf32>
    %1212 = arith.addf %1209, %1211 : vector<1x256xf32>
    %cst_599 = arith.constant 0.000000e+00 : f32
    %1213 = vector.broadcast %cst_599 : f32 to vector<1x256xf32>
    %1214 = arith.select %34, %1212, %1213 : vector<1x256xi1>, vector<1x256xf32>
    %1215 = arith.addf %1167, %1214 : vector<1x256xf32>
    %c0_600 = arith.constant 0 : index
    %c98_601 = arith.constant 98 : index
    %1216 = vector.load %arg4[%c0_600, %c98_601] : memref<2x358xf32, #tpu.memory_space<vmem>>, vector<1x256xf32>
    %c1_602 = arith.constant 1 : index
    %c98_603 = arith.constant 98 : index
    %1217 = vector.load %arg4[%c1_602, %c98_603] : memref<2x358xf32, #tpu.memory_space<vmem>>, vector<1x256xf32>
    %c44_604 = arith.constant 44 : index
    %1218 = memref.load %arg1[%c44_604] : memref<98xf32, #tpu.memory_space<smem>>
    %c93_605 = arith.constant 93 : index
    %1219 = memref.load %arg1[%c93_605] : memref<98xf32, #tpu.memory_space<smem>>
    %1220 = vector.broadcast %1218 : f32 to vector<1x256xf32>
    %1221 = arith.mulf %1220, %1216 : vector<1x256xf32>
    %1222 = vector.broadcast %1219 : f32 to vector<1x256xf32>
    %1223 = arith.mulf %1222, %1217 : vector<1x256xf32>
    %1224 = arith.addf %1221, %1223 : vector<1x256xf32>
    %cst_606 = arith.constant 0.000000e+00 : f32
    %1225 = vector.broadcast %cst_606 : f32 to vector<1x256xf32>
    %1226 = arith.select %43, %1224, %1225 : vector<1x256xi1>, vector<1x256xf32>
    %1227 = arith.addf %1179, %1226 : vector<1x256xf32>
    %c0_607 = arith.constant 0 : index
    %c99_608 = arith.constant 99 : index
    %1228 = vector.load %arg4[%c0_607, %c99_608] : memref<2x358xf32, #tpu.memory_space<vmem>>, vector<1x256xf32>
    %c1_609 = arith.constant 1 : index
    %c99_610 = arith.constant 99 : index
    %1229 = vector.load %arg4[%c1_609, %c99_610] : memref<2x358xf32, #tpu.memory_space<vmem>>, vector<1x256xf32>
    %c45_611 = arith.constant 45 : index
    %1230 = memref.load %arg1[%c45_611] : memref<98xf32, #tpu.memory_space<smem>>
    %c94_612 = arith.constant 94 : index
    %1231 = memref.load %arg1[%c94_612] : memref<98xf32, #tpu.memory_space<smem>>
    %1232 = vector.broadcast %1230 : f32 to vector<1x256xf32>
    %1233 = arith.mulf %1232, %1228 : vector<1x256xf32>
    %1234 = vector.broadcast %1231 : f32 to vector<1x256xf32>
    %1235 = arith.mulf %1234, %1229 : vector<1x256xf32>
    %1236 = arith.addf %1233, %1235 : vector<1x256xf32>
    %1237 = arith.addf %1191, %1236 : vector<1x256xf32>
    %c0_613 = arith.constant 0 : index
    %c100_614 = arith.constant 100 : index
    %1238 = vector.load %arg4[%c0_613, %c100_614] : memref<2x358xf32, #tpu.memory_space<vmem>>, vector<1x256xf32>
    %c1_615 = arith.constant 1 : index
    %c100_616 = arith.constant 100 : index
    %1239 = vector.load %arg4[%c1_615, %c100_616] : memref<2x358xf32, #tpu.memory_space<vmem>>, vector<1x256xf32>
    %c46_617 = arith.constant 46 : index
    %1240 = memref.load %arg1[%c46_617] : memref<98xf32, #tpu.memory_space<smem>>
    %c95_618 = arith.constant 95 : index
    %1241 = memref.load %arg1[%c95_618] : memref<98xf32, #tpu.memory_space<smem>>
    %1242 = vector.broadcast %1240 : f32 to vector<1x256xf32>
    %1243 = arith.mulf %1242, %1238 : vector<1x256xf32>
    %1244 = vector.broadcast %1241 : f32 to vector<1x256xf32>
    %1245 = arith.mulf %1244, %1239 : vector<1x256xf32>
    %1246 = arith.addf %1243, %1245 : vector<1x256xf32>
    %cst_619 = arith.constant 0.000000e+00 : f32
    %1247 = vector.broadcast %cst_619 : f32 to vector<1x256xf32>
    %1248 = arith.select %52, %1246, %1247 : vector<1x256xi1>, vector<1x256xf32>
    %1249 = arith.addf %1203, %1248 : vector<1x256xf32>
    %c0_620 = arith.constant 0 : index
    %c101_621 = arith.constant 101 : index
    %1250 = vector.load %arg4[%c0_620, %c101_621] : memref<2x358xf32, #tpu.memory_space<vmem>>, vector<1x256xf32>
    %c1_622 = arith.constant 1 : index
    %c101_623 = arith.constant 101 : index
    %1251 = vector.load %arg4[%c1_622, %c101_623] : memref<2x358xf32, #tpu.memory_space<vmem>>, vector<1x256xf32>
    %c47_624 = arith.constant 47 : index
    %1252 = memref.load %arg1[%c47_624] : memref<98xf32, #tpu.memory_space<smem>>
    %c96_625 = arith.constant 96 : index
    %1253 = memref.load %arg1[%c96_625] : memref<98xf32, #tpu.memory_space<smem>>
    %1254 = vector.broadcast %1252 : f32 to vector<1x256xf32>
    %1255 = arith.mulf %1254, %1250 : vector<1x256xf32>
    %1256 = vector.broadcast %1253 : f32 to vector<1x256xf32>
    %1257 = arith.mulf %1256, %1251 : vector<1x256xf32>
    %1258 = arith.addf %1255, %1257 : vector<1x256xf32>
    %cst_626 = arith.constant 0.000000e+00 : f32
    %1259 = vector.broadcast %cst_626 : f32 to vector<1x256xf32>
    %1260 = arith.select %61, %1258, %1259 : vector<1x256xi1>, vector<1x256xf32>
    %1261 = arith.addf %1215, %1260 : vector<1x256xf32>
    %c0_627 = arith.constant 0 : index
    %c102_628 = arith.constant 102 : index
    %1262 = vector.load %arg4[%c0_627, %c102_628] : memref<2x358xf32, #tpu.memory_space<vmem>>, vector<1x256xf32>
    %c1_629 = arith.constant 1 : index
    %c102_630 = arith.constant 102 : index
    %1263 = vector.load %arg4[%c1_629, %c102_630] : memref<2x358xf32, #tpu.memory_space<vmem>>, vector<1x256xf32>
    %c48_631 = arith.constant 48 : index
    %1264 = memref.load %arg1[%c48_631] : memref<98xf32, #tpu.memory_space<smem>>
    %c97_632 = arith.constant 97 : index
    %1265 = memref.load %arg1[%c97_632] : memref<98xf32, #tpu.memory_space<smem>>
    %1266 = vector.broadcast %1264 : f32 to vector<1x256xf32>
    %1267 = arith.mulf %1266, %1262 : vector<1x256xf32>
    %1268 = vector.broadcast %1265 : f32 to vector<1x256xf32>
    %1269 = arith.mulf %1268, %1263 : vector<1x256xf32>
    %1270 = arith.addf %1267, %1269 : vector<1x256xf32>
    %cst_633 = arith.constant 0.000000e+00 : f32
    %1271 = vector.broadcast %cst_633 : f32 to vector<1x256xf32>
    %1272 = arith.select %70, %1270, %1271 : vector<1x256xi1>, vector<1x256xf32>
    %1273 = arith.addf %1227, %1272 : vector<1x256xf32>
    %1274 = arith.addf %1273, %1237 : vector<1x256xf32>
    %1275 = arith.addf %1249, %1261 : vector<1x256xf32>
    %1276 = arith.addf %1274, %1275 : vector<1x256xf32>
    %1277 = arith.negf %1276 : vector<1x256xf32>
    %1278 = math.exp %1277 : vector<1x256xf32>
    %cst_634 = arith.constant 1.000000e+00 : f32
    %1279 = vector.broadcast %cst_634 : f32 to vector<1x256xf32>
    %1280 = arith.addf %1279, %1278 : vector<1x256xf32>
    %1281 = arith.divf %1279, %1280 : vector<1x256xf32>
    %c1_635 = arith.constant 1 : index
    %c0_636 = arith.constant 0 : index
    %c0_637 = arith.constant 0 : index
    %1282 = vector.load %arg2[%c1_635, %c0_636, %c0_637] : memref<2x4x256xf32, #tpu.memory_space<vmem>>, vector<1x4x256xf32>
    %1283 = vector.shape_cast %1282 : vector<1x4x256xf32> to vector<4x256xf32>
    %1284 = vector.broadcast %1281 : vector<1x256xf32> to vector<4x256xf32>
    %1285 = arith.mulf %1283, %1284 : vector<4x256xf32>
    %c1_638 = arith.constant 1 : index
    %c0_639 = arith.constant 0 : index
    %c0_640 = arith.constant 0 : index
    %1286 = vector.load %arg3[%c1_638, %c0_639, %c0_640] : memref<2x4x256xf32, #tpu.memory_space<vmem>>, vector<1x4x256xf32>
    %1287 = vector.shape_cast %1286 : vector<1x4x256xf32> to vector<4x256xf32>
    %1288 = vector.shape_cast %1285 : vector<4x256xf32> to vector<1x4x256xf32>
    tpu.vector_store %arg3[%c1_638, %c0_639, %c0_640], %1288 {strides = array<i32>} : memref<2x4x256xf32, #tpu.memory_space<vmem>>, vector<1x4x256xf32>,
    return
  }
  func.func @transform_0(%arg0: i32) -> i32 {
    %c0_i32 = arith.constant 0 : i32
    %c0_i32_0 = arith.constant 0 : i32
    return %c0_i32 : i32
  }
  func.func @transform_1(%arg0: i32) -> (i32, i32, i32) {
    %c0_i32 = arith.constant 0 : i32
    %c0_i32_0 = arith.constant 0 : i32
    %c0_i32_1 = arith.constant 0 : i32
    return %arg0, %c0_i32, %c0_i32_0 : i32, i32, i32
  }
  func.func @transform_2(%arg0: i32) -> (i32, i32, i32) {
    %c0_i32 = arith.constant 0 : i32
    %c0_i32_0 = arith.constant 0 : i32
    %c0_i32_1 = arith.constant 0 : i32
    return %arg0, %c0_i32, %c0_i32_0 : i32, i32, i32
  }
}

</mosaic_0001>

<bundles_post_ra>
// kernel: tpu_custom_call.1
= control target key start
LH: loop header
LB: loop body
LE: loop exit
PB: predicated region body
PF: predicated region fallthrough
CT: control target
= control target key end

     0   :  { %s7442_s0 = inlined_call_operand.hbm [shape: f32[98], index: 0, kind: input, shape index: {}]   ;;  %s7443_s1 = inlined_call_operand.hbm [shape: f32[2,4,256], index: 1, kind: input, shape index: {}]   ;;  %s7444_s2 = inlined_call_operand.hbm [shape: f32[2,4,256], index: 2, kind: output, shape index: {}]  }
   0x1   :  { %7687 = sst [smem:[#allocation178_spill]] %s7444_s2 }
   0x2   :  { %7 = vsyncpa [#allocation6], 0 }
   0x3   :  { %8 = vsyncpa [#allocation4], 0 }
   0x4   :  { %9 = vsyncpa [#allocation5], 0  ;;  %s4403_s11 = scalar_lea.hbm %s7442_s0, 16 }
   0x5   :  { %p4404_p0 = scmp.ne.s32.totalorder %s7442_s0, %s4403_s11  ;;  %p4407_p1 = scmp.lt.u32.totalorder %s4403_s11, %s7442_s0 }
   0x7   :  { %p4409_p2 = pnand %p4407_p1, %p4404_p0 }
   0x9   :  { %4412 = shalt.err (!%p4409_p2)
}
   0xa   :  { %s4463_s16 = smov [#allocation3]   ;;  %s4464_s19 = smov [#allocation7]  }
   0xb   :  { %17 = dma.hbm_to_smem %s7442_s0, 16, %s4463_s16, [#allocation6]  }
   0xc   :  { %s23_s20 = sshll.u32 %s4464_s19, 4  ;;  %s4413_s23 = scalar_lea.hbm %s7443_s1, 256  ;;  %s24_s20 = int_to_ptr.vmem [resolvable:$true] %s23_s20 }
   0xd   :  { %p4414_p3 = scmp.ne.s32.totalorder %s7443_s1, %s4413_s23  ;;  %p4417_p4 = scmp.lt.u32.totalorder %s4413_s23, %s7443_s1 }
   0xf   :  { %p4419_p5 = pnand %p4417_p4, %p4414_p3 }
  0x11   :  { %4422 = shalt.err (!%p4419_p5)
}
  0x12   :  { %s4423_s28 = scalar_lea.vmem %s24_s20, 256  ;;  %p4428_p7 = scmp.lt.s32.totalorder %s24_s20, %s24_s20 }
  0x13   :  { %p4424_p6 = scmp.ne.s32.totalorder %s24_s20, %s4423_s28  ;;  %p4429_p8 = scmp.lt.s32.totalorder %s4423_s28, %s4423_s28 }
  0x15   :  { %p4430_p9 = por %p4429_p8, %p4428_p7 }
  0x17   :  { %p4431_p10 = pnand %p4430_p9, %p4424_p6 }
  0x19   :  { %4434 = shalt.err (!%p4431_p10)
}
  0x1a   :  { %s7445_s0 = smov 128   ;;  %s7446_s29 = smov 8  }
  0x1b   :  { %29 = dma.hbm_to_vmem [thread:$0]  %s7443_s1, 256, %s24_s20, [#allocation4], %s7445_s0, %s7445_s0, %s7446_s29  }
  0x1c   :  { %4457 = dma.done.wait [#allocation6], 16  }
  0x1d   :  { %4458 = vsyncadd [#allocation6], 4294967280 }
  0x1e   :  { %4459 = dma.done.wait [#allocation4], 256  }
  0x1f   :  { %4460 = vsyncadd [#allocation4], 4294967040 }
  0x20   :  { %36 = sfence }
  0x21   :  { %v116_v0 = vld [vmem:[#allocation7] sm:$0xff]  ;;  %vm120_vm0 = vcmask 1043456   ;;  %vm112_vm1 = vcmask 410624   ;;  %v4467_v8 = vmov 0.0   ;;  %vm114_vm2 = vcmask 828824   ;;  %s4469_s1 = smov 51  }
  0x22   :  { %v118_v1 = vcombine.high %v116_v0, %v116_v0  ;;  %v137_v2 = vsel %vm120_vm0, %v116_v0, -inf  ;;  %v121_v3 = vsel %vm120_vm0, %v116_v0, 0.0  ;;  %113 = vst.msk [vmem:[#allocation2] sm:$0x3] %vm112_vm1, %v4467_v8  ;;  %v7465_v13 = vlaneseq  ;;  %s4133_s4 = sld [smem:[#allocation3 + $0x32]]  ;;  %s4132_s5 = sld [smem:[#allocation3 + $0x1]] }
  0x23   :  { %v138_v4 = vrot.slane %v137_v2, 4  ;;  %v122_v5 = vrot.slane %v121_v3, 4  ;;  %115 = vst.msk [vmem:[#allocation2 + $0x4] sm:$0x3] %vm114_vm2, %v4467_v8  ;;  %v4468_v16 = vmov 1966171168  }
  0x24   :  { %v144_v6 = vsel %vm120_vm0, %v118_v1, -inf  ;;  %v128_v7 = vsel %vm120_vm0, %v118_v1, 0.0  ;;  %v157_v17 = vunpack.c.l.s4 %v4468_v16  ;;  %v160_v27 = vshrl.u32 %v7465_v13, 7  ;;  %s4134_s6 = sld [smem:[#allocation3 + $0x2]]  ;;  %s4135_s7 = sld [smem:[#allocation3 + $0x33]] }
  0x25   :  { %v139_v9 = vmax.f32 %v137_v2, %v138_v4  ;;  %v145_v10 = vrot.slane %v144_v6, 4  ;;  %v123_v11 = vadd.f32 %v122_v5, %v121_v3  ;;  %v129_v12 = vrot.slane %v128_v7, 4  ;;  %s4138_s8 = sld [smem:[#allocation3 + $0x4]]  ;;  %s4139_s9 = sld [smem:[#allocation3 + $0x35]] }
  0x26   :  { %v158_v26 = vunpack.c.0.s8 %v157_v17  ;;  %vm177_vm3 = vcmp.ge.s32.totalorder %v7465_v13, 51  ;;  %vm178_vm4 = vcmp.lt.s32.totalorder %v7465_v13, 307  ;;  %vm173_vm5 = vcmask 416768   ;;  %s4140_s10 = sld [smem:[#allocation3 + $0x5]]  ;;  %s4141_s11 = sld [smem:[#allocation3 + $0x36]] }
  0x27   :  { %v140_v14 = vrot.slane %v139_v9, 2  ;;  %v146_v15 = vmax.f32 %v144_v6, %v145_v10  ;;  %v124_v18 = vrot.slane %v123_v11, 2  ;;  %v130_v19 = vadd.f32 %v129_v12, %v128_v7  ;;  %vm4576_vm6 = vmand %vm177_vm3, %vm178_vm4  ;;  %s4142_s12 = sld [smem:[#allocation3 + $0x6]]  ;;  %s7577_s13 = smov 127  }
  0x28   :  { %v4566_v35 = vsub.s32 %v158_v26, %v160_v27  ;;  %v233_v53 = vstv %s4132_s5  ;;  %v235_v54 = vstv %s4133_s4  ;;  %v4588_v56 = vsub.s32 0, %v160_v27  ;;  %s4143_s14 = sld [smem:[#allocation3 + $0x37]]  ;;  %s7575_s15 = smov 126  }
  0x29   :  { %v141_v20 = vmax.f32 %v139_v9, %v140_v14  ;;  %v147_v21 = vrot.slane %v146_v15, 2  ;;  %v125_v22 = vadd.f32 %v124_v18, %v123_v11  ;;  %v131_v23 = vrot.slane %v130_v19, 2  ;;  %s4144_s16 = sld [smem:[#allocation3 + $0x7]]  ;;  %s7573_s17 = smov 124  }
  0x2a   :  { %v268_v55 = vstv %s4134_s6  ;;  %v270_v58 = vstv %s4135_s7  ;;  %v4592_v59 = vsub.s32 2, %v160_v27  ;;  %v4598_v2 = vsub.s32 1, %v160_v27  ;;  %s4145_s18 = sld [smem:[#allocation3 + $0x38]]  ;;  %s4622_s20 = sld [smem:[#allocation3 + $0x39]] }
  0x2b   :  { %v142_v24 = vrot.slane %v141_v20, 1  ;;  %v148_v25 = vmax.f32 %v146_v15, %v147_v21  ;;  %v126_v28 = vrot.slane %v125_v22, 1  ;;  %v132_v29 = vadd.f32 %v131_v23, %v130_v19  ;;  %s4146_s19 = sld [smem:[#allocation3 + $0x8]]  ;;  %s4626_s21 = sld [smem:[#allocation3 + $0x9]] }
  0x2c   :  { %v311_v63 = vstv %s4138_s8  ;;  %v313_v3 = vstv %s4139_s9  ;;  %v346_v12 = vstv %s4140_s10  ;;  %v348_v14 = vstv %s4141_s11  ;;  %s7571_s22 = smov 123   ;;  %s4630_s23 = sld [smem:[#allocation3 + $0x3a]] }
  0x2d   :  { %v143_v30 = vmax.f32 %v141_v20, %v142_v24  ;;  %v149_v31 = vrot.slane %v148_v25, 1  ;;  %v127_v32 = vadd.f32 %v126_v28, %v125_v22  ;;  %v133_v33 = vrot.slane %v132_v29, 1  ;;  %s7567_s24 = smov 122   ;;  %s4150_s25 = sld [smem:[#allocation3 + $0xa]] }
  0x2e   :  { %v381_v18 = vstv %s4142_s12  ;;  %v383_v20 = vstv %s4143_s14  ;;  %s4151_s26 = sld [smem:[#allocation3 + $0x3b]]  ;;  %s7565_s28 = smov 112   ;;  %vm440_vm7 = vcmask 916480   ;;  %vm7494_vm9 = vcmask 777216  }
  0x2f   :  { %v150_v34 = vmax.f32 %v148_v25, %v149_v31  ;;  %v134_v36 = vadd.f32 %v133_v33, %v132_v29  ;;  %v151_v37 = vmul.f32 0.25, %v127_v32  ;;  %v416_v29 = vstv %s4144_s16  ;;  %s4152_s27 = sld [smem:[#allocation3 + $0xb]]  ;;  %s4153_s30 = sld [smem:[#allocation3 + $0x3c]] }
  0x30   :  { %s7563_s3 = smov 111   ;;  %s4154_s4 = sld [smem:[#allocation3 + $0xc]]  ;;  %vm7493_vm12 = vcmask 637952   ;;  %vm602_vm14 = vcmask 883712   ;;  %vm7492_vm4 = vcmask 744448  }
  0x31   :  { %v183_v38 = vcombine.low %v143_v30, %v150_v34  ;;  %v152_v39 = vmul.f32 0.25, %v134_v36  ;;  %v418_v30 = vstv %s4145_s18  ;;  %v475_v36 = vstv %s4146_s19  ;;  %s7559_s5 = smov 110   ;;  %s4155_s6 = sld [smem:[#allocation3 + $0x3d]] }
  0x32   :  { %s4156_s7 = sld [smem:[#allocation3 + $0xd]]  ;;  %s7557_s8 = smov 109  }
  0x33   :  { %v190_v40 = vrot.slane %v183_v38, %v4566_v35  ;;  %v155_v41 = vcombine.low %v151_v37, %v152_v39  ;;  %v477_v39 = vstv %s4622_s20  ;;  %s4157_s9 = sld [smem:[#allocation3 + $0x3e]]  ;;  %s7555_s11 = smov 108  }
  0x34   :  { %s4158_s10 = sld [smem:[#allocation3 + $0xe]]  ;;  %s4159_s12 = sld [smem:[#allocation3 + $0x3f]] }
  0x35   :  { %v197_v42 = vrot.slane %v190_v40, %v4566_v35  ;;  %v162_v43 = vrot.slane %v155_v41, %v4566_v35  ;;  %s4160_s14 = sld [smem:[#allocation3 + $0xf]]  ;;  %s7537_s16 = smov 107  }
  0x36   :  { %s4161_s18 = sld [smem:[#allocation3 + $0x40]]  ;;  %s4681_s20 = sld [smem:[#allocation3 + $0x41]] }
  0x37   :  { %198 = vrot.lane.b32.xlu0 %v197_v42, %s4469_s1  ;;  %v169_v44 = vrot.slane %v162_v43, %v4566_v35  ;;  %s4162_s19 = sld [smem:[#allocation3 + $0x10]]  ;;  %s4806_s0 = sld [smem:[#allocation3 + $0x1c]] }
  0x38   :  { %s4837_s29 = sld [smem:[#allocation3 + $0x4e]]  ;;  %s5635_s2 = sld [smem:[#allocation3 + $0x41]] }
  0x3b   :  { %170 = vrot.lane.b32.xlu0 %v169_v44, %s4469_s1  ;;  %v510_v44 = vstv %s4626_s21  ;;  %s4685_s21 = sld [smem:[#allocation3 + $0x11]] }
  0xa9   :  { %v199_v45 = vpop.permute.xlu0 %198 }
  0xaa   :  { %v200_v47 = vrot.slane %v199_v45, 7 }
  0xac   :  { %v201_v48 = vsel %vm173_vm5, %v200_v47, %v199_v45  ;;  %v512_v47 = vstv %s4630_s23  ;;  %s7535_s23 = smov 106  }
  0xad   :  { %204 = vst.msk [vmem:[#allocation2 + $0x1] ss:$2 sm:$0x7] %vm4576_vm6, %v201_v48  ;;  %v171_v49 = vpop.permute.xlu0 %170 }
  0xae   :  { %v172_v50 = vrot.slane %v171_v49, 7 }
  0xb0   :  { %v174_v51 = vsel %vm173_vm5, %v172_v50, %v171_v49 }
  0xb1   :  { %180 = vst.msk [vmem:[#allocation2] ss:$2 sm:$0x7] %vm4576_vm6, %v174_v51 }
  0xb4   :  { %v4586_v52 = vld [vmem:[#allocation2 + $0x1] ss:$2 sm:$0x7] }
  0xb5   :  { %v236_v61 = vmul.f32 %v235_v54, %v4586_v52  ;;  %v271_v1 = vmul.f32 %v270_v58, %v4586_v52  ;;  %v314_v8 = vmul.f32 %v313_v3, %v4586_v52  ;;  %v349_v19 = vmul.f32 %v348_v14, %v4586_v52  ;;  %v472_v38 = vld [vmem:[#allocation2 + $0x1] ss:$2 sm:$0x7] }
  0xb6   :  { %v384_v25 = vmul.f32 %v383_v20, %v4586_v52  ;;  %v419_v37 = vmul.f32 %v418_v30, %v4586_v52  ;;  %v478_v45 = vmul.f32 %v477_v39, %v472_v38  ;;  %v706_v30 = vstv %s4158_s10  ;;  %s4170_s10 = sld [smem:[#allocation3 + $0x14]] }
  0xb8   :  { %v4590_v57 = vld [vmem:[#allocation2] ss:$2 sm:$0x7] }
  0xb9   :  { %v234_v60 = vmul.f32 %v233_v53, %v4590_v57  ;;  %v269_v62 = vmul.f32 %v268_v55, %v4590_v57  ;;  %v312_v7 = vmul.f32 %v311_v63, %v4590_v57  ;;  %v347_v17 = vmul.f32 %v346_v12, %v4590_v57  ;;  %v471_v34 = vld [vmem:[#allocation2] ss:$2 sm:$0x7] }
  0xba   :  { %v382_v24 = vmul.f32 %v381_v18, %v4590_v57  ;;  %v417_v33 = vmul.f32 %v416_v29, %v4590_v57  ;;  %v476_v43 = vmul.f32 %v475_v36, %v471_v34  ;;  %v511_v51 = vmul.f32 %v510_v44, %v471_v34  ;;  %v632_v14 = vld [vmem:[#allocation2] ss:$2 sm:$0x7] }
  0xbb   :  { %v237_v0 = vadd.f32 %v236_v61, %v234_v60  ;;  %v272_v6 = vadd.f32 %v271_v1, %v269_v62  ;;  %v315_v11 = vadd.f32 %v314_v8, %v312_v7  ;;  %v350_v23 = vadd.f32 %v349_v19, %v347_v17 }
  0xbc   :  { %v385_v28 = vadd.f32 %v384_v25, %v382_v24  ;;  %v420_v42 = vadd.f32 %v419_v37, %v417_v33  ;;  %v479_v50 = vadd.f32 %v478_v45, %v476_v43  ;;  %v513_v53 = vmul.f32 %v512_v47, %v472_v38 }
  0xbd   :  { %v250_v4 = vrot.slane %v237_v0, %v4592_v59  ;;  %v242_v5 = vrot.slane %v237_v0, %v4588_v56  ;;  %v281_v9 = vrot.slane %v272_v6, %v4598_v2  ;;  %v246_v10 = vrot.slane %v237_v0, %v4598_v2 }
  0xbe   :  { %v320_v15 = vrot.slane %v315_v11, %v4588_v56  ;;  %v277_v16 = vrot.slane %v272_v6, %v4588_v56  ;;  %v328_v21 = vrot.slane %v315_v11, %v4592_v59  ;;  %v285_v22 = vrot.slane %v272_v6, %v4592_v59 }
  0xbf   :  { %255 = vrot.lane.b32.xlu0 %v250_v4, %s7577_s13  ;;  %251 = vrot.lane.b32.xlu1 %v242_v5, %s7577_s13  ;;  %v359_v26 = vrot.slane %v350_v23, %v4598_v2  ;;  %v324_v27 = vrot.slane %v315_v11, %v4598_v2  ;;  %v390_v31 = vrot.slane %v385_v28, %v4588_v56  ;;  %v545_v60 = vstv %s4150_s25  ;;  %s4689_s25 = sld [smem:[#allocation3 + $0x42]] }
  0xc0   :  { %v355_v32 = vrot.slane %v350_v23, %v4588_v56  ;;  %v398_v40 = vrot.slane %v385_v28, %v4592_v59  ;;  %v363_v41 = vrot.slane %v350_v23, %v4592_v59  ;;  %v429_v48 = vrot.slane %v420_v42, %v4598_v2 }
  0xc1   :  { %v394_v49 = vrot.slane %v385_v28, %v4598_v2  ;;  %v488_v54 = vrot.slane %v479_v50, %v4598_v2  ;;  %v425_v55 = vrot.slane %v420_v42, %v4588_v56  ;;  %v514_v58 = vadd.f32 %v513_v53, %v511_v51  ;;  %v796_v51 = vld [vmem:[#allocation2 + $0x1] ss:$2 sm:$0x7] }
  0xc2   :  { %v547_v61 = vstv %s4151_s26  ;;  %v433_v63 = vrot.slane %v420_v42, %v4592_v59  ;;  %v546_v0 = vmul.f32 %v545_v60, %v471_v34  ;;  %v578_v1 = vstv %s4152_s27  ;;  %s7533_s26 = smov 96   ;;  %s4166_s27 = sld [smem:[#allocation3 + $0x12]] }
  0xc3   :  { %288 = vrot.lane.b32.xlu0 %v281_v9, %s7575_s15  ;;  %253 = vrot.lane.b32.xlu1 %v246_v10, %s7577_s13  ;;  %v519_v62 = vrot.slane %v514_v58, %v4588_v56  ;;  %v548_v3 = vmul.f32 %v547_v61, %v472_v38  ;;  %v580_v4 = vstv %s4153_s30  ;;  %v527_v5 = vrot.slane %v514_v58, %v4592_v59  ;;  %s4167_s30 = sld [smem:[#allocation3 + $0x43]]  ;;  %s5633_s13 = sld [smem:[#allocation3 + $0x10]] }
  0xc4   :  { %v484_v6 = vrot.slane %v479_v50, %v4588_v56  ;;  %v579_v8 = vmul.f32 %v578_v1, %v471_v34  ;;  %v581_v9 = vmul.f32 %v580_v4, %v472_v38  ;;  %v492_v11 = vrot.slane %v479_v50, %v4592_v59 }
  0xc5   :  { %v549_v7 = vadd.f32 %v548_v3, %v546_v0  ;;  %v638_v17 = vstv %s4155_s6  ;;  %v523_v19 = vrot.slane %v514_v58, %v4598_v2  ;;  %v671_v25 = vstv %s4156_s7  ;;  %s7553_s6 = smov 95   ;;  %s4169_s7 = sld [smem:[#allocation3 + $0x44]] }
  0xc6   :  { %v582_v12 = vadd.f32 %v581_v9, %v579_v8  ;;  %v672_v29 = vmul.f32 %v671_v25, %v632_v14  ;;  %v707_v37 = vmul.f32 %v706_v30, %v632_v14  ;;  %v741_v42 = vstv %s4160_s14  ;;  %s4171_s14 = sld [smem:[#allocation3 + $0x45]] }
  0xc7   :  { %329 = vrot.lane.b32.xlu0 %v320_v15, %s7573_s17  ;;  %286 = vrot.lane.b32.xlu1 %v277_v16, %s7575_s15  ;;  %v558_v10 = vrot.slane %v549_v7, %v4598_v2  ;;  %v636_v15 = vstv %s4154_s4  ;;  %v633_v16 = vld [vmem:[#allocation2 + $0x1] ss:$2 sm:$0x7]  ;;  %v554_v23 = vrot.slane %v549_v7, %v4588_v56  ;;  %v562_v28 = vrot.slane %v549_v7, %v4592_v59  ;;  %s4168_s4 = sld [smem:[#allocation3 + $0x13]] }
  0xc8   :  { %v587_v18 = vrot.slane %v582_v12, %v4588_v56  ;;  %v637_v20 = vmul.f32 %v636_v15, %v632_v14  ;;  %v591_v34 = vrot.slane %v582_v12, %v4598_v2  ;;  %v743_v43 = vstv %s4161_s18  ;;  %s4172_s18 = sld [smem:[#allocation3 + $0x15]] }
  0xc9   :  { %v742_v47 = vmul.f32 %v741_v42, %v632_v14  ;;  %v744_v50 = vmul.f32 %v743_v43, %v633_v16  ;;  %v801_v53 = vstv %s4681_s20  ;;  %v834_v61 = vstv %s4685_s21  ;;  %s4173_s20 = sld [smem:[#allocation3 + $0x46]] }
  0xca   :  { %v867_v9 = vstv %s4166_s27  ;;  %s4174_s21 = sld [smem:[#allocation3 + $0x16]]  ;;  %s4175_s27 = sld [smem:[#allocation3 + $0x47]] }
  0xcb   :  { %333 = vrot.lane.b32.xlu0 %v328_v21, %s7573_s17  ;;  %290 = vrot.lane.b32.xlu1 %v285_v22, %s7575_s15  ;;  %v639_v21 = vmul.f32 %v638_v17, %v633_v16  ;;  %v595_v22 = vrot.slane %v582_v12, %v4592_v59  ;;  %v745_v58 = vadd.f32 %v744_v50, %v742_v47  ;;  %v904_v17 = vstv %s4169_s7  ;;  %s4734_s7 = sld [smem:[#allocation3 + $0x48]] }
  0xcc   :  { %s5628_s15 = sld [smem:[#allocation3 + $0x50]] }
  0xcd   :  { %v640_v24 = vadd.f32 %v639_v21, %v637_v20  ;;  %v754_v0 = vrot.slane %v745_v58, %v4598_v2  ;;  %v750_v7 = vrot.slane %v745_v58, %v4588_v56  ;;  %v758_v12 = vrot.slane %v745_v58, %v4592_v59 }
  0xce   :  { %v902_v15 = vstv %s4168_s4  ;;  %s7457_s4 = smov 90  }
  0xcf   :  { %366 = vrot.lane.b32.xlu0 %v359_v26, %s7571_s22  ;;  %331 = vrot.lane.b32.xlu1 %v324_v27, %s7573_s17  ;;  %v673_v26 = vstv %s4157_s9  ;;  %v645_v27 = vrot.slane %v640_v24, %v4588_v56  ;;  %v653_v33 = vrot.slane %v640_v24, %v4592_v59  ;;  %s7522_s9 = smov 94   ;;  %s5626_s17 = sld [smem:[#allocation3 + $0x1f]] }
  0xd0   :  { %v1030_v43 = vstv %s4174_s21  ;;  %s4751_s21 = sld [smem:[#allocation3 + $0x4a]] }
  0xd3   :  { %399 = vrot.lane.b32.xlu0 %v390_v31, %s7567_s24  ;;  %364 = vrot.lane.b32.xlu1 %v355_v32, %s7571_s22  ;;  %v674_v31 = vmul.f32 %v673_v26, %v633_v16  ;;  %v708_v32 = vstv %s4159_s12  ;;  %s7482_s12 = smov 93   ;;  %v956_v26 = vld [vmem:[#allocation2] ss:$2 sm:$0x7] }
  0xd4   :  { %v709_v38 = vmul.f32 %v708_v32, %v633_v16  ;;  %v1031_v50 = vmul.f32 %v1030_v43, %v956_v26 }
  0xd5   :  { %v675_v36 = vadd.f32 %v674_v31, %v672_v29  ;;  %v962_v29 = vstv %s4171_s14  ;;  %s4742_s14 = sld [smem:[#allocation3 + $0x49]] }
  0xd7   :  { %403 = vrot.lane.b32.xlu0 %v398_v40, %s7567_s24  ;;  %368 = vrot.lane.b32.xlu1 %v363_v41, %s7571_s22  ;;  %v684_v39 = vrot.slane %v675_v36, %v4598_v2  ;;  %v649_v40 = vrot.slane %v640_v24, %v4598_v2  ;;  %v710_v41 = vadd.f32 %v709_v38, %v707_v37  ;;  %v995_v38 = vstv %s4172_s18  ;;  %s4746_s18 = sld [smem:[#allocation3 + $0x19]]  ;;  %s5623_s22 = sld [smem:[#allocation3 + $0x34]] }
  0xd8   :  { %v680_v45 = vrot.slane %v675_v36, %v4588_v56  ;;  %v996_v42 = vmul.f32 %v995_v38, %v956_v26 }
  0xd9   :  { %v715_v44 = vrot.slane %v710_v41, %v4588_v56  ;;  %v719_v1 = vrot.slane %v710_v41, %v4598_v2 }
  0xdb   :  { %436 = vrot.lane.b32.xlu0 %v429_v48, %s7565_s28  ;;  %401 = vrot.lane.b32.xlu1 %v394_v49, %s7567_s24  ;;  %v795_v48 = vld [vmem:[#allocation2] ss:$2 sm:$0x7]  ;;  %v799_v49 = vstv %s4162_s19  ;;  %s7480_s19 = smov 92   ;;  %s5607_s24 = sld [smem:[#allocation3 + $0x3d]] }
  0xdc   :  { %v800_v60 = vmul.f32 %v799_v49, %v795_v48  ;;  %v835_v4 = vmul.f32 %v834_v61, %v795_v48  ;;  %v868_v14 = vmul.f32 %v867_v9, %v795_v48  ;;  %v903_v21 = vmul.f32 %v902_v15, %v795_v48 }
  0xdd   :  { %v1156_v15 = vstv %s4746_s18  ;;  %s4787_s18 = sld [smem:[#allocation3 + $0x4c]] }
  0xdf   :  { %495 = vrot.lane.b32.xlu0 %v488_v54, %s7563_s3  ;;  %434 = vrot.lane.b32.xlu1 %v425_v55, %s7565_s28  ;;  %v723_v54 = vrot.slane %v710_v41, %v4592_v59  ;;  %v688_v55 = vrot.slane %v675_v36, %v4592_v59 }
  0xe3   :  { %528 = vrot.lane.b32.xlu0 %v519_v62, %s7559_s5  ;;  %438 = vrot.lane.b32.xlu1 %v433_v63, %s7565_s28  ;;  %v802_v62 = vmul.f32 %v801_v53, %v796_v51  ;;  %v836_v63 = vstv %s4689_s25  ;;  %s7551_s25 = smov 91   ;;  %s5602_s28 = sld [smem:[#allocation3 + $0xc]] }
  0xe5   :  { %v803_v3 = vadd.f32 %v802_v62, %v800_v60  ;;  %v1067_v60 = vstv %s4734_s7  ;;  %s4775_s7 = sld [smem:[#allocation3 + $0x4b]] }
  0xe7   :  { %532 = vrot.lane.b32.xlu0 %v527_v5, %s7559_s5  ;;  %493 = vrot.lane.b32.xlu1 %v484_v6, %s7563_s3  ;;  %v837_v5 = vmul.f32 %v836_v63, %v796_v51  ;;  %v812_v6 = vrot.slane %v803_v3, %v4598_v2  ;;  %v816_v24 = vrot.slane %v803_v3, %v4592_v59 }
  0xe9   :  { %v838_v8 = vadd.f32 %v837_v5, %v835_v4 }
  0xeb   :  { %565 = vrot.lane.b32.xlu0 %v558_v10, %s7557_s8  ;;  %497 = vrot.lane.b32.xlu1 %v492_v11, %s7563_s3  ;;  %v869_v10 = vstv %s4167_s30  ;;  %v843_v11 = vrot.slane %v838_v8, %v4588_v56  ;;  %v847_v31 = vrot.slane %v838_v8, %v4598_v2  ;;  %s4176_s30 = sld [smem:[#allocation3 + $0x17]]  ;;  %s5600_s3 = sld [smem:[#allocation3 + $0x40]] }
  0xec   :  { %v870_v16 = vmul.f32 %v869_v10, %v796_v51 }
  0xee   :  { %v871_v20 = vadd.f32 %v870_v16, %v868_v14 }
  0xef   :  { %596 = vrot.lane.b32.xlu0 %v587_v18, %s7555_s11  ;;  %530 = vrot.lane.b32.xlu1 %v523_v19, %s7559_s5  ;;  %v851_v18 = vrot.slane %v838_v8, %v4592_v59  ;;  %v808_v19 = vrot.slane %v803_v3, %v4588_v56  ;;  %v1119_v3 = vld [vmem:[#allocation2] ss:$2 sm:$0x7]  ;;  %s5590_s5 = sld [smem:[#allocation3 + $0xb]] }
  0xf0   :  { %v876_v36 = vrot.slane %v871_v20, %v4588_v56  ;;  %v884_v41 = vrot.slane %v871_v20, %v4592_v59 }
  0xf1   :  { %v1065_v58 = vstv %s4176_s30  ;;  %s4770_s30 = sld [smem:[#allocation3 + $0x1a]]  ;;  %7820 = sst [smem:[#allocation141_spill]] %s5600_s3 }
  0xf2   :  { %s5690_s3 = sld [smem:[#allocation3 + $0x19]] }
  0xf3   :  { %600 = vrot.lane.b32.xlu0 %v595_v22, %s7555_s11  ;;  %563 = vrot.lane.b32.xlu1 %v554_v23, %s7557_s8  ;;  %v905_v22 = vmul.f32 %v904_v17, %v796_v51  ;;  %v880_v23 = vrot.slane %v871_v20, %v4598_v2  ;;  %v1158_v17 = vstv %s4751_s21  ;;  %s7447_s21 = smov 77  }
  0xf5   :  { %v906_v25 = vadd.f32 %v905_v22, %v903_v21  ;;  %7818 = sst [smem:[#allocation139_spill]] %s5590_s5  ;;  %s5705_s5 = sld [smem:[#allocation3 + $0x1c]] }
  0xf7   :  { %654 = vrot.lane.b32.xlu0 %v645_v27, %s7537_s16  ;;  %567 = vrot.lane.b32.xlu1 %v562_v28, %s7557_s8  ;;  %v960_v27 = vstv %s4170_s10  ;;  %v957_v28 = vld [vmem:[#allocation2 + $0x1] ss:$2 sm:$0x7]  ;;  %v911_v30 = vrot.slane %v906_v25, %v4588_v56  ;;  %v915_v48 = vrot.slane %v906_v25, %v4598_v2  ;;  %s4738_s10 = sld [smem:[#allocation3 + $0x18]]  ;;  %s5588_s8 = sld [smem:[#allocation3 + $0x3b]] }
  0xf8   :  { %v961_v32 = vmul.f32 %v960_v27, %v956_v26  ;;  %v1068_v5 = vmul.f32 %v1067_v60, %v957_v28  ;;  %v4834_v60 = vld [vmem:[#allocation2 + $0x1] ss:$2 sm:$0x7] }
  0xfb   :  { %658 = vrot.lane.b32.xlu0 %v653_v33, %s7537_s16  ;;  %598 = vrot.lane.b32.xlu1 %v591_v34, %s7555_s11  ;;  %v963_v33 = vmul.f32 %v962_v29, %v957_v28  ;;  %v919_v34 = vrot.slane %v906_v25, %v4592_v59  ;;  %s5586_s11 = sld [smem:[#allocation3 + $0xa]] }
  0xfd   :  { %v964_v37 = vadd.f32 %v963_v33, %v961_v32  ;;  %v1123_v4 = vstv %s4738_s10  ;;  %s4783_s10 = sld [smem:[#allocation3 + $0x1b]]  ;;  %7817 = sst [smem:[#allocation138_spill]] %s5588_s8 }
  0xfe   :  { %v1124_v14 = vmul.f32 %v1123_v4, %v1119_v3  ;;  %s5684_s8 = sld [smem:[#allocation3 + $0x49]] }
  0xff   :  { %691 = vrot.lane.b32.xlu0 %v684_v39, %s7535_s23  ;;  %656 = vrot.lane.b32.xlu1 %v649_v40, %s7537_s16  ;;  %v997_v39 = vstv %s4173_s20  ;;  %v969_v40 = vrot.slane %v964_v37, %v4588_v56  ;;  %v977_v47 = vrot.slane %v964_v37, %v4592_v59  ;;  %s7455_s20 = smov 80   ;;  %s5563_s16 = sld [smem:[#allocation3 + $0x36]] }
 0x101   :  { %7816 = sst [smem:[#allocation137_spill]] %s5586_s11 }
 0x102   :  { %s5682_s11 = sld [smem:[#allocation3 + $0x18]] }
 0x103   :  { %724 = vrot.lane.b32.xlu0 %v715_v44, %s7533_s26  ;;  %689 = vrot.lane.b32.xlu1 %v680_v45, %s7535_s23  ;;  %v998_v44 = vmul.f32 %v997_v39, %v957_v28  ;;  %v1032_v45 = vstv %s4175_s27  ;;  %s7451_s27 = smov 79   ;;  %v1226_v38 = vstv %s4783_s10  ;;  %s4830_s10 = sld [smem:[#allocation3 + $0x1d]] }
 0x104   :  { %v1033_v51 = vmul.f32 %v1032_v45, %v957_v28 }
 0x105   :  { %v999_v49 = vadd.f32 %v998_v44, %v996_v42 }
 0x107   :  { %728 = vrot.lane.b32.xlu0 %v723_v54, %s7533_s26  ;;  %693 = vrot.lane.b32.xlu1 %v688_v55, %s7535_s23  ;;  %v1008_v53 = vrot.slane %v999_v49, %v4598_v2  ;;  %v973_v54 = vrot.slane %v964_v37, %v4598_v2  ;;  %v1034_v55 = vadd.f32 %v1033_v51, %v1031_v50  ;;  %s5559_s23 = sld [smem:[#allocation3 + $0x5]] }
 0x109   :  { %v1039_v63 = vrot.slane %v1034_v55, %v4588_v56  ;;  %v1047_v10 = vrot.slane %v1034_v55, %v4592_v59  ;;  %v1043_v21 = vrot.slane %v1034_v55, %v4598_v2  ;;  %v4827_v55 = vld [vmem:[#allocation2] ss:$2 sm:$0x7] }
 0x10b   :  { %761 = vrot.lane.b32.xlu0 %v754_v0, %s7553_s6  ;;  %726 = vrot.lane.b32.xlu1 %v719_v1, %s7533_s26  ;;  %v1004_v0 = vrot.slane %v999_v49, %v4588_v56  ;;  %v1066_v1 = vmul.f32 %v1065_v58, %v956_v26  ;;  %v1284_v58 = vstv %s4806_s0  ;;  %s4846_s0 = sld [smem:[#allocation3 + $0x1e]]  ;;  %s5557_s26 = sld [smem:[#allocation3 + $0x35]] }
 0x10f   :  { %819 = vrot.lane.b32.xlu0 %v812_v6, %s7522_s9  ;;  %759 = vrot.lane.b32.xlu1 %v750_v7, %s7553_s6  ;;  %v1120_v6 = vld [vmem:[#allocation2 + $0x1] ss:$2 sm:$0x7]  ;;  %v1125_v7 = vstv %s4742_s14  ;;  %s7549_s14 = smov 78  }
 0x110   :  { %v1126_v16 = vmul.f32 %v1125_v7, %v1120_v6 }
 0x112   :  { %v1127_v22 = vadd.f32 %v1126_v16, %v1124_v14  ;;  %v1321_v16 = vstv %s4837_s29  ;;  %s4877_s29 = sld [smem:[#allocation3 + $0x51]] }
 0x113   :  { %852 = vrot.lane.b32.xlu0 %v843_v11, %s7482_s12  ;;  %763 = vrot.lane.b32.xlu1 %v758_v12, %s7553_s6  ;;  %v1012_v11 = vrot.slane %v999_v49, %v4592_v59  ;;  %v1069_v12 = vadd.f32 %v1068_v5, %v1066_v1  ;;  %v1285_v5 = vmul.f32 %v1284_v58, %v4827_v55  ;;  %s5584_s6 = sld [smem:[#allocation3 + $0x3a]] }
 0x114   :  { %v1136_v27 = vrot.slane %v1127_v22, %v4598_v2  ;;  %v1132_v44 = vrot.slane %v1127_v22, %v4588_v56 }
 0x115   :  { %v1078_v20 = vrot.slane %v1069_v12, %v4598_v2  ;;  %v1074_v28 = vrot.slane %v1069_v12, %v4588_v56 }
 0x117   :  { %856 = vrot.lane.b32.xlu0 %v851_v18, %s7482_s12  ;;  %817 = vrot.lane.b32.xlu1 %v808_v19, %s7522_s9 }
 0x119   :  { %7815 = sst [smem:[#allocation136_spill]] %s5584_s6  ;;  %s5673_s6 = sld [smem:[#allocation3 + $0x16]] }
 0x11b   :  { %887 = vrot.lane.b32.xlu0 %v880_v23, %s7480_s19  ;;  %821 = vrot.lane.b32.xlu1 %v816_v24, %s7522_s9  ;;  %v1157_v23 = vmul.f32 %v1156_v15, %v1119_v3  ;;  %v1159_v24 = vmul.f32 %v1158_v17, %v1120_v6  ;;  %v1319_v15 = vstv %s4830_s10  ;;  %s4896_s10 = sld [smem:[#allocation3 + $0x1f]]  ;;  %s4227_s9 = sld [smem:[#allocation3 + $0x61]] }
 0x11d   :  { %v1160_v29 = vadd.f32 %v1159_v24, %v1157_v23  ;;  %v1320_v23 = vmul.f32 %v1319_v15, %v4827_v55  ;;  %v1354_v24 = vstv %s4846_s0  ;;  %s4898_s0 = sld [smem:[#allocation3 + $0x21]] }
 0x11f   :  { %920 = vrot.lane.b32.xlu0 %v911_v30, %s7551_s25  ;;  %854 = vrot.lane.b32.xlu1 %v847_v31, %s7482_s12  ;;  %v1191_v30 = vstv %s4770_s30  ;;  %v1193_v31 = vstv %s4775_s7  ;;  %s7449_s30 = smov 76   ;;  %s4811_s7 = sld [smem:[#allocation3 + $0x4d]]  ;;  %v1173_v43 = vrot.slane %v1160_v29, %v4592_v59  ;;  %v1169_v4 = vrot.slane %v1160_v29, %v4598_v2 }
 0x120   :  { %v1192_v37 = vmul.f32 %v1191_v30, %v1119_v3  ;;  %v1194_v39 = vmul.f32 %v1193_v31, %v1120_v6  ;;  %s5132_s12 = sld [smem:[#allocation3 + $0x5e]] }
 0x122   :  { %v1195_v45 = vadd.f32 %v1194_v39, %v1192_v37  ;;  %v1355_v37 = vmul.f32 %v1354_v24, %v4827_v55 }
 0x123   :  { %924 = vrot.lane.b32.xlu0 %v919_v34, %s7551_s25  ;;  %885 = vrot.lane.b32.xlu1 %v876_v36, %s7480_s19  ;;  %v1165_v34 = vrot.slane %v1160_v29, %v4588_v56  ;;  %v1082_v36 = vrot.slane %v1069_v12, %v4592_v59  ;;  %v1438_v15 = vstv %s4898_s0  ;;  %s7470_s0 = smov 60  }
 0x124   :  { %v1204_v51 = vrot.slane %v1195_v45, %v4598_v2  ;;  %v1200_v12 = vrot.slane %v1195_v45, %v4588_v56 }
 0x127   :  { %978 = vrot.lane.b32.xlu0 %v969_v40, %s7457_s4  ;;  %889 = vrot.lane.b32.xlu1 %v884_v41, %s7480_s19  ;;  %v1228_v40 = vstv %s4787_s18  ;;  %s7453_s18 = smov 75   ;;  %s7513_s19 = smov 42  }
 0x12b   :  { %982 = vrot.lane.b32.xlu0 %v977_v47, %s7457_s4  ;;  %922 = vrot.lane.b32.xlu1 %v915_v48, %s7551_s25  ;;  %v1227_v47 = vmul.f32 %v1226_v38, %v1119_v3  ;;  %v1229_v48 = vmul.f32 %v1228_v40, %v1120_v6  ;;  %s5580_s25 = sld [smem:[#allocation3 + $0x9]] }
 0x12f   :  { %1015 = vrot.lane.b32.xlu0 %v1008_v53, %s7455_s20  ;;  %980 = vrot.lane.b32.xlu1 %v973_v54, %s7457_s4  ;;  %v1140_v53 = vrot.slane %v1127_v22, %v4592_v59  ;;  %v1230_v54 = vadd.f32 %v1229_v48, %v1227_v47  ;;  %v1208_v22 = vrot.slane %v1195_v45, %v4592_v59  ;;  %v1405_v48 = vstv %s4877_s29  ;;  %s7459_s4 = smov 62   ;;  %s4919_s29 = sld [smem:[#allocation3 + $0x53]] }
 0x131   :  { %v4753_v61 = vpop.permute.xlu0 %255  ;;  %v4755_v62 = vpop.permute.xlu1 %251  ;;  %v1235_v3 = vrot.slane %v1230_v54, %v4588_v56  ;;  %7814 = sst [smem:[#allocation135_spill]] %s5580_s25  ;;  %s5675_s25 = sld [smem:[#allocation3 + $0x47]] }
 0x132   :  { %7690 = vst [vmem:[#allocation12_spill] sm:$0xff] %v4753_v61  ;;  %7691 = vst [vmem:[#allocation13_spill] sm:$0xff] %v4755_v62 }
 0x133   :  { %1048 = vrot.lane.b32.xlu0 %v1039_v63, %s7451_s27  ;;  %1013 = vrot.lane.b32.xlu1 %v1004_v0, %s7455_s20  ;;  %v1286_v63 = vstv %s4811_s7  ;;  %s4851_s7 = sld [smem:[#allocation3 + $0x4f]] }
 0x134   :  { %v1287_v6 = vmul.f32 %v1286_v63, %v4834_v60 }
 0x135   :  { %v4763_v8 = vpop.permute.xlu0 %288  ;;  %v4765_v9 = vpop.permute.xlu1 %253 }
 0x136   :  { %7692 = vst [vmem:[#allocation14_spill] sm:$0xff] %v4763_v8  ;;  %7693 = vst [vmem:[#allocation15_spill] sm:$0xff] %v4765_v9  ;;  %v1288_v14 = vadd.f32 %v1287_v6, %v1285_v5  ;;  %v7835_v8 = vstv %s5607_s24 }
 0x137   :  { %1052 = vrot.lane.b32.xlu0 %v1047_v10, %s7451_s27  ;;  %1017 = vrot.lane.b32.xlu1 %v1012_v11, %s7455_s20  ;;  %v1243_v11 = vrot.slane %v1230_v54, %v4592_v59  ;;  %s4905_s20 = sld [smem:[#allocation3 + $0x52]] }
 0x138   :  { %v1301_v31 = vrot.slane %v1288_v14, %v4592_v59 }
 0x139   :  { %v4777_v18 = vpop.permute.xlu0 %329  ;;  %v4779_v19 = vpop.permute.xlu1 %286 }
 0x13a   :  { %7694 = vst [vmem:[#allocation16_spill] sm:$0xff] %v4777_v18  ;;  %7695 = vst [vmem:[#allocation17_spill] sm:$0xff] %v4779_v19  ;;  %v7839_v18 = vstv %s5628_s15  ;;  %s7844_s15 = sld [smem:[#allocation139_spill]] }
 0x13b   :  { %1085 = vrot.lane.b32.xlu0 %v1078_v20, %s7549_s14  ;;  %1050 = vrot.lane.b32.xlu1 %v1043_v21, %s7451_s27  ;;  %v1293_v21 = vrot.slane %v1288_v14, %v4588_v56  ;;  %s7531_s27 = smov 64  }
 0x13d   :  { %v4789_v25 = vpop.permute.xlu0 %333  ;;  %v4791_v26 = vpop.permute.xlu1 %290 }
 0x13e   :  { %7696 = vst [vmem:[#allocation18_spill] sm:$0xff] %v4789_v25  ;;  %7697 = vst [vmem:[#allocation19_spill] sm:$0xff] %v4791_v26 }
 0x13f   :  { %1143 = vrot.lane.b32.xlu0 %v1136_v27, %s7447_s21  ;;  %1083 = vrot.lane.b32.xlu1 %v1074_v28, %s7549_s14  ;;  %v1322_v27 = vmul.f32 %v1321_v16, %v4834_v60  ;;  %v1356_v28 = vstv %s4851_s7  ;;  %s7461_s7 = smov 63  }
 0x140   :  { %v1357_v38 = vmul.f32 %v1356_v28, %v4834_v60 }
 0x141   :  { %v4799_v32 = vpop.permute.xlu0 %366  ;;  %v4801_v33 = vpop.permute.xlu1 %331 }
 0x142   :  { %7698 = vst [vmem:[#allocation20_spill] sm:$0xff] %v4799_v32  ;;  %7699 = vst [vmem:[#allocation21_spill] sm:$0xff] %v4801_v33  ;;  %v1358_v45 = vadd.f32 %v1357_v38, %v1355_v37  ;;  %v1475_v38 = vstv %s4919_s29  ;;  %s4971_s29 = sld [smem:[#allocation3 + $0x25]] }
 0x143   :  { %1174 = vrot.lane.b32.xlu0 %v1165_v34, %s7449_s30  ;;  %1087 = vrot.lane.b32.xlu1 %v1082_v36, %s7549_s14  ;;  %v1239_v34 = vrot.slane %v1230_v54, %v4598_v2  ;;  %v1323_v36 = vadd.f32 %v1322_v27, %v1320_v23  ;;  %s5578_s14 = sld [smem:[#allocation3 + $0x39]] }
 0x144   :  { %v1363_v54 = vrot.slane %v1358_v45, %v4588_v56  ;;  %v1371_v6 = vrot.slane %v1358_v45, %v4592_v59  ;;  %v1367_v27 = vrot.slane %v1358_v45, %v4598_v2 }
 0x145   :  { %v4813_v41 = vpop.permute.xlu0 %399  ;;  %v4815_v42 = vpop.permute.xlu1 %364  ;;  %v1328_v58 = vrot.slane %v1323_v36, %v4588_v56 }
 0x146   :  { %7700 = vst [vmem:[#allocation22_spill] sm:$0xff] %v4813_v41  ;;  %7701 = vst [vmem:[#allocation23_spill] sm:$0xff] %v4815_v42 }
 0x147   :  { %1178 = vrot.lane.b32.xlu0 %v1173_v43, %s7449_s30  ;;  %1141 = vrot.lane.b32.xlu1 %v1132_v44, %s7447_s21  ;;  %v1332_v43 = vrot.slane %v1323_v36, %v4598_v2  ;;  %v1297_v44 = vrot.slane %v1288_v14, %v4598_v2  ;;  %v1389_v14 = vstv %s4896_s10  ;;  %s4942_s10 = sld [smem:[#allocation3 + $0x23]] }
 0x148   :  { %v1390_v28 = vmul.f32 %v1389_v14, %v4827_v55 }
 0x149   :  { %v4821_v49 = vpop.permute.xlu0 %403  ;;  %v4823_v50 = vpop.permute.xlu1 %368  ;;  %7813 = sst [smem:[#allocation134_spill]] %s5578_s14  ;;  %s5667_s14 = sld [smem:[#allocation3 + $0x46]] }
 0x14a   :  { %7702 = vst [vmem:[#allocation24_spill] sm:$0xff] %v4821_v49  ;;  %7703 = vst [vmem:[#allocation25_spill] sm:$0xff] %v4823_v50 }
 0x14b   :  { %1211 = vrot.lane.b32.xlu0 %v1204_v51, %s7453_s18  ;;  %1145 = vrot.lane.b32.xlu1 %v1140_v53, %s7447_s21  ;;  %s7547_s21 = smov 74  }
 0x14d   :  { %v4839_v0 = vpop.permute.xlu0 %436  ;;  %v4841_v1 = vpop.permute.xlu1 %401 }
 0x14e   :  { %7704 = vst [vmem:[#allocation26_spill] sm:$0xff] %v4841_v1 }
 0x14f   :  { %1244 = vrot.lane.b32.xlu0 %v1235_v3, %s7547_s21  ;;  %1176 = vrot.lane.b32.xlu1 %v1169_v4, %s7449_s30  ;;  %s4871_s30 = sld [smem:[#allocation3 + $0x20]]  ;;  %v1406_v3 = vmul.f32 %v1405_v48, %v4834_v60 }
 0x151   :  { %v4853_v7 = vpop.permute.xlu0 %495  ;;  %v4855_v10 = vpop.permute.xlu1 %434 }
 0x152   :  { %7705 = vst [vmem:[#allocation27_spill] sm:$0xff] %v4853_v7 }
 0x153   :  { %1248 = vrot.lane.b32.xlu0 %v1243_v11, %s7547_s21  ;;  %1209 = vrot.lane.b32.xlu1 %v1200_v12, %s7453_s18  ;;  %v1336_v11 = vrot.slane %v1323_v36, %v4592_v59 }
 0x155   :  { %v4863_v17 = vpop.permute.xlu0 %528  ;;  %v4865_v20 = vpop.permute.xlu1 %438  ;;  %v1403_v47 = vstv %s4871_s30  ;;  %s4914_s30 = sld [smem:[#allocation3 + $0x22]] }
 0x156   :  { %7706 = vst [vmem:[#allocation28_spill] sm:$0xff] %v4863_v17  ;;  %v1404_v63 = vmul.f32 %v1403_v47, %v4827_v55 }
 0x157   :  { %1302 = vrot.lane.b32.xlu0 %v1293_v21, %s7531_s27  ;;  %1213 = vrot.lane.b32.xlu1 %v1208_v22, %s7453_s18  ;;  %s4902_s18 = sld [smem:[#allocation3 + $0x50]]  ;;  %v1440_v21 = vstv %s4905_s20  ;;  %s4949_s20 = sld [smem:[#allocation3 + $0x54]] }
 0x158   :  { %v1407_v12 = vadd.f32 %v1406_v3, %v1404_v63  ;;  %v1441_v37 = vmul.f32 %v1440_v21, %v4834_v60 }
 0x159   :  { %v4879_v29 = vpop.permute.xlu0 %532  ;;  %v4881_v30 = vpop.permute.xlu1 %493 }
 0x15a   :  { %7707 = vst [vmem:[#allocation29_spill] sm:$0xff] %v4879_v29  ;;  %7708 = vst [vmem:[#allocation30_spill] sm:$0xff] %v4881_v30  ;;  %v1412_v24 = vrot.slane %v1407_v12, %v4588_v56  ;;  %v1420_v45 = vrot.slane %v1407_v12, %v4592_v59 }
 0x15b   :  { %1306 = vrot.lane.b32.xlu0 %v1301_v31, %s7531_s27  ;;  %1246 = vrot.lane.b32.xlu1 %v1239_v34, %s7547_s21  ;;  %v1439_v31 = vmul.f32 %v1438_v15, %v4827_v55  ;;  %v1473_v34 = vstv %s4914_s30  ;;  %s4962_s30 = sld [smem:[#allocation3 + $0x55]]  ;;  %v1508_v15 = vstv %s4942_s10  ;;  %s7467_s10 = smov 58  }
 0x15c   :  { %s5576_s21 = sld [smem:[#allocation3 + $0x8]] }
 0x15d   :  { %v4889_v39 = vpop.permute.xlu0 %565  ;;  %v4891_v40 = vpop.permute.xlu1 %497  ;;  %v1391_v16 = vstv %s4902_s18  ;;  %v1442_v48 = vadd.f32 %v1441_v37, %v1439_v31  ;;  %s4957_s18 = sld [smem:[#allocation3 + $0x24]]  ;;  %v1562_v31 = vld [vmem:[#allocation2] ss:$2 sm:$0x7] }
 0x15e   :  { %7709 = vst [vmem:[#allocation31_spill] sm:$0xff] %v4889_v39  ;;  %7710 = vst [vmem:[#allocation32_spill] sm:$0xff] %v4891_v40  ;;  %v1392_v36 = vmul.f32 %v1391_v16, %v4834_v60  ;;  %v1510_v16 = vstv %s4949_s20  ;;  %v1563_v37 = vld [vmem:[#allocation2 + $0x1] ss:$2 sm:$0x7]  ;;  %s4997_s20 = sld [smem:[#allocation3 + $0x26]] }
 0x15f   :  { %1339 = vrot.lane.b32.xlu0 %v1332_v43, %s7461_s7  ;;  %1304 = vrot.lane.b32.xlu1 %v1297_v44, %s7531_s27 }
 0x160   :  { %v1393_v47 = vadd.f32 %v1392_v36, %v1390_v28  ;;  %v1509_v28 = vmul.f32 %v1508_v15, %v4827_v55  ;;  %v1511_v36 = vmul.f32 %v1510_v16, %v4834_v60 }
 0x161   :  { %v4907_v51 = vpop.permute.xlu0 %596  ;;  %v4909_v53 = vpop.permute.xlu1 %530 }
 0x162   :  { %7711 = vst [vmem:[#allocation33_spill] sm:$0xff] %v4909_v53  ;;  %7812 = sst [smem:[#allocation133_spill]] %s5576_s21  ;;  %s7823_s21 = smov 126   ;;  %v3378_v53 = vstv %s5626_s17 }
 0x163   :  { %1372 = vrot.lane.b32.xlu0 %v1363_v54, %s7459_s4  ;;  %1337 = vrot.lane.b32.xlu1 %v1328_v58, %s7461_s7  ;;  %v1474_v54 = vmul.f32 %v1473_v34, %v4827_v55  ;;  %v1476_v58 = vmul.f32 %v1475_v38, %v4834_v60  ;;  %v1566_v34 = vstv %s4957_s18  ;;  %v1568_v38 = vstv %s4962_s30  ;;  %s5002_s18 = sld [smem:[#allocation3 + $0x57]]  ;;  %s5714_s17 = sld [smem:[#allocation3 + $0x1d]] }
 0x164   :  { %v1455_v55 = vrot.slane %v1442_v48, %v4592_v59  ;;  %v1569_v60 = vmul.f32 %v1568_v38, %v1563_v37  ;;  %s5010_s30 = sld [smem:[#allocation3 + $0x27]]  ;;  %s7840_s24 = sld [smem:[#allocation133_spill]] }
 0x165   :  { %v4921_v4 = vpop.permute.xlu0 %600  ;;  %v4923_v5 = vpop.permute.xlu1 %563  ;;  %v1477_v14 = vadd.f32 %v1476_v58, %v1474_v54  ;;  %v1512_v58 = vadd.f32 %v1511_v36, %v1509_v28 }
 0x166   :  { %7712 = vst [vmem:[#allocation34_spill] sm:$0xff] %v4923_v5 }
 0x167   :  { %1376 = vrot.lane.b32.xlu0 %v1371_v6, %s7459_s4  ;;  %1341 = vrot.lane.b32.xlu1 %v1336_v11, %s7461_s7  ;;  %v1451_v6 = vrot.slane %v1442_v48, %v4598_v2  ;;  %v1416_v11 = vrot.slane %v1407_v12, %v4598_v2  ;;  %s4976_s7 = sld [smem:[#allocation3 + $0x56]]  ;;  %v1447_v12 = vrot.slane %v1442_v48, %v4588_v56 }
 0x168   :  { %v1490_v54 = vrot.slane %v1477_v14, %v4592_v59  ;;  %v1521_v48 = vrot.slane %v1512_v58, %v4598_v2  ;;  %v1525_v13 = vrot.slane %v1512_v58, %v4592_v59 }
 0x169   :  { %v4933_v22 = vpop.permute.xlu0 %654  ;;  %v4935_v23 = vpop.permute.xlu1 %567 }
 0x16a   :  { %7713 = vst [vmem:[#allocation35_spill] sm:$0xff] %v4933_v22  ;;  %7714 = vst [vmem:[#allocation36_spill] sm:$0xff] %v4935_v23  ;;  %v5054_v23 = vld [vmem:[#allocation2] ss:$2 sm:$0x7] }
 0x16b   :  { %1421 = vrot.lane.b32.xlu0 %v1412_v24, %s7470_s0  ;;  %1374 = vrot.lane.b32.xlu1 %v1367_v27, %s7459_s4  ;;  %s7463_s4 = smov 59   ;;  %v1482_v27 = vrot.slane %v1477_v14, %v4588_v56 }
 0x16d   :  { %v4951_v43 = vpop.permute.xlu0 %658  ;;  %v4953_v44 = vpop.permute.xlu1 %598  ;;  %v1603_v15 = vstv %s4976_s7  ;;  %s5014_s7 = sld [smem:[#allocation3 + $0x58]] }
 0x16e   :  { %7715 = vst [vmem:[#allocation37_spill] sm:$0xff] %v4951_v43  ;;  %v1604_v36 = vmul.f32 %v1603_v15, %v1563_v37 }
 0x16f   :  { %1425 = vrot.lane.b32.xlu0 %v1420_v45, %s7470_s0  ;;  %1395 = vrot.lane.b32.xlu1 %v1393_v47, %s7531_s27  ;;  %s5555_s27 = sld [smem:[#allocation3 + $0x4]] }
 0x171   :  { %v4964_v63 = vpop.permute.xlu0 %691  ;;  %v4966_v3 = vpop.permute.xlu1 %656 }
 0x172   :  { %7716 = vst [vmem:[#allocation38_spill] sm:$0xff] %v4964_v63  ;;  %7717 = vst [vmem:[#allocation39_spill] sm:$0xff] %v4966_v3 }
 0x173   :  { %1458 = vrot.lane.b32.xlu0 %v1451_v6, %s7463_s4  ;;  %1423 = vrot.lane.b32.xlu1 %v1416_v11, %s7470_s0  ;;  %v1567_v6 = vmul.f32 %v1566_v34, %v1562_v31  ;;  %v1601_v11 = vstv %s4971_s29  ;;  %s7545_s29 = smov 48   ;;  %s5064_s0 = sld [smem:[#allocation3 + $0x5a]] }
 0x174   :  { %v1602_v34 = vmul.f32 %v1601_v11, %v1562_v31  ;;  %v1636_v11 = vstv %s4997_s20  ;;  %s7476_s20 = smov 46  }
 0x175   :  { %v4978_v21 = vpop.permute.xlu0 %724  ;;  %v4980_v24 = vpop.permute.xlu1 %689  ;;  %v1570_v28 = vadd.f32 %v1569_v60, %v1567_v6  ;;  %v1638_v60 = vstv %s5002_s18  ;;  %s5038_s18 = sld [smem:[#allocation3 + $0x59]] }
 0x176   :  { %7718 = vst [vmem:[#allocation40_spill] sm:$0xff] %v4978_v21  ;;  %7719 = vst [vmem:[#allocation41_spill] sm:$0xff] %v4980_v24  ;;  %v1605_v6 = vadd.f32 %v1604_v36, %v1602_v34  ;;  %v1639_v34 = vmul.f32 %v1638_v60, %v1563_v37  ;;  %v1671_v36 = vstv %s5014_s7  ;;  %s7478_s7 = smov 45  }
 0x177   :  { %1491 = vrot.lane.b32.xlu0 %v1482_v27, %s7467_s10  ;;  %1456 = vrot.lane.b32.xlu1 %v1447_v12, %s7463_s4  ;;  %v1486_v12 = vrot.slane %v1477_v14, %v4598_v2  ;;  %v1579_v14 = vrot.slane %v1570_v28, %v4598_v2 }
 0x179   :  { %v4990_v45 = vpop.permute.xlu0 %728  ;;  %v4992_v47 = vpop.permute.xlu1 %693 }
 0x17a   :  { %7720 = vst [vmem:[#allocation42_spill] sm:$0xff] %v4990_v45  ;;  %7721 = vst [vmem:[#allocation43_spill] sm:$0xff] %v4992_v47  ;;  %v1669_v45 = vstv %s5010_s30  ;;  %s5057_s30 = sld [smem:[#allocation3 + $0x29]] }
 0x17b   :  { %1495 = vrot.lane.b32.xlu0 %v1490_v54, %s7467_s10  ;;  %1460 = vrot.lane.b32.xlu1 %v1455_v55, %s7463_s4  ;;  %v1517_v55 = vrot.slane %v1512_v58, %v4588_v56  ;;  %s7472_s4 = smov 47   ;;  %v1618_v58 = vrot.slane %v1605_v6, %v4592_v59  ;;  %v1670_v21 = vmul.f32 %v1669_v45, %v1562_v31 }
 0x17d   :  { %v5004_v16 = vpop.permute.xlu0 %761  ;;  %v5006_v27 = vpop.permute.xlu1 %726 }
 0x17e   :  { %7722 = vst [vmem:[#allocation44_spill] sm:$0xff] %v5006_v27 }
 0x17f   :  { %1528 = vrot.lane.b32.xlu0 %v1521_v48, %s7545_s29  ;;  %1493 = vrot.lane.b32.xlu1 %v1486_v12, %s7467_s10  ;;  %v1610_v12 = vrot.slane %v1605_v6, %v4588_v56  ;;  %s5033_s10 = sld [smem:[#allocation3 + $0x28]] }
 0x181   :  { %v5016_v38 = vpop.permute.xlu0 %819  ;;  %v5018_v54 = vpop.permute.xlu1 %759 }
 0x182   :  { %7723 = vst [vmem:[#allocation45_spill] sm:$0xff] %v5016_v38  ;;  %v1637_v38 = vmul.f32 %v1636_v11, %v1562_v31  ;;  %v1575_v11 = vrot.slane %v1570_v28, %v4588_v56  ;;  %v5061_v31 = vld [vmem:[#allocation2 + $0x1] ss:$2 sm:$0x7] }
 0x183   :  { %1586 = vrot.lane.b32.xlu0 %v1579_v14, %s7472_s4  ;;  %1526 = vrot.lane.b32.xlu1 %v1517_v55, %s7545_s29 }
 0x185   :  { %v5026_v15 = vpop.permute.xlu0 %852  ;;  %v5028_v48 = vpop.permute.xlu1 %763  ;;  %v1727_v5 = vstv %s5033_s10  ;;  %s5073_s10 = sld [smem:[#allocation3 + $0x2a]] }
 0x186   :  { %7724 = vst [vmem:[#allocation46_spill] sm:$0xff] %v5026_v15  ;;  %v1640_v15 = vadd.f32 %v1639_v34, %v1637_v38  ;;  %v1614_v38 = vrot.slane %v1605_v6, %v4598_v2  ;;  %v1728_v34 = vmul.f32 %v1727_v5, %v5054_v23 }
 0x187   :  { %1619 = vrot.lane.b32.xlu0 %v1610_v12, %s7476_s20  ;;  %1530 = vrot.lane.b32.xlu1 %v1525_v13, %s7545_s29  ;;  %v1672_v13 = vmul.f32 %v1671_v36, %v1563_v37  ;;  %v1729_v37 = vstv %s5038_s18  ;;  %s5078_s18 = sld [smem:[#allocation3 + $0x5b]]  ;;  %s5574_s29 = sld [smem:[#allocation3 + $0x38]] }
 0x188   :  { %v1730_v36 = vmul.f32 %v1729_v37, %v5061_v31  ;;  %v1645_v5 = vrot.slane %v1640_v15, %v4588_v56 }
 0x189   :  { %v5040_v14 = vpop.permute.xlu0 %856  ;;  %v5042_v55 = vpop.permute.xlu1 %817  ;;  %v1673_v27 = vadd.f32 %v1672_v13, %v1670_v21  ;;  %v1764_v13 = vstv %s5064_s0  ;;  %s5105_s0 = sld [smem:[#allocation3 + $0x5c]] }
 0x18a   :  { %7725 = vst [vmem:[#allocation47_spill] sm:$0xff] %v5040_v14  ;;  %7726 = vst [vmem:[#allocation48_spill] sm:$0xff] %v5042_v55  ;;  %v1649_v14 = vrot.slane %v1640_v15, %v4598_v2  ;;  %v1583_v55 = vrot.slane %v1570_v28, %v4592_v59 }
 0x18b   :  { %1623 = vrot.lane.b32.xlu0 %v1618_v58, %s7476_s20  ;;  %1584 = vrot.lane.b32.xlu1 %v1575_v11, %s7472_s4  ;;  %v1678_v21 = vrot.slane %v1673_v27, %v4588_v56  ;;  %v1686_v6 = vrot.slane %v1673_v27, %v4592_v59  ;;  %v1731_v58 = vadd.f32 %v1730_v36, %v1728_v34  ;;  %v1762_v11 = vstv %s5057_s30  ;;  %s7520_s30 = smov 43  }
 0x18c   :  { %v1765_v34 = vmul.f32 %v1764_v13, %v5061_v31  ;;  %v7733_v36 = vlaneseq }
 0x18d   :  { %v5048_v60 = vpop.permute.xlu0 %887  ;;  %v5050_v12 = vpop.permute.xlu1 %821 }
 0x18e   :  { %7727 = vst [vmem:[#allocation49_spill] sm:$0xff] %v5048_v60  ;;  %7728 = vst [vmem:[#allocation50_spill] sm:$0xff] %v5050_v12  ;;  %v1797_v60 = vstv %s5073_s10  ;;  %s5114_s10 = sld [smem:[#allocation3 + $0x2c]] }
 0x18f   :  { %1656 = vrot.lane.b32.xlu0 %v1649_v14, %s7478_s7  ;;  %1588 = vrot.lane.b32.xlu1 %v1583_v55, %s7472_s4  ;;  %s7543_s4 = smov 44  }
 0x191   :  { %v5066_v45 = vpop.permute.xlu0 %920  ;;  %v5068_v28 = vpop.permute.xlu1 %854 }
 0x192   :  { %7729 = vst [vmem:[#allocation51_spill] sm:$0xff] %v5068_v28  ;;  %v1653_v28 = vrot.slane %v1640_v15, %v4592_v59 }
 0x193   :  { %1687 = vrot.lane.b32.xlu0 %v1678_v21, %s7543_s4  ;;  %1621 = vrot.lane.b32.xlu1 %v1614_v38, %s7476_s20  ;;  %v1736_v38 = vrot.slane %v1731_v58, %v4588_v56  ;;  %s5098_s20 = sld [smem:[#allocation3 + $0x2b]] }
 0x195   :  { %v5080_v14 = vpop.permute.xlu0 %924  ;;  %v5082_v55 = vpop.permute.xlu1 %885 }
 0x196   :  { %7730 = vst [vmem:[#allocation52_spill] sm:$0xff] %v5082_v55  ;;  %v1763_v55 = vmul.f32 %v1762_v11, %v5054_v23  ;;  %v1744_v11 = vrot.slane %v1731_v58, %v4592_v59 }
 0x197   :  { %1691 = vrot.lane.b32.xlu0 %v1686_v6, %s7543_s4  ;;  %1654 = vrot.lane.b32.xlu1 %v1645_v5, %s7478_s7  ;;  %v38_v6 = vand.u32 127, %v7733_v36  ;;  %v1799_v5 = vstv %s5078_s18  ;;  %s5119_s18 = sld [smem:[#allocation3 + $0x5d]] }
 0x198   :  { %v1766_v12 = vadd.f32 %v1765_v34, %v1763_v55  ;;  %v1740_v55 = vrot.slane %v1731_v58, %v4598_v2 }
 0x199   :  { %v5090_v37 = vpop.permute.xlu0 %978  ;;  %v5092_v21 = vpop.permute.xlu1 %889  ;;  %v39_v13 = vadd.s32 128, %v38_v6 }
 0x19a   :  { %7731 = vst [vmem:[#allocation53_spill] sm:$0xff] %v5090_v37  ;;  %7732 = vst [vmem:[#allocation54_spill] sm:$0xff] %v5092_v21  ;;  %v1682_v21 = vrot.slane %v1673_v27, %v4598_v2 }
 0x19b   :  { %1745 = vrot.lane.b32.xlu0 %v1736_v38, %s7520_s30  ;;  %1658 = vrot.lane.b32.xlu1 %v1653_v28, %s7478_s7  ;;  %v1798_v38 = vmul.f32 %v1797_v60, %v5054_v23  ;;  %v1800_v28 = vmul.f32 %v1799_v5, %v5061_v31  ;;  %s5121_s7 = sld [smem:[#allocation3 + $0x2d]]  ;;  %v1775_v60 = vrot.slane %v1766_v12, %v4598_v2  ;;  %v1834_v5 = vstv %s5105_s0  ;;  %s7526_s0 = smov 29  }
 0x19d   :  { %v5107_v37 = vpop.permute.xlu0 %982  ;;  %v5109_v15 = vpop.permute.xlu1 %922  ;;  %v1801_v34 = vadd.f32 %v1800_v28, %v1798_v38  ;;  %v1771_v38 = vrot.slane %v1766_v12, %v4588_v56  ;;  %v1892_v39 = vstv %s5119_s18  ;;  %s4222_s18 = sld [smem:[#allocation3 + $0x2e]] }
 0x19e   :  { %7734 = vst [vmem:[#allocation55_spill] sm:$0xff] %v5107_v37 }
 0x19f   :  { %1749 = vrot.lane.b32.xlu0 %v1744_v11, %s7520_s30  ;;  %1689 = vrot.lane.b32.xlu1 %v1682_v21, %s7543_s4  ;;  %v1832_v11 = vstv %s5098_s20  ;;  %v5134_v21 = vand.u32 15, %v39_v13  ;;  %v1806_v58 = vrot.slane %v1801_v34, %v4588_v56  ;;  %s7511_s20 = smov 32   ;;  %v1835_v13 = vmul.f32 %v1834_v5, %v5061_v31  ;;  %s5571_s4 = sld [smem:[#allocation3 + $0x7]] }
 0x1a0   :  { %v1833_v28 = vmul.f32 %v1832_v11, %v5054_v23 }
 0x1a1   :  { %v5123_v36 = vpop.permute.xlu0 %1015  ;;  %v5125_v27 = vpop.permute.xlu1 %980  ;;  %v1925_v23 = vstv %s5121_s7  ;;  %s7505_s7 = smov 30  }
 0x1a2   :  { %7735 = vst [vmem:[#allocation56_spill] sm:$0xff] %v5123_v36  ;;  %7736 = vst [vmem:[#allocation57_spill] sm:$0xff] %v5125_v27  ;;  %v5147_v27 = vand.u32 15, %v38_v6  ;;  %v1814_v6 = vrot.slane %v1801_v34, %v4592_v59  ;;  %v5165_v24 = vadd.f32 %v1835_v13, %v1833_v28 }
 0x1a3   :  { %1782 = vrot.lane.b32.xlu0 %v1775_v60, %s7513_s19  ;;  %1747 = vrot.lane.b32.xlu1 %v1740_v55, %s7520_s30  ;;  %v5144_v60 = vld [vmem:[#allocation2] ss:$2 sm:$0x7]  ;;  %v1890_v55 = vstv %s5114_s10  ;;  %s7561_s10 = smov 3   ;;  %s4226_s30 = sld [smem:[#allocation3 + $0x30]] }
 0x1a4   :  { %v1891_v31 = vmul.f32 %v1890_v55, %v5144_v60  ;;  %v5169_v5 = vadd.s32 4294967293, %v5147_v27  ;;  %v1926_v28 = vmul.f32 %v1925_v23, %v5144_v60  ;;  %v441_v55 = vsel %vm440_vm7, %v4855_v10, %v4839_v0 }
 0x1a5   :  { %v5137_v36 = vpop.permute.xlu0 %1048  ;;  %v5139_v37 = vpop.permute.xlu1 %1013  ;;  %v5197_v43 = vadd.s32 4294967294, %v5147_v27  ;;  %v5207_v10 = vadd.s32 4294967295, %v5147_v27  ;;  %7811 = sst [smem:[#allocation132_spill]] %s5571_s4  ;;  %s5665_s4 = sld [smem:[#allocation3 + $0x15]] }
 0x1a6   :  { %7737 = vst [vmem:[#allocation58_spill] sm:$0xff] %v5137_v36  ;;  %7738 = vst [vmem:[#allocation59_spill] sm:$0xff] %v5139_v37  ;;  %v5153_v36 = vadd.s32 4294967293, %v5134_v21  ;;  %v5155_v37 = vld [vmem:[#allocation2 + $0x1] ss:$2 sm:$0x7] }
 0x1a7   :  { %1815 = vrot.lane.b32.xlu0 %v1806_v58, %s7511_s20  ;;  %1780 = vrot.lane.b32.xlu1 %v1771_v38, %s7513_s19  ;;  %v1779_v58 = vrot.slane %v1766_v12, %v4592_v59  ;;  %v442_v38 = vsel %vm440_vm7, %v4839_v0, %v4865_v20  ;;  %v5179_v12 = vadd.s32 4294967294, %v5134_v21  ;;  %7743 = vst [vmem:[#allocation64_spill] sm:$0xff] %v5197_v43  ;;  %vm7648_vm10 = vcmp.ge.s32.totalorder %v5169_v5, 0 }
 0x1a8   :  { %vm7647_vm8 = vcmp.ge.s32.totalorder %v5153_v36, 0  ;;  %v767_v0 = vsel %vm7494_vm9, %v5004_v16, %v5028_v48  ;;  %7744 = vst [vmem:[#allocation65_spill] sm:$0xff] %v5207_v10  ;;  %v766_v48 = vsel %vm7494_vm9, %v5018_v54, %v5004_v16  ;;  %vm74_vm13 = vcmp.ge.s32.totalorder %v5197_v43, 0 }
 0x1a9   :  { %v5159_v11 = vpop.permute.xlu0 %1052  ;;  %v5161_v47 = vpop.permute.xlu1 %1017  ;;  %7741 = vst [vmem:[#allocation62_spill] sm:$0xff] %v5179_v12  ;;  %v446_v63 = vsel %vm7647_vm8, %v442_v38, 0.0  ;;  %vm7658_vm11 = vcmp.ge.s32.totalorder %v5179_v12, 0  ;;  %v5232_v16 = vadd.s32 1, %v5134_v21  ;;  %v770_v54 = vsel %vm74_vm13, %v766_v48, 0.0 }
 0x1aa   :  { %7739 = vst [vmem:[#allocation60_spill] sm:$0xff] %v5159_v11  ;;  %7740 = vst [vmem:[#allocation61_spill] sm:$0xff] %v5161_v47  ;;  %v1893_v11 = vmul.f32 %v1892_v39, %v5155_v37  ;;  %v1927_v47 = vstv %s5132_s12  ;;  %v1810_v39 = vrot.slane %v1801_v34, %v4598_v2  ;;  %s7541_s12 = smov 31   ;;  %vm7491_vm15 = vcmp.ge.s32.totalorder %v5207_v10, 0 }
 0x1ab   :  { %1819 = vrot.lane.b32.xlu0 %v1814_v6, %s7511_s20  ;;  %1784 = vrot.lane.b32.xlu1 %v1779_v58, %s7513_s19  ;;  %v1845_v6 = vrot.slane %v5165_v24, %v4598_v2  ;;  %v1928_v23 = vmul.f32 %v1927_v47, %v5155_v37  ;;  %v445_v47 = vsel %vm7648_vm10, %v441_v55, 0.0  ;;  %7748 = vst [vmem:[#allocation69_spill] sm:$0xff] %v5232_v16  ;;  %vm7685_vm3 = vcmp.lt.s32.totalorder %v5232_v16, 16  ;;  %s5426_s19 = sld [smem:[#allocation3 + $0x60]] }
 0x1ac   :  { %v5191_v58 = vadd.f32 %v1893_v11, %v1891_v31  ;;  %v449_v11 = vcombine.low %v445_v47, %v446_v63  ;;  %v771_v63 = vsel %vm7658_vm11, %v767_v0, 0.0  ;;  %v1849_v55 = vrot.slane %v5165_v24, %v4592_v59 }
 0x1ad   :  { %v1086_v13 = vpop.permute.xlu0 %1085  ;;  %v5186_v20 = vpop.permute.xlu1 %1050  ;;  %v5211_v34 = vadd.f32 %v1928_v23, %v1926_v28  ;;  %v5226_v28 = vadd.s32 1, %v5147_v27  ;;  %v774_v0 = vcombine.low %v770_v54, %v771_v63 }
 0x1ae   :  { %7742 = vst [vmem:[#allocation63_spill] sm:$0xff] %v5186_v20  ;;  %v5223_v20 = vadd.s32 4294967295, %v5134_v21  ;;  %v456_v23 = vrot.slane %v449_v11, %v4566_v35  ;;  %v604_v11 = vsel %vm602_vm14, %v4953_v44, %v4921_v4  ;;  %v1899_v54 = vrot.slane %v5191_v58, %v4588_v56 }
 0x1af   :  { %1852 = vrot.lane.b32.xlu0 %v1845_v6, %s7541_s12  ;;  %1817 = vrot.lane.b32.xlu1 %v1810_v39, %s7511_s20  ;;  %v1903_v6 = vrot.slane %v5191_v58, %v4598_v2  ;;  %v1841_v39 = vrot.slane %v5165_v24, %v4588_v56  ;;  %7747 = vst [vmem:[#allocation68_spill] sm:$0xff] %v5226_v28  ;;  %vm7686_vm2 = vcmp.lt.s32.totalorder %v5226_v28, 16  ;;  %s5418_s20 = sld [smem:[#allocation3 + $0x2f]] }
 0x1b0   :  { %7746 = vst [vmem:[#allocation67_spill] sm:$0xff] %v5223_v20  ;;  %vm7490_vm1 = vcmp.ge.s32.totalorder %v5223_v20, 0  ;;  %v603_v24 = vsel %vm602_vm14, %v4907_v51, %v4953_v44  ;;  %v781_v4 = vrot.slane %v774_v0, %v4566_v35  ;;  %v927_v0 = vsel %vm7492_vm4, %v5066_v45, %v5109_v15 }
 0x1b1   :  { %v5216_v31 = vpop.permute.xlu0 %1143  ;;  %v1084_v38 = vpop.permute.xlu1 %1083  ;;  %v1907_v45 = vrot.slane %v5191_v58, %v4592_v59  ;;  %v1938_v58 = vrot.slane %v5211_v34, %v4598_v2  ;;  %7791 = sst [smem:[#allocation112_spill]] %s5426_s19 }
 0x1b2   :  { %7745 = vst [vmem:[#allocation66_spill] sm:$0xff] %v5216_v31  ;;  %v1090_v47 = vsel %vm7493_vm12, %v1084_v38, %v1086_v13 }
 0x1b3   :  { %1910 = vrot.lane.b32.xlu0 %v1903_v6, %s7505_s7  ;;  %1850 = vrot.lane.b32.xlu1 %v1841_v39, %s7541_s12  ;;  %v1934_v6 = vrot.slane %v5211_v34, %v4588_v56  ;;  %v1094_v51 = vsel %vm7491_vm15, %v1090_v47, 0.0  ;;  %v928_v47 = vsel %vm7492_vm4, %v5109_v15, %v5080_v14  ;;  %v788_v14 = vrot.slane %v781_v4, %v4566_v35 }
 0x1b4   :  { %vm1250_vm4 = vcmask 605184  }
 0x1b5   :  { %v5242_v31 = vpop.permute.xlu0 %1174  ;;  %v1088_v22 = vpop.permute.xlu1 %1087  ;;  %7790 = sst [smem:[#allocation111_spill]] %s5418_s20 }
 0x1b6   :  { %7749 = vst [vmem:[#allocation70_spill] sm:$0xff] %v5242_v31  ;;  %v1091_v48 = vsel %vm7493_vm12, %v1086_v13, %v1088_v22  ;;  %v5262_v22 = vadd.s32 2, %v5147_v27  ;;  %v5265_v13 = vadd.s32 2, %v5134_v21 }
 0x1b7   :  { %v1095_v38 = vsel %vm7490_vm1, %v1091_v48, 0.0  ;;  %1943 = vrot.lane.b32.xlu0 %v1934_v6, %s7526_s0  ;;  %1854 = vrot.lane.b32.xlu1 %v1849_v55, %s7541_s12  ;;  %v463_v55 = vrot.slane %v456_v23, %v4566_v35  ;;  %v607_v6 = vsel %vm7686_vm2, %v603_v24, 0.0  ;;  %v608_v48 = vsel %vm7685_vm3, %v604_v11, 0.0  ;;  %s5569_s12 = sld [smem:[#allocation3 + $0x37]] }
 0x1b8   :  { %7750 = vst [vmem:[#allocation71_spill] sm:$0xff] %v5262_v22  ;;  %7751 = vst [vmem:[#allocation72_spill] sm:$0xff] %v5265_v13  ;;  %v1098_v44 = vcombine.low %v1094_v51, %v1095_v38  ;;  %vm100_vm1 = vcmp.lt.s32.totalorder %v5262_v22, 16  ;;  %vm7646_vm15 = vcmp.lt.s32.totalorder %v5265_v13, 16  ;;  %v611_v23 = vcombine.low %v607_v6, %v608_v48 }
 0x1b9   :  { %v5270_v39 = vpop.permute.xlu0 %1178  ;;  %v5272_v63 = vpop.permute.xlu1 %1141  ;;  %v931_v15 = vsel %vm100_vm1, %v927_v0, 0.0  ;;  %v932_v51 = vsel %vm7646_vm15, %v928_v47, 0.0  ;;  %v7873_v22 = vstv %s5675_s25  ;;  %v7874_v13 = vstv %s5684_s8  ;;  %s7877_s8 = sld [smem:[#allocation136_spill]]  ;;  %s5964_s25 = sld [smem:[#allocation3 + $0x56]] }
 0x1ba   :  { %7752 = vst [vmem:[#allocation73_spill] sm:$0xff] %v5270_v39  ;;  %7753 = vst [vmem:[#allocation74_spill] sm:$0xff] %v5272_v63  ;;  %v1105_v24 = vrot.slane %v1098_v44, %v4566_v35  ;;  %v618_v44 = vrot.slane %v611_v23, %v4566_v35 }
 0x1bb   :  { %1908 = vrot.lane.b32.xlu1 %v1899_v54, %s7505_s7  ;;  %464 = vrot.lane.b32.xlu0 %v463_v55, %s7561_s10  ;;  %v935_v54 = vcombine.low %v931_v15, %v932_v51  ;;  %v5327_v51 = vadd.s32 3, %v5134_v21 }
 0x1bc   :  { %v1112_v4 = vrot.slane %v1105_v24, %v4566_v35  ;;  %v625_v23 = vrot.slane %v618_v44, %v4566_v35  ;;  %v5324_v24 = vadd.s32 3, %v5147_v27 }
 0x1bd   :  { %v5292_v11 = vpop.permute.xlu0 %1211  ;;  %v5294_v38 = vpop.permute.xlu1 %1145  ;;  %v942_v48 = vrot.slane %v935_v54, %v4566_v35  ;;  %7761 = vst [vmem:[#allocation82_spill] sm:$0xff] %v5327_v51  ;;  %vm7645_vm9 = vcmp.lt.s32.totalorder %v5327_v51, 16 }
 0x1be   :  { %7754 = vst [vmem:[#allocation75_spill] sm:$0xff] %v5292_v11  ;;  %7755 = vst [vmem:[#allocation76_spill] sm:$0xff] %v5294_v38  ;;  %vm7496_vm12 = vcmp.lt.s32.totalorder %v5324_v24, 16 }
 0x1bf   :  { %1912 = vrot.lane.b32.xlu1 %v1907_v45, %s7505_s7  ;;  %789 = vrot.lane.b32.xlu0 %v788_v14, %s7561_s10  ;;  %v949_v15 = vrot.slane %v942_v48, %v4566_v35  ;;  %7760 = vst [vmem:[#allocation81_spill] sm:$0xff] %v5324_v24  ;;  %s4223_s7 = sld [smem:[#allocation3 + $0x5f]] }
 0x1c1   :  { %v1245_v55 = vpop.permute.xlu0 %1244  ;;  %v5306_v6 = vpop.permute.xlu1 %1176 }
 0x1c2   :  { %7756 = vst [vmem:[#allocation77_spill] sm:$0xff] %v5306_v6 }
 0x1c3   :  { %1945 = vrot.lane.b32.xlu1 %v1938_v58, %s7526_s0  ;;  %1113 = vrot.lane.b32.xlu0 %v1112_v4, %s7561_s10 }
 0x1c5   :  { %v1249_v0 = vpop.permute.xlu0 %1248  ;;  %v5314_v47 = vpop.permute.xlu1 %1209 }
 0x1c6   :  { %7757 = vst [vmem:[#allocation78_spill] sm:$0xff] %v5314_v47 }
 0x1c7   :  { %626 = vrot.lane.b32.xlu1 %v625_v23, %s7561_s10 }
 0x1c9   :  { %v5318_v45 = vpop.permute.xlu0 %1302  ;;  %v5320_v14 = vpop.permute.xlu1 %1213 }
 0x1ca   :  { %7758 = vst [vmem:[#allocation79_spill] sm:$0xff] %v5318_v45  ;;  %7759 = vst [vmem:[#allocation80_spill] sm:$0xff] %v5320_v14 }
 0x1cb   :  { %950 = vrot.lane.b32.xlu1 %v949_v15, %s7561_s10 }
 0x1cd   :  { %v5330_v54 = vpop.permute.xlu0 %1306  ;;  %v1247_v44 = vpop.permute.xlu1 %1246 }
 0x1ce   :  { %7762 = vst [vmem:[#allocation83_spill] sm:$0xff] %v5330_v54  ;;  %v1251_v58 = vsel %vm1250_vm4, %v1245_v55, %v1247_v44  ;;  %v1252_v4 = vsel %vm1250_vm4, %v1247_v44, %v1249_v0 }
 0x1cf   :  { %v1255_v27 = vsel %vm7496_vm12, %v1251_v58, 0.0  ;;  %v1256_v21 = vsel %vm7645_vm9, %v1252_v4, 0.0  ;;  %vm7508_vm12 = vcmask 392192  }
 0x1d0   :  { %v1259_v48 = vcombine.low %v1255_v27, %v1256_v21 }
 0x1d1   :  { %v5340_v23 = vpop.permute.xlu0 %1339  ;;  %v5342_v15 = vpop.permute.xlu1 %1304 }
 0x1d2   :  { %7763 = vst [vmem:[#allocation84_spill] sm:$0xff] %v5340_v23  ;;  %7764 = vst [vmem:[#allocation85_spill] sm:$0xff] %v5342_v15  ;;  %v1266_v54 = vrot.slane %v1259_v48, %v4566_v35 }
 0x1d4   :  { %v1273_v45 = vrot.slane %v1266_v54, %v4566_v35 }
 0x1d5   :  { %v5346_v14 = vpop.permute.xlu0 %1372  ;;  %v5348_v55 = vpop.permute.xlu1 %1337 }
 0x1d6   :  { %7765 = vst [vmem:[#allocation86_spill] sm:$0xff] %v5346_v14  ;;  %7766 = vst [vmem:[#allocation87_spill] sm:$0xff] %v5348_v55  ;;  %1274 = vrot.lane.b32.xlu1 %v1273_v45, %s7561_s10 }
 0x1d9   :  { %v5351_v0 = vpop.permute.xlu0 %1376  ;;  %v5353_v44 = vpop.permute.xlu1 %1341 }
 0x1da   :  { %7767 = vst [vmem:[#allocation88_spill] sm:$0xff] %v5351_v0  ;;  %7768 = vst [vmem:[#allocation89_spill] sm:$0xff] %v5353_v44 }
 0x1dd   :  { %v5355_v58 = vpop.permute.xlu0 %1421  ;;  %v5357_v4 = vpop.permute.xlu1 %1374 }
 0x1de   :  { %7769 = vst [vmem:[#allocation90_spill] sm:$0xff] %v5355_v58  ;;  %7770 = vst [vmem:[#allocation91_spill] sm:$0xff] %v5357_v4 }
 0x1e1   :  { %v5359_v27 = vpop.permute.xlu0 %1425  ;;  %v5361_v21 = vpop.permute.xlu1 %1395 }
 0x1e2   :  { %7771 = vst [vmem:[#allocation92_spill] sm:$0xff] %v5359_v27 }
 0x1e5   :  { %v5363_v48 = vpop.permute.xlu0 %1458  ;;  %v5365_v54 = vpop.permute.xlu1 %1423 }
 0x1e6   :  { %7772 = vst [vmem:[#allocation93_spill] sm:$0xff] %v5363_v48  ;;  %7773 = vst [vmem:[#allocation94_spill] sm:$0xff] %v5365_v54  ;;  %v5380_v48 = vld [vmem:[#allocation7 + $0x8] sm:$0xff] }
 0x1e9   :  { %v5367_v14 = vpop.permute.xlu0 %1491  ;;  %v5369_v55 = vpop.permute.xlu1 %1456 }
 0x1ea   :  { %7774 = vst [vmem:[#allocation95_spill] sm:$0xff] %v5367_v14  ;;  %7775 = vst [vmem:[#allocation96_spill] sm:$0xff] %v5369_v55 }
 0x1ed   :  { %v5371_v45 = vpop.permute.xlu0 %1495  ;;  %v5373_v0 = vpop.permute.xlu1 %1460 }
 0x1ee   :  { %7776 = vst [vmem:[#allocation97_spill] sm:$0xff] %v5371_v45  ;;  %7777 = vst [vmem:[#allocation98_spill] sm:$0xff] %v5373_v0 }
 0x1f1   :  { %v1529_v44 = vpop.permute.xlu0 %1528  ;;  %v5375_v58 = vpop.permute.xlu1 %1493 }
 0x1f2   :  { %7778 = vst [vmem:[#allocation99_spill] sm:$0xff] %v5375_v58 }
 0x1f5   :  { %v5377_v4 = vpop.permute.xlu0 %1586  ;;  %v1527_v27 = vpop.permute.xlu1 %1526 }
 0x1f6   :  { %7779 = vst [vmem:[#allocation100_spill] sm:$0xff] %v5377_v4  ;;  %v1533_v23 = vsel %vm7508_vm12, %v1527_v27, %v1529_v44  ;;  %v5391_v4 = vcombine.high %v5380_v48, %v5380_v48 }
 0x1f7   :  { %v1537_v45 = vsel %vm7648_vm10, %v1533_v23, 0.0 }
 0x1f8   :  { %v2153_v23 = vsel %vm120_vm0, %v5391_v4, 0.0 }
 0x1f9   :  { %v5382_v54 = vpop.permute.xlu0 %1619  ;;  %v1531_v14 = vpop.permute.xlu1 %1530 }
 0x1fa   :  { %7780 = vst [vmem:[#allocation101_spill] sm:$0xff] %v5382_v54  ;;  %v1534_v55 = vsel %vm7508_vm12, %v1529_v44, %v1531_v14  ;;  %v2146_v14 = vsel %vm120_vm0, %v5380_v48, 0.0  ;;  %vm7517_vm12 = vcmask 359424  }
 0x1fb   :  { %v1538_v0 = vsel %vm7647_vm8, %v1534_v55, 0.0 }
 0x1fc   :  { %v1541_v58 = vcombine.low %v1537_v45, %v1538_v0  ;;  %v2147_v0 = vrot.slane %v2146_v14, 4  ;;  %v2154_v45 = vrot.slane %v2153_v23, 4 }
 0x1fd   :  { %v5393_v15 = vpop.permute.xlu0 %1623  ;;  %v5395_v27 = vpop.permute.xlu1 %1584 }
 0x1fe   :  { %7781 = vst [vmem:[#allocation102_spill] sm:$0xff] %v5393_v15  ;;  %7782 = vst [vmem:[#allocation103_spill] sm:$0xff] %v5395_v27  ;;  %v1548_v54 = vrot.slane %v1541_v58, %v4566_v35  ;;  %v2148_v58 = vadd.f32 %v2147_v0, %v2146_v14  ;;  %v2155_v11 = vadd.f32 %v2154_v45, %v2153_v23 }
 0x200   :  { %v1555_v44 = vrot.slane %v1548_v54, %v4566_v35  ;;  %v2149_v6 = vrot.slane %v2148_v58, 2  ;;  %v2156_v38 = vrot.slane %v2155_v11, 2 }
 0x201   :  { %v5403_v55 = vpop.permute.xlu0 %1656  ;;  %v5405_v47 = vpop.permute.xlu1 %1588 }
 0x202   :  { %7783 = vst [vmem:[#allocation104_spill] sm:$0xff] %v5403_v55  ;;  %7784 = vst [vmem:[#allocation105_spill] sm:$0xff] %v5405_v47  ;;  %1556 = vrot.lane.b32.xlu0 %v1555_v44, %s7561_s10  ;;  %v2150_v47 = vadd.f32 %v2149_v6, %v2148_v58  ;;  %v2157_v44 = vadd.f32 %v2156_v38, %v2155_v11  ;;  %v1960_v38 = vstv %s4223_s7  ;;  %s7529_s7 = smov 28  }
 0x204   :  { %v2151_v0 = vrot.slane %v2150_v47, 1  ;;  %v2158_v45 = vrot.slane %v2157_v44, 1 }
 0x205   :  { %v1688_v15 = vpop.permute.xlu0 %1687  ;;  %v5408_v27 = vpop.permute.xlu1 %1621 }
 0x206   :  { %7785 = vst [vmem:[#allocation106_spill] sm:$0xff] %v5408_v27  ;;  %v1958_v27 = vstv %s4222_s18  ;;  %s7539_s18 = smov 27  }
 0x207   :  { %v1959_v58 = vmul.f32 %v1958_v27, %v5144_v60 }
 0x209   :  { %v1692_v39 = vpop.permute.xlu0 %1691  ;;  %v5410_v31 = vpop.permute.xlu1 %1654 }
 0x20a   :  { %7786 = vst [vmem:[#allocation107_spill] sm:$0xff] %v5410_v31 }
 0x20d   :  { %v5412_v54 = vpop.permute.xlu0 %1745  ;;  %v5414_v55 = vpop.permute.xlu1 %1658 }
 0x20e   :  { %7787 = vst [vmem:[#allocation108_spill] sm:$0xff] %v5412_v54  ;;  %7788 = vst [vmem:[#allocation109_spill] sm:$0xff] %v5414_v55 }
 0x211   :  { %v5416_v63 = vpop.permute.xlu0 %1749  ;;  %v1690_v3 = vpop.permute.xlu1 %1689 }
 0x212   :  { %7789 = vst [vmem:[#allocation110_spill] sm:$0xff] %v5416_v63  ;;  %v1694_v14 = vsel %vm7517_vm12, %v1688_v15, %v1690_v3  ;;  %v1695_v23 = vsel %vm7517_vm12, %v1690_v3, %v1692_v39  ;;  %v1961_v15 = vmul.f32 %v1960_v38, %v5155_v37  ;;  %v2159_v63 = vadd.f32 %v2158_v45, %v2157_v44 }
 0x213   :  { %v1698_v31 = vsel %vm7686_vm2, %v1694_v14, 0.0  ;;  %v1699_v11 = vsel %vm7685_vm3, %v1695_v23, 0.0  ;;  %v2152_v14 = vadd.f32 %v2151_v0, %v2150_v47  ;;  %v2169_v38 = vsel %vm120_vm0, %v5391_v4, -inf }
 0x214   :  { %v1702_v6 = vcombine.low %v1698_v31, %v1699_v11  ;;  %v1962_v54 = vadd.f32 %v1961_v15, %v1959_v58  ;;  %v7518_v31 = vstv %s5418_s20  ;;  %v2177_v11 = vmul.f32 0.25, %v2159_v63  ;;  %s5643_s20 = sld [smem:[#allocation3 + $0x42]] }
 0x215   :  { %v5429_v55 = vpop.permute.xlu0 %1782  ;;  %v5431_v3 = vpop.permute.xlu1 %1747  ;;  %v2176_v27 = vmul.f32 0.25, %v2152_v14  ;;  %v1994_v47 = vmul.f32 %v7518_v31, %v5144_v60  ;;  %v2162_v63 = vsel %vm120_vm0, %v5380_v48, -inf  ;;  %vm1856_vm12 = vcmask 252928  }
 0x216   :  { %7792 = vst [vmem:[#allocation113_spill] sm:$0xff] %v5429_v55  ;;  %7793 = vst [vmem:[#allocation114_spill] sm:$0xff] %v5431_v3  ;;  %v1709_v39 = vrot.slane %v1702_v6, %v4566_v35  ;;  %v7519_v3 = vstv %s5426_s19  ;;  %v1967_v6 = vrot.slane %v1962_v54, %v4588_v56  ;;  %v1975_v58 = vrot.slane %v1962_v54, %v4592_v59  ;;  %s7822_s19 = smov 127  }
 0x217   :  { %v1996_v44 = vmul.f32 %v7519_v3, %v5155_v37  ;;  %v2180_v45 = vcombine.low %v2176_v27, %v2177_v11  ;;  %v2170_v37 = vrot.slane %v2169_v38, 4  ;;  %vm7644_vm0 = vcmask 220160  }
 0x218   :  { %v1716_v23 = vrot.slane %v1709_v39, %v4566_v35 }
 0x219   :  { %v5436_v29 = vpop.permute.xlu1 %1780  ;;  %v5440_v55 = vpop.permute.xlu0 %1815  ;;  %v1997_v39 = vadd.f32 %v1996_v44, %v1994_v47  ;;  %v2187_v14 = vrot.slane %v2180_v45, %v4566_v35 }
 0x21a   :  { %7794 = vst [vmem:[#allocation115_spill] sm:$0xff] %v5436_v29  ;;  %1717 = vrot.lane.b32.xlu1 %v1716_v23, %s7561_s10  ;;  %7795 = vst [vmem:[#allocation116_spill] sm:$0xff] %v5440_v55  ;;  %v2163_v23 = vrot.slane %v2162_v63, 4 }
 0x21b   :  { %v2006_v27 = vrot.slane %v1997_v39, %v4598_v2  ;;  %v2194_v4 = vrot.slane %v2187_v14, %v4566_v35 }
 0x21c   :  { %v2164_v11 = vmax.f32 %v2162_v63, %v2163_v23 }
 0x21d   :  { %v5447_v0 = vpop.permute.xlu1 %1784  ;;  %v5458_v15 = vpop.permute.xlu0 %1819 }
 0x21e   :  { %7796 = vst [vmem:[#allocation117_spill] sm:$0xff] %v5447_v0  ;;  %1976 = vrot.lane.b32.xlu1 %v1967_v6, %s7529_s7  ;;  %7797 = vst [vmem:[#allocation118_spill] sm:$0xff] %v5458_v15  ;;  %v2171_v6 = vmax.f32 %v2169_v38, %v2170_v37  ;;  %v2165_v45 = vrot.slane %v2164_v11, 2 }
 0x220   :  { %v2172_v3 = vrot.slane %v2171_v6, 2  ;;  %v2166_v38 = vmax.f32 %v2164_v11, %v2165_v45  ;;  %v2047_v11 = vld [vmem:[#allocation2] ss:$2 sm:$0x7]  ;;  %v2010_v45 = vrot.slane %v1997_v39, %v4592_v59 }
 0x221   :  { %v5460_v60 = vpop.permute.xlu1 %1817  ;;  %v1853_v47 = vpop.permute.xlu0 %1852 }
 0x222   :  { %7798 = vst [vmem:[#allocation119_spill] sm:$0xff] %v5460_v60  ;;  %1980 = vrot.lane.b32.xlu1 %v1975_v58, %s7529_s7  ;;  %v2173_v14 = vmax.f32 %v2171_v6, %v2172_v3  ;;  %v2051_v6 = vstv %s4226_s30  ;;  %s7569_s30 = smov 26  }
 0x224   :  { %v2174_v37 = vrot.slane %v2173_v14, 1 }
 0x225   :  { %v1851_v48 = vpop.permute.xlu1 %1850 }
 0x226   :  { %2013 = vrot.lane.b32.xlu1 %v2006_v27, %s7539_s18  ;;  %v1857_v44 = vsel %vm1856_vm12, %v1851_v48, %v1853_v47  ;;  %v1942_v48 = vrot.slane %v5211_v34, %v4592_v59  ;;  %v2048_v34 = vld [vmem:[#allocation2 + $0x1] ss:$2 sm:$0x7] }
 0x227   :  { %v1861_v15 = vsel %vm74_vm13, %v1857_v44, 0.0 }
 0x229   :  { %v1855_v31 = vpop.permute.xlu1 %1854 }
 0x22a   :  { %v1858_v58 = vsel %vm1856_vm12, %v1853_v47, %v1855_v31  ;;  %2195 = vrot.lane.b32.xlu1 %v2194_v4, %s4469_s1  ;;  %v2167_v31 = vrot.slane %v2166_v38, 1  ;;  %v2175_v47 = vmax.f32 %v2173_v14, %v2174_v37 }
 0x22b   :  { %v1862_v27 = vsel %vm7658_vm11, %v1858_v58, 0.0  ;;  %v2053_v58 = vstv %s4227_s9  ;;  %s5546_s9 = sld [smem:[#allocation3 + $0x32]] }
 0x22c   :  { %v1865_v0 = vcombine.low %v1861_v15, %v1862_v27  ;;  %v2168_v4 = vmax.f32 %v2166_v38, %v2167_v31  ;;  %v1971_v15 = vrot.slane %v1962_v54, %v4598_v2  ;;  %v2052_v27 = vmul.f32 %v2051_v6, %v2047_v11 }
 0x22e   :  { %v1872_v63 = vrot.slane %v1865_v0, %v4566_v35  ;;  %v2203_v3 = vcombine.low %v2168_v4, %v2175_v47  ;;  %v2002_v0 = vrot.slane %v1997_v39, %v4588_v56  ;;  %v5497_v39 = vpop.permute.xlu1 %1908  ;;  %v5505_v4 = vpop.permute.xlu0 %1910 }
 0x22f   :  { %7799 = vst [vmem:[#allocation120_spill] sm:$0xff] %v5497_v39  ;;  %7802 = vst [vmem:[#allocation123_spill] sm:$0xff] %v5505_v4 }
 0x230   :  { %v1879_v23 = vrot.slane %v1872_v63, %v4566_v35  ;;  %v2210_v44 = vrot.slane %v2203_v3, %v4566_v35  ;;  %v2054_v63 = vmul.f32 %v2053_v58, %v2048_v34 }
 0x232   :  { %1880 = vrot.lane.b32.xlu0 %v1879_v23, %s7561_s10  ;;  %v2217_v54 = vrot.slane %v2210_v44, %v4566_v35  ;;  %v5488_v38 = vadd.f32 %v2054_v63, %v2052_v27  ;;  %v5499_v31 = vpop.permute.xlu1 %1912  ;;  %v5511_v3 = vpop.permute.xlu0 %1943  ;;  %v5525_v63 = vld [vmem:[#allocation2] ss:$2 sm:$0x3] }
 0x233   :  { %7800 = vst [vmem:[#allocation121_spill] sm:$0xff] %v5499_v31  ;;  %7803 = vst [vmem:[#allocation124_spill] sm:$0xff] %v5511_v3 }
 0x234   :  { %v2060_v14 = vrot.slane %v5488_v38, %v4588_v56  ;;  %v2068_v23 = vrot.slane %v5488_v38, %v4592_v59  ;;  %7806 = vst [vmem:[#allocation127_spill] sm:$0xff] %v5525_v63  ;;  %v2064_v46 = vrot.slane %v5488_v38, %v4598_v2 }
 0x236   :  { %1947 = vrot.lane.b32.xlu0 %v1942_v48, %s7526_s0  ;;  %v5501_v37 = vpop.permute.xlu1 %1945  ;;  %v5515_v11 = vpop.permute.xlu0 %464  ;;  %s5548_s0 = sld [smem:[#allocation3 + $0x2]] }
 0x237   :  { %7801 = vst [vmem:[#allocation122_spill] sm:$0xff] %v5501_v37 }
 0x23a   :  { %1978 = vrot.lane.b32.xlu0 %v1971_v15, %s7529_s7  ;;  %v5503_v48 = vpop.permute.xlu1 %626  ;;  %v5521_v34 = vpop.permute.xlu0 %789  ;;  %s5553_s7 = sld [smem:[#allocation3 + $0x33]] }
 0x23e   :  { %2011 = vrot.lane.b32.xlu0 %v2002_v0, %s7539_s18  ;;  %v5507_v47 = vpop.permute.xlu1 %950 }
 0x242   :  { %2015 = vrot.lane.b32.xlu0 %v2010_v45, %s7539_s18  ;;  %v5523_v45 = vpop.permute.xlu0 %1113  ;;  %s5565_s18 = sld [smem:[#allocation3 + $0x6]] }
 0x246   :  { %2218 = vrot.lane.b32.xlu0 %v2217_v54, %s4469_s1  ;;  %s5544_s1 = sld [smem:[#allocation3 + $0x1]] }
 0x248   :  { %v5509_v15 = vpop.permute.xlu1 %1274  ;;  %7810 = sst [smem:[#allocation131_spill]] %s5565_s18  ;;  %s5659_s18 = sld [smem:[#allocation3 + $0x45]] }
 0x24a   :  { %2069 = vrot.lane.b32.xlu0 %v2060_v14, %s7569_s30 }
 0x24e   :  { %2073 = vrot.lane.b32.xlu0 %v2068_v23, %s7569_s30 }
 0x274   :  { %v5528_v23 = vpop.permute.xlu0 %1556 }
 0x28c   :  { %v5513_v0 = vpop.permute.xlu1 %1717 }
 0x290   :  { %v5517_v6 = vpop.permute.xlu1 %1976 }
 0x291   :  { %7804 = vst [vmem:[#allocation125_spill] sm:$0xff] %v5517_v6 }
 0x294   :  { %v5519_v44 = vpop.permute.xlu1 %1980 }
 0x295   :  { %7805 = vst [vmem:[#allocation126_spill] sm:$0xff] %v5519_v44 }
 0x298   :  { %v2014_v58 = vpop.permute.xlu1 %2013 }
 0x29c   :  { %v2196_v27 = vpop.permute.xlu1 %2195 }
 0x29d   :  { %v2197_v54 = vrot.slane %v2196_v27, 7 }
 0x29f   :  { %v2198_v14 = vsel %vm173_vm5, %v2197_v54, %v2196_v27 }
 0x2a0   :  { %2200 = vst.msk [vmem:[#allocation2] ss:$2 sm:$0x7] %vm4576_vm6, %v2198_v14 }
 0x2a4   :  { %v5532_v3 = vpop.permute.xlu0 %1880 }
 0x2a7   :  { %v5751_v49 = vld [vmem:[#allocation2] ss:$2 sm:$0x7] }
 0x2a8   :  { %v5534_v37 = vpop.permute.xlu0 %1947  ;;  %v5753_v26 = vld [vmem:[#allocation2] ss:$2 sm:$0x7] }
 0x2a9   :  { %7807 = vst [vmem:[#allocation128_spill] sm:$0xff] %v5534_v37  ;;  %v5550_v37 = vld [vmem:[#allocation2 + $0x1] ss:$2 sm:$0x3] }
 0x2aa   :  { %7809 = vst [vmem:[#allocation130_spill] sm:$0xff] %v5550_v37 }
 0x2ac   :  { %v5536_v44 = vpop.permute.xlu0 %1978 }
 0x2ad   :  { %7808 = vst [vmem:[#allocation129_spill] sm:$0xff] %v5536_v44 }
 0x2b0   :  { %v2012_v6 = vpop.permute.xlu0 %2011 }
 0x2b1   :  { %v2018_v31 = vsel %vm7644_vm0, %v2012_v6, %v2014_v58 }
 0x2b2   :  { %v2022_v27 = vsel %vm100_vm1, %v2018_v31, 0.0  ;;  %v2252_v31 = vstv %s5544_s1  ;;  %s5614_s1 = sld [smem:[#allocation3 + $0x3e]] }
 0x2b4   :  { %v2016_v55 = vpop.permute.xlu0 %2015 }
 0x2b5   :  { %v2019_v60 = vsel %vm7644_vm0, %v2014_v58, %v2016_v55  ;;  %v2288_v58 = vstv %s5553_s7  ;;  %s5612_s7 = sld [smem:[#allocation3 + $0xd]]  ;;  %vm7947_vm0 = vcmask 744448  }
 0x2b6   :  { %v2023_v54 = vsel %vm7646_vm15, %v2019_v60, 0.0 }
 0x2b7   :  { %v2026_v14 = vcombine.low %v2022_v27, %v2023_v54  ;;  %v2286_v27 = vstv %s5548_s0  ;;  %s5621_s0 = sld [smem:[#allocation3 + $0x3]] }
 0x2b8   :  { %v2219_v29 = vpop.permute.xlu0 %2218 }
 0x2b9   :  { %v2033_v6 = vrot.slane %v2026_v14, %v4566_v35  ;;  %v2220_v44 = vrot.slane %v2219_v29, 7 }
 0x2bb   :  { %v2221_v55 = vsel %vm173_vm5, %v2220_v44, %v2219_v29  ;;  %v2040_v60 = vrot.slane %v2033_v6, %v4566_v35  ;;  %v5593_v29 = vld [vmem:[#allocation2] ss:$2 sm:$0x7]  ;;  %v2254_v44 = vstv %s5546_s9  ;;  %s5616_s9 = sld [smem:[#allocation3 + $0xe]]  ;;  %v2678_v39 = vstv %s5612_s7  ;;  %s5699_s7 = sld [smem:[#allocation3 + $0x4b]] }
 0x2bc   :  { %2223 = vst.msk [vmem:[#allocation2 + $0x1] ss:$2 sm:$0x7] %vm4576_vm6, %v2221_v55  ;;  %v2253_v54 = vmul.f32 %v2252_v31, %v5593_v29  ;;  %vm7642_vm5 = vcmask 23552   ;;  %vm7643_vm6 = vcmask 523264  }
 0x2bd   :  { %2041 = vrot.lane.b32.xlu1 %v2040_v60, %s7561_s10  ;;  %s5598_s10 = sld [smem:[#allocation3 + $0x3c]]  ;;  %v2287_v60 = vmul.f32 %v2286_v27, %v5593_v29  ;;  %v2362_v27 = vstv %s5559_s23  ;;  %s5651_s23 = sld [smem:[#allocation3 + $0x43]]  ;;  %v2320_v4 = vstv %s5621_s0 }
 0x2be   :  { %s7824_s0 = sld [smem:[#allocation131_spill]]  ;;  %v2321_v41 = vmul.f32 %v2320_v4, %v5593_v29 }
 0x2c1   :  { %2071 = vrot.lane.b32.xlu1 %v2064_v46, %s7569_s30  ;;  %s5618_s30 = sld [smem:[#allocation3 + $0x3f]]  ;;  %v2328_v46 = vstv %s5555_s27  ;;  %s5641_s27 = sld [smem:[#allocation3 + $0x11]] }
 0x2c3   :  { %7819 = sst [smem:[#allocation140_spill]] %s5598_s10  ;;  %v5604_v38 = vld [vmem:[#allocation2 + $0x1] ss:$2 sm:$0x7]  ;;  %s5692_s10 = sld [smem:[#allocation3 + $0x4a]] }
 0x2c4   :  { %v2255_v14 = vmul.f32 %v2254_v44, %v5604_v38  ;;  %v2289_v6 = vmul.f32 %v2288_v58, %v5604_v38  ;;  %v7827_v17 = vstv %s7824_s0  ;;  %s5771_s0 = sld [smem:[#allocation3 + $0x1e]]  ;;  %v5773_v50 = vld [vmem:[#allocation2 + $0x1] ss:$2 sm:$0x7] }
 0x2c5   :  { %v2397_v40 = vmul.f32 %v7827_v17, %v5593_v29 }
 0x2c6   :  { %v2256_v55 = vadd.f32 %v2255_v14, %v2253_v54  ;;  %v2290_v58 = vadd.f32 %v2289_v6, %v2287_v60  ;;  %v2330_v54 = vstv %s5557_s26  ;;  %v2364_v14 = vstv %s5563_s16  ;;  %s5649_s26 = sld [smem:[#allocation3 + $0x12]]  ;;  %s5657_s16 = sld [smem:[#allocation3 + $0x14]] }
 0x2c7   :  { %7821 = sst [smem:[#allocation142_spill]] %s5618_s30  ;;  %v2331_v6 = vmul.f32 %v2330_v54, %v5604_v38  ;;  %v2365_v60 = vmul.f32 %v2364_v14, %v5604_v38  ;;  %v2803_v14 = vstv %s5633_s13  ;;  %s5736_s13 = sld [smem:[#allocation3 + $0x4e]] }
 0x2c8   :  { %v2265_v31 = vrot.slane %v2256_v55, %v4598_v2  ;;  %v2261_v44 = vrot.slane %v2256_v55, %v4588_v56  ;;  %s5707_s30 = sld [smem:[#allocation3 + $0x4d]] }
 0x2ca   :  { %2272 = vrot.lane.b32.xlu1 %v2265_v31, %s7822_s19  ;;  %2270 = vrot.lane.b32.xlu0 %v2261_v44, %s7822_s19  ;;  %v2295_v31 = vrot.slane %v2290_v58, %v4588_v56  ;;  %v2269_v44 = vrot.slane %v2256_v55, %v4592_v59  ;;  %v2329_v55 = vmul.f32 %v2328_v46, %v5593_v29 }
 0x2cb   :  { %v2303_v46 = vrot.slane %v2290_v58, %v4592_v59 }
 0x2ce   :  { %2304 = vrot.lane.b32.xlu1 %v2295_v31, %s7823_s21  ;;  %2274 = vrot.lane.b32.xlu0 %v2269_v44, %s7822_s19  ;;  %v2299_v31 = vrot.slane %v2290_v58, %v4598_v2  ;;  %v2332_v44 = vadd.f32 %v2331_v6, %v2329_v55  ;;  %s5697_s19 = sld [smem:[#allocation3 + $0x1a]]  ;;  %v2363_v58 = vmul.f32 %v2362_v27, %v5593_v29  ;;  %v2805_v6 = vstv %s5635_s2  ;;  %s7826_s2 = smov 124  }
 0x2cf   :  { %v7825_v27 = vstv %s5569_s12  ;;  %s7830_s12 = smov 123  }
 0x2d0   :  { %v2366_v30 = vadd.f32 %v2365_v60, %v2363_v58  ;;  %v2399_v7 = vmul.f32 %v7825_v27, %v5604_v38  ;;  %v5738_v58 = vld [vmem:[#allocation2] ss:$2 sm:$0x7]  ;;  %v2345_v17 = vrot.slane %v2332_v44, %v4592_v59  ;;  %v7829_v60 = vstv %s5574_s29  ;;  %s7833_s29 = sld [smem:[#allocation142_spill]] }
 0x2d1   :  { %v2433_v54 = vmul.f32 %v7829_v60, %v5604_v38  ;;  %v7832_v60 = vstv %s5602_s28  ;;  %v2679_v42 = vmul.f32 %v2678_v39, %v5738_v58  ;;  %v2804_v39 = vmul.f32 %v2803_v14, %v5751_v49  ;;  %s7841_s28 = sld [smem:[#allocation135_spill]] }
 0x2d2   :  { %2308 = vrot.lane.b32.xlu1 %v2303_v46, %s7823_s21  ;;  %2306 = vrot.lane.b32.xlu0 %v2299_v31, %s7823_s21  ;;  %v2341_v46 = vrot.slane %v2332_v44, %v4598_v2  ;;  %v2337_v31 = vrot.slane %v2332_v44, %v4588_v56  ;;  %s7828_s21 = sld [smem:[#allocation132_spill]]  ;;  %v5746_v1 = vadd.f32 %v2399_v7, %v2397_v40  ;;  %v5764_v40 = vld [vmem:[#allocation2 + $0x1] ss:$2 sm:$0x7] }
 0x2d3   :  { %v2379_v55 = vrot.slane %v2366_v30, %v4592_v59  ;;  %v2375_v27 = vrot.slane %v2366_v30, %v4598_v2  ;;  %v2647_v4 = vmul.f32 %v7835_v8, %v5764_v40  ;;  %v2806_v8 = vmul.f32 %v2805_v6, %v5773_v50  ;;  %v5825_v6 = vld [vmem:[#allocation2 + $0x1] ss:$2 sm:$0x7] }
 0x2d4   :  { %v2409_v32 = vrot.slane %v5746_v1, %v4598_v2 }
 0x2d6   :  { %2348 = vrot.lane.b32.xlu1 %v2341_v46, %s7826_s2  ;;  %2346 = vrot.lane.b32.xlu0 %v2337_v31, %s7826_s2  ;;  %v2371_v31 = vrot.slane %v2366_v30, %v4588_v56  ;;  %v2645_v46 = vmul.f32 %v7832_v60, %v5738_v58  ;;  %v3379_v60 = vmul.f32 %v3378_v53, %v5753_v26  ;;  %v7836_v53 = vstv %s5614_s1  ;;  %v2483_v30 = vld [vmem:[#allocation2] ss:$2 sm:$0x7]  ;;  %s7842_s1 = sld [smem:[#allocation137_spill]] }
 0x2d7   :  { %v7837_v14 = vstv %s7833_s29  ;;  %s5997_s29 = sld [smem:[#allocation3 + $0x5b]] }
 0x2d8   :  { %v7831_v44 = vstv %s7828_s21  ;;  %v2715_v25 = vmul.f32 %v7837_v14, %v5764_v40  ;;  %s7868_s21 = smov 112  }
 0x2d9   :  { %v2431_v7 = vmul.f32 %v7831_v44, %v5593_v29  ;;  %v2681_v29 = vmul.f32 %v7836_v53, %v5764_v40 }
 0x2da   :  { %2380 = vrot.lane.b32.xlu1 %v2371_v31, %s7830_s12  ;;  %2350 = vrot.lane.b32.xlu0 %v2345_v17, %s7826_s2  ;;  %v5775_v31 = vld [vmem:[#allocation2 + $0x1] ss:$2 sm:$0x7]  ;;  %v7834_v17 = vstv %s5616_s9  ;;  %s5810_s9 = sld [smem:[#allocation3 + $0x20]]  ;;  %s7849_s2 = sld [smem:[#allocation134_spill]] }
 0x2db   :  { %v2713_v44 = vmul.f32 %v7834_v17, %v5738_v58  ;;  %v5787_v19 = vadd.f32 %v2433_v54, %v2431_v7  ;;  %v2405_v17 = vrot.slane %v5746_v1, %v4588_v56  ;;  %v7838_v54 = vstv %s5623_s22  ;;  %s5823_s22 = sld [smem:[#allocation3 + $0x21]] }
 0x2dc   :  { %v2323_v7 = vmul.f32 %v7838_v54, %v5604_v38  ;;  %v3381_v33 = vmul.f32 %v7839_v18, %v5775_v31  ;;  %v5816_v14 = vadd.f32 %v2681_v29, %v2679_v42  ;;  %v7843_v38 = vstv %s5643_s20  ;;  %s5851_s20 = sld [smem:[#allocation3 + $0x22]] }
 0x2dd   :  { %v5818_v61 = vadd.f32 %v2715_v25, %v2713_v44  ;;  %v2840_v18 = vmul.f32 %v7843_v38, %v5773_v50  ;;  %v7848_v25 = vstv %s5651_s23  ;;  %v7850_v44 = vstv %s7840_s24  ;;  %s7854_s23 = smov 122   ;;  %s6008_s24 = sld [smem:[#allocation3 + $0x5d]] }
 0x2de   :  { %2384 = vrot.lane.b32.xlu1 %v2379_v55, %s7830_s12  ;;  %2382 = vrot.lane.b32.xlu0 %v2375_v27, %s7830_s12  ;;  %v5812_v55 = vld [vmem:[#allocation2] ss:$2 sm:$0x7]  ;;  %v5814_v27 = vadd.f32 %v2647_v4, %v2645_v46  ;;  %v5827_v54 = vadd.f32 %v2323_v7, %v2321_v41  ;;  %v5829_v53 = vadd.f32 %v3381_v33, %v3379_v60  ;;  %v7851_v29 = vstv %s7841_s28  ;;  %v5846_v41 = vld [vmem:[#allocation2 + $0x1] ss:$2 sm:$0x7] }
 0x2df   :  { %v5831_v46 = vadd.f32 %v2806_v8, %v2804_v39  ;;  %v2872_v42 = vmul.f32 %v7848_v25, %v5773_v50  ;;  %v2488_v4 = vmul.f32 %v7850_v44, %v2483_v30  ;;  %v5840_v38 = vmul.f32 %v7851_v29, %v2483_v30  ;;  %v5859_v8 = vld [vmem:[#allocation2] ss:$2 sm:$0x7]  ;;  %s5995_s12 = sld [smem:[#allocation3 + $0x2a]]  ;;  %s6018_s28 = sld [smem:[#allocation3 + $0x2c]] }
 0x2e0   :  { %7845 = vst [vmem:[#allocation143_spill] sm:$0xff] %v5827_v54  ;;  %7846 = vst [vmem:[#allocation144_spill] sm:$0xff] %v5829_v53  ;;  %v7852_v62 = vstv %s7842_s1  ;;  %v7853_v33 = vstv %s5641_s27  ;;  %v7855_v39 = vstv %s7844_s15  ;;  %v7857_v44 = vstv %s5657_s16  ;;  %s5867_s27 = sld [smem:[#allocation3 + $0x4f]]  ;;  %s5883_s16 = sld [smem:[#allocation3 + $0x52]] }
 0x2e1   :  { %7847 = vst [vmem:[#allocation145_spill] sm:$0xff] %v5831_v46  ;;  %v5844_v9 = vmul.f32 %v7852_v62, %v2483_v30  ;;  %v2838_v60 = vmul.f32 %v7853_v33, %v5751_v49  ;;  %v5857_v7 = vmul.f32 %v7855_v39, %v2483_v30  ;;  %v7856_v62 = vstv %s5649_s26  ;;  %s5881_s26 = sld [smem:[#allocation3 + $0x51]]  ;;  %s6039_s1 = sld [smem:[#allocation3 + $0x5f]] }
 0x2e2   :  { %2416 = vrot.lane.b32.xlu1 %v2409_v32, %s7854_s23  ;;  %2414 = vrot.lane.b32.xlu0 %v2405_v17, %s7854_s23  ;;  %v2870_v25 = vmul.f32 %v7856_v62, %v5751_v49  ;;  %v2961_v29 = vmul.f32 %v7857_v44, %v5812_v55  ;;  %v3344_v32 = vstv %s5771_s0  ;;  %v7858_v17 = vstv %s7849_s2  ;;  %s7886_s0 = smov 111   ;;  %s6050_s15 = sld [smem:[#allocation3 + $0x2d]] }
 0x2e3   :  { %v2490_v30 = vmul.f32 %v7858_v17, %v5825_v6  ;;  %v5873_v33 = vadd.f32 %v2840_v18, %v2838_v60  ;;  %v7860_v39 = vstv %s5665_s4  ;;  %v7861_v62 = vstv %s5673_s6  ;;  %v5889_v18 = vld [vmem:[#allocation2 + $0x1] ss:$2 sm:$0x7]  ;;  %s5896_s6 = sld [smem:[#allocation3 + $0x53]]  ;;  %s5910_s4 = sld [smem:[#allocation3 + $0x24]] }
 0x2e4   :  { %v2995_v54 = vmul.f32 %v7860_v39, %v5812_v55  ;;  %v3029_v37 = vmul.f32 %v7861_v62, %v5812_v55  ;;  %v2439_v44 = vrot.slane %v5787_v19, %v4588_v56  ;;  %v2413_v17 = vrot.slane %v5746_v1, %v4592_v59  ;;  %s7896_s2 = smov 110  }
 0x2e5   :  { %7859 = vst [vmem:[#allocation146_spill] sm:$0xff] %v5873_v33  ;;  %v5891_v60 = vadd.f32 %v2872_v42, %v2870_v25  ;;  %v7863_v39 = vstv %s5659_s18  ;;  %v7864_v33 = vstv %s5667_s14  ;;  %v7865_v46 = vstv %s5682_s11  ;;  %s5912_s18 = sld [smem:[#allocation3 + $0x55]]  ;;  %s5938_s11 = sld [smem:[#allocation3 + $0x26]] }
 0x2e6   :  { %v2963_v62 = vmul.f32 %v7863_v39, %v5846_v41  ;;  %v2997_v63 = vmul.f32 %v7864_v33, %v5846_v41  ;;  %v3120_v24 = vmul.f32 %v7865_v46, %v5859_v8  ;;  %v7866_v1 = vstv %s5690_s3  ;;  %2448 = vrot.lane.b32.xlu1 %v2439_v44, %s7868_s21  ;;  %2418 = vrot.lane.b32.xlu0 %v2413_v17, %s7854_s23  ;;  %s5925_s3 = sld [smem:[#allocation3 + $0x25]]  ;;  %s5966_s14 = sld [smem:[#allocation3 + $0x59]] }
 0x2e7   :  { %7862 = vst [vmem:[#allocation147_spill] sm:$0xff] %v5891_v60  ;;  %v3152_v53 = vmul.f32 %v7866_v1, %v5859_v8  ;;  %v7867_v42 = vstv %s5697_s19  ;;  %v7870_v39 = vstv %s5705_s5  ;;  %v7871_v60 = vstv %s5714_s17  ;;  %s5936_s5 = sld [smem:[#allocation3 + $0x28]]  ;;  %s5976_s19 = sld [smem:[#allocation3 + $0x29]] }
 0x2e8   :  { %v3186_v25 = vmul.f32 %v7867_v42, %v5859_v8  ;;  %v5916_v33 = vadd.f32 %v2963_v62, %v2961_v29  ;;  %v3277_v46 = vmul.f32 %v7870_v39, %v5753_v26  ;;  %v3311_v1 = vmul.f32 %v7871_v60, %v5753_v26  ;;  %s5987_s17 = sld [smem:[#allocation3 + $0x5a]]  ;;  %s6092_s23 = sld [smem:[#allocation3 + $0x44]] }
 0x2e9   :  { %v3392_v51 = vstv %s5810_s9  ;;  %v5927_v42 = vadd.f32 %v2997_v63, %v2995_v54  ;;  %v3031_v44 = vmul.f32 %v7873_v22, %v5846_v41  ;;  %v3122_v17 = vmul.f32 %v7874_v13, %v5889_v18  ;;  %s6041_s9 = sld [smem:[#allocation3 + $0x5e]] }
 0x2ea   :  { %7869 = vst [vmem:[#allocation148_spill] sm:$0xff] %v5916_v33  ;;  %v3426_v29 = vstv %s5823_s22  ;;  %v2447_v60 = vrot.slane %v5787_v19, %v4592_v59  ;;  %v2443_v63 = vrot.slane %v5787_v19, %v4598_v2  ;;  %v5944_v54 = vadd.f32 %v2490_v30, %v2488_v4  ;;  %s7893_s22 = sld [smem:[#allocation140_spill]] }
 0x2eb   :  { %7872 = vst [vmem:[#allocation149_spill] sm:$0xff] %v5927_v42  ;;  %v7875_v22 = vstv %s5692_s10  ;;  %v5949_v62 = vadd.f32 %v3031_v44, %v3029_v37  ;;  %v3345_v39 = vmul.f32 %v3344_v32, %v5753_v26  ;;  %v3393_v42 = vmul.f32 %v3392_v51, %v5753_v26  ;;  %s5974_s10 = sld [smem:[#allocation3 + $0x57]] }
 0x2ec   :  { %v3154_v13 = vmul.f32 %v7875_v22, %v5889_v18  ;;  %v3460_v33 = vstv %s5851_s20  ;;  %2452 = vrot.lane.b32.xlu1 %v2447_v60, %s7868_s21  ;;  %2450 = vrot.lane.b32.xlu0 %v2443_v63, %s7868_s21  ;;  %v5956_v19 = vadd.f32 %v3122_v17, %v3120_v24  ;;  %v7880_v30 = vstv %s5699_s7  ;;  %s5983_s7 = sld [smem:[#allocation3 + $0xf]]  ;;  %s7898_s20 = sld [smem:[#allocation141_spill]] }
 0x2ed   :  { %7876 = vst [vmem:[#allocation150_spill] sm:$0xff] %v5949_v62  ;;  %v3188_v22 = vmul.f32 %v7880_v30, %v5889_v18  ;;  %v3346_v37 = vstv %s5867_s27  ;;  %v7881_v51 = vstv %s5707_s30  ;;  %v3394_v44 = vstv %s5881_s26  ;;  %s7883_s30 = sld [smem:[#allocation138_spill]]  ;;  %s7900_s27 = smov 109  }
 0x2ee   :  { %7878 = vst [vmem:[#allocation151_spill] sm:$0xff] %v5956_v19  ;;  %v5958_v4 = vadd.f32 %v3154_v13, %v3152_v53  ;;  %v3279_v32 = vmul.f32 %v7881_v51, %v5775_v31  ;;  %v3427_v24 = vmul.f32 %v3426_v29, %v5753_v26  ;;  %v3428_v17 = vstv %s5883_s16  ;;  %s4267_s26 = sld [smem:[#allocation3 + $0x13]]  ;;  %s4276_s16 = sld [smem:[#allocation3 + $0x48]] }
 0x2ef   :  { %v2496_v53 = vrot.slane %v5944_v54, %v4588_v56  ;;  %v7882_v60 = vstv %s7877_s8  ;;  %v3461_v13 = vmul.f32 %v3460_v33, %v5753_v26  ;;  %v3462_v30 = vstv %s5896_s6  ;;  %v6000_v33 = vld [vmem:[#allocation2 + $0x1] ss:$2 sm:$0x7]  ;;  %s4275_s6 = sld [smem:[#allocation3 + $0x17]]  ;;  %s7905_s21 = smov 95  }
 0x2f0   :  { %7879 = vst [vmem:[#allocation152_spill] sm:$0xff] %v5958_v4  ;;  %v2524_v63 = vmul.f32 %v7882_v60, %v5825_v6  ;;  %v5989_v29 = vadd.f32 %v3188_v22, %v3186_v25  ;;  %v5991_v51 = vadd.f32 %v3279_v32, %v3277_v46  ;;  %v3551_v4 = vstv %s5910_s4  ;;  %s7904_s4 = smov 108   ;;  %s7906_s8 = smov 91  }
 0x2f1   :  { %v3553_v19 = vstv %s5912_s18  ;;  %2505 = vrot.lane.b32.xlu1 %v2496_v53, %s7886_s0  ;;  %v7887_v60 = vstv %s5736_s13  ;;  %v3347_v25 = vmul.f32 %v3346_v37, %v5775_v31  ;;  %v3395_v22 = vmul.f32 %v3394_v44, %v5775_v31  ;;  %v6025_v44 = vld [vmem:[#allocation2] ss:$2 sm:$0x7]  ;;  %s6031_s13 = sld [smem:[#allocation3 + $0x2e]]  ;;  %s4284_s18 = sld [smem:[#allocation3 + $0x4c]] }
 0x2f2   :  { %7884 = vst [vmem:[#allocation153_spill] sm:$0xff] %v5989_v29  ;;  %7885 = vst [vmem:[#allocation154_spill] sm:$0xff] %v5991_v51  ;;  %v3313_v62 = vmul.f32 %v7887_v60, %v5775_v31  ;;  %v3429_v46 = vmul.f32 %v3428_v17, %v5775_v31  ;;  %v6013_v29 = vld [vmem:[#allocation2] ss:$2 sm:$0x7]  ;;  %v3585_v20 = vstv %s5925_s3  ;;  %v3708_v53 = vstv %s5936_s5  ;;  %s4283_s3 = sld [smem:[#allocation3 + $0x1b]] }
 0x2f3   :  { %v7888_v32 = vstv %s7883_s30  ;;  %v3619_v10 = vstv %s5938_s11  ;;  %v2504_v60 = vrot.slane %v5944_v54, %v4592_v59  ;;  %v6023_v37 = vadd.f32 %v2524_v63, %v5840_v38  ;;  %s4300_s5 = sld [smem:[#allocation3 + $0x54]]  ;;  %s4299_s11 = sld [smem:[#allocation3 + $0x23]] }
 0x2f4   :  { %v2558_v51 = vmul.f32 %v7888_v32, %v5825_v6  ;;  %v6027_v17 = vadd.f32 %v3313_v62, %v3311_v1  ;;  %v6029_v32 = vadd.f32 %v3347_v25, %v3345_v39  ;;  %v6033_v12 = vadd.f32 %v3395_v22, %v3393_v42  ;;  %v6044_v1 = vld [vmem:[#allocation2 + $0x1] ss:$2 sm:$0x7]  ;;  %s7908_s30 = smov 74  }
 0x2f5   :  { %v6035_v43 = vadd.f32 %v3429_v46, %v3427_v24  ;;  %v3463_v16 = vmul.f32 %v3462_v30, %v5775_v31  ;;  %v3554_v38 = vmul.f32 %v3553_v19, %v6000_v33  ;;  %2509 = vrot.lane.b32.xlu1 %v2504_v60, %s7886_s0  ;;  %v3552_v62 = vmul.f32 %v3551_v4, %v6013_v29 }
 0x2f6   :  { %7889 = vst [vmem:[#allocation155_spill] sm:$0xff] %v6027_v17  ;;  %7890 = vst [vmem:[#allocation156_spill] sm:$0xff] %v6029_v32  ;;  %v3586_v42 = vmul.f32 %v3585_v20, %v6013_v29  ;;  %v3587_v39 = vstv %s5964_s25  ;;  %v3710_v24 = vstv %s5966_s14  ;;  %v6053_v19 = vadd.f32 %v2558_v51, %v5844_v9  ;;  %s4308_s25 = sld [smem:[#allocation3 + $0x58]]  ;;  %s7907_s14 = smov 78  }
 0x2f7   :  { %7891 = vst [vmem:[#allocation157_spill] sm:$0xff] %v6033_v12  ;;  %7892 = vst [vmem:[#allocation158_spill] sm:$0xff] %v6035_v43  ;;  %v3709_v63 = vmul.f32 %v3708_v53, %v6025_v44  ;;  %v3621_v30 = vstv %s5974_s10  ;;  %v3742_v25 = vstv %s5976_s19  ;;  %v2534_v4 = vrot.slane %v6023_v37, %v4598_v2  ;;  %v6070_v43 = vld [vmem:[#allocation2 + $0x1] ss:$2 sm:$0x7]  ;;  %s4307_s10 = sld [smem:[#allocation3 + $0x27]] }
 0x2f8   :  { %v6060_v22 = vadd.f32 %v3463_v16, %v3461_v13  ;;  %v3620_v20 = vmul.f32 %v3619_v10, %v6013_v29  ;;  %v3744_v46 = vstv %s5987_s17  ;;  %v6064_v60 = vadd.f32 %v3554_v38, %v3552_v62  ;;  %s4316_s19 = sld [smem:[#allocation3 + $0x5c]]  ;;  %s7909_s17 = sld [smem:[#allocation112_spill]] }
 0x2f9   :  { %v3588_v9 = vmul.f32 %v3587_v39, %v6000_v33  ;;  %v3711_v51 = vmul.f32 %v3710_v24, %v6044_v1  ;;  %v3778_v53 = vstv %s5997_s29  ;;  %2541 = vrot.lane.b32.xlu1 %v2534_v4, %s7896_s2  ;;  %v3622_v12 = vmul.f32 %v3621_v30, %v6000_v33  ;;  %v6081_v24 = vld [vmem:[#allocation2] ss:$2 sm:$0x7]  ;;  %s7911_s29 = smov 48  }
 0x2fa   :  { %7894 = vst [vmem:[#allocation159_spill] sm:$0xff] %v6060_v22  ;;  %7895 = vst [vmem:[#allocation160_spill] sm:$0xff] %v6064_v60  ;;  %v3743_v16 = vmul.f32 %v3742_v25, %v6025_v44  ;;  %v3776_v10 = vstv %s5995_s12  ;;  %v3869_v13 = vstv %s6008_s24  ;;  %v2564_v38 = vrot.slane %v6053_v19, %v4588_v56  ;;  %s7910_s12 = sld [smem:[#allocation111_spill]]  ;;  %s7912_s24 = smov 44  }
 0x2fb   :  { %v7897_v62 = vstv %s7893_s22  ;;  %v6083_v4 = vadd.f32 %v3588_v9, %v3586_v42  ;;  %v3867_v30 = vstv %s6018_s28  ;;  %v6086_v60 = vadd.f32 %v3711_v51, %v3709_v63  ;;  %s7914_s28 = smov 31   ;;  %s7925_s22 = smov 107  }
 0x2fc   :  { %v2590_v39 = vmul.f32 %v7897_v62, %v5825_v6  ;;  %v6088_v25 = vadd.f32 %v3622_v12, %v3620_v20  ;;  %v3745_v22 = vmul.f32 %v3744_v46, %v6044_v1  ;;  %v3779_v32 = vmul.f32 %v3778_v53, %v6044_v1 }
 0x2fd   :  { %v3777_v6 = vmul.f32 %v3776_v10, %v6025_v44  ;;  %v3870_v62 = vmul.f32 %v3869_v13, %v6070_v43  ;;  %v3935_v17 = vstv %s6039_s1  ;;  %v3903_v28 = vstv %s6041_s9  ;;  %2573 = vrot.lane.b32.xlu1 %v2564_v38, %s7900_s27  ;;  %s7924_s1 = smov 3   ;;  %s4137_s9 = sld [smem:[#allocation3 + $0x34]] }
 0x2fe   :  { %7899 = vst [vmem:[#allocation161_spill] sm:$0xff] %v6088_v25  ;;  %v2746_v42 = vstv %s5983_s7  ;;  %v3868_v63 = vmul.f32 %v3867_v30, %v6081_v24  ;;  %v3933_v9 = vstv %s6031_s13  ;;  %v3901_v12 = vstv %s6050_s15  ;;  %s4315_s7 = sld [smem:[#allocation3 + $0x2b]]  ;;  %s7916_s13 = smov 27  }
 0x2ff   :  { %v6104_v20 = vadd.f32 %v2590_v39, %v5857_v7  ;;  %v7901_v46 = vstv %s7898_s20  ;;  %v6109_v53 = vadd.f32 %v3745_v22, %v3743_v16  ;;  %v6111_v10 = vadd.f32 %v3779_v32, %v3777_v6  ;;  %s4517_s15 = smov 125   ;;  %s7928_s20 = smov 96  }
 0x300   :  { %v2749_v51 = vmul.f32 %v7901_v46, %v5764_v40  ;;  %v2572_v13 = vrot.slane %v6053_v19, %v4592_v59  ;;  %v6115_v38 = vadd.f32 %v3870_v62, %v3868_v63  ;;  %v3936_v30 = vmul.f32 %v3935_v17, %v6070_v43 }
 0x301   :  { %v3904_v25 = vmul.f32 %v3903_v28, %v6070_v43  ;;  %v3934_v7 = vmul.f32 %v3933_v9, %v6081_v24  ;;  %v3902_v40 = vmul.f32 %v3901_v12, %v6081_v24  ;;  %v2747_v22 = vmul.f32 %v2746_v42, %v5738_v58 }
 0x302   :  { %2577 = vrot.lane.b32.xlu1 %v2572_v13, %s7900_s27  ;;  %v2600_v39 = vrot.slane %v6104_v20, %v4598_v2  ;;  %v2905_v28 = vstv %s6092_s23  ;;  %v2903_v6 = vstv %s4267_s26  ;;  %v3064_v58 = vstv %s4276_s16  ;;  %s7954_s23 = smov 64   ;;  %s4131_s26 = sld [smem:[#allocation3 + $0x31]] }
 0x303   :  { %v6123_v32 = vadd.f32 %v3936_v30, %v3934_v7  ;;  %v6125_v16 = vadd.f32 %v3904_v25, %v3902_v40  ;;  %v6129_v17 = vadd.f32 %v2749_v51, %v2747_v22  ;;  %v2906_v63 = vmul.f32 %v2905_v28, %v5773_v50  ;;  %s7964_s16 = smov 94  }
 0x304   :  { %v2904_v25 = vmul.f32 %v2903_v6, %v5751_v49  ;;  %v3062_v42 = vstv %s4275_s6  ;;  %v3065_v46 = vmul.f32 %v3064_v58, %v5846_v41  ;;  %v3221_v49 = vstv %s4284_s18  ;;  %s7967_s6 = smov 93   ;;  %s7986_s18 = smov 90  }
 0x305   :  { %7902 = vst [vmem:[#allocation162_spill] sm:$0xff] %v6123_v32  ;;  %7903 = vst [vmem:[#allocation163_spill] sm:$0xff] %v6125_v16  ;;  %v2755_v62 = vrot.slane %v6129_v17, %v4588_v56  ;;  %v2763_v9 = vrot.slane %v6129_v17, %v4592_v59  ;;  %v3063_v50 = vmul.f32 %v3062_v42, %v5812_v55  ;;  %v3219_v30 = vstv %s4283_s3  ;;  %s8020_s3 = smov 79  }
 0x306   :  { %2607 = vrot.lane.b32.xlu1 %v2600_v39, %s7904_s4  ;;  %v6140_v12 = vadd.f32 %v2906_v63, %v2904_v25  ;;  %v3222_v41 = vmul.f32 %v3221_v49, %v5889_v18  ;;  %v3496_v40 = vstv %s4300_s5  ;;  %v3220_v55 = vmul.f32 %v3219_v30, %v5859_v8  ;;  %s8046_s5 = smov 77  }
 0x307   :  { %v6147_v13 = vadd.f32 %v3065_v46, %v3063_v50  ;;  %v3494_v22 = vstv %s4299_s11  ;;  %v3497_v6 = vmul.f32 %v3496_v40, %v5775_v31  ;;  %v3653_v8 = vstv %s4308_s25  ;;  %s8054_s11 = smov 76   ;;  %s8109_s25 = smov 63  }
 0x308   :  { %v2916_v51 = vrot.slane %v6140_v12, %v4598_v2  ;;  %v6157_v28 = vadd.f32 %v3222_v41, %v3220_v55  ;;  %v3495_v18 = vmul.f32 %v3494_v22, %v5753_v26  ;;  %v3651_v58 = vstv %s4307_s10  ;;  %s8134_s10 = smov 60  }
 0x309   :  { %v3071_v7 = vrot.slane %v6147_v13, %v4588_v56  ;;  %v3079_v39 = vrot.slane %v6147_v13, %v4592_v59  ;;  %v3654_v31 = vmul.f32 %v3653_v8, %v6000_v33  ;;  %v3812_v42 = vstv %s4316_s19  ;;  %s8136_s19 = smov 59  }
 0x30a   :  { %2764 = vrot.lane.b32.xlu1 %v2755_v62, %s7905_s21  ;;  %v3232_v62 = vrot.slane %v6157_v28, %v4598_v2  ;;  %v6164_v63 = vadd.f32 %v3497_v6, %v3495_v18  ;;  %v3652_v26 = vmul.f32 %v3651_v58, %v6013_v29 }
 0x30c   :  { %v3503_v25 = vrot.slane %v6164_v63, %v4588_v56  ;;  %v3511_v46 = vrot.slane %v6164_v63, %v4592_v59  ;;  %v6174_v50 = vadd.f32 %v3654_v31, %v3652_v26 }
 0x30e   :  { %2768 = vrot.lane.b32.xlu1 %v2763_v9, %s7905_s21  ;;  %v3810_v9 = vstv %s4315_s7  ;;  %v3664_v33 = vrot.slane %v6174_v50, %v4598_v2  ;;  %s4230_s7 = sld [smem:[#allocation3 + $0x31]] }
 0x30f   :  { %v3811_v49 = vmul.f32 %v3810_v9, %v6025_v44 }
 0x312   :  { %2923 = vrot.lane.b32.xlu1 %v2916_v51, %s7906_s8  ;;  %v3813_v51 = vmul.f32 %v3812_v42, %v6044_v1  ;;  %v7915_v1 = vstv %s7910_s12  ;;  %s8140_s12 = smov 47  }
 0x313   :  { %v3968_v40 = vmul.f32 %v6081_v24, %v7915_v1 }
 0x314   :  { %v6181_v30 = vadd.f32 %v3813_v51, %v3811_v49 }
 0x316   :  { %3080 = vrot.lane.b32.xlu1 %v3071_v7, %s7907_s14  ;;  %v3819_v29 = vrot.slane %v6181_v30, %v4588_v56  ;;  %v7913_v7 = vstv %s7909_s17  ;;  %v3827_v44 = vrot.slane %v6181_v30, %v4592_v59  ;;  %s8138_s17 = smov 58  }
 0x317   :  { %v3970_v41 = vmul.f32 %v6070_v43, %v7913_v7 }
 0x319   :  { %v6195_v55 = vadd.f32 %v3970_v41, %v3968_v40 }
 0x31a   :  { %3084 = vrot.lane.b32.xlu1 %v3079_v39, %s7907_s14  ;;  %v6200_v39 = vpop.permute.xlu0 %2069 }
 0x31b   :  { %v3980_v22 = vrot.slane %v6195_v55, %v4598_v2 }
 0x31e   :  { %3239 = vrot.lane.b32.xlu1 %v3232_v62, %s7908_s30  ;;  %v6205_v43 = vpop.permute.xlu0 %2073 }
 0x322   :  { %3512 = vrot.lane.b32.xlu1 %v3503_v25, %s7911_s29 }
 0x326   :  { %3516 = vrot.lane.b32.xlu1 %v3511_v46, %s7911_s29 }
 0x32a   :  { %3671 = vrot.lane.b32.xlu1 %v3664_v33, %s7912_s24 }
 0x32e   :  { %3828 = vrot.lane.b32.xlu1 %v3819_v29, %s7914_s28 }
 0x32f   :  { %v6202_v6 = vpop.permute.xlu1 %2041 }
 0x332   :  { %3832 = vrot.lane.b32.xlu1 %v3827_v44, %s7914_s28 }
 0x333   :  { %v6207_v18 = vpop.permute.xlu1 %2071 }
 0x336   :  { %3987 = vrot.lane.b32.xlu1 %v3980_v22, %s7916_s13 }
 0x33c   :  { %v6209_v24 = vpop.permute.xlu1 %2272  ;;  %v6211_v62 = vpop.permute.xlu0 %2270 }
 0x340   :  { %v6213_v8 = vpop.permute.xlu1 %2304  ;;  %v6215_v58 = vpop.permute.xlu0 %2274 }
 0x341   :  { %7917 = vst [vmem:[#allocation164_spill] sm:$0xff] %v6213_v8 }
 0x344   :  { %v6217_v25 = vpop.permute.xlu1 %2308  ;;  %v6219_v31 = vpop.permute.xlu0 %2306 }
 0x345   :  { %7918 = vst [vmem:[#allocation165_spill] sm:$0xff] %v6217_v25  ;;  %7919 = vst [vmem:[#allocation166_spill] sm:$0xff] %v6219_v31 }
 0x348   :  { %v6221_v42 = vpop.permute.xlu1 %2348  ;;  %v6223_v26 = vpop.permute.xlu0 %2346 }
 0x34c   :  { %v6225_v9 = vpop.permute.xlu1 %2380  ;;  %v6227_v46 = vpop.permute.xlu0 %2350 }
 0x350   :  { %v6229_v51 = vpop.permute.xlu1 %2384  ;;  %v6231_v49 = vpop.permute.xlu0 %2382 }
 0x351   :  { %7920 = vst [vmem:[#allocation167_spill] sm:$0xff] %v6229_v51  ;;  %v8023_v51 = vld [vmem:[#allocation50_spill] sm:$0xff] }
 0x354   :  { %v6233_v33 = vpop.permute.xlu1 %2416  ;;  %v6235_v29 = vpop.permute.xlu0 %2414 }
 0x355   :  { %7921 = vst [vmem:[#allocation168_spill] sm:$0xff] %v6233_v33  ;;  %7922 = vst [vmem:[#allocation169_spill] sm:$0xff] %v6235_v29 }
 0x358   :  { %v2449_v7 = vpop.permute.xlu1 %2448  ;;  %v6237_v41 = vpop.permute.xlu0 %2418 }
 0x359   :  { %7923 = vst [vmem:[#allocation170_spill] sm:$0xff] %v6237_v41  ;;  %v2500_v41 = vrot.slane %v5944_v54, %v4598_v2  ;;  %v2596_v54 = vrot.slane %v6104_v20, %v4588_v56 }
 0x35e   :  { %v2453_v1 = vpop.permute.xlu1 %2452  ;;  %v2451_v40 = vpop.permute.xlu0 %2450 }
 0x35f   :  { %v2454_v44 = vsel %vm440_vm7, %v2449_v7, %v2451_v40  ;;  %v2455_v22 = vsel %vm440_vm7, %v2451_v40, %v2453_v1  ;;  %v2530_v7 = vrot.slane %v6023_v37, %v4588_v56  ;;  %v2538_v1 = vrot.slane %v6023_v37, %v4592_v59 }
 0x360   :  { %v2458_v16 = vsel %vm7648_vm10, %v2454_v44, 0.0  ;;  %v2459_v32 = vsel %vm7647_vm8, %v2455_v22, 0.0  ;;  %v2759_v37 = vrot.slane %v6129_v17, %v4598_v2  ;;  %v628_v17 = vrot.slane %v5503_v48, 7 }
 0x361   :  { %v2462_v25 = vcombine.low %v2458_v16, %v2459_v32  ;;  %v2568_v32 = vrot.slane %v6053_v19, %v4598_v2  ;;  %v2604_v16 = vrot.slane %v6104_v20, %v4592_v59  ;;  %v2912_v19 = vrot.slane %v6140_v12, %v4588_v56 }
 0x362   :  { %v466_v20 = vrot.slane %v5515_v11, 7  ;;  %v3075_v44 = vrot.slane %v6147_v13, %v4598_v2  ;;  %vm7937_vm7 = vcmask 777216  }
 0x363   :  { %v2469_v33 = vrot.slane %v2462_v25, %v4566_v35 }
 0x364   :  { %v468_v22 = vsel %vm7642_vm5, %v466_v20, %v5515_v11  ;;  %v3236_v11 = vrot.slane %v6157_v28, %v4592_v59  ;;  %v1558_v20 = vrot.slane %v5528_v23, 7 }
 0x365   :  { %v2476_v29 = vrot.slane %v2469_v33, %v4566_v35  ;;  %v2920_v33 = vrot.slane %v6140_v12, %v4592_v59  ;;  %v629_v12 = vsel %vm7642_vm5, %v628_v17, %v5503_v48  ;;  %v3668_v17 = vrot.slane %v6174_v50, %v4592_v59 }
 0x367   :  { %2477 = vrot.lane.b32.xlu0 %v2476_v29, %s7924_s1  ;;  %v305_v29 = vstv %s4137_s9  ;;  %s8186_s9 = smov 32  }
 0x368   :  { %v306_v40 = vmul.f32 %v305_v29, %v4586_v52  ;;  %v952_v52 = vrot.slane %v5507_v47, 7 }
 0x36a   :  { %v953_v48 = vsel %vm7642_vm5, %v952_v52, %v5507_v47 }
 0x36b   :  { %2507 = vrot.lane.b32.xlu0 %v2500_v41, %s7886_s0  ;;  %s4136_s0 = sld [smem:[#allocation3 + $0x3]] }
 0x36f   :  { %2539 = vrot.lane.b32.xlu0 %v2530_v7, %s7896_s2 }
 0x371   :  { %v303_v25 = vstv %s4136_s0  ;;  %s8161_s0 = smov 42  }
 0x372   :  { %v304_v41 = vmul.f32 %v303_v25, %v4590_v57  ;;  %v1276_v25 = vrot.slane %v5509_v15, 7 }
 0x373   :  { %2543 = vrot.lane.b32.xlu0 %v2538_v1, %s7896_s2  ;;  %v3228_v1 = vrot.slane %v6157_v28, %v4588_v56  ;;  %v3660_v28 = vrot.slane %v6174_v50, %v4588_v56  ;;  %s7927_s2 = smov 106  }
 0x374   :  { %v307_v7 = vadd.f32 %v306_v40, %v304_v41  ;;  %v1277_v29 = vsel %vm7642_vm5, %v1276_v25, %v5509_v15  ;;  %v1719_v40 = vrot.slane %v5513_v0, 7  ;;  %v1559_v15 = vsel %vm7642_vm5, %v1558_v20, %v5528_v23 }
 0x375   :  { %v3976_v23 = vrot.slane %v6195_v55, %v4588_v56 }
 0x376   :  { %v470_v57 = vadd.f32 %v468_v22, %v307_v7  ;;  %v3823_v7 = vrot.slane %v6181_v30, %v4598_v2  ;;  %v1720_v50 = vsel %vm7642_vm5, %v1719_v40, %v5513_v0  ;;  %v3984_v0 = vrot.slane %v6195_v55, %v4592_v59 }
 0x377   :  { %2575 = vrot.lane.b32.xlu0 %v2568_v32, %s7900_s27  ;;  %v791_v32 = vrot.slane %v5521_v34, 7  ;;  %v2691_v55 = vrot.slane %v5816_v14, %v4598_v2  ;;  %s207_s27 = sld [smem:[#allocation3]] }
 0x379   :  { %v792_v13 = vsel %vm7642_vm5, %v791_v32, %v5521_v34 }
 0x37b   :  { %2605 = vrot.lane.b32.xlu0 %v2596_v54, %s7904_s4  ;;  %v631_v54 = vadd.f32 %v629_v12, %v470_v57  ;;  %v2043_v12 = vrot.slane %v6202_v6, 7 }
 0x37d   :  { %v2044_v32 = vsel %vm7642_vm5, %v2043_v12, %v6202_v6  ;;  %v6342_v6 = vpop.permute.xlu1 %2505 }
 0x37f   :  { %2609 = vrot.lane.b32.xlu0 %v2604_v16, %s7904_s4  ;;  %v794_v16 = vadd.f32 %v792_v13, %v631_v54  ;;  %s7971_s4 = smov 92  }
 0x381   :  { %v6349_v13 = vpop.permute.xlu1 %2509 }
 0x382   :  { %7926 = vst [vmem:[#allocation171_spill] sm:$0xff] %v6349_v13  ;;  %v8045_v13 = vld [vmem:[#allocation60_spill] sm:$0xff] }
 0x383   :  { %2766 = vrot.lane.b32.xlu0 %v2759_v37, %s7905_s21  ;;  %v3507_v37 = vrot.slane %v6164_v63, %v4598_v2  ;;  %v1397_v63 = vrot.slane %v5361_v21, 1  ;;  %s8007_s21 = smov 80  }
 0x387   :  { %2921 = vrot.lane.b32.xlu0 %v2912_v19, %s7906_s8  ;;  %v1115_v19 = vrot.slane %v5523_v45, 7 }
 0x389   :  { %v1116_v34 = vsel %vm7642_vm5, %v1115_v19, %v5523_v45  ;;  %v1398_v45 = vsel %vm7643_vm6, %v5361_v21, %v1397_v63 }
 0x38b   :  { %2925 = vrot.lane.b32.xlu0 %v2920_v33, %s7906_s8  ;;  %v955_v33 = vadd.f32 %v953_v48, %v794_v16  ;;  %v2721_v16 = vrot.slane %v5818_v61, %v4588_v56  ;;  %v6355_v48 = vpop.permute.xlu1 %2541  ;;  %s8077_s8 = smov 75  }
 0x38c   :  { %7929 = vst [vmem:[#allocation172_spill] sm:$0xff] %v6355_v48  ;;  %v7995_v48 = vld [vmem:[#allocation33_spill] sm:$0xff] }
 0x38d   :  { %v1118_v47 = vadd.f32 %v1116_v34, %v955_v33 }
 0x38f   :  { %3082 = vrot.lane.b32.xlu0 %v3075_v44, %s7907_s14  ;;  %v1279_v41 = vadd.f32 %v1277_v29, %v1118_v47  ;;  %v1882_v44 = vrot.slane %v5532_v3, 7  ;;  %s8123_s14 = smov 62  }
 0x391   :  { %v1400_v22 = vadd.f32 %v1398_v45, %v1279_v41  ;;  %v1883_v21 = vsel %vm7642_vm5, %v1882_v44, %v5532_v3  ;;  %v2653_v3 = vrot.slane %v5814_v27, %v4588_v56  ;;  %vm7938_vm5 = vmmov %vm7937_vm7 }
 0x393   :  { %3237 = vrot.lane.b32.xlu0 %v3228_v1, %s7908_s30  ;;  %v1561_v57 = vadd.f32 %v1559_v15, %v1400_v22  ;;  %v7935_v22 = vld [vmem:[#allocation68_spill] sm:$0xff] }
 0x395   :  { %v1722_v1 = vadd.f32 %v1720_v50, %v1561_v57  ;;  %v7936_v50 = vld [vmem:[#allocation69_spill] sm:$0xff] }
 0x397   :  { %3241 = vrot.lane.b32.xlu0 %v3236_v11, %s7908_s30  ;;  %v1885_v54 = vadd.f32 %v1883_v21, %v1722_v1  ;;  %v2661_v11 = vrot.slane %v5814_v27, %v4592_v59  ;;  %s2226_s30 = sld [smem:[#allocation3]] }
 0x399   :  { %v2046_v30 = vadd.f32 %v2044_v32, %v1885_v54 }
 0x39b   :  { %3514 = vrot.lane.b32.xlu0 %v3507_v37, %s7911_s29  ;;  %v2094_v52 = vrot.slane %v2046_v30, %v4598_v2  ;;  %v6357_v37 = vpop.permute.xlu1 %2573  ;;  %s6984_s29 = sld [smem:[#allocation3 + $0x30]] }
 0x39c   :  { %7930 = vst [vmem:[#allocation173_spill] sm:$0xff] %v6357_v37 }
 0x39f   :  { %3669 = vrot.lane.b32.xlu0 %v3660_v28, %s7912_s24  ;;  %v6359_v19 = vpop.permute.xlu1 %2577 }
 0x3a0   :  { %7931 = vst [vmem:[#allocation174_spill] sm:$0xff] %v6359_v19  ;;  %v7982_v19 = vld [vmem:[#allocation19_spill] sm:$0xff] }
 0x3a3   :  { %3673 = vrot.lane.b32.xlu0 %v3668_v17, %s7912_s24  ;;  %v2608_v25 = vpop.permute.xlu1 %2607  ;;  %s6992_s24 = sld [smem:[#allocation3 + $0x61]] }
 0x3a7   :  { %3830 = vrot.lane.b32.xlu0 %v3823_v7, %s7914_s28  ;;  %v2765_v28 = vpop.permute.xlu1 %2764  ;;  %s8141_s28 = smov 46  }
 0x3ab   :  { %3985 = vrot.lane.b32.xlu0 %v3976_v23, %s7916_s13  ;;  %v2769_v47 = vpop.permute.xlu1 %2768 }
 0x3af   :  { %3989 = vrot.lane.b32.xlu0 %v3984_v0, %s7916_s13  ;;  %v2924_v20 = vpop.permute.xlu1 %2923  ;;  %s8142_s13 = smov 43  }
 0x3b3   :  { %2101 = vrot.lane.b32.xlu0 %v2094_v52, %s4517_s15  ;;  %v3081_v40 = vpop.permute.xlu1 %3080 }
 0x3b7   :  { %2662 = vrot.lane.b32.xlu0 %v2653_v3, %s7925_s22  ;;  %v3085_v21 = vpop.permute.xlu1 %3084  ;;  %v7940_v3 = vld [vmem:[#allocation62_spill] sm:$0xff] }
 0x3bb   :  { %2666 = vrot.lane.b32.xlu0 %v2661_v11, %s7925_s22 }
 0x3bf   :  { %2698 = vrot.lane.b32.xlu0 %v2691_v55, %s7927_s2 }
 0x3c3   :  { %2730 = vrot.lane.b32.xlu0 %v2721_v16, %s7928_s20 }
 0x3d9   :  { %v6361_v33 = vpop.permute.xlu0 %2477 }
 0x3dd   :  { %v6363_v34 = vpop.permute.xlu0 %2507 }
 0x3e1   :  { %v6365_v29 = vpop.permute.xlu0 %2539 }
 0x3e2   :  { %7932 = vst [vmem:[#allocation175_spill] sm:$0xff] %v6365_v29 }
 0x3e5   :  { %v6367_v63 = vpop.permute.xlu0 %2543 }
 0x3e6   :  { %7933 = vst [vmem:[#allocation176_spill] sm:$0xff] %v6367_v63 }
 0x3e9   :  { %v6369_v41 = vpop.permute.xlu0 %2575 }
 0x3ea   :  { %7934 = vst [vmem:[#allocation177_spill] sm:$0xff] %v6369_v41  ;;  %v7984_v41 = vld [vmem:[#allocation22_spill] sm:$0xff] }
 0x3ed   :  { %v2606_v17 = vpop.permute.xlu0 %2605 }
 0x3ee   :  { %v2611_v45 = vsel %vm602_vm14, %v2606_v17, %v2608_v25 }
 0x3ef   :  { %v2615_v7 = vsel %vm7686_vm2, %v2611_v45, 0.0  ;;  %v3240_v45 = vpop.permute.xlu1 %3239 }
 0x3f1   :  { %v2610_v15 = vpop.permute.xlu0 %2609 }
 0x3f2   :  { %v2612_v44 = vsel %vm602_vm14, %v2608_v25, %v2610_v15  ;;  %v2090_v15 = vrot.slane %v2046_v30, %v4588_v56  ;;  %vm7941_vm14 = vcmask 637952  }
 0x3f3   :  { %v2616_v12 = vsel %vm7685_vm3, %v2612_v44, 0.0  ;;  %v2098_v44 = vrot.slane %v2046_v30, %v4592_v59 }
 0x3f4   :  { %v2619_v57 = vcombine.low %v2615_v7, %v2616_v12  ;;  %v3513_v7 = vpop.permute.xlu1 %3512 }
 0x3f5   :  { %v2767_v1 = vpop.permute.xlu0 %2766 }
 0x3f6   :  { %v2626_v23 = vrot.slane %v2619_v57, %v4566_v35  ;;  %v2770_v32 = vsel %vm7937_vm7, %v2765_v28, %v2767_v1  ;;  %v2771_v54 = vsel %vm7938_vm5, %v2767_v1, %v2769_v47  ;;  %vm7942_vm5 = vmmov %vm7941_vm14 }
 0x3f7   :  { %v2774_v52 = vsel %vm74_vm13, %v2770_v32, 0.0  ;;  %v2775_v11 = vsel %vm7658_vm11, %v2771_v54, 0.0  ;;  %v7945_v54 = vld [vmem:[#allocation67_spill] sm:$0xff] }
 0x3f8   :  { %v2778_v55 = vcombine.low %v2774_v52, %v2775_v11  ;;  %v2633_v16 = vrot.slane %v2626_v23, %v4566_v35  ;;  %v7943_v23 = vld [vmem:[#allocation65_spill] sm:$0xff]  ;;  %vm7946_vm6 = vcmp.ge.s32.totalorder %v7945_v54, 0 }
 0x3f9   :  { %v2922_v25 = vpop.permute.xlu0 %2921  ;;  %vm7944_vm7 = vcmp.ge.s32.totalorder %v7943_v23, 0 }
 0x3fa   :  { %v2785_v17 = vrot.slane %v2778_v55, %v4566_v35  ;;  %2634 = vrot.lane.b32.xlu1 %v2633_v16, %s7924_s1  ;;  %v2657_v55 = vrot.slane %v5814_v27, %v4598_v2 }
 0x3fc   :  { %v2792_v28 = vrot.slane %v2785_v17, %v4566_v35 }
 0x3fd   :  { %v2926_v47 = vpop.permute.xlu0 %2925 }
 0x3fe   :  { %2099 = vrot.lane.b32.xlu1 %v2090_v15, %s4517_s15  ;;  %2793 = vrot.lane.b32.xlu0 %v2792_v28, %s7924_s1  ;;  %v2928_v30 = vsel %vm7947_vm0, %v2924_v20, %v2926_v47  ;;  %v2687_v15 = vrot.slane %v5816_v14, %v4588_v56 }
 0x401   :  { %v3083_v12 = vpop.permute.xlu0 %3082 }
 0x402   :  { %v3086_v57 = vsel %vm7941_vm14, %v3081_v40, %v3083_v12  ;;  %v3087_v1 = vsel %vm7942_vm5, %v3083_v12, %v3085_v21  ;;  %2103 = vrot.lane.b32.xlu1 %v2098_v44, %s4517_s15  ;;  %v3517_v40 = vpop.permute.xlu1 %3516  ;;  %vm7948_vm14 = vmmov %vm7947_vm0  ;;  %v7949_v44 = vld [vmem:[#allocation72_spill] sm:$0xff]  ;;  %v2932_v12 = vsel %vm7646_vm15, %v2928_v30, 0.0  ;;  %vm7952_vm0 = vcmask 392192  }
 0x403   :  { %v3090_v32 = vsel %vm7944_vm7, %v3086_v57, 0.0  ;;  %v3091_v52 = vsel %vm7946_vm6, %v3087_v1, 0.0  ;;  %v2927_v21 = vsel %vm7948_vm14, %v2922_v25, %v2924_v20  ;;  %v2695_v25 = vrot.slane %v5816_v14, %v4592_v59  ;;  %vm7953_vm6 = vmmov %vm7952_vm0 }
 0x404   :  { %v3094_v11 = vcombine.low %v3090_v32, %v3091_v52  ;;  %v2931_v1 = vsel %vm100_vm1, %v2927_v21, 0.0  ;;  %v7956_v21 = vld [vmem:[#allocation81_spill] sm:$0xff] }
 0x405   :  { %v3238_v16 = vpop.permute.xlu0 %3237  ;;  %v2935_v32 = vcombine.low %v2931_v1, %v2932_v12  ;;  %vm7957_vm5 = vcmp.lt.s32.totalorder %v7956_v21, 16  ;;  %v2725_v12 = vrot.slane %v5818_v61, %v4598_v2 }
 0x406   :  { %v3101_v17 = vrot.slane %v3094_v11, %v4566_v35  ;;  %2664 = vrot.lane.b32.xlu1 %v2657_v55, %s7925_s22  ;;  %v3243_v20 = vsel %vm1250_vm4, %v3238_v16, %v3240_v45  ;;  %v3672_v52 = vpop.permute.xlu1 %3671  ;;  %v7951_v11 = vld [vmem:[#allocation82_spill] sm:$0xff]  ;;  %s8196_s22 = smov 30  }
 0x407   :  { %v2942_v16 = vrot.slane %v2935_v32, %v4566_v35 }
 0x408   :  { %v3108_v28 = vrot.slane %v3101_v17, %v4566_v35 }
 0x409   :  { %v3242_v57 = vpop.permute.xlu0 %3241  ;;  %v2949_v32 = vrot.slane %v2942_v16, %v4566_v35 }
 0x40a   :  { %v3244_v27 = vsel %vm1250_vm4, %v3240_v45, %v3242_v57  ;;  %2696 = vrot.lane.b32.xlu1 %v2687_v15, %s7927_s2  ;;  %3109 = vrot.lane.b32.xlu0 %v3108_v28, %s7924_s1  ;;  %v7955_v28 = vld [vmem:[#allocation144_spill] sm:$0xff]  ;;  %v3247_v45 = vsel %vm7957_vm5, %v3243_v20, 0.0  ;;  %vm7958_vm4 = vcmask 359424   ;;  %vm7653_vm5 = vcmask 1014784  }
 0x40b   :  { %v3248_v55 = vsel %vm7645_vm9, %v3244_v27, 0.0  ;;  %v3829_v27 = vpop.permute.xlu1 %3828  ;;  %vm7959_vm7 = vmmov %vm7958_vm4  ;;  %vm660_vm9 = vcmask 875520  }
 0x40c   :  { %v3251_v14 = vcombine.low %v3247_v45, %v3248_v55 }
 0x40d   :  { %v3515_v30 = vpop.permute.xlu0 %3514 }
 0x40e   :  { %v3518_v17 = vsel %vm7952_vm0, %v3513_v7, %v3515_v30  ;;  %v3519_v15 = vsel %vm7953_vm6, %v3515_v30, %v3517_v40  ;;  %2700 = vrot.lane.b32.xlu1 %v2695_v25, %s7927_s2  ;;  %3384 = vrot.lane.b32.xlu0 %v7955_v28, %s7954_s23  ;;  %v3258_v1 = vrot.slane %v3251_v14, %v4566_v35  ;;  %vm7655_vm0 = vcmask 1039360   ;;  %s8220_s2 = smov 28  }
 0x40f   :  { %v3522_v57 = vsel %vm7648_vm10, %v3518_v17, 0.0  ;;  %v3523_v7 = vsel %vm7647_vm8, %v3519_v15, 0.0  ;;  %vm7651_vm6 = vcmask 1031168  }
 0x410   :  { %v3526_v25 = vcombine.low %v3522_v57, %v3523_v7  ;;  %v3265_v14 = vrot.slane %v3258_v1, %v4566_v35 }
 0x411   :  { %v3670_v40 = vpop.permute.xlu0 %3669 }
 0x412   :  { %2732 = vrot.lane.b32.xlu1 %v2725_v12, %s7928_s20  ;;  %v3675_v20 = vsel %vm7958_vm4, %v3670_v40, %v3672_v52  ;;  %v3533_v28 = vrot.slane %v3526_v25, %v4566_v35  ;;  %v3833_v12 = vpop.permute.xlu1 %3832  ;;  %vm7652_vm4 = vcmask 1006592  }
 0x413   :  { %v3679_v17 = vsel %vm7686_vm2, %v3675_v20, 0.0 }
 0x415   :  { %v3674_v55 = vpop.permute.xlu0 %3673 }
 0x416   :  { %v3676_v30 = vsel %vm7959_vm7, %v3672_v52, %v3674_v55  ;;  %2950 = vrot.lane.b32.xlu1 %v2949_v32, %s7924_s1  ;;  %v3540_v32 = vrot.slane %v3533_v28, %v4566_v35  ;;  %vm7650_vm7 = vcmask 998400  }
 0x417   :  { %v3680_v15 = vsel %vm7685_vm3, %v3676_v30, 0.0 }
 0x418   :  { %v3683_v45 = vcombine.low %v3679_v17, %v3680_v15 }
 0x419   :  { %v3831_v57 = vpop.permute.xlu0 %3830 }
 0x41a   :  { %v3690_v16 = vrot.slane %v3683_v45, %v4566_v35  ;;  %v3834_v7 = vsel %vm1856_vm12, %v3829_v27, %v3831_v57  ;;  %v3835_v52 = vsel %vm1856_vm12, %v3831_v57, %v3833_v12  ;;  %3266 = vrot.lane.b32.xlu1 %v3265_v14, %s7924_s1  ;;  %v3988_v27 = vpop.permute.xlu1 %3987  ;;  %vm7960_vm12 = vcmask 220160  }
 0x41b   :  { %v3838_v40 = vsel %vm74_vm13, %v3834_v7, 0.0  ;;  %v3839_v20 = vsel %vm7658_vm11, %v3835_v52, 0.0  ;;  %vm7961_vm14 = vmmov %vm7960_vm12  ;;  %v209_v52 = vstv %s207_s27 }
 0x41c   :  { %v3842_v25 = vcombine.low %v3838_v40, %v3839_v20  ;;  %v3697_v1 = vrot.slane %v3690_v16, %v4566_v35  ;;  %v2729_v16 = vrot.slane %v5818_v61, %v4592_v59  ;;  %v7962_v40 = vld [vmem:[#allocation145_spill] sm:$0xff]  ;;  %v7966_v61 = vld [vmem:[#allocation146_spill] sm:$0xff] }
 0x41d   :  { %v3986_v55 = vpop.permute.xlu0 %3985  ;;  %v2816_v20 = vrot.slane %v7962_v40, %v4598_v2 }
 0x41e   :  { %v3849_v30 = vrot.slane %v3842_v25, %v4566_v35  ;;  %3541 = vrot.lane.b32.xlu1 %v3540_v32, %s7924_s1  ;;  %3698 = vrot.lane.b32.xlu0 %v3697_v1, %s7924_s1  ;;  %v3991_v17 = vsel %vm7960_vm12, %v3986_v55, %v3988_v27  ;;  %v211_v32 = vstv %s4131_s26  ;;  %v7963_v1 = vld [vmem:[#allocation127_spill] sm:$0xff]  ;;  %vm7654_vm12 = vcmask 908288  }
 0x41f   :  { %v3995_v28 = vsel %vm100_vm1, %v3991_v17, 0.0  ;;  %v210_v55 = vmul.f32 %v209_v52, %v7963_v1  ;;  %v2846_v17 = vrot.slane %v7966_v61, %v4588_v56  ;;  %v7969_v52 = vld [vmem:[#allocation15_spill] sm:$0xff]  ;;  %v7972_v1 = vld [vmem:[#allocation12_spill] sm:$0xff] }
 0x420   :  { %v3856_v15 = vrot.slane %v3849_v30, %v4566_v35  ;;  %v7965_v30 = vld [vmem:[#allocation130_spill] sm:$0xff] }
 0x421   :  { %v3990_v45 = vpop.permute.xlu0 %3989 }
 0x422   :  { %v3992_v14 = vsel %vm7961_vm14, %v3988_v27, %v3990_v45  ;;  %3857 = vrot.lane.b32.xlu1 %v3856_v15, %s7924_s1  ;;  %v212_v27 = vmul.f32 %v211_v32, %v7965_v30  ;;  %v2812_v15 = vrot.slane %v7962_v40, %v4588_v56  ;;  %vm7657_vm14 = vcmask 900096   ;;  %v7973_v30 = vld [vmem:[#allocation21_spill] sm:$0xff] }
 0x423   :  { %v3996_v12 = vsel %vm7646_vm15, %v3992_v14, 0.0  ;;  %v2820_v14 = vrot.slane %v7962_v40, %v4592_v59  ;;  %v7970_v40 = vld [vmem:[#allocation13_spill] sm:$0xff]  ;;  %vm7661_vm15 = vcmask 867328  }
 0x424   :  { %v3999_v57 = vcombine.low %v3995_v28, %v3996_v12  ;;  %v213_v45 = vadd.f32 %v212_v27, %v210_v55  ;;  %v259_v55 = vsel %vm7655_vm0, %v7969_v52, %v7972_v1  ;;  %v7974_v27 = vld [vmem:[#allocation16_spill] sm:$0xff] }
 0x426   :  { %v4006_v7 = vrot.slane %v3999_v57, %v4566_v35  ;;  %2734 = vrot.lane.b32.xlu1 %v2729_v16, %s7928_s20  ;;  %v218_v28 = vrot.slane %v213_v45, %v4588_v56  ;;  %v222_v12 = vrot.slane %v213_v45, %v4598_v2  ;;  %v7968_v57 = vld [vmem:[#allocation147_spill] sm:$0xff]  ;;  %v7976_v45 = vld [vmem:[#allocation148_spill] sm:$0xff]  ;;  %s8224_s20 = smov 26  }
 0x427   :  { %v2882_v16 = vrot.slane %v7968_v57, %v4598_v2 }
 0x428   :  { %v4013_v25 = vrot.slane %v4006_v7, %v4566_v35  ;;  %v2854_v35 = vrot.slane %v7966_v61, %v4592_v59  ;;  %v2850_v7 = vrot.slane %v7966_v61, %v4598_v2  ;;  %v226_v32 = vsel %vm7647_vm8, %v222_v12, 0.0  ;;  %v7977_v12 = vld [vmem:[#allocation14_spill] sm:$0xff] }
 0x429   :  { %v336_v61 = vsel %vm7653_vm5, %v7974_v27, %v7973_v30  ;;  %vm7659_vm8 = vcmask 891904   ;;  %v294_v37 = vsel %vm7651_vm6, %v7977_v12, %v7982_v19  ;;  %v7988_v19 = vld [vmem:[#allocation30_spill] sm:$0xff] }
 0x42a   :  { %2823 = vrot.lane.b32.xlu1 %v2816_v20, %s7964_s16  ;;  %4014 = vrot.lane.b32.xlu0 %v4013_v25, %s7924_s1  ;;  %v258_v20 = vsel %vm7655_vm0, %v7970_v40, %v7969_v52  ;;  %v225_v25 = vsel %vm7648_vm10, %v218_v28, 0.0  ;;  %vm730_vm10 = vcmask 785408   ;;  %v7979_v52 = vld [vmem:[#allocation20_spill] sm:$0xff]  ;;  %v7980_v40 = vld [vmem:[#allocation23_spill] sm:$0xff]  ;;  %vm7994_vm0 = vcmp.lt.s32.totalorder %v7951_v11, 16  ;;  %s8149_s1 = smov 45  }
 0x42b   :  { %v262_v28 = vsel %vm74_vm13, %v258_v20, 0.0  ;;  %v371_v1 = vsel %vm7652_vm4, %v7980_v40, %v7979_v52  ;;  %v7983_v20 = vld [vmem:[#allocation26_spill] sm:$0xff]  ;;  %v7987_v40 = vld [vmem:[#allocation27_spill] sm:$0xff] }
 0x42c   :  { %v406_v63 = vsel %vm7650_vm7, %v7984_v41, %v7983_v20 }
 0x42e   :  { %2855 = vrot.lane.b32.xlu1 %v2846_v17, %s7967_s6  ;;  %2821 = vrot.lane.b32.xlu0 %v2812_v15, %s7964_s16  ;;  %v7975_v17 = vld [vmem:[#allocation18_spill] sm:$0xff] }
 0x42f   :  { %v337_v15 = vsel %vm7653_vm5, %v7973_v30, %v7975_v17  ;;  %v7981_v30 = vld [vmem:[#allocation25_spill] sm:$0xff]  ;;  %v263_v17 = vsel %vm7658_vm11, %v259_v55, 0.0  ;;  %vm7992_vm5 = vcmp.ge.s32.totalorder %v7945_v54, 0 }
 0x430   :  { %v372_v27 = vsel %vm7652_vm4, %v7979_v52, %v7981_v30  ;;  %v340_v52 = vsel %vm7686_vm2, %v336_v61, 0.0  ;;  %v341_v55 = vsel %vm7685_vm3, %v337_v15, 0.0  ;;  %v7989_v30 = vld [vmem:[#allocation32_spill] sm:$0xff]  ;;  %v2977_v61 = vrot.slane %v7976_v45, %v4592_v59 }
 0x431   :  { %v501_v41 = vsel %vm7654_vm12, %v7987_v40, %v7989_v30  ;;  %v2886_v15 = vrot.slane %v7968_v57, %v4592_v59  ;;  %vm7991_vm4 = vcmp.ge.s32.totalorder %v7943_v23, 0 }
 0x432   :  { %2859 = vrot.lane.b32.xlu1 %v2854_v35, %s7967_s6  ;;  %2825 = vrot.lane.b32.xlu0 %v2820_v14, %s7964_s16  ;;  %v2969_v35 = vrot.slane %v7976_v45, %v4588_v56  ;;  %v2878_v14 = vrot.slane %v7968_v57, %v4588_v56  ;;  %v505_v57 = vsel %vm7658_vm11, %v501_v41, 0.0  ;;  %vm7668_vm11 = vcmask 646144  }
 0x436   :  { %2889 = vrot.lane.b32.xlu1 %v2882_v16, %s7971_s4  ;;  %2857 = vrot.lane.b32.xlu0 %v2850_v7, %s7967_s6  ;;  %v7978_v16 = vld [vmem:[#allocation17_spill] sm:$0xff] }
 0x437   :  { %v293_v7 = vsel %vm7651_vm6, %v7978_v16, %v7977_v12  ;;  %v7985_v16 = vld [vmem:[#allocation24_spill] sm:$0xff]  ;;  %v500_v12 = vsel %vm7654_vm12, %v7988_v19, %v7987_v40  ;;  %vm7662_vm6 = vcmask 769024   ;;  %vm7993_vm12 = vcmp.lt.s32.totalorder %v7956_v21, 16 }
 0x438   :  { %v407_v29 = vsel %vm7650_vm7, %v7983_v20, %v7985_v16  ;;  %v375_v20 = vsel %vm100_vm1, %v371_v1, 0.0  ;;  %vm7990_vm7 = vcmp.lt.s32.totalorder %v7949_v44, 16  ;;  %v298_v16 = vsel %vm7992_vm5, %v294_v37, 0.0 }
 0x439   :  { %v410_v40 = vsel %vm7993_vm12, %v406_v63, 0.0  ;;  %v411_v1 = vsel %vm7994_vm0, %v407_v29, 0.0  ;;  %v343_v19 = vadd.f32 %v341_v55, %v226_v32  ;;  %v504_v30 = vsel %vm74_vm13, %v500_v12, 0.0  ;;  %v7996_v63 = vld [vmem:[#allocation28_spill] sm:$0xff]  ;;  %v7997_v29 = vld [vmem:[#allocation29_spill] sm:$0xff]  ;;  %v7998_v55 = vld [vmem:[#allocation149_spill] sm:$0xff] }
 0x43a   :  { %2978 = vrot.lane.b32.xlu1 %v2969_v35, %s7986_s18  ;;  %2887 = vrot.lane.b32.xlu0 %v2878_v14, %s7971_s4  ;;  %v376_v35 = vsel %vm7990_vm7, %v372_v27, 0.0  ;;  %v297_v14 = vsel %vm7991_vm4, %v293_v7, 0.0  ;;  %v342_v27 = vadd.f32 %v340_v52, %v225_v25  ;;  %vm7665_vm7 = vcmask 752640  }
 0x43b   :  { %v377_v37 = vadd.f32 %v375_v20, %v262_v28  ;;  %v378_v7 = vadd.f32 %v376_v35, %v263_v17  ;;  %v535_v8 = vsel %vm7657_vm14, %v7996_v63, %v7995_v48  ;;  %v536_v25 = vsel %vm7657_vm14, %v7995_v48, %v7997_v29  ;;  %v7999_v20 = vld [vmem:[#allocation39_spill] sm:$0xff]  ;;  %v8010_v63 = vld [vmem:[#allocation36_spill] sm:$0xff] }
 0x43c   :  { %vm7666_vm0 = vcmask 760832   ;;  %vm7663_vm5 = vcmask 736256   ;;  %v412_v32 = vadd.f32 %v410_v40, %v297_v14  ;;  %v413_v52 = vadd.f32 %v411_v1, %v298_v16  ;;  %v8000_v35 = vld [vmem:[#allocation35_spill] sm:$0xff]  ;;  %v8004_v40 = vld [vmem:[#allocation38_spill] sm:$0xff]  ;;  %v8005_v1 = vld [vmem:[#allocation41_spill] sm:$0xff] }
 0x43d   :  { %vm7664_vm4 = vcmask 654336   ;;  %v3007_v12 = vrot.slane %v7998_v55, %v4598_v2  ;;  %v2973_v28 = vrot.slane %v7976_v45, %v4598_v2  ;;  %v506_v17 = vadd.f32 %v504_v30, %v342_v27  ;;  %v8006_v27 = vld [vmem:[#allocation43_spill] sm:$0xff] }
 0x43e   :  { %2982 = vrot.lane.b32.xlu1 %v2977_v61, %s7986_s18  ;;  %2891 = vrot.lane.b32.xlu0 %v2886_v15, %s7971_s4  ;;  %v507_v41 = vadd.f32 %v505_v57, %v343_v19  ;;  %v661_v61 = vsel %vm660_vm9, %v8000_v35, %v7999_v20  ;;  %v8001_v15 = vld [vmem:[#allocation37_spill] sm:$0xff]  ;;  %vm8002_vm12 = vcmp.ge.s32.totalorder %v7943_v23, 0  ;;  %vm8003_vm14 = vcmp.ge.s32.totalorder %v7945_v54, 0  ;;  %v8008_v30 = vld [vmem:[#allocation31_spill] sm:$0xff]  ;;  %v8009_v57 = vld [vmem:[#allocation34_spill] sm:$0xff] }
 0x43f   :  { %v662_v48 = vsel %vm660_vm9, %v7999_v20, %v8001_v15  ;;  %v539_v14 = vsel %vm8002_vm12, %v535_v8, 0.0  ;;  %v540_v16 = vsel %vm8003_vm14, %v536_v25, 0.0  ;;  %v696_v45 = vsel %vm7661_vm15, %v8005_v1, %v8004_v40  ;;  %v8011_v25 = vld [vmem:[#allocation44_spill] sm:$0xff]  ;;  %v8013_v15 = vld [vmem:[#allocation42_spill] sm:$0xff] }
 0x440   :  { %v697_v19 = vsel %vm7661_vm15, %v8004_v40, %v8006_v27  ;;  %v570_v8 = vsel %vm7659_vm8, %v8009_v57, %v8008_v30  ;;  %v571_v29 = vsel %vm7659_vm8, %v8008_v30, %v8010_v63  ;;  %v8012_v20 = vld [vmem:[#allocation40_spill] sm:$0xff]  ;;  %v732_v40 = vsel %vm730_vm10, %v8011_v25, %v8013_v15 }
 0x441   :  { %v731_v35 = vsel %vm730_vm10, %v8012_v20, %v8011_v25  ;;  %vm8014_vm14 = vcmp.lt.s32.totalorder %v7949_v44, 16  ;;  %v8015_v1 = vld [vmem:[#allocation150_spill] sm:$0xff]  ;;  %v3003_v30 = vrot.slane %v7998_v55, %v4588_v56  ;;  %v541_v57 = vadd.f32 %v539_v14, %v377_v37  ;;  %v8021_v14 = vld [vmem:[#allocation45_spill] sm:$0xff] }
 0x442   :  { %3014 = vrot.lane.b32.xlu1 %v3007_v12, %s8007_s21  ;;  %2980 = vrot.lane.b32.xlu0 %v2973_v28, %s7986_s18  ;;  %v665_v12 = vsel %vm100_vm1, %v661_v61, 0.0  ;;  %v666_v28 = vsel %vm8014_vm14, %v662_v48, 0.0  ;;  %v3037_v27 = vrot.slane %v8015_v1, %v4588_v56  ;;  %v542_v63 = vadd.f32 %v540_v16, %v378_v7  ;;  %v8022_v16 = vld [vmem:[#allocation48_spill] sm:$0xff] }
 0x443   :  { %vm8016_vm12 = vcmp.lt.s32.totalorder %v7956_v21, 16  ;;  %vm8017_vm8 = vcmp.lt.s32.totalorder %v7951_v11, 16  ;;  %v574_v15 = vadd.f32 %v570_v8, %v412_v32  ;;  %v575_v31 = vadd.f32 %v571_v29, %v413_v52 }
 0x444   :  { %v700_v20 = vsel %vm8016_vm12, %v696_v45, 0.0  ;;  %v701_v25 = vsel %vm8017_vm8, %v697_v19, 0.0  ;;  %vm8018_vm15 = vcmp.ge.s32.totalorder %v5169_v5, 0  ;;  %vm8019_vm14 = vcmp.ge.s32.totalorder %v5153_v36, 0 }
 0x445   :  { %v735_v61 = vsel %vm8018_vm15, %v731_v35, 0.0  ;;  %v736_v48 = vsel %vm8019_vm14, %v732_v40, 0.0  ;;  %v667_v37 = vadd.f32 %v665_v12, %v506_v17  ;;  %v668_v7 = vadd.f32 %v666_v28, %v507_v41  ;;  %v8024_v35 = vld [vmem:[#allocation49_spill] sm:$0xff]  ;;  %v8025_v40 = vld [vmem:[#allocation52_spill] sm:$0xff]  ;;  %v8026_v28 = vld [vmem:[#allocation54_spill] sm:$0xff] }
 0x446   :  { %3046 = vrot.lane.b32.xlu1 %v3037_v27, %s8020_s3  ;;  %3012 = vrot.lane.b32.xlu0 %v3003_v30, %s8007_s21  ;;  %v824_v45 = vsel %vm7662_vm6, %v8022_v16, %v8021_v14  ;;  %v825_v32 = vsel %vm7662_vm6, %v8021_v14, %v8023_v51  ;;  %vm7667_vm8 = vcmask 629760   ;;  %vm7670_vm12 = vcmask 621568   ;;  %v8035_v16 = vld [vmem:[#allocation56_spill] sm:$0xff] }
 0x447   :  { %v702_v52 = vadd.f32 %v700_v20, %v541_v57  ;;  %v703_v19 = vadd.f32 %v701_v25, %v542_v63  ;;  %vm7669_vm15 = vcmask 613376   ;;  %v3045_v8 = vrot.slane %v8015_v1, %v4592_v59  ;;  %v8029_v57 = vld [vmem:[#allocation51_spill] sm:$0xff]  ;;  %v8030_v63 = vld [vmem:[#allocation46_spill] sm:$0xff]  ;;  %v8031_v20 = vld [vmem:[#allocation57_spill] sm:$0xff] }
 0x448   :  { %v3011_v17 = vrot.slane %v7998_v55, %v4592_v59  ;;  %v737_v41 = vadd.f32 %v735_v61, %v574_v15  ;;  %v738_v29 = vadd.f32 %v736_v48, %v575_v31  ;;  %v892_v12 = vsel %vm7665_vm7, %v8025_v40, %v8024_v35  ;;  %v8032_v31 = vld [vmem:[#allocation53_spill] sm:$0xff]  ;;  %v8033_v15 = vld [vmem:[#allocation47_spill] sm:$0xff] }
 0x449   :  { %v893_v51 = vsel %vm7665_vm7, %v8024_v35, %v8026_v28  ;;  %vm8027_vm14 = vcmp.ge.s32.totalorder %v7943_v23, 0  ;;  %vm8028_vm6 = vcmp.ge.s32.totalorder %v7945_v54, 0  ;;  %v859_v55 = vsel %vm7666_vm0, %v8030_v63, %v8029_v57  ;;  %v8034_v48 = vld [vmem:[#allocation55_spill] sm:$0xff]  ;;  %v8037_v35 = vld [vmem:[#allocation61_spill] sm:$0xff] }
 0x44a   :  { %v828_v27 = vsel %vm8027_vm14, %v824_v45, 0.0  ;;  %v829_v30 = vsel %vm8028_vm6, %v825_v32, 0.0  ;;  %v985_v25 = vsel %vm7663_vm5, %v8032_v31, %v8031_v20  ;;  %3050 = vrot.lane.b32.xlu1 %v3045_v8, %s8020_s3  ;;  %3016 = vrot.lane.b32.xlu0 %v3011_v17, %s8007_s21  ;;  %v860_v61 = vsel %vm7666_vm0, %v8029_v57, %v8033_v15  ;;  %v8036_v45 = vld [vmem:[#allocation59_spill] sm:$0xff]  ;;  %v8038_v28 = vld [vmem:[#allocation151_spill] sm:$0xff] }
 0x44b   :  { %v986_v14 = vsel %vm7663_vm5, %v8031_v20, %v8034_v48  ;;  %v1020_v32 = vsel %vm7664_vm4, %v8036_v45, %v8035_v16  ;;  %v1021_v40 = vsel %vm7664_vm4, %v8035_v16, %v8037_v35  ;;  %vm7672_vm6 = vcmask 515072   ;;  %v8040_v48 = vld [vmem:[#allocation63_spill] sm:$0xff]  ;;  %v8041_v16 = vld [vmem:[#allocation58_spill] sm:$0xff] }
 0x44c   :  { %v896_v8 = vsel %vm7686_vm2, %v892_v12, 0.0  ;;  %v897_v17 = vsel %vm7685_vm3, %v893_v51, 0.0  ;;  %vm7671_vm14 = vcmask 506880   ;;  %v3132_v57 = vrot.slane %v8038_v28, %v4598_v2 }
 0x44d   :  { %v3041_v63 = vrot.slane %v8015_v1, %v4598_v2  ;;  %v830_v20 = vadd.f32 %v828_v27, %v667_v37  ;;  %v831_v31 = vadd.f32 %v829_v30, %v668_v7  ;;  %vm8039_vm5 = vcmp.lt.s32.totalorder %v7956_v21, 16 }
 0x44e   :  { %v989_v15 = vsel %vm8039_vm5, %v985_v25, 0.0  ;;  %v1055_v45 = vsel %vm7668_vm11, %v8041_v16, %v8040_v48  ;;  %vm8042_vm4 = vcmp.lt.s32.totalorder %v7951_v11, 16  ;;  %vm8043_vm7 = vcmp.ge.s32.totalorder %v5169_v5, 0  ;;  %3139 = vrot.lane.b32.xlu1 %v3132_v57, %s8046_s5  ;;  %v8055_v16 = vld [vmem:[#allocation73_spill] sm:$0xff] }
 0x44f   :  { %v990_v12 = vsel %vm8042_vm4, %v986_v14, 0.0  ;;  %v1024_v51 = vsel %vm8043_vm7, %v1020_v32, 0.0  ;;  %vm8044_vm0 = vcmp.ge.s32.totalorder %v5153_v36, 0  ;;  %v1056_v1 = vsel %vm7668_vm11, %v8040_v48, %v8045_v13  ;;  %3048 = vrot.lane.b32.xlu0 %v3041_v63, %s8020_s3  ;;  %v8047_v32 = vld [vmem:[#allocation152_spill] sm:$0xff] }
 0x450   :  { %v1025_v35 = vsel %vm8044_vm0, %v1021_v40, 0.0  ;;  %v863_v37 = vadd.f32 %v859_v55, %v702_v52  ;;  %v864_v7 = vadd.f32 %v860_v61, %v703_v19  ;;  %v898_v27 = vadd.f32 %v896_v8, %v737_v41  ;;  %v8049_v41 = vld [vmem:[#allocation66_spill] sm:$0xff]  ;;  %v8051_v61 = vld [vmem:[#allocation76_spill] sm:$0xff] }
 0x451   :  { %v899_v30 = vadd.f32 %v897_v17, %v738_v29  ;;  %v1059_v25 = vsel %vm74_vm13, %v1055_v45, 0.0  ;;  %v991_v14 = vadd.f32 %v989_v15, %v830_v20  ;;  %vm7677_vm7 = vcmask 490496   ;;  %v8050_v29 = vld [vmem:[#allocation74_spill] sm:$0xff]  ;;  %v8052_v17 = vld [vmem:[#allocation77_spill] sm:$0xff]  ;;  %v8056_v45 = vld [vmem:[#allocation75_spill] sm:$0xff] }
 0x452   :  { %vm7673_vm5 = vcmask 482304   ;;  %v3160_v40 = vrot.slane %v8047_v32, %v4588_v56  ;;  %v3128_v13 = vrot.slane %v8038_v28, %v4588_v56  ;;  %v1026_v48 = vadd.f32 %v1024_v51, %v863_v37  ;;  %v8053_v63 = vld [vmem:[#allocation70_spill] sm:$0xff] }
 0x453   :  { %v1027_v57 = vadd.f32 %v1025_v35, %v864_v7  ;;  %vm8048_vm0 = vcmp.ge.s32.totalorder %v7940_v3, 0  ;;  %v992_v19 = vadd.f32 %v990_v12, %v831_v31  ;;  %v1148_v55 = vsel %vm7667_vm8, %v8050_v29, %v8049_v41  ;;  %v8057_v12 = vld [vmem:[#allocation78_spill] sm:$0xff]  ;;  %v8058_v35 = vld [vmem:[#allocation80_spill] sm:$0xff]  ;;  %v8059_v7 = vld [vmem:[#allocation85_spill] sm:$0xff] }
 0x454   :  { %v1060_v52 = vsel %vm8048_vm0, %v1056_v1, 0.0  ;;  %v1149_v8 = vsel %vm7667_vm8, %v8049_v41, %v8051_v61  ;;  %v1181_v20 = vsel %vm7670_vm12, %v8053_v63, %v8052_v17  ;;  %vm7674_vm4 = vcmask 474112   ;;  %3169 = vrot.lane.b32.xlu1 %v3160_v40, %s8054_s11  ;;  %3137 = vrot.lane.b32.xlu0 %v3128_v13, %s8046_s5  ;;  %v8060_v41 = vld [vmem:[#allocation79_spill] sm:$0xff] }
 0x455   :  { %v1061_v15 = vadd.f32 %v1059_v25, %v898_v27  ;;  %v1182_v31 = vsel %vm7670_vm12, %v8052_v17, %v8055_v16  ;;  %v1216_v51 = vsel %vm7669_vm15, %v8057_v12, %v8056_v45  ;;  %v1217_v1 = vsel %vm7669_vm15, %v8056_v45, %v8058_v35  ;;  %v8062_v17 = vld [vmem:[#allocation83_spill] sm:$0xff]  ;;  %v8065_v45 = vld [vmem:[#allocation84_spill] sm:$0xff] }
 0x456   :  { %v1062_v37 = vadd.f32 %v1060_v52, %v899_v30  ;;  %vm8061_vm0 = vcmask 523264   ;;  %vm7675_vm8 = vcmask 384000   ;;  %vm7676_vm11 = vcmask 375808  }
 0x457   :  { %v1309_v40 = vsel %vm8061_vm0, %v8060_v41, %v8059_v7  ;;  %v3168_v27 = vrot.slane %v8047_v32, %v4592_v59  ;;  %v3136_v25 = vrot.slane %v8038_v28, %v4592_v59  ;;  %v1152_v13 = vadd.f32 %v1148_v55, %v991_v14  ;;  %vm8063_vm15 = vmmov %vm8061_vm0  ;;  %v8066_v28 = vld [vmem:[#allocation87_spill] sm:$0xff]  ;;  %v8068_v55 = vld [vmem:[#allocation89_spill] sm:$0xff] }
 0x458   :  { %v1153_v29 = vadd.f32 %v1149_v8, %v992_v19  ;;  %v1185_v61 = vsel %vm7686_vm2, %v1181_v20, 0.0  ;;  %v1310_v30 = vsel %vm8063_vm15, %v8059_v7, %v8062_v17  ;;  %v1186_v52 = vsel %vm7685_vm3, %v1182_v31, 0.0  ;;  %v8069_v20 = vld [vmem:[#allocation91_spill] sm:$0xff]  ;;  %v8070_v31 = vld [vmem:[#allocation86_spill] sm:$0xff] }
 0x459   :  { %v1220_v63 = vsel %vm100_vm1, %v1216_v51, 0.0  ;;  %vm8064_vm0 = vcmp.lt.s32.totalorder %v7949_v44, 16  ;;  %v1344_v14 = vsel %vm7672_vm6, %v8066_v28, %v8065_v45  ;;  %3173 = vrot.lane.b32.xlu1 %v3168_v27, %s8054_s11  ;;  %3141 = vrot.lane.b32.xlu0 %v3136_v25, %s8046_s5  ;;  %vm8067_vm12 = vcmp.ge.s32.totalorder %v5169_v5, 0  ;;  %v8071_v51 = vld [vmem:[#allocation88_spill] sm:$0xff]  ;;  %v8073_v41 = vld [vmem:[#allocation153_spill] sm:$0xff] }
 0x45a   :  { %v1221_v16 = vsel %vm8064_vm0, %v1217_v1, 0.0  ;;  %v1313_v19 = vsel %vm8067_vm12, %v1309_v40, 0.0  ;;  %v1345_v8 = vsel %vm7672_vm6, %v8065_v45, %v8068_v55  ;;  %v1379_v12 = vsel %vm7671_vm14, %v8070_v31, %v8069_v20 }
 0x45b   :  { %v1380_v35 = vsel %vm7671_vm14, %v8069_v20, %v8071_v51  ;;  %v1187_v1 = vadd.f32 %v1185_v61, %v1026_v48  ;;  %vm8072_vm15 = vcmp.ge.s32.totalorder %v5153_v36, 0  ;;  %vm1751_vm0 = vcmask 351232  }
 0x45c   :  { %v1314_v7 = vsel %vm8072_vm15, %v1310_v30, 0.0  ;;  %v3198_v40 = vrot.slane %v8073_v41, %v4598_v2  ;;  %v3164_v27 = vrot.slane %v8047_v32, %v4598_v2  ;;  %v1188_v25 = vadd.f32 %v1186_v52, %v1027_v57  ;;  %v8078_v57 = vld [vmem:[#allocation94_spill] sm:$0xff]  ;;  %v8080_v52 = vld [vmem:[#allocation92_spill] sm:$0xff] }
 0x45d   :  { %v1222_v17 = vadd.f32 %v1220_v63, %v1061_v15  ;;  %v1223_v45 = vadd.f32 %v1221_v16, %v1062_v37  ;;  %v1348_v28 = vsel %vm74_vm13, %v1344_v14, 0.0  ;;  %vm1914_vm12 = vcmask 244736   ;;  %v8079_v15 = vld [vmem:[#allocation90_spill] sm:$0xff]  ;;  %v8081_v63 = vld [vmem:[#allocation93_spill] sm:$0xff]  ;;  %v8082_v16 = vld [vmem:[#allocation96_spill] sm:$0xff] }
 0x45e   :  { %v1315_v55 = vadd.f32 %v1313_v19, %v1152_v13  ;;  %vm8074_vm14 = vcmp.ge.s32.totalorder %v7940_v3, 0  ;;  %vm8075_vm15 = vcmp.ge.s32.totalorder %v7943_v23, 0  ;;  %vm8076_vm6 = vcmp.ge.s32.totalorder %v7945_v54, 0  ;;  %3205 = vrot.lane.b32.xlu1 %v3198_v40, %s8077_s8  ;;  %3171 = vrot.lane.b32.xlu0 %v3164_v27, %s8054_s11  ;;  %v8085_v40 = vld [vmem:[#allocation99_spill] sm:$0xff] }
 0x45f   :  { %v1349_v48 = vsel %vm8074_vm14, %v1345_v8, 0.0  ;;  %v1383_v61 = vsel %vm8075_vm15, %v1379_v12, 0.0  ;;  %v1384_v30 = vsel %vm8076_vm6, %v1380_v35, 0.0  ;;  %v1316_v32 = vadd.f32 %v1314_v7, %v1153_v29  ;;  %v8083_v8 = vld [vmem:[#allocation98_spill] sm:$0xff]  ;;  %v8084_v29 = vld [vmem:[#allocation154_spill] sm:$0xff]  ;;  %v8086_v27 = vld [vmem:[#allocation95_spill] sm:$0xff] }
 0x460   :  { %v1428_v37 = vsel %vm7677_vm7, %v8079_v15, %v8078_v57  ;;  %v1429_v13 = vsel %vm7677_vm7, %v8078_v57, %v8080_v52  ;;  %v1463_v14 = vsel %vm7673_vm5, %v8082_v16, %v8081_v63  ;;  %vm7680_vm14 = vcmask 367616   ;;  %v8087_v52 = vld [vmem:[#allocation97_spill] sm:$0xff] }
 0x461   :  { %v1350_v19 = vadd.f32 %v1348_v28, %v1187_v1  ;;  %v1464_v20 = vsel %vm7673_vm5, %v8081_v63, %v8083_v8  ;;  %vm1786_vm6 = vcmask 343040   ;;  %vm1821_vm15 = vcmask 261120   ;;  %v8095_v8 = vld [vmem:[#allocation102_spill] sm:$0xff] }
 0x462   :  { %v3285_v31 = vrot.slane %v8084_v29, %v4588_v56  ;;  %v3194_v12 = vrot.slane %v8073_v41, %v4588_v56  ;;  %v1351_v51 = vadd.f32 %v1349_v48, %v1188_v25  ;;  %v1385_v35 = vadd.f32 %v1383_v61, %v1222_v17  ;;  %v8089_v17 = vld [vmem:[#allocation100_spill] sm:$0xff]  ;;  %v8091_v61 = vld [vmem:[#allocation105_spill] sm:$0xff] }
 0x463   :  { %v1386_v7 = vadd.f32 %v1384_v30, %v1223_v45  ;;  %v1498_v57 = vsel %vm7674_vm4, %v8086_v27, %v8085_v40  ;;  %v1432_v1 = vsel %vm7686_vm2, %v1428_v37, 0.0  ;;  %v1433_v28 = vsel %vm7685_vm3, %v1429_v13, 0.0  ;;  %v8090_v45 = vld [vmem:[#allocation103_spill] sm:$0xff]  ;;  %v8092_v37 = vld [vmem:[#allocation106_spill] sm:$0xff]  ;;  %v8093_v13 = vld [vmem:[#allocation101_spill] sm:$0xff] }
 0x464   :  { %v1467_v15 = vsel %vm100_vm1, %v1463_v14, 0.0  ;;  %v1499_v63 = vsel %vm7674_vm4, %v8085_v40, %v8087_v52  ;;  %3294 = vrot.lane.b32.xlu1 %v3285_v31, %s7954_s23  ;;  %3203 = vrot.lane.b32.xlu0 %v3194_v12, %s8077_s8  ;;  %vm8088_vm5 = vcmp.lt.s32.totalorder %v7949_v44, 16  ;;  %v1591_v48 = vsel %vm7675_vm8, %v8090_v45, %v8089_v17 }
 0x465   :  { %v1468_v25 = vsel %vm8088_vm5, %v1464_v20, 0.0  ;;  %v1592_v30 = vsel %vm7675_vm8, %v8089_v17, %v8091_v61  ;;  %v1626_v16 = vsel %vm7676_vm11, %v8093_v13, %v8092_v37  ;;  %vm8094_vm4 = vcmp.lt.s32.totalorder %v7956_v21, 16 }
 0x466   :  { %v1502_v14 = vsel %vm8094_vm4, %v1498_v57, 0.0  ;;  %v1627_v31 = vsel %vm7676_vm11, %v8092_v37, %v8095_v8  ;;  %v3293_v20 = vrot.slane %v8084_v29, %v4592_v59  ;;  %v3202_v12 = vrot.slane %v8073_v41, %v4592_v59 }
 0x467   :  { %v1434_v40 = vadd.f32 %v1432_v1, %v1315_v55  ;;  %v1435_v27 = vadd.f32 %v1433_v28, %v1316_v32  ;;  %v1469_v52 = vadd.f32 %v1467_v15, %v1350_v19  ;;  %vm8096_vm5 = vcmp.lt.s32.totalorder %v7951_v11, 16  ;;  %v8100_v32 = vld [vmem:[#allocation114_spill] sm:$0xff]  ;;  %v8102_v1 = vld [vmem:[#allocation110_spill] sm:$0xff] }
 0x468   :  { %v1503_v17 = vsel %vm8096_vm5, %v1499_v63, 0.0  ;;  %vm7684_vm8 = vcmask 236544   ;;  %v1470_v45 = vadd.f32 %v1468_v25, %v1351_v51  ;;  %v1595_v57 = vsel %vm74_vm13, %v1591_v48, 0.0  ;;  %3298 = vrot.lane.b32.xlu1 %v3293_v20, %s7954_s23  ;;  %3207 = vrot.lane.b32.xlu0 %v3202_v12, %s8077_s8  ;;  %v8101_v19 = vld [vmem:[#allocation108_spill] sm:$0xff]  ;;  %v8103_v63 = vld [vmem:[#allocation123_spill] sm:$0xff]  ;;  %v8104_v25 = vld [vmem:[#allocation120_spill] sm:$0xff] }
 0x469   :  { %vm8097_vm4 = vcmp.ge.s32.totalorder %v7940_v3, 0  ;;  %vm8098_vm11 = vcmp.ge.s32.totalorder %v7943_v23, 0  ;;  %vm8099_vm7 = vcmp.ge.s32.totalorder %v7945_v54, 0  ;;  %v1504_v55 = vadd.f32 %v1502_v14, %v1385_v35  ;;  %v8106_v20 = vld [vmem:[#allocation104_spill] sm:$0xff]  ;;  %v8107_v12 = vld [vmem:[#allocation107_spill] sm:$0xff] }
 0x46a   :  { %v1596_v61 = vsel %vm8097_vm4, %v1592_v30, 0.0  ;;  %v1630_v37 = vsel %vm8098_vm11, %v1626_v16, 0.0  ;;  %v1631_v41 = vsel %vm8099_vm7, %v1627_v31, 0.0  ;;  %v1752_v51 = vsel %vm1751_vm0, %v8101_v19, %v8100_v32  ;;  %v8105_v30 = vld [vmem:[#allocation155_spill] sm:$0xff] }
 0x46b   :  { %v1753_v28 = vsel %vm1751_vm0, %v8100_v32, %v8102_v1  ;;  %v1505_v15 = vadd.f32 %v1503_v17, %v1386_v7  ;;  %v1915_v48 = vsel %vm1914_vm12, %v8104_v25, %v8103_v63  ;;  %v3323_v13 = vrot.slane %v8105_v30, %v4598_v2 }
 0x46c   :  { %v3289_v16 = vrot.slane %v8084_v29, %v4598_v2  ;;  %v1597_v35 = vadd.f32 %v1595_v57, %v1434_v40  ;;  %v1598_v14 = vadd.f32 %v1596_v61, %v1435_v27  ;;  %v1632_v8 = vadd.f32 %v1630_v37, %v1469_v52  ;;  %v8110_v29 = vld [vmem:[#allocation113_spill] sm:$0xff]  ;;  %v8111_v40 = vld [vmem:[#allocation115_spill] sm:$0xff] }
 0x46d   :  { %vm2075_vm11 = vcmask 211968   ;;  %v1633_v31 = vadd.f32 %v1631_v41, %v1470_v45  ;;  %v1661_v32 = vsel %vm7680_vm14, %v8107_v12, %v8106_v20  ;;  %v1756_v7 = vsel %vm100_vm1, %v1752_v51, 0.0  ;;  %3330 = vrot.lane.b32.xlu1 %v3323_v13, %s8109_s25  ;;  %v8112_v52 = vld [vmem:[#allocation119_spill] sm:$0xff]  ;;  %v8113_v45 = vld [vmem:[#allocation116_spill] sm:$0xff]  ;;  %v8115_v37 = vld [vmem:[#allocation121_spill] sm:$0xff] }
 0x46e   :  { %vm8108_vm7 = vcmp.lt.s32.totalorder %v7949_v44, 16  ;;  %3296 = vrot.lane.b32.xlu0 %v3289_v16, %s7954_s23  ;;  %v1787_v27 = vsel %vm1786_vm6, %v8111_v40, %v8110_v29  ;;  %v1822_v57 = vsel %vm1821_vm15, %v8113_v45, %v8112_v52  ;;  %vm8114_vm5 = vcmp.ge.s32.totalorder %v7943_v23, 0  ;;  %v8116_v51 = vld [vmem:[#allocation156_spill] sm:$0xff]  ;;  %v8117_v13 = vld [vmem:[#allocation109_spill] sm:$0xff]  ;;  %v8119_v40 = vld [vmem:[#allocation117_spill] sm:$0xff]  ;;  %s8233_s23 = smov 29  }
 0x46f   :  { %v1757_v17 = vsel %vm8108_vm7, %v1753_v28, 0.0  ;;  %v1919_v61 = vsel %vm8114_vm5, %v1915_v48, 0.0  ;;  %vm7683_vm4 = vcmask 228352   ;;  %v1916_v41 = vsel %vm1914_vm12, %v8103_v63, %v8115_v37  ;;  %v8120_v45 = vld [vmem:[#allocation118_spill] sm:$0xff]  ;;  %v8121_v23 = vld [vmem:[#allocation129_spill] sm:$0xff] }
 0x470   :  { %v2076_v19 = vsel %vm2075_vm11, %v6200_v39, %v6207_v18  ;;  %v3353_v1 = vrot.slane %v8116_v51, %v4588_v56  ;;  %v3319_v28 = vrot.slane %v8105_v30, %v4588_v56  ;;  %v1665_v25 = vadd.f32 %v1661_v32, %v1504_v55  ;;  %v8122_v44 = vld [vmem:[#allocation125_spill] sm:$0xff] }
 0x471   :  { %v1662_v48 = vsel %vm7680_vm14, %v8106_v20, %v8117_v13  ;;  %v1758_v16 = vadd.f32 %v1756_v7, %v1597_v35  ;;  %v1759_v12 = vadd.f32 %v1757_v17, %v1598_v14  ;;  %vm8118_vm7 = vcmp.lt.s32.totalorder %v7956_v21, 16  ;;  %v8127_v7 = vld [vmem:[#allocation122_spill] sm:$0xff]  ;;  %v8128_v17 = vld [vmem:[#allocation124_spill] sm:$0xff] }
 0x472   :  { %v1791_v63 = vsel %vm8118_vm7, %v1787_v27, 0.0  ;;  %v1788_v39 = vsel %vm1786_vm6, %v8110_v29, %v8119_v40  ;;  %v1823_v37 = vsel %vm1821_vm15, %v8112_v52, %v8120_v45  ;;  %v1983_v55 = vsel %vm7683_vm4, %v8122_v44, %v8121_v23  ;;  %3362 = vrot.lane.b32.xlu1 %v3353_v1, %s8123_s14  ;;  %3328 = vrot.lane.b32.xlu0 %v3319_v28, %s8109_s25  ;;  %v2102_v27 = vpop.permute.xlu0 %2101  ;;  %v6904_v52 = vpop.permute.xlu1 %2634 }
 0x473   :  { %vm8124_vm5 = vcmp.ge.s32.totalorder %v5169_v5, 0  ;;  %v1921_v14 = vadd.f32 %v1919_v61, %v1758_v16  ;;  %vm8125_vm7 = vcmp.ge.s32.totalorder %v7945_v54, 0  ;;  %vm8126_vm14 = vcmp.lt.s32.totalorder %v7956_v21, 16 }
 0x474   :  { %v1826_v35 = vsel %vm8124_vm5, %v1822_v57, 0.0  ;;  %v1920_v20 = vsel %vm8125_vm7, %v1916_v41, 0.0  ;;  %v2080_v32 = vsel %vm8126_vm14, %v2076_v19, 0.0  ;;  %v1950_v29 = vsel %vm7684_vm8, %v8128_v17, %v8127_v7 }
 0x475   :  { %v2077_v44 = vsel %vm2075_vm11, %v6207_v18, %v6205_v43  ;;  %v3361_v57 = vrot.slane %v8116_v51, %v4592_v59  ;;  %v3327_v61 = vrot.slane %v8105_v30, %v4592_v59  ;;  %v1793_v41 = vadd.f32 %v1791_v63, %v1632_v8  ;;  %v8131_v18 = vld [vmem:[#allocation126_spill] sm:$0xff] }
 0x476   :  { %vm8129_vm14 = vcmp.lt.s32.totalorder %v7951_v11, 16  ;;  %vm8130_vm5 = vcmp.ge.s32.totalorder %v5153_v36, 0  ;;  %v1987_v28 = vsel %vm7686_vm2, %v1983_v55, 0.0  ;;  %v1828_v43 = vadd.f32 %v1826_v35, %v1665_v25 }
 0x477   :  { %v1792_v19 = vsel %vm8129_vm14, %v1788_v39, 0.0  ;;  %v1827_v1 = vsel %vm8130_vm5, %v1823_v37, 0.0  ;;  %v1984_v13 = vsel %vm7683_vm4, %v8121_v23, %v8131_v18  ;;  %v2082_v16 = vadd.f32 %v2080_v32, %v1921_v14  ;;  %3366 = vrot.lane.b32.xlu1 %v3361_v57, %s8123_s14  ;;  %3332 = vrot.lane.b32.xlu0 %v3327_v61, %s8109_s25  ;;  %v8132_v39 = vld [vmem:[#allocation128_spill] sm:$0xff]  ;;  %v2100_v37 = vpop.permute.xlu1 %2099  ;;  %v8133_v23 = vld [vmem:[#allocation157_spill] sm:$0xff] }
 0x478   :  { %vm7682_vm7 = vcmask 1022976   ;;  %v1666_v30 = vadd.f32 %v1662_v48, %v1505_v15  ;;  %v1922_v8 = vadd.f32 %v1920_v20, %v1759_v12  ;;  %v1954_v63 = vadd.f32 %v1950_v29, %v1793_v41  ;;  %v6933_v20 = vpop.permute.xlu0 %2662 }
 0x479   :  { %v2081_v40 = vsel %vm8129_vm14, %v2077_v44, 0.0  ;;  %v1951_v25 = vsel %vm7684_vm8, %v8127_v7, %v8132_v39  ;;  %v1989_v45 = vadd.f32 %v1987_v28, %v1828_v43  ;;  %v3405_v55 = vrot.slane %v8133_v23, %v4598_v2 }
 0x47a   :  { %v3357_v35 = vrot.slane %v8116_v51, %v4598_v2  ;;  %v1794_v14 = vadd.f32 %v1792_v19, %v1633_v31  ;;  %v1829_v32 = vadd.f32 %v1827_v1, %v1666_v30  ;;  %v1988_v15 = vsel %vm7685_vm3, %v1984_v13, 0.0  ;;  %v8135_v31 = vld [vmem:[#allocation158_spill] sm:$0xff] }
 0x47b   :  { %v2106_v48 = vsel %vm7682_vm7, %v2100_v37, %v2102_v27  ;;  %v2083_v12 = vadd.f32 %v2081_v40, %v1922_v8  ;;  %v2084_v17 = vadd.f32 %v2082_v16, %v1954_v63  ;;  %3412 = vrot.lane.b32.xlu1 %v3405_v55, %s8134_s10  ;;  %v2104_v51 = vpop.permute.xlu1 %2103  ;;  %v3435_v61 = vrot.slane %v8135_v31, %v4588_v56  ;;  %v8137_v40 = vld [vmem:[#allocation159_spill] sm:$0xff] }
 0x47c   :  { %v2110_v7 = vadd.f32 %v2106_v48, %v1989_v45  ;;  %3364 = vrot.lane.b32.xlu0 %v3357_v35, %s8123_s14  ;;  %v1955_v29 = vadd.f32 %v1951_v25, %v1794_v14  ;;  %v1990_v57 = vadd.f32 %v1988_v15, %v1829_v32  ;;  %v3401_v41 = vrot.slane %v8133_v23, %v4588_v56  ;;  %v6944_v18 = vpop.permute.xlu0 %2666  ;;  %v2225_v32 = vld [vmem:[#allocation2 + $0x1] ss:$2 sm:$0x3] }
 0x47d   :  { %v2107_v19 = vsel %vm7682_vm7, %v2102_v27, %v2104_v51  ;;  %v3443_v30 = vrot.slane %v8135_v31, %v4592_v59  ;;  %v3409_v8 = vrot.slane %v8133_v23, %v4592_v59  ;;  %v3473_v39 = vrot.slane %v8137_v40, %v4598_v2  ;;  %v8139_v23 = vld [vmem:[#allocation160_spill] sm:$0xff] }
 0x47e   :  { %v2112_v44 = vadd.f32 %v2110_v7, %v2084_v17  ;;  %v2085_v28 = vadd.f32 %v2083_v12, %v1955_v29  ;;  %v2111_v43 = vadd.f32 %v2107_v19, %v1990_v57  ;;  %v3439_v25 = vrot.slane %v8135_v31, %v4598_v2 }
 0x47f   :  { %3444 = vrot.lane.b32.xlu1 %v3435_v61, %s8136_s19  ;;  %v6946_v16 = vpop.permute.xlu1 %2664  ;;  %v3560_v55 = vrot.slane %v8139_v23, %v4588_v56  ;;  %v3469_v35 = vrot.slane %v8137_v40, %v4588_v56  ;;  %v2230_v15 = vstv %s4230_s7  ;;  %v3568_v7 = vrot.slane %v8139_v23, %v4592_v59 }
 0x480   :  { %v4228_v1 = vmul.f32 -1.442695, %v2112_v44  ;;  %3410 = vrot.lane.b32.xlu0 %v3401_v41, %s8134_s10  ;;  %v2113_v13 = vadd.f32 %v2111_v43, %v2085_v28  ;;  %v6960_v45 = vpop.permute.xlu0 %2698  ;;  %v3477_v29 = vrot.slane %v8137_v40, %v4592_v59  ;;  %v2224_v44 = vld [vmem:[#allocation2] ss:$2 sm:$0x3]  ;;  %v2228_v57 = vstv %s2226_s30 }
 0x481   :  { %v2231_v61 = vmul.f32 %v2230_v15, %v2225_v32  ;;  %v2229_v19 = vmul.f32 %v2228_v57, %v2224_v44  ;;  %v3598_v28 = vrot.slane %v6083_v4, %v4598_v2  ;;  %v3564_v43 = vrot.slane %v8139_v23, %v4598_v2  ;;  %v4020_v23 = vld [vmem:[#allocation2] ss:$2 sm:$0x7]  ;;  %v4021_v15 = vld [vmem:[#allocation2 + $0x1] ss:$2 sm:$0x7] }
 0x482   :  { %4387 = vpow2.f32 %v4228_v1  ;;  %v4229_v27 = vmul.f32 -1.442695, %v2113_v13  ;;  %v3594_v40 = vrot.slane %v6083_v4, %v4588_v56  ;;  %v3602_v32 = vrot.slane %v6083_v4, %v4592_v59  ;;  %v8143_v44 = vld [vmem:[#allocation161_spill] sm:$0xff] }
 0x483   :  { %3448 = vrot.lane.b32.xlu1 %v3443_v30, %s8136_s19  ;;  %v6954_v63 = vpop.permute.xlu1 %2696  ;;  %v2232_v13 = vadd.f32 %v2231_v61, %v2229_v19  ;;  %v3632_v57 = vrot.slane %v8143_v44, %v4598_v2  ;;  %vm8144_vm5 = vcmp.ge.s32.totalorder %v5169_v5, 0  ;;  %v3721_v4 = vrot.slane %v6086_v60, %v4598_v2 }
 0x484   :  { %3414 = vrot.lane.b32.xlu0 %v3409_v8, %s8134_s10  ;;  %4389 = vpow2.f32 %v4229_v27  ;;  %v2731_v12 = vpop.permute.xlu0 %2730  ;;  %v3717_v27 = vrot.slane %v6086_v60, %v4588_v56  ;;  %v3636_v19 = vrot.slane %v8143_v44, %v4592_v59  ;;  %vm8147_vm14 = vcmask 23552  }
 0x485   :  { %vm8151_vm7 = vcmask 1014784  }
 0x486   :  { %vm8154_vm8 = vmmov %vm8151_vm7 }
 0x487   :  { %3480 = vrot.lane.b32.xlu1 %v3473_v39, %s8138_s17  ;;  %v6964_v37 = vpop.permute.xlu1 %2700  ;;  %v2237_v39 = vrot.slane %v2232_v13, %v4588_v56 }
 0x488   :  { %3446 = vrot.lane.b32.xlu0 %v3439_v25, %s8136_s19  ;;  %v6994_v30 = vpop.permute.xlu0 %2793 }
 0x489   :  { %v2244_v61 = vsel %vm8144_vm5, %v2237_v39, 0.0  ;;  %vm8148_vm5 = vcmp.ge.s32.totalorder %v5153_v36, 0 }
 0x48b   :  { %3569 = vrot.lane.b32.xlu1 %v3560_v55, %s8140_s12  ;;  %v6972_v17 = vpop.permute.xlu1 %2732  ;;  %v4024_v55 = vstv %s6984_s29 }
 0x48c   :  { %v4388_v14 = vpop.eup %4387  ;;  %3478 = vrot.lane.b32.xlu0 %v3469_v35, %s8138_s17  ;;  %v6980_v51 = vsel %vm730_vm10, %v2731_v12, %v6972_v17  ;;  %v7005_v25 = vpop.permute.xlu0 %3109 }
 0x48d   :  { %v2120_v48 = vadd.f32 1.0, %v4388_v14  ;;  %v3725_v14 = vrot.slane %v6086_v60, %v4592_v59 }
 0x48e   :  { %v4390_v31 = vpop.eup %4389 }
 0x48f   :  { %3573 = vrot.lane.b32.xlu1 %v3568_v7, %s8140_s12  ;;  %4391 = vrcp.f32 %v2120_v48  ;;  %v2121_v41 = vadd.f32 1.0, %v4390_v31  ;;  %v6986_v1 = vpop.permute.xlu1 %2950  ;;  %v4026_v48 = vstv %s6992_s24  ;;  %v2241_v7 = vrot.slane %v2232_v13, %v4598_v2 }
 0x490   :  { %3482 = vrot.lane.b32.xlu0 %v3477_v29, %s8138_s17  ;;  %v2479_v29 = vrot.slane %v6361_v33, 7  ;;  %v7021_v31 = vmul.f32 %v4024_v55, %v4020_v23  ;;  %v3751_v13 = vrot.slane %v6109_v53, %v4588_v56  ;;  %v7040_v39 = vpop.permute.xlu0 %3384  ;;  %v3755_v55 = vrot.slane %v6109_v53, %v4598_v2 }
 0x491   :  { %4393 = vrcp.f32 %v2121_v41  ;;  %v3628_v41 = vrot.slane %v8143_v44, %v4588_v56  ;;  %v2245_v23 = vsel %vm8148_vm5, %v2241_v7, 0.0  ;;  %vm8152_vm5 = vcmask 23552  }
 0x492   :  { %v2480_v44 = vsel %vm8147_vm14, %v2479_v29, %v6361_v33  ;;  %vm8150_vm14 = vcmask 1039360  }
 0x493   :  { %3605 = vrot.lane.b32.xlu1 %v3598_v28, %s8141_s28  ;;  %v6998_v8 = vpop.permute.xlu1 %3266  ;;  %vm8153_vm4 = vmmov %vm8150_vm14 }
 0x494   :  { %3571 = vrot.lane.b32.xlu0 %v3564_v43, %s8140_s12  ;;  %v2636_v43 = vrot.slane %v6904_v52, 7 }
 0x496   :  { %v2637_v7 = vsel %vm8152_vm5, %v2636_v43, %v6904_v52  ;;  %v8159_v43 = vld [vmem:[#allocation171_spill] sm:$0xff] }
 0x497   :  { %3726 = vrot.lane.b32.xlu1 %v3717_v27, %s8142_s13  ;;  %v7010_v35 = vpop.permute.xlu1 %3541  ;;  %v3759_v27 = vrot.slane %v6109_v53, %v4592_v59 }
 0x498   :  { %3603 = vrot.lane.b32.xlu0 %v3594_v40, %s8141_s28  ;;  %v7038_v40 = vmul.f32 %v4026_v48, %v4021_v15  ;;  %v2795_v15 = vrot.slane %v6994_v30, 7 }
 0x499   :  { %v4392_v12 = vpop.eup %4391 }
 0x49a   :  { %8145 = vst [vmem:[#allocation68_spill] sm:$0xff] %v7038_v40  ;;  %v2126_v40 = vld [vmem:[#allocation7] sm:$0xff] }
 0x49b   :  { %3730 = vrot.lane.b32.xlu1 %v3725_v14, %s8142_s13  ;;  %v4394_v28 = vpop.eup %4393  ;;  %v7042_v60 = vpop.permute.xlu1 %3857  ;;  %v2130_v14 = vrot.slane %v4392_v12, %v4588_v56 }
 0x49c   :  { %3607 = vrot.lane.b32.xlu0 %v3602_v32, %s8141_s28  ;;  %8146 = vst [vmem:[#allocation69_spill] sm:$0xff] %v7042_v60  ;;  %v2134_v32 = vrot.slane %v4394_v28, %v4588_v56  ;;  %v2276_v28 = vsel %vm8150_vm14, %v6211_v62, %v6209_v24  ;;  %v2352_v60 = vsel %vm8151_vm7, %v6223_v26, %v6221_v42  ;;  %v7081_v62 = vpop.permute.xlu0 %3698  ;;  %vm8156_vm7 = vcmask 1006592  }
 0x49d   :  { %v2386_v26 = vsel %vm8156_vm7, %v6225_v9, %v6231_v49  ;;  %vm8157_vm14 = vcmask 908288  }
 0x49e   :  { %v2137_v29 = vcombine.low %v2130_v14, %v2134_v32  ;;  %v2353_v14 = vsel %vm8154_vm8, %v6221_v42, %v6227_v46  ;;  %v8155_v32 = vld [vmem:[#allocation143_spill] sm:$0xff]  ;;  %v2511_v52 = vsel %vm8157_vm14, %v6342_v6, %v6363_v34  ;;  %v2280_v42 = vsel %vm74_vm13, %v2276_v28, 0.0  ;;  %vm8160_vm8 = vmmov %vm8157_vm14 }
 0x49f   :  { %3639 = vrot.lane.b32.xlu1 %v3632_v57, %s8149_s1  ;;  %v2952_v57 = vrot.slane %v6986_v1, 7  ;;  %v2482_v33 = vadd.f32 %v2480_v44, %v8155_v32  ;;  %v2735_v12 = vpop.permute.xlu1 %2734  ;;  %v2356_v46 = vsel %vm7686_vm2, %v2352_v60, 0.0  ;;  %v2512_v9 = vsel %vm8160_vm8, %v6363_v34, %v8159_v43  ;;  %v8164_v34 = vld [vmem:[#allocation167_spill] sm:$0xff]  ;;  %v8169_v32 = vld [vmem:[#allocation72_spill] sm:$0xff] }
 0x4a0   :  { %3728 = vrot.lane.b32.xlu0 %v3721_v4, %s8142_s13  ;;  %v2277_v4 = vsel %vm8153_vm4, %v6209_v24, %v6215_v58  ;;  %v2139_v48 = vmul.f32 %v2137_v29, %v2126_v40  ;;  %vm8158_vm4 = vmmov %vm8152_vm5  ;;  %v7093_v58 = vsel %vm730_vm10, %v6972_v17, %v2735_v12  ;;  %vm8162_vm5 = vcmp.ge.s32.totalorder %v7940_v3, 0  ;;  %v7120_v12 = vpop.permute.xlu0 %4014  ;;  %v8166_v29 = vld [vmem:[#allocation164_spill] sm:$0xff] }
 0x4a1   :  { %v2796_v24 = vsel %vm8158_vm4, %v2795_v15, %v6994_v30  ;;  %v2639_v40 = vadd.f32 %v2637_v7, %v2482_v33  ;;  %v2281_v6 = vsel %vm8162_vm5, %v2277_v4, 0.0  ;;  %v2357_v17 = vsel %vm7685_vm3, %v2353_v14, 0.0  ;;  %vm8163_vm10 = vmmov %vm8158_vm4  ;;  %v8165_v33 = vld [vmem:[#allocation166_spill] sm:$0xff] }
 0x4a2   :  { %2140 = vst [vmem:[#allocation8] sm:$0xff] %v2139_v48  ;;  %v2668_v30 = vsel %vm660_vm9, %v6933_v20, %v6946_v16  ;;  %v2953_v60 = vsel %vm8163_vm10, %v2952_v57, %v6986_v1  ;;  %v2515_v44 = vsel %vm74_vm13, %v2511_v52, 0.0  ;;  %vm8167_vm14 = vcmask 1031168   ;;  %vm8168_vm4 = vmmov %vm8162_vm5 }
 0x4a3   :  { %3760 = vrot.lane.b32.xlu1 %v3751_v13, %s8161_s0  ;;  %v2387_v13 = vsel %vm8156_vm7, %v6231_v49, %v8164_v34  ;;  %v2798_v15 = vadd.f32 %v2796_v24, %v2639_v40  ;;  %v2824_v48 = vpop.permute.xlu1 %2823  ;;  %v2310_v20 = vsel %vm8167_vm14, %v8166_v29, %v8165_v33  ;;  %v2358_v28 = vadd.f32 %v2356_v46, %v2244_v61  ;;  %v8172_v46 = vld [vmem:[#allocation169_spill] sm:$0xff]  ;;  %v8184_v29 = vld [vmem:[#allocation65_spill] sm:$0xff] }
 0x4a4   :  { %3637 = vrot.lane.b32.xlu0 %v3628_v41, %s8149_s1  ;;  %v2390_v41 = vsel %vm100_vm1, %v2386_v26, 0.0  ;;  %v2516_v1 = vsel %vm8168_vm4, %v2512_v9, 0.0  ;;  %v3111_v49 = vrot.slane %v7005_v25, 7  ;;  %v2359_v7 = vadd.f32 %v2357_v17, %v2245_v23  ;;  %v8171_v23 = vld [vmem:[#allocation168_spill] sm:$0xff]  ;;  %v8175_v9 = vld [vmem:[#allocation175_spill] sm:$0xff] }
 0x4a5   :  { %v2669_v57 = vsel %vm660_vm9, %v6946_v16, %v6944_v18  ;;  %v2672_v4 = vsel %vm100_vm1, %v2668_v30, 0.0  ;;  %v2955_v14 = vadd.f32 %v2953_v60, %v2798_v15  ;;  %vm8170_vm8 = vcmp.lt.s32.totalorder %v8169_v32, 16  ;;  %v8174_v16 = vld [vmem:[#allocation172_spill] sm:$0xff]  ;;  %v2822_v30 = vpop.permute.xlu0 %2821 }
 0x4a6   :  { %v2391_v61 = vsel %vm8170_vm8, %v2387_v13, 0.0  ;;  %v2392_v26 = vadd.f32 %v2390_v41, %v2280_v42  ;;  %v2517_v52 = vadd.f32 %v2515_v44, %v2358_v28  ;;  %v3268_v24 = vrot.slane %v6998_v8, 7  ;;  %v8177_v17 = vld [vmem:[#allocation176_spill] sm:$0xff]  ;;  %vm8179_vm7 = vmmov %vm8170_vm8 }
 0x4a7   :  { %3764 = vrot.lane.b32.xlu1 %v3759_v27, %s8161_s0  ;;  %vm8173_vm5 = vcmask 998400   ;;  %v2518_v18 = vadd.f32 %v2516_v1, %v2359_v7  ;;  %vm8176_vm9 = vcmask 900096   ;;  %v2856_v27 = vpop.permute.xlu1 %2855  ;;  %v2673_v42 = vsel %vm8179_vm7, %v2669_v57, 0.0  ;;  %v8191_v57 = vld [vmem:[#allocation170_spill] sm:$0xff] }
 0x4a8   :  { %3641 = vrot.lane.b32.xlu0 %v3636_v19, %s8149_s1  ;;  %v2420_v43 = vsel %vm8173_vm5, %v8172_v46, %v8171_v23  ;;  %v2545_v40 = vsel %vm8176_vm9, %v8175_v9, %v8174_v16  ;;  %vm8178_vm10 = vmmov %vm8176_vm9  ;;  %v2674_v60 = vadd.f32 %v2672_v4, %v2517_v52  ;;  %vm8180_vm14 = vcmask 23552   ;;  %v8199_v9 = vld [vmem:[#allocation165_spill] sm:$0xff] }
 0x4a9   :  { %v2546_v19 = vsel %vm8178_vm10, %v8174_v16, %v8177_v17  ;;  %v3112_v34 = vsel %vm8180_vm14, %v3111_v49, %v7005_v25  ;;  %vm8181_vm4 = vcmask 769024   ;;  %vm8182_vm8 = vcmask 867328  }
 0x4aa   :  { %v2827_v13 = vsel %vm8181_vm4, %v2822_v30, %v2824_v48  ;;  %v2702_v41 = vsel %vm8182_vm8, %v6954_v63, %v6960_v45  ;;  %vm8183_vm5 = vmmov %vm8182_vm8  ;;  %v3114_v15 = vadd.f32 %v3112_v34, %v2955_v14  ;;  %vm8185_vm9 = vcmp.ge.s32.totalorder %v8184_v29, 0  ;;  %v2826_v14 = vpop.permute.xlu0 %2825  ;;  %v8202_v30 = vld [vmem:[#allocation177_spill] sm:$0xff] }
 0x4ab   :  { %v2703_v44 = vsel %vm8183_vm5, %v6960_v45, %v6964_v37  ;;  %v2831_v28 = vsel %vm8185_vm9, %v2827_v13, 0.0  ;;  %v8187_v1 = vrot.slane %v6111_v10, %v4598_v2  ;;  %vm8188_vm10 = vmmov %vm8185_vm9  ;;  %vm8189_vm7 = vcmp.ge.s32.totalorder %v7945_v54, 0  ;;  %v2860_v4 = vpop.permute.xlu1 %2859 }
 0x4ac   :  { %3762 = vrot.lane.b32.xlu0 %v3755_v55, %s8161_s0  ;;  %v2549_v63 = vsel %vm8188_vm10, %v2545_v40, 0.0  ;;  %v2550_v45 = vsel %vm8189_vm7, %v2546_v19, 0.0  ;;  %v3269_v37 = vsel %vm8180_vm14, %v3268_v24, %v6998_v8  ;;  %v7174_v25 = vadd.f32 %v2831_v28, %v2674_v60 }
 0x4ad   :  { %3796 = vrot.lane.b32.xlu1 %v8187_v1, %s8186_s9  ;;  %v2393_v49 = vadd.f32 %v2391_v61, %v2281_v6  ;;  %vm8190_vm4 = vcmp.lt.s32.totalorder %v7956_v21, 16  ;;  %vm8192_vm8 = vcmask 998400   ;;  %v2675_v55 = vadd.f32 %v2673_v42, %v2518_v18  ;;  %v8203_v42 = vld [vmem:[#allocation173_spill] sm:$0xff] }
 0x4ae   :  { %v2424_v7 = vsel %vm8190_vm4, %v2420_v43, 0.0  ;;  %v2421_v53 = vsel %vm8192_vm8, %v8171_v23, %v8191_v57  ;;  %vm8193_vm5 = vmmov %vm8190_vm4  ;;  %vm8194_vm9 = vcmp.lt.s32.totalorder %v7951_v11, 16  ;;  %v3386_v8 = vrot.slane %v7040_v39, 1 }
 0x4af   :  { %v2706_v52 = vsel %vm8193_vm5, %v2702_v41, 0.0  ;;  %v2707_v46 = vsel %vm8194_vm9, %v2703_v44, 0.0  ;;  %vm8195_vm10 = vcmask 769024   ;;  %v2551_v61 = vadd.f32 %v2549_v63, %v2392_v26  ;;  %v2890_v41 = vpop.permute.xlu1 %2889  ;;  %v2858_v44 = vpop.permute.xlu0 %2857  ;;  %vm8205_vm5 = vmmov %vm8194_vm9 }
 0x4b0   :  { %v2828_v6 = vsel %vm8195_vm10, %v2824_v48, %v2826_v14  ;;  %v2552_v24 = vadd.f32 %v2550_v45, %v2393_v49  ;;  %v3271_v43 = vadd.f32 %v3269_v37, %v3114_v15  ;;  %v8197_v23 = vrot.slane %v6115_v38, %v4588_v56 }
 0x4b1   :  { %v2832_v16 = vsel %vm8189_vm7, %v2828_v6, 0.0  ;;  %v8198_v18 = vrot.slane %v6111_v10, %v4588_v56  ;;  %vm8200_vm14 = vcmask 1031168   ;;  %vm8201_vm4 = vcmp.ge.s32.totalorder %v8184_v29, 0 }
 0x4b2   :  { %3885 = vrot.lane.b32.xlu1 %v8197_v23, %s8196_s22  ;;  %v2311_v48 = vsel %vm8200_vm14, %v8165_v33, %v8199_v9  ;;  %v2314_v26 = vsel %vm8201_vm4, %v2310_v20, 0.0  ;;  %v3543_v40 = vrot.slane %v7010_v35, 7  ;;  %v7203_v17 = vadd.f32 %v2832_v16, %v2675_v55 }
 0x4b3   :  { %3794 = vrot.lane.b32.xlu0 %v8198_v18, %s8186_s9  ;;  %v2426_v19 = vadd.f32 %v2424_v7, %v2314_v26  ;;  %vm8204_vm8 = vcmask 891904   ;;  %v2708_v34 = vadd.f32 %v2706_v52, %v2551_v61  ;;  %v2709_v13 = vadd.f32 %v2707_v46, %v2552_v24  ;;  %v2888_v14 = vpop.permute.xlu0 %2887  ;;  %v8216_v52 = vld [vmem:[#allocation162_spill] sm:$0xff] }
 0x4b4   :  { %v2579_v60 = vsel %vm8204_vm8, %v8203_v42, %v8202_v30  ;;  %v2425_v15 = vsel %vm8205_vm5, %v2421_v53, 0.0  ;;  %vm8206_vm9 = vcmask 523264   ;;  %vm8207_vm10 = vcmask 760832   ;;  %v8214_v53 = vld [vmem:[#allocation174_spill] sm:$0xff] }
 0x4b5   :  { %v3387_v33 = vsel %vm8206_vm9, %v7040_v39, %v3386_v8  ;;  %v2861_v20 = vsel %vm8207_vm10, %v2856_v27, %v2858_v44  ;;  %vm8208_vm7 = vmmov %vm8207_vm10  ;;  %vm8209_vm14 = vcmp.ge.s32.totalorder %v5169_v5, 0  ;;  %v8210_v49 = vrot.slane %v6115_v38, %v4592_v59  ;;  %v8217_v46 = vld [vmem:[#allocation68_spill] sm:$0xff] }
 0x4b6   :  { %v2862_v28 = vsel %vm8208_vm7, %v2858_v44, %v2860_v4  ;;  %v2740_v1 = vsel %vm8209_vm14, %v6980_v51, 0.0  ;;  %v3389_v63 = vadd.f32 %v3387_v33, %v3271_v43  ;;  %v2865_v45 = vadd.f32 %v2861_v20, %v2708_v34  ;;  %v2979_v4 = vpop.permute.xlu1 %2978 }
 0x4b7   :  { %v7217_v37 = vadd.f32 %v2862_v28, %v2709_v13  ;;  %3889 = vrot.lane.b32.xlu1 %v8210_v49, %s8196_s22  ;;  %v8211_v39 = vrot.slane %v6111_v10, %v4592_v59  ;;  %v2583_v27 = vadd.f32 %v2579_v60, %v2426_v19  ;;  %vm8212_vm4 = vcmask 23552   ;;  %v2892_v26 = vpop.permute.xlu0 %2891 }
 0x4b8   :  { %v3544_v7 = vsel %vm8212_vm4, %v3543_v40, %v7010_v35  ;;  %v3880_v51 = vrot.slane %v6115_v38, %v4598_v2  ;;  %vm8213_vm8 = vcmp.ge.s32.totalorder %v7945_v54, 0  ;;  %vm8215_vm5 = vcmask 891904   ;;  %vm8222_vm7 = vmmov %vm8212_vm4 }
 0x4b9   :  { %3798 = vrot.lane.b32.xlu0 %v8211_v39, %s8186_s9  ;;  %v2315_v57 = vsel %vm8213_vm8, %v2311_v48, 0.0  ;;  %v2580_v55 = vsel %vm8215_vm5, %v8202_v30, %v8214_v53  ;;  %v3946_v10 = vrot.slane %v8216_v52, %v4598_v2  ;;  %v4028_v8 = vadd.f32 %v8217_v46, %v7021_v31  ;;  %v8221_v31 = vld [vmem:[#allocation69_spill] sm:$0xff]  ;;  %vm8225_vm8 = vmmov %vm8212_vm4 }
 0x4ba   :  { %v2427_v6 = vadd.f32 %v2425_v15, %v2315_v57  ;;  %v2742_v35 = vadd.f32 %v2740_v1, %v2583_v27  ;;  %v3700_v61 = vrot.slane %v7081_v62, 7  ;;  %vm8218_vm9 = vcmask 752640   ;;  %v2983_v48 = vpop.permute.xlu1 %2982 }
 0x4bb   :  { %v2893_v38 = vsel %vm8218_vm9, %v2888_v14, %v2890_v41  ;;  %v3546_v24 = vadd.f32 %v3544_v7, %v3389_v63  ;;  %vm8219_vm10 = vcmp.ge.s32.totalorder %v5153_v36, 0  ;;  %3953 = vrot.lane.b32.xlu1 %v3946_v10, %s8220_s2  ;;  %v3859_v18 = vrot.slane %v8221_v31, 7  ;;  %vm8223_vm14 = vmmov %vm8218_vm9  ;;  %v2981_v20 = vpop.permute.xlu0 %2980 }
 0x4bc   :  { %v2741_v43 = vsel %vm8219_vm10, %v7093_v58, 0.0  ;;  %v2897_v16 = vsel %vm7686_vm2, %v2893_v38, 0.0  ;;  %v2584_v23 = vadd.f32 %v2580_v55, %v2427_v6  ;;  %v4033_v40 = vrot.slane %v4028_v8, %v4588_v56  ;;  %v8230_v55 = vld [vmem:[#allocation163_spill] sm:$0xff] }
 0x4bd   :  { %3887 = vrot.lane.b32.xlu0 %v3880_v51, %s8196_s22  ;;  %v2899_v9 = vadd.f32 %v2897_v16, %v2742_v35  ;;  %v3942_v19 = vrot.slane %v8216_v52, %v4588_v56  ;;  %v3701_v58 = vsel %vm8222_vm7, %v3700_v61, %v7081_v62  ;;  %v4016_v42 = vrot.slane %v7120_v12, 7 }
 0x4be   :  { %v2743_v30 = vadd.f32 %v2741_v43, %v2584_v23  ;;  %v2894_v60 = vsel %vm8223_vm14, %v2890_v41, %v2892_v26  ;;  %v3703_v34 = vadd.f32 %v3701_v58, %v3546_v24  ;;  %v3860_v44 = vsel %vm8212_vm4, %v3859_v18, %v8221_v31  ;;  %v3015_v33 = vpop.permute.xlu1 %3014 }
 0x4bf   :  { %v2898_v13 = vsel %vm7685_vm3, %v2894_v60, 0.0  ;;  %4042 = vrot.lane.b32.xlu1 %v4033_v40, %s8224_s20  ;;  %v4041_v62 = vrot.slane %v4028_v8, %v4592_v59  ;;  %v3950_v28 = vrot.slane %v8216_v52, %v4592_v59  ;;  %v4017_v41 = vsel %vm8225_vm8, %v4016_v42, %v7120_v12  ;;  %v3013_v53 = vpop.permute.xlu0 %3012 }
 0x4c0   :  { %v2900_v15 = vadd.f32 %v2898_v13, %v2743_v30  ;;  %vm8226_vm5 = vcmask 736256   ;;  %v3862_v49 = vadd.f32 %v3860_v44, %v3703_v34  ;;  %vm8228_vm10 = vcmp.lt.s32.totalorder %v7956_v21, 16 }
 0x4c1   :  { %3951 = vrot.lane.b32.xlu0 %v3942_v19, %s8220_s2  ;;  %v2984_v1 = vsel %vm8226_vm5, %v2979_v4, %v2981_v20  ;;  %vm8227_vm9 = vmmov %vm8226_vm5  ;;  %vm8229_vm7 = vcmp.lt.s32.totalorder %v7951_v11, 16  ;;  %v3914_v4 = vrot.slane %v8230_v55, %v4598_v2  ;;  %v4037_v14 = vrot.slane %v4028_v8, %v4598_v2 }
 0x4c2   :  { %v2985_v63 = vsel %vm8227_vm9, %v2981_v20, %v2983_v48  ;;  %v2988_v39 = vsel %vm8228_vm10, %v2984_v1, 0.0  ;;  %v4019_v12 = vadd.f32 %v4017_v41, %v3862_v49  ;;  %v3047_v57 = vpop.permute.xlu1 %3046  ;;  %vm8231_vm14 = vcmask 654336  }
 0x4c3   :  { %v2989_v27 = vsel %vm8229_vm7, %v2985_v63, 0.0  ;;  %4046 = vrot.lane.b32.xlu1 %v4041_v62, %s8224_s20  ;;  %v2990_v7 = vadd.f32 %v2988_v39, %v7174_v25  ;;  %v3018_v52 = vsel %vm8231_vm14, %v3013_v53, %v3015_v33  ;;  %vm8232_vm4 = vcmp.ge.s32.totalorder %v5169_v5, 0  ;;  %v3017_v6 = vpop.permute.xlu0 %3016  ;;  %vm8234_vm8 = vmmov %vm8231_vm14 }
 0x4c4   :  { %v2991_v51 = vadd.f32 %v2989_v27, %v7203_v17  ;;  %v3022_v10 = vsel %vm8232_vm4, %v3018_v52, 0.0  ;;  %v4062_v17 = vrot.slane %v4019_v12, %v4588_v56  ;;  %v3910_v35 = vrot.slane %v8230_v55, %v4588_v56 }
 0x4c5   :  { %3955 = vrot.lane.b32.xlu0 %v3950_v28, %s8220_s2  ;;  %v3024_v25 = vadd.f32 %v3022_v10, %v2865_v45  ;;  %v3019_v61 = vsel %vm8234_vm8, %v3015_v33, %v3017_v6  ;;  %vm8235_vm5 = vcmp.ge.s32.totalorder %v5153_v36, 0  ;;  %v4070_v45 = vrot.slane %v4019_v12, %v4592_v59 }
 0x4c6   :  { %v3051_v46 = vpop.permute.xlu1 %3050  ;;  %v3023_v8 = vsel %vm8235_vm5, %v3019_v61, 0.0  ;;  %v3918_v16 = vrot.slane %v8230_v55, %v4592_v59  ;;  %vm8236_vm9 = vcmask 646144   ;;  %vm8238_vm7 = vcmp.ge.s32.totalorder %v7940_v3, 0 }
 0x4c7   :  { %3921 = vrot.lane.b32.xlu1 %v3914_v4, %s8233_s23  ;;  %v3025_v38 = vadd.f32 %v3023_v8, %v7217_v37  ;;  %v3049_v43 = vpop.permute.xlu0 %3048  ;;  %vm8237_vm10 = vmmov %vm8236_vm9  ;;  %v4066_v40 = vrot.slane %v4019_v12, %v4598_v2  ;;  %vm8239_vm14 = vcmask 629760   ;;  %vm8241_vm8 = vcmask 621568  }
 0x4c8   :  { %v3052_v23 = vsel %vm8236_vm9, %v3047_v57, %v3049_v43  ;;  %v3053_v31 = vsel %vm8237_vm10, %v3049_v43, %v3051_v46  ;;  %vm8240_vm4 = vmmov %vm8239_vm14  ;;  %vm8243_vm9 = vcmask 613376  }
 0x4c9   :  { %4044 = vrot.lane.b32.xlu0 %v4037_v14, %s8224_s20  ;;  %v3056_v18 = vsel %vm74_vm13, %v3052_v23, 0.0  ;;  %v3057_v48 = vsel %vm8238_vm7, %v3053_v31, 0.0  ;;  %vm8242_vm5 = vmmov %vm8241_vm8  ;;  %vm8245_vm7 = vcmp.lt.s32.totalorder %v8169_v32, 16 }
 0x4ca   :  { %v3140_v24 = vpop.permute.xlu1 %3139  ;;  %v3058_v37 = vadd.f32 %v3056_v18, %v2899_v9  ;;  %v3059_v26 = vadd.f32 %v3057_v48, %v2900_v15  ;;  %vm8244_vm10 = vmmov %vm8243_vm9 }
 0x4cb   :  { %4071 = vrot.lane.b32.xlu1 %v4062_v17, %s4517_s15  ;;  %v3138_v59 = vpop.permute.xlu0 %3137 }
 0x4cc   :  { %v3143_v58 = vsel %vm8239_vm14, %v3138_v59, %v3140_v24  ;;  %vm8246_vm14 = vcmask 523264  }
 0x4cd   :  { %3919 = vrot.lane.b32.xlu0 %v3910_v35, %s8233_s23  ;;  %v3147_v30 = vadd.f32 %v3143_v58, %v2990_v7 }
 0x4ce   :  { %v3170_v19 = vpop.permute.xlu1 %3169 }
 0x4cf   :  { %4075 = vrot.lane.b32.xlu1 %v4070_v45, %s4517_s15  ;;  %v3142_v60 = vpop.permute.xlu0 %3141 }
 0x4d0   :  { %v3144_v34 = vsel %vm8240_vm4, %v3140_v24, %v3142_v60  ;;  %vm8247_vm4 = vmmov %vm8246_vm14 }
 0x4d1   :  { %3923 = vrot.lane.b32.xlu0 %v3918_v16, %s8233_s23  ;;  %v3148_v13 = vadd.f32 %v3144_v34, %v2991_v51 }
 0x4d2   :  { %v3174_v42 = vpop.permute.xlu1 %3173 }
 0x4d3   :  { %v3172_v33 = vpop.permute.xlu0 %3171 }
 0x4d4   :  { %v3175_v20 = vsel %vm8241_vm8, %v3170_v19, %v3172_v33  ;;  %v3176_v9 = vsel %vm8242_vm5, %v3172_v33, %v3174_v42  ;;  %vm8248_vm8 = vcmp.ge.s32.totalorder %v5169_v5, 0  ;;  %vm8249_vm5 = vcmp.ge.s32.totalorder %v5153_v36, 0 }
 0x4d5   :  { %4073 = vrot.lane.b32.xlu0 %v4066_v40, %s4517_s15  ;;  %v3179_v2 = vsel %vm7686_vm2, %v3175_v20, 0.0  ;;  %v3180_v15 = vsel %vm7685_vm3, %v3176_v9, 0.0  ;;  %s4518_s15 = smov [#allocation8]  }
 0x4d6   :  { %v3206_v44 = vpop.permute.xlu1 %3205  ;;  %v3181_v62 = vadd.f32 %v3179_v2, %v3024_v25  ;;  %v3182_v28 = vadd.f32 %v3180_v15, %v3025_v38  ;;  %s4118_s27 = sshll.u32 %s4518_s15, 4  ;;  %s4119_s27 = int_to_ptr.vmem [resolvable:$true] %s4118_s27 }
 0x4d7   :  { %v3204_v1 = vpop.permute.xlu0 %3203  ;;  %s4435_s26 = scalar_lea.vmem %s4119_s27, 256  ;;  %p4440_p12 = scmp.lt.s32.totalorder %s4119_s27, %s4119_s27 }
 0x4d8   :  { %v3209_v63 = vsel %vm8243_vm9, %v3204_v1, %v3206_v44  ;;  %vm8250_vm9 = vcmask 515072   ;;  %p4436_p11 = scmp.ne.s32.totalorder %s4119_s27, %s4435_s26  ;;  %p4441_p13 = scmp.lt.s32.totalorder %s4435_s26, %s4435_s26 }
 0x4d9   :  { %v3213_v49 = vsel %vm100_vm1, %v3209_v63, 0.0 }
 0x4da   :  { %v3295_v41 = vpop.permute.xlu1 %3294  ;;  %v3215_v39 = vadd.f32 %v3213_v49, %v3058_v37  ;;  %p4442_p0 = por %p4441_p13, %p4440_p12 }
 0x4db   :  { %v3208_v7 = vpop.permute.xlu0 %3207 }
 0x4dc   :  { %v3210_v51 = vsel %vm8244_vm10, %v3206_v44, %v3208_v7  ;;  %vm8251_vm10 = vmmov %vm8250_vm9  ;;  %p4443_p1 = pnand %p4442_p0, %p4436_p11 }
 0x4dd   :  { %v3214_v12 = vsel %vm8245_vm7, %v3210_v51, 0.0  ;;  %vm8252_vm7 = vcmp.ge.s32.totalorder %v7940_v3, 0 }
 0x4de   :  { %v3299_v27 = vpop.permute.xlu1 %3298  ;;  %v3216_v57 = vadd.f32 %v3214_v12, %v3059_v26 }
 0x4e0   :  { %v3297_v55 = vpop.permute.xlu0 %3296 }
 0x4e1   :  { %v3300_v4 = vsel %vm8246_vm14, %v3295_v41, %v3297_v55  ;;  %v3301_v14 = vsel %vm8247_vm4, %v3297_v55, %v3299_v27  ;;  %vm8253_vm14 = vcmask 506880  }
 0x4e2   :  { %v3331_v53 = vpop.permute.xlu1 %3330  ;;  %v3304_v52 = vsel %vm8248_vm8, %v3300_v4, 0.0  ;;  %v3305_v10 = vsel %vm8249_vm5, %v3301_v14, 0.0  ;;  %vm8254_vm4 = vmmov %vm8253_vm14  ;;  %vm8255_vm8 = vcmp.ge.s32.totalorder %v8184_v29, 0  ;;  %vm8256_vm5 = vcmp.ge.s32.totalorder %v7945_v54, 0 }
 0x4e3   :  { %v3306_v25 = vadd.f32 %v3304_v52, %v3147_v30  ;;  %v3307_v17 = vadd.f32 %v3305_v10, %v3148_v13 }
 0x4e4   :  { %v3329_v6 = vpop.permute.xlu0 %3328 }
 0x4e5   :  { %v3334_v35 = vsel %vm8250_vm9, %v3329_v6, %v3331_v53  ;;  %vm8257_vm9 = vcmask 490496  }
 0x4e6   :  { %v3363_v46 = vpop.permute.xlu1 %3362  ;;  %v3338_v61 = vsel %vm74_vm13, %v3334_v35, 0.0 }
 0x4e7   :  { %v3340_v8 = vadd.f32 %v3338_v61, %v3181_v62 }
 0x4e9   :  { %v3333_v45 = vpop.permute.xlu0 %3332 }
 0x4ea   :  { %v3367_v38 = vpop.permute.xlu1 %3366  ;;  %v3335_v24 = vsel %vm8251_vm10, %v3331_v53, %v3333_v45  ;;  %vm8258_vm10 = vmmov %vm8257_vm9 }
 0x4eb   :  { %v3339_v43 = vsel %vm8252_vm7, %v3335_v24, 0.0  ;;  %vm8259_vm7 = vcmask 482304  }
 0x4ec   :  { %v7334_v16 = vadd.f32 %v3339_v43, %v3182_v28 }
 0x4ee   :  { %v3413_v23 = vpop.permute.xlu1 %3412  ;;  %v3365_v31 = vpop.permute.xlu0 %3364 }
 0x4ef   :  { %v3368_v18 = vsel %vm8253_vm14, %v3363_v46, %v3365_v31  ;;  %v3369_v48 = vsel %vm8254_vm4, %v3365_v31, %v3367_v38  ;;  %vm8260_vm14 = vmmov %vm8259_vm7  ;;  %vm8261_vm4 = vcmask 474112  }
 0x4f0   :  { %v3372_v37 = vsel %vm8255_vm8, %v3368_v18, 0.0  ;;  %v3373_v26 = vsel %vm8256_vm5, %v3369_v48, 0.0  ;;  %vm8262_vm8 = vmmov %vm8261_vm4  ;;  %vm8263_vm5 = vcmask 384000  }
 0x4f1   :  { %v7342_v40 = vadd.f32 %v3372_v37, %v3215_v39  ;;  %v7344_v19 = vadd.f32 %v3373_v26, %v3216_v57 }
 0x4f2   :  { %v3445_v59 = vpop.permute.xlu1 %3444  ;;  %v3411_v58 = vpop.permute.xlu0 %3410 }
 0x4f3   :  { %v3416_v30 = vsel %vm8257_vm9, %v3411_v58, %v3413_v23  ;;  %vm8264_vm9 = vmmov %vm8263_vm5 }
 0x4f4   :  { %v3420_v42 = vsel %vm7686_vm2, %v3416_v30, 0.0 }
 0x4f5   :  { %v3422_v60 = vadd.f32 %v3420_v42, %v3306_v25 }
 0x4f6   :  { %v3449_v34 = vpop.permute.xlu1 %3448  ;;  %v3415_v13 = vpop.permute.xlu0 %3414 }
 0x4f7   :  { %v3417_v44 = vsel %vm8258_vm10, %v3413_v23, %v3415_v13  ;;  %vm8265_vm10 = vcmask 375808  }
 0x4f8   :  { %v3421_v33 = vsel %vm7685_vm3, %v3417_v44, 0.0  ;;  %vm8267_vm3 = vcmp.lt.s32.totalorder %v7956_v21, 16  ;;  %vm8268_vm2 = vmmov %vm8265_vm10 }
 0x4f9   :  { %v3423_v20 = vadd.f32 %v3421_v33, %v3307_v17 }
 0x4fa   :  { %v3481_v9 = vpop.permute.xlu1 %3480  ;;  %v3447_v2 = vpop.permute.xlu0 %3446 }
 0x4fb   :  { %v3450_v15 = vsel %vm8259_vm7, %v3445_v59, %v3447_v2  ;;  %v3451_v43 = vsel %vm8260_vm14, %v3447_v2, %v3449_v34  ;;  %vm8266_vm7 = vcmp.lt.s32.totalorder %v8169_v32, 16  ;;  %vm8269_vm14 = vcmp.lt.s32.totalorder %v7951_v11, 16 }
 0x4fc   :  { %v3454_v62 = vsel %vm100_vm1, %v3450_v15, 0.0  ;;  %v3455_v26 = vsel %vm8266_vm7, %v3451_v43, 0.0 }
 0x4fd   :  { %v3456_v28 = vadd.f32 %v3454_v62, %v3340_v8 }
 0x4fe   :  { %v3570_v41 = vpop.permute.xlu1 %3569  ;;  %v3479_v1 = vpop.permute.xlu0 %3478 }
 0x4ff   :  { %v3484_v23 = vsel %vm8261_vm4, %v3479_v1, %v3481_v9  ;;  %vm8270_vm4 = vcmp.ge.s32.totalorder %v7940_v3, 0 }
 0x500   :  { %v3488_v59 = vsel %vm8267_vm3, %v3484_v23, 0.0  ;;  %vm8271_vm3 = vcmp.ge.s32.totalorder %v8184_v29, 0 }
 0x501   :  { %v3490_v1 = vadd.f32 %v3488_v59, %v7342_v40 }
 0x502   :  { %v3574_v63 = vpop.permute.xlu1 %3573  ;;  %v3483_v49 = vpop.permute.xlu0 %3482 }
 0x503   :  { %v3485_v31 = vsel %vm8262_vm8, %v3481_v9, %v3483_v49  ;;  %vm8275_vm8 = vmmov %vm8271_vm3 }
 0x504   :  { %v3489_v13 = vsel %vm8269_vm14, %v3485_v31, 0.0 }
 0x505   :  { %v3491_v49 = vadd.f32 %v3489_v13, %v7344_v19 }
 0x506   :  { %v3606_v39 = vpop.permute.xlu1 %3605  ;;  %v3572_v27 = vpop.permute.xlu0 %3571 }
 0x507   :  { %v3575_v18 = vsel %vm8263_vm5, %v3570_v41, %v3572_v27  ;;  %v3576_v48 = vsel %vm8264_vm9, %v3572_v27, %v3574_v63  ;;  %v3457_v41 = vadd.f32 %v3455_v26, %v7334_v16 }
 0x508   :  { %v3579_v44 = vsel %vm74_vm13, %v3575_v18, 0.0  ;;  %v3580_v2 = vsel %vm8270_vm4, %v3576_v48, 0.0  ;;  %vm8273_vm13 = vmmov %vm8266_vm7  ;;  %vm8282_vm7 = vcmask 228352  }
 0x509   :  { %v3582_v16 = vadd.f32 %v3580_v2, %v3423_v20 }
 0x50a   :  { %v3727_v7 = vpop.permute.xlu1 %3726  ;;  %v3604_v51 = vpop.permute.xlu0 %3603 }
 0x50b   :  { %v3609_v37 = vsel %vm8265_vm10, %v3604_v51, %v3606_v39  ;;  %vm8281_vm10 = vcmask 236544  }
 0x50c   :  { %v3613_v15 = vsel %vm8271_vm3, %v3609_v37, 0.0  ;;  %vm8287_vm3 = vcmp.lt.s32.totalorder %v7935_v22, 16 }
 0x50e   :  { %v3731_v12 = vpop.permute.xlu1 %3730  ;;  %v3608_v57 = vpop.permute.xlu0 %3607 }
 0x50f   :  { %v3610_v58 = vsel %vm8268_vm2, %v3606_v39, %v3608_v57  ;;  %vm8272_vm2 = vcmp.ge.s32.totalorder %v7945_v54, 0  ;;  %v3581_v39 = vadd.f32 %v3579_v44, %v3422_v60 }
 0x510   :  { %v3614_v0 = vsel %vm8272_vm2, %v3610_v58, 0.0  ;;  %vm8280_vm9 = vmmov %vm8272_vm2  ;;  %vm8288_vm2 = vcmp.lt.s32.totalorder %v7936_v50, 16 }
 0x511   :  { %v3616_v47 = vadd.f32 %v3614_v0, %v3457_v41 }
 0x512   :  { %v7355_v53 = vpop.permute.xlu1 %3639  ;;  %v3729_v55 = vpop.permute.xlu0 %3728 }
 0x513   :  { %v3732_v30 = vsel %vm1751_vm0, %v3727_v7, %v3729_v55  ;;  %v3733_v33 = vsel %vm1751_vm0, %v3729_v55, %v3731_v12  ;;  %vm8274_vm0 = vcmp.lt.s32.totalorder %v7956_v21, 16  ;;  %v3615_v12 = vadd.f32 %v3613_v15, %v3456_v28 }
 0x514   :  { %v3736_v63 = vsel %vm100_vm1, %v3732_v30, 0.0  ;;  %v3737_v3 = vsel %vm8273_vm13, %v3733_v33, 0.0  ;;  %vm8276_vm1 = vcmask 367616   ;;  %vm8277_vm5 = vmmov %vm8274_vm0 }
 0x515   :  { %v3738_v55 = vadd.f32 %v3736_v63, %v3581_v39  ;;  %v3739_v32 = vadd.f32 %v3737_v3, %v3582_v16  ;;  %vm8289_vm13 = vmmov %vm8281_vm10  ;;  %v4097_v16 = vld [vmem:[#allocation7 + $0x8] sm:$0xff] }
 0x516   :  { %v3761_v4 = vpop.permute.xlu1 %3760  ;;  %v3638_v14 = vpop.permute.xlu0 %3637 }
 0x51a   :  { %v3765_v52 = vpop.permute.xlu1 %3764  ;;  %v3642_v10 = vpop.permute.xlu0 %3641 }
 0x51e   :  { %v3763_v17 = vpop.permute.xlu0 %3762 }
 0x51f   :  { %v3797_v25 = vpop.permute.xlu1 %3796  ;;  %v3766_v9 = vsel %vm1786_vm6, %v3761_v4, %v3763_v17  ;;  %v3767_v19 = vsel %vm1786_vm6, %v3763_v17, %v3765_v52  ;;  %v3643_v4 = vsel %vm8276_vm1, %v3638_v14, %v7355_v53  ;;  %vm8278_vm6 = vmmov %vm8276_vm1 }
 0x520   :  { %v3770_v27 = vsel %vm8274_vm0, %v3766_v9, 0.0  ;;  %v3644_v52 = vsel %vm8278_vm6, %v7355_v53, %v3642_v10  ;;  %v3647_v31 = vadd.f32 %v3643_v4, %v3490_v1  ;;  %vm8290_vm0 = vcmask 1022976  }
 0x521   :  { %v3648_v10 = vadd.f32 %v3644_v52, %v3491_v49 }
 0x524   :  { %v3886_v46 = vpop.permute.xlu1 %3885 }
 0x525   :  { %v3795_v6 = vpop.permute.xlu0 %3794 }
 0x526   :  { %v3800_v28 = vsel %vm1821_vm15, %v3795_v6, %v3797_v25 }
 0x529   :  { %v3890_v35 = vpop.permute.xlu1 %3889 }
 0x52b   :  { %v3799_v61 = vpop.permute.xlu0 %3798 }
 0x52c   :  { %v3801_v29 = vsel %vm1821_vm15, %v3797_v25, %v3799_v61  ;;  %vm8284_vm15 = vcmp.ge.s32.totalorder %v5169_v5, 0 }
 0x52d   :  { %v3954_v8 = vpop.permute.xlu1 %3953  ;;  %v3804_v18 = vsel %vm8284_vm15, %v3800_v28, 0.0 }
 0x52e   :  { %v3806_v58 = vadd.f32 %v3804_v18, %v3647_v31 }
 0x52f   :  { %v3888_v38 = vpop.permute.xlu0 %3887 }
 0x530   :  { %v3891_v62 = vsel %vm1914_vm12, %v3886_v46, %v3888_v38  ;;  %v3892_v60 = vsel %vm1914_vm12, %v3888_v38, %v3890_v35  ;;  %v3772_v46 = vadd.f32 %v3770_v27, %v3615_v12  ;;  %vm8279_vm12 = vmmov %vm8269_vm14 }
 0x531   :  { %v4043_v45 = vpop.permute.xlu1 %4042  ;;  %v3895_v40 = vsel %vm8275_vm8, %v3891_v62, 0.0  ;;  %v3771_v17 = vsel %vm8279_vm12, %v3767_v19, 0.0  ;;  %v3896_v14 = vsel %vm8280_vm9, %v3892_v60, 0.0  ;;  %vm8283_vm14 = vmmov %vm8282_vm7 }
 0x532   :  { %v3897_v43 = vadd.f32 %v3895_v40, %v3738_v55  ;;  %vm8286_vm4 = vmmov %vm8279_vm12  ;;  %v3773_v48 = vadd.f32 %v3771_v17, %v3616_v47  ;;  %v3898_v37 = vadd.f32 %v3896_v14, %v3739_v32 }
 0x533   :  { %v3952_v24 = vpop.permute.xlu0 %3951  ;;  %vm8291_vm8 = vmmov %vm8290_vm0 }
 0x534   :  { %v3957_v35 = vsel %vm8282_vm7, %v3952_v24, %v3954_v8 }
 0x535   :  { %v4047_v42 = vpop.permute.xlu1 %4046 }
 0x537   :  { %v3956_v34 = vpop.permute.xlu0 %3955 }
 0x538   :  { %v3958_v6 = vsel %vm8283_vm14, %v3954_v8, %v3956_v34  ;;  %v3961_v8 = vsel %vm8287_vm3, %v3957_v35, 0.0 }
 0x539   :  { %v3922_v7 = vpop.permute.xlu1 %3921  ;;  %v3962_v59 = vsel %vm8288_vm2, %v3958_v6, 0.0  ;;  %v3963_v34 = vadd.f32 %v3961_v8, %v3806_v58 }
 0x53b   :  { %v4045_v51 = vpop.permute.xlu0 %4044 }
 0x53c   :  { %v4048_v57 = vsel %vm2075_vm11, %v4043_v45, %v4045_v51  ;;  %v4049_v45 = vsel %vm2075_vm11, %v4045_v51, %v4047_v42  ;;  %vm8285_vm11 = vcmp.ge.s32.totalorder %v5153_v36, 0 }
 0x53d   :  { %v4052_v20 = vsel %vm8277_vm5, %v4048_v57, 0.0  ;;  %v4072_v61 = vpop.permute.xlu1 %4071  ;;  %v3805_v53 = vsel %vm8285_vm11, %v3801_v29, 0.0  ;;  %v4053_v54 = vsel %vm8286_vm4, %v4049_v45, 0.0 }
 0x53e   :  { %v4054_v25 = vadd.f32 %v4052_v20, %v3897_v43  ;;  %v3807_v30 = vadd.f32 %v3805_v53, %v3648_v10  ;;  %v4055_v36 = vadd.f32 %v4053_v54, %v3898_v37 }
 0x53f   :  { %v3920_v23 = vpop.permute.xlu0 %3919 }
 0x540   :  { %v3925_v21 = vsel %vm8281_vm10, %v3920_v23, %v3922_v7  ;;  %v3964_v11 = vadd.f32 %v3962_v59, %v3807_v30 }
 0x541   :  { %v3929_v38 = vadd.f32 %v3925_v21, %v3772_v46  ;;  %v4076_v13 = vpop.permute.xlu1 %4075 }
 0x543   :  { %v4056_v26 = vadd.f32 %v4054_v25, %v3929_v38  ;;  %v3924_v24 = vpop.permute.xlu0 %3923 }
 0x544   :  { %v3926_v5 = vsel %vm8289_vm13, %v3922_v7, %v3924_v24 }
 0x545   :  { %v3930_v42 = vadd.f32 %v3926_v5, %v3773_v48 }
 0x547   :  { %v4057_v44 = vadd.f32 %v4055_v36, %v3930_v42  ;;  %v4074_v33 = vpop.permute.xlu0 %4073 }
 0x548   :  { %v4077_v9 = vsel %vm8290_vm0, %v4072_v61, %v4074_v33  ;;  %v4078_v2 = vsel %vm8291_vm8, %v4074_v33, %v4076_v13 }
 0x549   :  { %v4081_v22 = vadd.f32 %v4077_v9, %v3963_v34  ;;  %v4082_v15 = vadd.f32 %v4078_v2, %v3964_v11 }
 0x54b   :  { %v4083_v62 = vadd.f32 %v4081_v22, %v4056_v26  ;;  %v4084_v50 = vadd.f32 %v4082_v15, %v4057_v44 }
 0x54d   :  { %v4327_v41 = vmul.f32 -1.442695, %v4083_v62  ;;  %v4328_v1 = vmul.f32 -1.442695, %v4084_v50 }
 0x54f   :  { %4395 = vpow2.f32 %v4327_v41 }
 0x550   :  { %4397 = vpow2.f32 %v4328_v1 }
 0x559   :  { %v4396_v0 = vpop.eup %4395 }
 0x55a   :  { %v4398_v63 = vpop.eup %4397  ;;  %v4091_v49 = vadd.f32 1.0, %v4396_v0 }
 0x55b   :  { %v4092_v39 = vadd.f32 1.0, %v4398_v63 }
 0x55c   :  { %4399 = vrcp.f32 %v4091_v49 }
 0x55d   :  { %4401 = vrcp.f32 %v4092_v39 }
 0x566   :  { %v4400_v3 = vpop.eup %4399 }
 0x567   :  { %v4402_v27 = vpop.eup %4401  ;;  %v4101_v7 = vrot.slane %v4400_v3, %v4588_v56 }
 0x568   :  { %v4105_v51 = vrot.slane %v4402_v27, %v4588_v56 }
 0x56a   :  { %v4108_v12 = vcombine.low %v4101_v7, %v4105_v51 }
 0x56c   :  { %v4110_v40 = vmul.f32 %v4108_v12, %v4097_v16 }
 0x56e   :  { %4112 = vst [vmem:[#allocation8 + $0x8] sm:$0xff] %v4110_v40 }
 0x56f   :  { %4446 = shalt.err (!%p4443_p1)
}
 0x570   :  { %s8292_s4 = sld [smem:[#allocation178_spill]] }
 0x576   :  { %s4447_s18 = scalar_lea.hbm %s8292_s4, 256 }
 0x577   :  { %p4448_p2 = scmp.ne.s32.totalorder %s8292_s4, %s4447_s18  ;;  %p4451_p3 = scmp.lt.u32.totalorder %s4447_s18, %s8292_s4 }
 0x579   :  { %p4453_p4 = pnand %p4451_p3, %p4448_p2 }
 0x57b   :  { %4456 = shalt.err (!%p4453_p4)
}
 0x57c   :  { %s8293_s8 = smov 8   ;;  %s8294_s25 = smov 128  }
 0x57d   :  { %4124 = dma.vmem_to_hbm [thread:$0]  %s4119_s27, 256, %s8292_s4, [#allocation5], %s8294_s25, %s8294_s25, %s8293_s8  }
 0x57e   :  { %4461 = dma.done.wait [#allocation5], 256  }
 0x57f   :  { %4462 = vsyncadd [#allocation5], 4294967040 }
 0x580   :  { %4128 = vsyncpa [#allocation4], 1 }
 0x581   :  { %4129 = vsyncpa [#allocation5], 1 }
 0x582   :  { %4130 = vsyncpa [#allocation6], 1 }

</bundles_post_ra>
